<compile_context>
chip_gen: v7x
topology: tpu7x:2x2x1
jax: 0.10.0
libtpu: 0.0.40
codegen_flags: <defaults>
</compile_context>

<pallas_src>
import functools
import math

import jax
import jax.numpy as jnp
from jax.experimental import pallas as pl
from jax.experimental.pallas import tpu as pltpu


# --------------------------------------------------------------------------
# The single fused kernel.
# --------------------------------------------------------------------------
def _upf_fused_kernel(patches_ref, pos_ref, w3_ref, b3_ref, bng_ref, bnb_ref,
                      query_ref, w1_ref, b1_ref,
                      wq_ref, bq_ref, wkv_ref, bkv_ref, wo_ref, bo_ref,
                      lng_ref, lnb_ref, fw1_ref, fb1_ref, fw2_ref, fb2_ref,
                      halfE_ref, halfET_ref, bmask_ref, segE_ref, segET_ref,
                      t_ref, out_ref, *, n_batch, seq_len, ct, n_seg, scale,
                      bn_eps, ln_eps, l2_eps):
    f32 = jnp.float32

    # ---- proj_student: conv3x3 (im2col matmul) + BN (batch stats) + ReLU ----
    conv = jnp.dot(patches_ref[...], w3_ref[...],
                   preferred_element_type=f32) + b3_ref[...]
    mu = jnp.mean(conv, axis=0, keepdims=True)
    var = jnp.mean(jnp.square(conv - mu), axis=0, keepdims=True)
    s_tok = (conv - mu) * jax.lax.rsqrt(var + bn_eps) * bng_ref[...] + bnb_ref[...]
    s_tok = jnp.maximum(s_tok, 0.0) + pos_ref[...]            # (N*L, 2*Cs)

    # ---- proj_pos (conv1x1 + ReLU on self-query) + q projection (shared) ----
    pe = jnp.dot(query_ref[...], w1_ref[...],
                 preferred_element_type=f32) + b1_ref[...]
    pe = jnp.maximum(pe, 0.0)                                 # (L, 2*Ct)
    q = jnp.dot(pe, wq_ref[...], preferred_element_type=f32) + bq_ref[...]

    # ---- K and V from one lane-dense matmul (block-diag Wk|Wv) --------------
    kv = jnp.dot(s_tok, wkv_ref[...], preferred_element_type=f32) + bkv_ref[...]
    k_cat = kv[:, :2 * ct]                                    # (N*L, 2*Ct)
    v_cat = kv[:, 2 * ct:]                                    # (N*L, 2*Ct)

    bmask = bmask_ref[...]                                    # (n_seg*L, 2*Ct)
    segE = segE_ref[...]                                      # (n_seg*L, n_seg)
    segET = segET_ref[...]                                    # (n_seg, n_seg*L)

    # ---- block-column attention: all heads of both projectors at once -------
    outs = []
    for n in range(n_batch):
        k_n = k_cat[n * seq_len:(n + 1) * seq_len, :]         # (L, 2*Ct)
        v_n = v_cat[n * seq_len:(n + 1) * seq_len, :]
        k_blk = jnp.concatenate([k_n] * n_seg, axis=0) * bmask   # (n_seg*L, 2*Ct)
        v_blk = jnp.concatenate([v_n] * n_seg, axis=0) * bmask
        sc = jax.lax.dot_general(q, k_blk, (((1,), (1,)), ((), ())),
                                 preferred_element_type=f32) * scale  # (L, n_seg*L)
        sc = sc - jnp.max(sc, axis=-1, keepdims=True)         # shared max: cancels
        p = jnp.exp(sc)
        den = jnp.dot(p, segE, preferred_element_type=f32)    # per-segment sums
        inv = pl.reciprocal(den, approx=True)
        p = p * jnp.dot(inv, segET, preferred_element_type=f32)
        outs.append(jnp.dot(p, v_blk, preferred_element_type=f32))   # (L, 2*Ct)
    o = jnp.concatenate(outs, axis=0)                         # (N*L, 2*Ct)

    # ---- output projection + per-projector LayerNorm (segment-matmul stats) -
    o = jnp.dot(o, wo_ref[...], preferred_element_type=f32) + bo_ref[...]
    halfE = halfE_ref[...]
    halfET = halfET_ref[...]
    inv_ct = 1.0 / ct
    mu = jnp.dot(o, halfE, preferred_element_type=f32) * inv_ct      # (N*L, 2)
    xc = o - jnp.dot(mu, halfET, preferred_element_type=f32)
    var = jnp.dot(xc * xc, halfE, preferred_element_type=f32) * inv_ct
    rstd = jnp.dot(jax.lax.rsqrt(var + ln_eps), halfET,
                   preferred_element_type=f32)
    xn = xc * rstd * lng_ref[...] + lnb_ref[...]

    # ---- FFN (identity residual = FFN input) --------------------------------
    h1 = jnp.maximum(jnp.dot(xn, fw1_ref[...], preferred_element_type=f32)
                     + fb1_ref[...], 0.0)
    y = jnp.dot(h1, fw2_ref[...], preferred_element_type=f32) + fb2_ref[...]
    feats = xn + y                                            # (N*L, 2*Ct)

    # ---- frequency losses (DC == mean, AC == residual; L2 norm; SSE) --------
    t2 = t_ref[...]                                           # (N*L, Ct)
    fs = feats[:, :ct]                                        # projector_0 -> spatial
    fc = feats[:, ct:]                                        # projector_1 -> channel

    def l2n(x, axis):   # F.normalize(x, p=2, eps=1e-12)
        nrm = jnp.sqrt(jnp.sum(x * x, axis=axis, keepdims=True))
        return x / jnp.maximum(nrm, l2_eps)

    sdc = f32(0.0)
    sac = f32(0.0)
    cdc = f32(0.0)
    cac = f32(0.0)
    for n in range(n_batch):
        sl = slice(n * seq_len, (n + 1) * seq_len)
        s, c, t = fs[sl, :], fc[sl, :], t2[sl, :]             # (L, Ct) each
        # spatial path: DC = spatial mean per channel; normalize over C.
        s_dc = jnp.mean(s, axis=0, keepdims=True)
        t_dc = jnp.mean(t, axis=0, keepdims=True)
        sdc += seq_len * jnp.sum(jnp.square(l2n(s_dc, 1) - l2n(t_dc, 1)))
        sac += jnp.sum(jnp.square(l2n(s - s_dc, 1) - l2n(t - t_dc, 1)))
        # channel path: DC = channel mean per token; normalize over L.
        c_dc = jnp.mean(c, axis=1, keepdims=True)
        tc_dc = jnp.mean(t, axis=1, keepdims=True)
        cdc += ct * jnp.sum(jnp.square(l2n(c_dc, 0) - l2n(tc_dc, 0)))
        cac += jnp.sum(jnp.square(l2n(c - c_dc, 0) - l2n(t - tc_dc, 0)))

    out_ref[0] = sdc
    out_ref[1] = sac
    out_ref[2] = cdc
    out_ref[3] = cac


def upf_fused_sums(operands, *, n_batch, seq_len, ct, n_seg, scale):
    kern = functools.partial(
        _upf_fused_kernel, n_batch=n_batch, seq_len=seq_len, ct=ct,
        n_seg=n_seg, scale=scale, bn_eps=1e-5, ln_eps=1e-5, l2_eps=1e-12)
    return pl.pallas_call(
        kern,
        out_shape=jax.ShapeDtypeStruct((4,), jnp.float32),
        out_specs=pl.BlockSpec(memory_space=pltpu.SMEM),
    )(*operands)


# --------------------------------------------------------------------------
# JAX glue (tiny, one-time per forward): im2col, parameter prep, DWL MLP.
# --------------------------------------------------------------------------
def im2col_3x3(x):
    """(N, C, H, W) -> (N*H*W, C*9) patches (shared by both projectors)."""
    n, c, h, w = x.shape
    xp = jnp.pad(x, ((0, 0), (0, 0), (1, 1), (1, 1)))
    cols = [xp[:, :, i:i + h, j:j + w] for i in range(3) for j in range(3)]
    patches = jnp.stack(cols, axis=2)                         # (N, C, 9, H, W)
    return patches.transpose(0, 3, 4, 1, 2).reshape(n * h * w, c * 9)


def _blkdiag(a, b):
    z1 = jnp.zeros((a.shape[0], b.shape[1]), a.dtype)
    z2 = jnp.zeros((b.shape[0], a.shape[1]), b.dtype)
    return jnp.concatenate([jnp.concatenate([a, z1], axis=1),
                            jnp.concatenate([z2, b], axis=1)], axis=0)


def prepare_fused_params(params, cfg, n_batch):
    """Lane-concatenate / block-diagonalize both projectors' weights."""
    p0, p1 = params["proj0"], params["proj1"]
    h, w = cfg["query_hw"]
    L = h * w
    cs = cfg["student_dims"]
    ct = cfg["teacher_dims"]
    hd = ct // cfg["num_heads"]
    n_seg = 2 * cfg["num_heads"]

    def cat1(f):   # concat the two projectors along lanes, as a (1, X) row
        return jnp.concatenate([f(p0).reshape(1, -1), f(p1).reshape(1, -1)], axis=1)

    pos_tok = jnp.concatenate(
        [jnp.tile(p["pos_embed"].reshape(cs, L).T, (n_batch, 1)) for p in (p0, p1)],
        axis=1)                                               # (N*L, 2*Cs)

    ops = {
        "w3": jnp.concatenate([p0["conv3_w"].reshape(cs, cs * 9).T,
                               p1["conv3_w"].reshape(cs, cs * 9).T], axis=1),
        "b3": cat1(lambda p: p["conv3_b"]),
        "bng": cat1(lambda p: p["bn_g"]),
        "bnb": cat1(lambda p: p["bn_b"]),
        "pos": pos_tok,
        "query": jnp.concatenate([p0["query"], p1["query"]], axis=1),   # (L, 2*Ct)
        "w1": _blkdiag(p0["conv1_w"].reshape(ct, ct).T,
                       p1["conv1_w"].reshape(ct, ct).T),
        "b1": cat1(lambda p: p["conv1_b"]),
        "wq": _blkdiag(p0["wq"], p1["wq"]),
        "bq": cat1(lambda p: p["bq"]),
        "wkv": jnp.concatenate([_blkdiag(p0["wk"], p1["wk"]),
                                _blkdiag(p0["wv"], p1["wv"])], axis=1),  # (2Cs,4Ct)
        "bkv": jnp.concatenate([cat1(lambda p: p["bk"]),
                                cat1(lambda p: p["bv"])], axis=1),
        "wo": _blkdiag(p0["wo"], p1["wo"]),
        "bo": cat1(lambda p: p["bo"]),
        "lng": cat1(lambda p: p["ln_g"]),
        "lnb": cat1(lambda p: p["ln_b"]),
        "fw1": _blkdiag(p0["ffn_w1"], p1["ffn_w1"]),
        "fb1": cat1(lambda p: p["ffn_b1"]),
        "fw2": _blkdiag(p0["ffn_w2"], p1["ffn_w2"]),
        "fb2": cat1(lambda p: p["ffn_b2"]),
    }

    # Constant selector matrices (hoisted out of the kernel, passed as inputs).
    rows = jnp.arange(n_seg * L)
    ops["halfE"] = (jnp.arange(2 * ct)[:, None] // ct
                    == jnp.arange(2)[None, :]).astype(jnp.float32)       # (2Ct, 2)
    ops["halfET"] = ops["halfE"].T
    ops["bmask"] = (rows[:, None] // L
                    == jnp.arange(2 * ct)[None, :] // hd).astype(jnp.float32)
    ops["segE"] = (rows[:, None] // L
                   == jnp.arange(n_seg)[None, :]).astype(jnp.float32)    # (nsL, ns)
    ops["segET"] = ops["segE"].T
    return ops


def dynamic_weight_learner(p, alpha_jfd, target_spat=2.0, target_chan=2.0):
    # Tiny 4->32->4 MLP; left in plain JAX (no benefit from a Pallas kernel).
    a = jnp.asarray(alpha_jfd, jnp.float32).reshape(1, 4)
    h = jax.nn.relu(a @ p["fc1_w"].T + p["fc1_b"])
    o = jax.nn.sigmoid(h @ p["fc2_w"].T + p["fc2_b"])[0]
    spat_diff = target_spat - o[0]
    chan_diff = target_chan - o[2]
    new = jnp.stack([o[0] + spat_diff * 0.1,
                     o[1] + spat_diff * 0.1,
                     o[2] + chan_diff * 0.1,
                     o[3] + chan_diff * 0.1])
    new = jnp.clip(new, 0.0, 1.0)
    return new[0], new[1], new[2], new[3]


def unified_loss_forward(params, cfg, preds_S, preds_T):
    n, cs, h, w = preds_S.shape
    ct = cfg["teacher_dims"]
    L = h * w
    hd = ct // cfg["num_heads"]
    n_seg = 2 * cfg["num_heads"]
    scale = cfg["softmax_scale"][1] / math.sqrt(hd)

    a_dc, a_ac, a_dc1, a_ac1 = dynamic_weight_learner(params["dwl"],
                                                      cfg["alpha_jfd"])

    ops = prepare_fused_params(params, cfg, n)
    patches = im2col_3x3(preds_S.astype(jnp.float32))          # (N*L, Cs*9)
    t_tok = preds_T.astype(jnp.float32).transpose(0, 2, 3, 1).reshape(n * L, ct)

    operands = [patches, ops["pos"], ops["w3"], ops["b3"], ops["bng"], ops["bnb"],
                ops["query"], ops["w1"], ops["b1"],
                ops["wq"], ops["bq"], ops["wkv"], ops["bkv"], ops["wo"], ops["bo"],
                ops["lng"], ops["lnb"], ops["fw1"], ops["fb1"], ops["fw2"],
                ops["fb2"], ops["halfE"], ops["halfET"], ops["bmask"],
                ops["segE"], ops["segET"], t_tok]

    sums = upf_fused_sums(operands, n_batch=n, seq_len=L, ct=ct,
                          n_seg=n_seg, scale=scale)
    spat_loss = (a_dc * sums[0] / n, a_ac * sums[1] / n)
    channel_loss = (a_dc1 * sums[2] / n, a_ac1 * sums[3] / n)
    return spat_loss, channel_loss


# --------------------------------------------------------------------------
# Deterministic parameter init
# --------------------------------------------------------------------------
def _normal(key, shape, std=0.05):
    return std * jax.random.normal(key, shape, jnp.float32)


def init_projector_params(key, cs, ct, h, w):
    ks = jax.random.split(key, 12)
    return {
        "conv1_w": _normal(ks[0], (ct, ct, 1, 1)), "conv1_b": jnp.zeros((ct,), jnp.float32),
        "conv3_w": _normal(ks[1], (cs, cs, 3, 3)), "conv3_b": jnp.zeros((cs,), jnp.float32),
        "bn_g": jnp.ones((cs,), jnp.float32), "bn_b": jnp.zeros((cs,), jnp.float32),
        "pos_embed": _normal(ks[2], (1, cs, h, w), std=0.02),
        "query": _normal(ks[3], (h * w, ct), std=0.02),
        "wq": _normal(ks[4], (ct, ct)), "bq": jnp.zeros((ct,), jnp.float32),
        "wk": _normal(ks[5], (cs, ct)), "bk": jnp.zeros((ct,), jnp.float32),
        "wv": _normal(ks[6], (cs, ct)), "bv": jnp.zeros((ct,), jnp.float32),
        "wo": _normal(ks[7], (ct, ct)), "bo": jnp.zeros((ct,), jnp.float32),
        "ln_g": jnp.ones((ct,), jnp.float32), "ln_b": jnp.zeros((ct,), jnp.float32),
        "ffn_w1": _normal(ks[8], (ct, 4 * ct)), "ffn_b1": jnp.zeros((4 * ct,), jnp.float32),
        "ffn_w2": _normal(ks[9], (4 * ct, ct)), "ffn_b2": jnp.zeros((ct,), jnp.float32),
    }


def init_dwl_params(key, input_dim=4, hidden_dim=32):
    k1, k2 = jax.random.split(key)
    b1 = math.sqrt(6.0 / (input_dim + hidden_dim))
    b2 = math.sqrt(6.0 / (hidden_dim + 4))
    return {
        "fc1_w": jax.random.uniform(k1, (hidden_dim, input_dim), jnp.float32, -b1, b1),
        "fc1_b": jnp.zeros((hidden_dim,), jnp.float32),
        "fc2_w": jax.random.uniform(k2, (4, hidden_dim), jnp.float32, -b2, b2),
        "fc2_b": jnp.zeros((4,), jnp.float32),
    }


# --------------------------------------------------------------------------
# Main
# --------------------------------------------------------------------------
if __name__ == "__main__":
    N, Cs, Ct, H, W = 2, 16, 32, 8, 8
    cfg = {
        "alpha_jfd": [1.0, 1.0, 0.5, 0.5],
        "student_dims": Cs,
        "teacher_dims": Ct,
        "query_hw": (H, W),
        "num_heads": 4,
        "softmax_scale": (1.0, 1.0),
    }

    key = jax.random.PRNGKey(0)
    k_s, k_t, k_p0, k_p1, k_dwl = jax.random.split(key, 5)
    preds_S = jax.random.normal(k_s, (N, Cs, H, W), jnp.float32)
    preds_T = jax.random.normal(k_t, (N, Ct, H, W), jnp.float32)

    params = {
        "proj0": init_projector_params(k_p0, Cs, Ct, H, W),
        "proj1": init_projector_params(k_p1, Cs, Ct, H, W),
        "dwl": init_dwl_params(k_dwl),
    }

    fwd = jax.jit(lambda p, s, t: unified_loss_forward(p, cfg, s, t))
    (spat_dc, spat_ac), (chan_dc, chan_ac) = fwd(params, preds_S, preds_T)
    jax.block_until_ready((spat_dc, spat_ac, chan_dc, chan_ac))
    print("KERNEL_OK")
</pallas_src>

<mosaic_0001>
module attributes {stable_mosaic.version = 11 : i64} {
  func.func @_upf_fused_kernel(%arg0: memref<128x144xf32, #tpu.memory_space<vmem>>, %arg1: memref<128x32xf32, #tpu.memory_space<vmem>>, %arg2: memref<144x32xf32, #tpu.memory_space<vmem>>, %arg3: memref<1x32xf32, #tpu.memory_space<vmem>>, %arg4: memref<1x32xf32, #tpu.memory_space<vmem>>, %arg5: memref<1x32xf32, #tpu.memory_space<vmem>>, %arg6: memref<64x64xf32, #tpu.memory_space<vmem>>, %arg7: memref<64x64xf32, #tpu.memory_space<vmem>>, %arg8: memref<1x64xf32, #tpu.memory_space<vmem>>, %arg9: memref<64x64xf32, #tpu.memory_space<vmem>>, %arg10: memref<1x64xf32, #tpu.memory_space<vmem>>, %arg11: memref<32x128xf32, #tpu.memory_space<vmem>>, %arg12: memref<1x128xf32, #tpu.memory_space<vmem>>, %arg13: memref<64x64xf32, #tpu.memory_space<vmem>>, %arg14: memref<1x64xf32, #tpu.memory_space<vmem>>, %arg15: memref<1x64xf32, #tpu.memory_space<vmem>>, %arg16: memref<1x64xf32, #tpu.memory_space<vmem>>, %arg17: memref<64x256xf32, #tpu.memory_space<vmem>>, %arg18: memref<1x256xf32, #tpu.memory_space<vmem>>, %arg19: memref<256x64xf32, #tpu.memory_space<vmem>>, %arg20: memref<1x64xf32, #tpu.memory_space<vmem>>, %arg21: memref<64x2xf32, #tpu.memory_space<vmem>>, %arg22: memref<2x64xf32, #tpu.memory_space<vmem>>, %arg23: memref<512x64xf32, #tpu.memory_space<vmem>>, %arg24: memref<512x8xf32, #tpu.memory_space<vmem>>, %arg25: memref<8x512xf32, #tpu.memory_space<vmem>>, %arg26: memref<128x32xf32, #tpu.memory_space<vmem>>, %arg27: memref<4xf32, #tpu.memory_space<smem>>) attributes {dimension_semantics = [], scalar_prefetch = 0 : i64, scratch_operands = 0 : i64, tpu.core_type = #tpu.core_type<tc>} {
    %c0 = arith.constant 0 : index
    %c0_0 = arith.constant 0 : index
    %0 = vector.load %arg0[%c0, %c0_0] : memref<128x144xf32, #tpu.memory_space<vmem>>, vector<128x144xf32>
    %c0_1 = arith.constant 0 : index
    %c0_2 = arith.constant 0 : index
    %1 = vector.load %arg2[%c0_1, %c0_2] : memref<144x32xf32, #tpu.memory_space<vmem>>, vector<144x32xf32>
    %cst = arith.constant dense<0.000000e+00> : vector<128x32xf32>
    %2 = tpu.matmul %0, %1, %cst {dimension_numbers = #tpu.dot_dimension_numbers<[1], [0], [0], [1], [0, 0, 1, 1], [], []>} : vector<128x144xf32>, vector<144x32xf32>, vector<128x32xf32> -> vector<128x32xf32>
    %c0_3 = arith.constant 0 : index
    %c0_4 = arith.constant 0 : index
    %3 = vector.load %arg3[%c0_3, %c0_4] : memref<1x32xf32, #tpu.memory_space<vmem>>, vector<1x32xf32>
    %4 = vector.broadcast %3 : vector<1x32xf32> to vector<128x32xf32>
    %5 = arith.addf %2, %4 : vector<128x32xf32>
    %cst_5 = arith.constant dense<0.000000e+00> : vector<32xf32>
    %6 = vector.multi_reduction <add>, %5, %cst_5 [0] : vector<128x32xf32> to vector<32xf32>
    %7 = vector.shape_cast %6 : vector<32xf32> to vector<1x32xf32>
    %cst_6 = arith.constant 1.280000e+02 : f32
    %8 = vector.broadcast %cst_6 : f32 to vector<1x32xf32>
    %9 = arith.divf %7, %8 : vector<1x32xf32>
    %10 = vector.broadcast %9 : vector<1x32xf32> to vector<128x32xf32>
    %11 = arith.subf %5, %10 : vector<128x32xf32>
    %12 = arith.mulf %11, %11 : vector<128x32xf32>
    %cst_7 = arith.constant dense<0.000000e+00> : vector<32xf32>
    %13 = vector.multi_reduction <add>, %12, %cst_7 [0] : vector<128x32xf32> to vector<32xf32>
    %14 = vector.shape_cast %13 : vector<32xf32> to vector<1x32xf32>
    %cst_8 = arith.constant 1.280000e+02 : f32
    %15 = vector.broadcast %cst_8 : f32 to vector<1x32xf32>
    %16 = arith.divf %14, %15 : vector<1x32xf32>
    %17 = vector.broadcast %9 : vector<1x32xf32> to vector<128x32xf32>
    %18 = arith.subf %5, %17 : vector<128x32xf32>
    %cst_9 = arith.constant 9.99999974E-6 : f32
    %19 = vector.broadcast %cst_9 : f32 to vector<1x32xf32>
    %20 = arith.addf %16, %19 : vector<1x32xf32>
    %21 = math.rsqrt %20 : vector<1x32xf32>
    %22 = vector.broadcast %21 : vector<1x32xf32> to vector<128x32xf32>
    %23 = arith.mulf %18, %22 : vector<128x32xf32>
    %c0_10 = arith.constant 0 : index
    %c0_11 = arith.constant 0 : index
    %24 = vector.load %arg4[%c0_10, %c0_11] : memref<1x32xf32, #tpu.memory_space<vmem>>, vector<1x32xf32>
    %25 = vector.broadcast %24 : vector<1x32xf32> to vector<128x32xf32>
    %26 = arith.mulf %23, %25 : vector<128x32xf32>
    %c0_12 = arith.constant 0 : index
    %c0_13 = arith.constant 0 : index
    %27 = vector.load %arg5[%c0_12, %c0_13] : memref<1x32xf32, #tpu.memory_space<vmem>>, vector<1x32xf32>
    %28 = vector.broadcast %27 : vector<1x32xf32> to vector<128x32xf32>
    %29 = arith.addf %26, %28 : vector<128x32xf32>
    %cst_14 = arith.constant 0.000000e+00 : f32
    %30 = vector.broadcast %cst_14 : f32 to vector<128x32xf32>
    %31 = arith.maximumf %29, %30 : vector<128x32xf32>
    %c0_15 = arith.constant 0 : index
    %c0_16 = arith.constant 0 : index
    %32 = vector.load %arg1[%c0_15, %c0_16] : memref<128x32xf32, #tpu.memory_space<vmem>>, vector<128x32xf32>
    %33 = arith.addf %31, %32 : vector<128x32xf32>
    %c0_17 = arith.constant 0 : index
    %c0_18 = arith.constant 0 : index
    %34 = vector.load %arg6[%c0_17, %c0_18] : memref<64x64xf32, #tpu.memory_space<vmem>>, vector<64x64xf32>
    %c0_19 = arith.constant 0 : index
    %c0_20 = arith.constant 0 : index
    %35 = vector.load %arg7[%c0_19, %c0_20] : memref<64x64xf32, #tpu.memory_space<vmem>>, vector<64x64xf32>
    %cst_21 = arith.constant dense<0.000000e+00> : vector<64x64xf32>
    %36 = tpu.matmul %34, %35, %cst_21 {dimension_numbers = #tpu.dot_dimension_numbers<[1], [0], [0], [1], [0, 0, 1, 1], [], []>} : vector<64x64xf32>, vector<64x64xf32>, vector<64x64xf32> -> vector<64x64xf32>
    %c0_22 = arith.constant 0 : index
    %c0_23 = arith.constant 0 : index
    %37 = vector.load %arg8[%c0_22, %c0_23] : memref<1x64xf32, #tpu.memory_space<vmem>>, vector<1x64xf32>
    %38 = vector.broadcast %37 : vector<1x64xf32> to vector<64x64xf32>
    %39 = arith.addf %36, %38 : vector<64x64xf32>
    %cst_24 = arith.constant 0.000000e+00 : f32
    %40 = vector.broadcast %cst_24 : f32 to vector<64x64xf32>
    %41 = arith.maximumf %39, %40 : vector<64x64xf32>
    %c0_25 = arith.constant 0 : index
    %c0_26 = arith.constant 0 : index
    %42 = vector.load %arg9[%c0_25, %c0_26] : memref<64x64xf32, #tpu.memory_space<vmem>>, vector<64x64xf32>
    %cst_27 = arith.constant dense<0.000000e+00> : vector<64x64xf32>
    %43 = tpu.matmul %41, %42, %cst_27 {dimension_numbers = #tpu.dot_dimension_numbers<[1], [0], [0], [1], [0, 0, 1, 1], [], []>} : vector<64x64xf32>, vector<64x64xf32>, vector<64x64xf32> -> vector<64x64xf32>
    %c0_28 = arith.constant 0 : index
    %c0_29 = arith.constant 0 : index
    %44 = vector.load %arg10[%c0_28, %c0_29] : memref<1x64xf32, #tpu.memory_space<vmem>>, vector<1x64xf32>
    %45 = vector.broadcast %44 : vector<1x64xf32> to vector<64x64xf32>
    %46 = arith.addf %43, %45 : vector<64x64xf32>
    %c0_30 = arith.constant 0 : index
    %c0_31 = arith.constant 0 : index
    %47 = vector.load %arg11[%c0_30, %c0_31] : memref<32x128xf32, #tpu.memory_space<vmem>>, vector<32x128xf32>
    %cst_32 = arith.constant dense<0.000000e+00> : vector<128x128xf32>
    %48 = tpu.matmul %33, %47, %cst_32 {dimension_numbers = #tpu.dot_dimension_numbers<[1], [0], [0], [1], [0, 0, 1, 1], [], []>} : vector<128x32xf32>, vector<32x128xf32>, vector<128x128xf32> -> vector<128x128xf32>
    %c0_33 = arith.constant 0 : index
    %c0_34 = arith.constant 0 : index
    %49 = vector.load %arg12[%c0_33, %c0_34] : memref<1x128xf32, #tpu.memory_space<vmem>>, vector<1x128xf32>
    %50 = vector.broadcast %49 : vector<1x128xf32> to vector<128x128xf32>
    %51 = arith.addf %48, %50 : vector<128x128xf32>
    %52 = vector.extract_strided_slice %51 {offsets = [0, 0], sizes = [128, 64], strides = [1, 1]} : vector<128x128xf32> to vector<128x64xf32>
    %53 = vector.extract_strided_slice %51 {offsets = [0, 64], sizes = [128, 64], strides = [1, 1]} : vector<128x128xf32> to vector<128x64xf32>
    %c0_35 = arith.constant 0 : index
    %c0_36 = arith.constant 0 : index
    %54 = vector.load %arg23[%c0_35, %c0_36] : memref<512x64xf32, #tpu.memory_space<vmem>>, vector<512x64xf32>
    %c0_37 = arith.constant 0 : index
    %c0_38 = arith.constant 0 : index
    %55 = vector.load %arg24[%c0_37, %c0_38] : memref<512x8xf32, #tpu.memory_space<vmem>>, vector<512x8xf32>
    %c0_39 = arith.constant 0 : index
    %c0_40 = arith.constant 0 : index
    %56 = vector.load %arg25[%c0_39, %c0_40] : memref<8x512xf32, #tpu.memory_space<vmem>>, vector<8x512xf32>
    %57 = vector.extract_strided_slice %52 {offsets = [0, 0], sizes = [64, 64], strides = [1, 1]} : vector<128x64xf32> to vector<64x64xf32>
    %58 = vector.extract_strided_slice %53 {offsets = [0, 0], sizes = [64, 64], strides = [1, 1]} : vector<128x64xf32> to vector<64x64xf32>
    %59 = tpu.concatenate %57, %57, %57, %57, %57, %57, %57, %57 in 0 : vector<64x64xf32>, vector<64x64xf32>, vector<64x64xf32>, vector<64x64xf32>, vector<64x64xf32>, vector<64x64xf32>, vector<64x64xf32>, vector<64x64xf32> -> vector<512x64xf32>
    %60 = arith.mulf %59, %54 : vector<512x64xf32>
    %61 = tpu.concatenate %58, %58, %58, %58, %58, %58, %58, %58 in 0 : vector<64x64xf32>, vector<64x64xf32>, vector<64x64xf32>, vector<64x64xf32>, vector<64x64xf32>, vector<64x64xf32>, vector<64x64xf32>, vector<64x64xf32> -> vector<512x64xf32>
    %62 = arith.mulf %61, %54 : vector<512x64xf32>
    %cst_41 = arith.constant dense<0.000000e+00> : vector<64x512xf32>
    %63 = tpu.matmul %46, %60, %cst_41 {dimension_numbers = #tpu.dot_dimension_numbers<[1], [1], [0], [0], [0, 0, 1, 0], [], []>} : vector<64x64xf32>, vector<512x64xf32>, vector<64x512xf32> -> vector<64x512xf32>
    %cst_42 = arith.constant 0.353553385 : f32
    %64 = vector.broadcast %cst_42 : f32 to vector<64x512xf32>
    %65 = arith.mulf %63, %64 : vector<64x512xf32>
    %cst_43 = arith.constant dense<0xFF800000> : vector<64xf32>
    %66 = vector.multi_reduction <maximumf>, %65, %cst_43 [1] : vector<64x512xf32> to vector<64xf32>
    %67 = vector.shape_cast %66 : vector<64xf32> to vector<64x1xf32>
    %68 = vector.broadcast %67 : vector<64x1xf32> to vector<64x512xf32>
    %69 = arith.subf %65, %68 : vector<64x512xf32>
    %70 = math.exp %69 : vector<64x512xf32>
    %cst_44 = arith.constant dense<0.000000e+00> : vector<64x8xf32>
    %71 = tpu.matmul %70, %55, %cst_44 {dimension_numbers = #tpu.dot_dimension_numbers<[1], [0], [0], [1], [0, 0, 1, 1], [], []>} : vector<64x512xf32>, vector<512x8xf32>, vector<64x8xf32> -> vector<64x8xf32>
    %72 = tpu.reciprocal %71 {approx = true} : vector<64x8xf32> -> vector<64x8xf32>
    %cst_45 = arith.constant dense<0.000000e+00> : vector<64x512xf32>
    %73 = tpu.matmul %72, %56, %cst_45 {dimension_numbers = #tpu.dot_dimension_numbers<[1], [0], [0], [1], [0, 0, 1, 1], [], []>} : vector<64x8xf32>, vector<8x512xf32>, vector<64x512xf32> -> vector<64x512xf32>
    %74 = arith.mulf %70, %73 : vector<64x512xf32>
    %cst_46 = arith.constant dense<0.000000e+00> : vector<64x64xf32>
    %75 = tpu.matmul %74, %62, %cst_46 {dimension_numbers = #tpu.dot_dimension_numbers<[1], [0], [0], [1], [0, 0, 1, 1], [], []>} : vector<64x512xf32>, vector<512x64xf32>, vector<64x64xf32> -> vector<64x64xf32>
    %76 = vector.extract_strided_slice %52 {offsets = [64, 0], sizes = [64, 64], strides = [1, 1]} : vector<128x64xf32> to vector<64x64xf32>
    %77 = vector.extract_strided_slice %53 {offsets = [64, 0], sizes = [64, 64], strides = [1, 1]} : vector<128x64xf32> to vector<64x64xf32>
    %78 = tpu.concatenate %76, %76, %76, %76, %76, %76, %76, %76 in 0 : vector<64x64xf32>, vector<64x64xf32>, vector<64x64xf32>, vector<64x64xf32>, vector<64x64xf32>, vector<64x64xf32>, vector<64x64xf32>, vector<64x64xf32> -> vector<512x64xf32>
    %79 = arith.mulf %78, %54 : vector<512x64xf32>
    %80 = tpu.concatenate %77, %77, %77, %77, %77, %77, %77, %77 in 0 : vector<64x64xf32>, vector<64x64xf32>, vector<64x64xf32>, vector<64x64xf32>, vector<64x64xf32>, vector<64x64xf32>, vector<64x64xf32>, vector<64x64xf32> -> vector<512x64xf32>
    %81 = arith.mulf %80, %54 : vector<512x64xf32>
    %cst_47 = arith.constant dense<0.000000e+00> : vector<64x512xf32>
    %82 = tpu.matmul %46, %79, %cst_47 {dimension_numbers = #tpu.dot_dimension_numbers<[1], [1], [0], [0], [0, 0, 1, 0], [], []>} : vector<64x64xf32>, vector<512x64xf32>, vector<64x512xf32> -> vector<64x512xf32>
    %cst_48 = arith.constant 0.353553385 : f32
    %83 = vector.broadcast %cst_48 : f32 to vector<64x512xf32>
    %84 = arith.mulf %82, %83 : vector<64x512xf32>
    %cst_49 = arith.constant dense<0xFF800000> : vector<64xf32>
    %85 = vector.multi_reduction <maximumf>, %84, %cst_49 [1] : vector<64x512xf32> to vector<64xf32>
    %86 = vector.shape_cast %85 : vector<64xf32> to vector<64x1xf32>
    %87 = vector.broadcast %86 : vector<64x1xf32> to vector<64x512xf32>
    %88 = arith.subf %84, %87 : vector<64x512xf32>
    %89 = math.exp %88 : vector<64x512xf32>
    %cst_50 = arith.constant dense<0.000000e+00> : vector<64x8xf32>
    %90 = tpu.matmul %89, %55, %cst_50 {dimension_numbers = #tpu.dot_dimension_numbers<[1], [0], [0], [1], [0, 0, 1, 1], [], []>} : vector<64x512xf32>, vector<512x8xf32>, vector<64x8xf32> -> vector<64x8xf32>
    %91 = tpu.reciprocal %90 {approx = true} : vector<64x8xf32> -> vector<64x8xf32>
    %cst_51 = arith.constant dense<0.000000e+00> : vector<64x512xf32>
    %92 = tpu.matmul %91, %56, %cst_51 {dimension_numbers = #tpu.dot_dimension_numbers<[1], [0], [0], [1], [0, 0, 1, 1], [], []>} : vector<64x8xf32>, vector<8x512xf32>, vector<64x512xf32> -> vector<64x512xf32>
    %93 = arith.mulf %89, %92 : vector<64x512xf32>
    %cst_52 = arith.constant dense<0.000000e+00> : vector<64x64xf32>
    %94 = tpu.matmul %93, %81, %cst_52 {dimension_numbers = #tpu.dot_dimension_numbers<[1], [0], [0], [1], [0, 0, 1, 1], [], []>} : vector<64x512xf32>, vector<512x64xf32>, vector<64x64xf32> -> vector<64x64xf32>
    %95 = tpu.concatenate %75, %94 in 0 : vector<64x64xf32>, vector<64x64xf32> -> vector<128x64xf32>
    %c0_53 = arith.constant 0 : index
    %c0_54 = arith.constant 0 : index
    %96 = vector.load %arg13[%c0_53, %c0_54] : memref<64x64xf32, #tpu.memory_space<vmem>>, vector<64x64xf32>
    %cst_55 = arith.constant dense<0.000000e+00> : vector<128x64xf32>
    %97 = tpu.matmul %95, %96, %cst_55 {dimension_numbers = #tpu.dot_dimension_numbers<[1], [0], [0], [1], [0, 0, 1, 1], [], []>} : vector<128x64xf32>, vector<64x64xf32>, vector<128x64xf32> -> vector<128x64xf32>
    %c0_56 = arith.constant 0 : index
    %c0_57 = arith.constant 0 : index
    %98 = vector.load %arg14[%c0_56, %c0_57] : memref<1x64xf32, #tpu.memory_space<vmem>>, vector<1x64xf32>
    %99 = vector.broadcast %98 : vector<1x64xf32> to vector<128x64xf32>
    %100 = arith.addf %97, %99 : vector<128x64xf32>
    %c0_58 = arith.constant 0 : index
    %c0_59 = arith.constant 0 : index
    %101 = vector.load %arg21[%c0_58, %c0_59] : memref<64x2xf32, #tpu.memory_space<vmem>>, vector<64x2xf32>
    %c0_60 = arith.constant 0 : index
    %c0_61 = arith.constant 0 : index
    %102 = vector.load %arg22[%c0_60, %c0_61] : memref<2x64xf32, #tpu.memory_space<vmem>>, vector<2x64xf32>
    %cst_62 = arith.constant dense<0.000000e+00> : vector<128x2xf32>
    %103 = tpu.matmul %100, %101, %cst_62 {dimension_numbers = #tpu.dot_dimension_numbers<[1], [0], [0], [1], [0, 0, 1, 1], [], []>} : vector<128x64xf32>, vector<64x2xf32>, vector<128x2xf32> -> vector<128x2xf32>
    %cst_63 = arith.constant 3.125000e-02 : f32
    %104 = vector.broadcast %cst_63 : f32 to vector<128x2xf32>
    %105 = arith.mulf %103, %104 : vector<128x2xf32>
    %cst_64 = arith.constant dense<0.000000e+00> : vector<128x64xf32>
    %106 = tpu.matmul %105, %102, %cst_64 {dimension_numbers = #tpu.dot_dimension_numbers<[1], [0], [0], [1], [0, 0, 1, 1], [], []>} : vector<128x2xf32>, vector<2x64xf32>, vector<128x64xf32> -> vector<128x64xf32>
    %107 = arith.subf %100, %106 : vector<128x64xf32>
    %108 = arith.mulf %107, %107 : vector<128x64xf32>
    %cst_65 = arith.constant dense<0.000000e+00> : vector<128x2xf32>
    %109 = tpu.matmul %108, %101, %cst_65 {dimension_numbers = #tpu.dot_dimension_numbers<[1], [0], [0], [1], [0, 0, 1, 1], [], []>} : vector<128x64xf32>, vector<64x2xf32>, vector<128x2xf32> -> vector<128x2xf32>
    %cst_66 = arith.constant 3.125000e-02 : f32
    %110 = vector.broadcast %cst_66 : f32 to vector<128x2xf32>
    %111 = arith.mulf %109, %110 : vector<128x2xf32>
    %cst_67 = arith.constant 9.99999974E-6 : f32
    %112 = vector.broadcast %cst_67 : f32 to vector<128x2xf32>
    %113 = arith.addf %111, %112 : vector<128x2xf32>
    %114 = math.rsqrt %113 : vector<128x2xf32>
    %cst_68 = arith.constant dense<0.000000e+00> : vector<128x64xf32>
    %115 = tpu.matmul %114, %102, %cst_68 {dimension_numbers = #tpu.dot_dimension_numbers<[1], [0], [0], [1], [0, 0, 1, 1], [], []>} : vector<128x2xf32>, vector<2x64xf32>, vector<128x64xf32> -> vector<128x64xf32>
    %116 = arith.mulf %107, %115 : vector<128x64xf32>
    %c0_69 = arith.constant 0 : index
    %c0_70 = arith.constant 0 : index
    %117 = vector.load %arg15[%c0_69, %c0_70] : memref<1x64xf32, #tpu.memory_space<vmem>>, vector<1x64xf32>
    %118 = vector.broadcast %117 : vector<1x64xf32> to vector<128x64xf32>
    %119 = arith.mulf %116, %118 : vector<128x64xf32>
    %c0_71 = arith.constant 0 : index
    %c0_72 = arith.constant 0 : index
    %120 = vector.load %arg16[%c0_71, %c0_72] : memref<1x64xf32, #tpu.memory_space<vmem>>, vector<1x64xf32>
    %121 = vector.broadcast %120 : vector<1x64xf32> to vector<128x64xf32>
    %122 = arith.addf %119, %121 : vector<128x64xf32>
    %c0_73 = arith.constant 0 : index
    %c0_74 = arith.constant 0 : index
    %123 = vector.load %arg17[%c0_73, %c0_74] : memref<64x256xf32, #tpu.memory_space<vmem>>, vector<64x256xf32>
    %cst_75 = arith.constant dense<0.000000e+00> : vector<128x256xf32>
    %124 = tpu.matmul %122, %123, %cst_75 {dimension_numbers = #tpu.dot_dimension_numbers<[1], [0], [0], [1], [0, 0, 1, 1], [], []>} : vector<128x64xf32>, vector<64x256xf32>, vector<128x256xf32> -> vector<128x256xf32>
    %c0_76 = arith.constant 0 : index
    %c0_77 = arith.constant 0 : index
    %125 = vector.load %arg18[%c0_76, %c0_77] : memref<1x256xf32, #tpu.memory_space<vmem>>, vector<1x256xf32>
    %126 = vector.broadcast %125 : vector<1x256xf32> to vector<128x256xf32>
    %127 = arith.addf %124, %126 : vector<128x256xf32>
    %cst_78 = arith.constant 0.000000e+00 : f32
    %128 = vector.broadcast %cst_78 : f32 to vector<128x256xf32>
    %129 = arith.maximumf %127, %128 : vector<128x256xf32>
    %c0_79 = arith.constant 0 : index
    %c0_80 = arith.constant 0 : index
    %130 = vector.load %arg19[%c0_79, %c0_80] : memref<256x64xf32, #tpu.memory_space<vmem>>, vector<256x64xf32>
    %cst_81 = arith.constant dense<0.000000e+00> : vector<128x64xf32>
    %131 = tpu.matmul %129, %130, %cst_81 {dimension_numbers = #tpu.dot_dimension_numbers<[1], [0], [0], [1], [0, 0, 1, 1], [], []>} : vector<128x256xf32>, vector<256x64xf32>, vector<128x64xf32> -> vector<128x64xf32>
    %c0_82 = arith.constant 0 : index
    %c0_83 = arith.constant 0 : index
    %132 = vector.load %arg20[%c0_82, %c0_83] : memref<1x64xf32, #tpu.memory_space<vmem>>, vector<1x64xf32>
    %133 = vector.broadcast %132 : vector<1x64xf32> to vector<128x64xf32>
    %134 = arith.addf %131, %133 : vector<128x64xf32>
    %135 = arith.addf %122, %134 : vector<128x64xf32>
    %c0_84 = arith.constant 0 : index
    %c0_85 = arith.constant 0 : index
    %136 = vector.load %arg26[%c0_84, %c0_85] : memref<128x32xf32, #tpu.memory_space<vmem>>, vector<128x32xf32>
    %137 = vector.extract_strided_slice %135 {offsets = [0, 0], sizes = [128, 32], strides = [1, 1]} : vector<128x64xf32> to vector<128x32xf32>
    %138 = vector.extract_strided_slice %135 {offsets = [0, 32], sizes = [128, 32], strides = [1, 1]} : vector<128x64xf32> to vector<128x32xf32>
    %139 = vector.extract_strided_slice %137 {offsets = [0, 0], sizes = [64, 32], strides = [1, 1]} : vector<128x32xf32> to vector<64x32xf32>
    %140 = vector.extract_strided_slice %138 {offsets = [0, 0], sizes = [64, 32], strides = [1, 1]} : vector<128x32xf32> to vector<64x32xf32>
    %141 = vector.extract_strided_slice %136 {offsets = [0, 0], sizes = [64, 32], strides = [1, 1]} : vector<128x32xf32> to vector<64x32xf32>
    %cst_86 = arith.constant dense<0.000000e+00> : vector<32xf32>
    %142 = vector.multi_reduction <add>, %139, %cst_86 [0] : vector<64x32xf32> to vector<32xf32>
    %143 = vector.shape_cast %142 : vector<32xf32> to vector<1x32xf32>
    %cst_87 = arith.constant 6.400000e+01 : f32
    %144 = vector.broadcast %cst_87 : f32 to vector<1x32xf32>
    %145 = arith.divf %143, %144 : vector<1x32xf32>
    %cst_88 = arith.constant dense<0.000000e+00> : vector<32xf32>
    %146 = vector.multi_reduction <add>, %141, %cst_88 [0] : vector<64x32xf32> to vector<32xf32>
    %147 = vector.shape_cast %146 : vector<32xf32> to vector<1x32xf32>
    %cst_89 = arith.constant 6.400000e+01 : f32
    %148 = vector.broadcast %cst_89 : f32 to vector<1x32xf32>
    %149 = arith.divf %147, %148 : vector<1x32xf32>
    %150 = arith.mulf %145, %145 : vector<1x32xf32>
    %cst_90 = arith.constant dense<0.000000e+00> : vector<1xf32>
    %151 = vector.multi_reduction <add>, %150, %cst_90 [1] : vector<1x32xf32> to vector<1xf32>
    %152 = vector.shape_cast %151 : vector<1xf32> to vector<1x1xf32>
    %153 = math.sqrt %152 : vector<1x1xf32>
    %cst_91 = arith.constant 9.99999996E-13 : f32
    %154 = vector.broadcast %cst_91 : f32 to vector<1x1xf32>
    %155 = arith.maximumf %153, %154 : vector<1x1xf32>
    %156 = vector.broadcast %155 : vector<1x1xf32> to vector<1x32xf32>
    %157 = arith.divf %145, %156 : vector<1x32xf32>
    %158 = arith.mulf %149, %149 : vector<1x32xf32>
    %cst_92 = arith.constant dense<0.000000e+00> : vector<1xf32>
    %159 = vector.multi_reduction <add>, %158, %cst_92 [1] : vector<1x32xf32> to vector<1xf32>
    %160 = vector.shape_cast %159 : vector<1xf32> to vector<1x1xf32>
    %161 = math.sqrt %160 : vector<1x1xf32>
    %cst_93 = arith.constant 9.99999996E-13 : f32
    %162 = vector.broadcast %cst_93 : f32 to vector<1x1xf32>
    %163 = arith.maximumf %161, %162 : vector<1x1xf32>
    %164 = vector.broadcast %163 : vector<1x1xf32> to vector<1x32xf32>
    %165 = arith.divf %149, %164 : vector<1x32xf32>
    %166 = arith.subf %157, %165 : vector<1x32xf32>
    %167 = arith.mulf %166, %166 : vector<1x32xf32>
    %168 = vector.shape_cast %167 : vector<1x32xf32> to vector<1x1x32xf32>
    %cst_94 = arith.constant dense<0.000000e+00> : vector<1xf32>
    %169 = vector.multi_reduction <add>, %168, %cst_94 [1, 2] : vector<1x1x32xf32> to vector<1xf32>
    %170 = vector.shape_cast %169 : vector<1xf32> to vector<1x1x1xf32>
    %171 = vector.extract %170[0, 0, 0] : f32 from vector<1x1x1xf32>
    %cst_95 = arith.constant 6.400000e+01 : f32
    %172 = arith.mulf %cst_95, %171 : f32
    %cst_96 = arith.constant 0.000000e+00 : f32
    %173 = arith.addf %cst_96, %172 : f32
    %174 = vector.broadcast %145 : vector<1x32xf32> to vector<64x32xf32>
    %175 = arith.subf %139, %174 : vector<64x32xf32>
    %176 = arith.mulf %175, %175 : vector<64x32xf32>
    %cst_97 = arith.constant dense<0.000000e+00> : vector<64xf32>
    %177 = vector.multi_reduction <add>, %176, %cst_97 [1] : vector<64x32xf32> to vector<64xf32>
    %178 = vector.shape_cast %177 : vector<64xf32> to vector<64x1xf32>
    %179 = math.sqrt %178 : vector<64x1xf32>
    %cst_98 = arith.constant 9.99999996E-13 : f32
    %180 = vector.broadcast %cst_98 : f32 to vector<64x1xf32>
    %181 = arith.maximumf %179, %180 : vector<64x1xf32>
    %182 = vector.broadcast %181 : vector<64x1xf32> to vector<64x32xf32>
    %183 = arith.divf %175, %182 : vector<64x32xf32>
    %184 = vector.broadcast %149 : vector<1x32xf32> to vector<64x32xf32>
    %185 = arith.subf %141, %184 : vector<64x32xf32>
    %186 = arith.mulf %185, %185 : vector<64x32xf32>
    %cst_99 = arith.constant dense<0.000000e+00> : vector<64xf32>
    %187 = vector.multi_reduction <add>, %186, %cst_99 [1] : vector<64x32xf32> to vector<64xf32>
    %188 = vector.shape_cast %187 : vector<64xf32> to vector<64x1xf32>
    %189 = math.sqrt %188 : vector<64x1xf32>
    %cst_100 = arith.constant 9.99999996E-13 : f32
    %190 = vector.broadcast %cst_100 : f32 to vector<64x1xf32>
    %191 = arith.maximumf %189, %190 : vector<64x1xf32>
    %192 = vector.broadcast %191 : vector<64x1xf32> to vector<64x32xf32>
    %193 = arith.divf %185, %192 : vector<64x32xf32>
    %194 = arith.subf %183, %193 : vector<64x32xf32>
    %195 = arith.mulf %194, %194 : vector<64x32xf32>
    %196 = vector.shape_cast %195 : vector<64x32xf32> to vector<1x64x32xf32>
    %cst_101 = arith.constant dense<0.000000e+00> : vector<1xf32>
    %197 = vector.multi_reduction <add>, %196, %cst_101 [1, 2] : vector<1x64x32xf32> to vector<1xf32>
    %198 = vector.shape_cast %197 : vector<1xf32> to vector<1x1x1xf32>
    %199 = vector.extract %198[0, 0, 0] : f32 from vector<1x1x1xf32>
    %cst_102 = arith.constant 0.000000e+00 : f32
    %200 = arith.addf %cst_102, %199 : f32
    %cst_103 = arith.constant dense<0.000000e+00> : vector<64xf32>
    %201 = vector.multi_reduction <add>, %140, %cst_103 [1] : vector<64x32xf32> to vector<64xf32>
    %202 = vector.shape_cast %201 : vector<64xf32> to vector<64x1xf32>
    %cst_104 = arith.constant 3.200000e+01 : f32
    %203 = vector.broadcast %cst_104 : f32 to vector<64x1xf32>
    %204 = arith.divf %202, %203 : vector<64x1xf32>
    %cst_105 = arith.constant dense<0.000000e+00> : vector<64xf32>
    %205 = vector.multi_reduction <add>, %141, %cst_105 [1] : vector<64x32xf32> to vector<64xf32>
    %206 = vector.shape_cast %205 : vector<64xf32> to vector<64x1xf32>
    %cst_106 = arith.constant 3.200000e+01 : f32
    %207 = vector.broadcast %cst_106 : f32 to vector<64x1xf32>
    %208 = arith.divf %206, %207 : vector<64x1xf32>
    %209 = arith.mulf %204, %204 : vector<64x1xf32>
    %cst_107 = arith.constant dense<0.000000e+00> : vector<1xf32>
    %210 = vector.multi_reduction <add>, %209, %cst_107 [0] : vector<64x1xf32> to vector<1xf32>
    %211 = vector.shape_cast %210 : vector<1xf32> to vector<1x1xf32>
    %212 = math.sqrt %211 : vector<1x1xf32>
    %cst_108 = arith.constant 9.99999996E-13 : f32
    %213 = vector.broadcast %cst_108 : f32 to vector<1x1xf32>
    %214 = arith.maximumf %212, %213 : vector<1x1xf32>
    %215 = vector.broadcast %214 : vector<1x1xf32> to vector<64x1xf32>
    %216 = arith.divf %204, %215 : vector<64x1xf32>
    %217 = arith.mulf %208, %208 : vector<64x1xf32>
    %cst_109 = arith.constant dense<0.000000e+00> : vector<1xf32>
    %218 = vector.multi_reduction <add>, %217, %cst_109 [0] : vector<64x1xf32> to vector<1xf32>
    %219 = vector.shape_cast %218 : vector<1xf32> to vector<1x1xf32>
    %220 = math.sqrt %219 : vector<1x1xf32>
    %cst_110 = arith.constant 9.99999996E-13 : f32
    %221 = vector.broadcast %cst_110 : f32 to vector<1x1xf32>
    %222 = arith.maximumf %220, %221 : vector<1x1xf32>
    %223 = vector.broadcast %222 : vector<1x1xf32> to vector<64x1xf32>
    %224 = arith.divf %208, %223 : vector<64x1xf32>
    %225 = arith.subf %216, %224 : vector<64x1xf32>
    %226 = arith.mulf %225, %225 : vector<64x1xf32>
    %227 = vector.shape_cast %226 : vector<64x1xf32> to vector<1x64x1xf32>
    %cst_111 = arith.constant dense<0.000000e+00> : vector<1xf32>
    %228 = vector.multi_reduction <add>, %227, %cst_111 [1, 2] : vector<1x64x1xf32> to vector<1xf32>
    %229 = vector.shape_cast %228 : vector<1xf32> to vector<1x1x1xf32>
    %230 = vector.extract %229[0, 0, 0] : f32 from vector<1x1x1xf32>
    %cst_112 = arith.constant 3.200000e+01 : f32
    %231 = arith.mulf %cst_112, %230 : f32
    %cst_113 = arith.constant 0.000000e+00 : f32
    %232 = arith.addf %cst_113, %231 : f32
    %233 = vector.broadcast %204 : vector<64x1xf32> to vector<64x32xf32>
    %234 = arith.subf %140, %233 : vector<64x32xf32>
    %235 = arith.mulf %234, %234 : vector<64x32xf32>
    %cst_114 = arith.constant dense<0.000000e+00> : vector<32xf32>
    %236 = vector.multi_reduction <add>, %235, %cst_114 [0] : vector<64x32xf32> to vector<32xf32>
    %237 = vector.shape_cast %236 : vector<32xf32> to vector<1x32xf32>
    %238 = math.sqrt %237 : vector<1x32xf32>
    %cst_115 = arith.constant 9.99999996E-13 : f32
    %239 = vector.broadcast %cst_115 : f32 to vector<1x32xf32>
    %240 = arith.maximumf %238, %239 : vector<1x32xf32>
    %241 = vector.broadcast %240 : vector<1x32xf32> to vector<64x32xf32>
    %242 = arith.divf %234, %241 : vector<64x32xf32>
    %243 = vector.broadcast %208 : vector<64x1xf32> to vector<64x32xf32>
    %244 = arith.subf %141, %243 : vector<64x32xf32>
    %245 = arith.mulf %244, %244 : vector<64x32xf32>
    %cst_116 = arith.constant dense<0.000000e+00> : vector<32xf32>
    %246 = vector.multi_reduction <add>, %245, %cst_116 [0] : vector<64x32xf32> to vector<32xf32>
    %247 = vector.shape_cast %246 : vector<32xf32> to vector<1x32xf32>
    %248 = math.sqrt %247 : vector<1x32xf32>
    %cst_117 = arith.constant 9.99999996E-13 : f32
    %249 = vector.broadcast %cst_117 : f32 to vector<1x32xf32>
    %250 = arith.maximumf %248, %249 : vector<1x32xf32>
    %251 = vector.broadcast %250 : vector<1x32xf32> to vector<64x32xf32>
    %252 = arith.divf %244, %251 : vector<64x32xf32>
    %253 = arith.subf %242, %252 : vector<64x32xf32>
    %254 = arith.mulf %253, %253 : vector<64x32xf32>
    %255 = vector.shape_cast %254 : vector<64x32xf32> to vector<1x64x32xf32>
    %cst_118 = arith.constant dense<0.000000e+00> : vector<1xf32>
    %256 = vector.multi_reduction <add>, %255, %cst_118 [1, 2] : vector<1x64x32xf32> to vector<1xf32>
    %257 = vector.shape_cast %256 : vector<1xf32> to vector<1x1x1xf32>
    %258 = vector.extract %257[0, 0, 0] : f32 from vector<1x1x1xf32>
    %cst_119 = arith.constant 0.000000e+00 : f32
    %259 = arith.addf %cst_119, %258 : f32
    %260 = vector.extract_strided_slice %137 {offsets = [64, 0], sizes = [64, 32], strides = [1, 1]} : vector<128x32xf32> to vector<64x32xf32>
    %261 = vector.extract_strided_slice %138 {offsets = [64, 0], sizes = [64, 32], strides = [1, 1]} : vector<128x32xf32> to vector<64x32xf32>
    %262 = vector.extract_strided_slice %136 {offsets = [64, 0], sizes = [64, 32], strides = [1, 1]} : vector<128x32xf32> to vector<64x32xf32>
    %cst_120 = arith.constant dense<0.000000e+00> : vector<32xf32>
    %263 = vector.multi_reduction <add>, %260, %cst_120 [0] : vector<64x32xf32> to vector<32xf32>
    %264 = vector.shape_cast %263 : vector<32xf32> to vector<1x32xf32>
    %cst_121 = arith.constant 6.400000e+01 : f32
    %265 = vector.broadcast %cst_121 : f32 to vector<1x32xf32>
    %266 = arith.divf %264, %265 : vector<1x32xf32>
    %cst_122 = arith.constant dense<0.000000e+00> : vector<32xf32>
    %267 = vector.multi_reduction <add>, %262, %cst_122 [0] : vector<64x32xf32> to vector<32xf32>
    %268 = vector.shape_cast %267 : vector<32xf32> to vector<1x32xf32>
    %cst_123 = arith.constant 6.400000e+01 : f32
    %269 = vector.broadcast %cst_123 : f32 to vector<1x32xf32>
    %270 = arith.divf %268, %269 : vector<1x32xf32>
    %271 = arith.mulf %266, %266 : vector<1x32xf32>
    %cst_124 = arith.constant dense<0.000000e+00> : vector<1xf32>
    %272 = vector.multi_reduction <add>, %271, %cst_124 [1] : vector<1x32xf32> to vector<1xf32>
    %273 = vector.shape_cast %272 : vector<1xf32> to vector<1x1xf32>
    %274 = math.sqrt %273 : vector<1x1xf32>
    %cst_125 = arith.constant 9.99999996E-13 : f32
    %275 = vector.broadcast %cst_125 : f32 to vector<1x1xf32>
    %276 = arith.maximumf %274, %275 : vector<1x1xf32>
    %277 = vector.broadcast %276 : vector<1x1xf32> to vector<1x32xf32>
    %278 = arith.divf %266, %277 : vector<1x32xf32>
    %279 = arith.mulf %270, %270 : vector<1x32xf32>
    %cst_126 = arith.constant dense<0.000000e+00> : vector<1xf32>
    %280 = vector.multi_reduction <add>, %279, %cst_126 [1] : vector<1x32xf32> to vector<1xf32>
    %281 = vector.shape_cast %280 : vector<1xf32> to vector<1x1xf32>
    %282 = math.sqrt %281 : vector<1x1xf32>
    %cst_127 = arith.constant 9.99999996E-13 : f32
    %283 = vector.broadcast %cst_127 : f32 to vector<1x1xf32>
    %284 = arith.maximumf %282, %283 : vector<1x1xf32>
    %285 = vector.broadcast %284 : vector<1x1xf32> to vector<1x32xf32>
    %286 = arith.divf %270, %285 : vector<1x32xf32>
    %287 = arith.subf %278, %286 : vector<1x32xf32>
    %288 = arith.mulf %287, %287 : vector<1x32xf32>
    %289 = vector.shape_cast %288 : vector<1x32xf32> to vector<1x1x32xf32>
    %cst_128 = arith.constant dense<0.000000e+00> : vector<1xf32>
    %290 = vector.multi_reduction <add>, %289, %cst_128 [1, 2] : vector<1x1x32xf32> to vector<1xf32>
    %291 = vector.shape_cast %290 : vector<1xf32> to vector<1x1x1xf32>
    %292 = vector.extract %291[0, 0, 0] : f32 from vector<1x1x1xf32>
    %cst_129 = arith.constant 6.400000e+01 : f32
    %293 = arith.mulf %cst_129, %292 : f32
    %294 = arith.addf %173, %293 : f32
    %295 = vector.broadcast %266 : vector<1x32xf32> to vector<64x32xf32>
    %296 = arith.subf %260, %295 : vector<64x32xf32>
    %297 = arith.mulf %296, %296 : vector<64x32xf32>
    %cst_130 = arith.constant dense<0.000000e+00> : vector<64xf32>
    %298 = vector.multi_reduction <add>, %297, %cst_130 [1] : vector<64x32xf32> to vector<64xf32>
    %299 = vector.shape_cast %298 : vector<64xf32> to vector<64x1xf32>
    %300 = math.sqrt %299 : vector<64x1xf32>
    %cst_131 = arith.constant 9.99999996E-13 : f32
    %301 = vector.broadcast %cst_131 : f32 to vector<64x1xf32>
    %302 = arith.maximumf %300, %301 : vector<64x1xf32>
    %303 = vector.broadcast %302 : vector<64x1xf32> to vector<64x32xf32>
    %304 = arith.divf %296, %303 : vector<64x32xf32>
    %305 = vector.broadcast %270 : vector<1x32xf32> to vector<64x32xf32>
    %306 = arith.subf %262, %305 : vector<64x32xf32>
    %307 = arith.mulf %306, %306 : vector<64x32xf32>
    %cst_132 = arith.constant dense<0.000000e+00> : vector<64xf32>
    %308 = vector.multi_reduction <add>, %307, %cst_132 [1] : vector<64x32xf32> to vector<64xf32>
    %309 = vector.shape_cast %308 : vector<64xf32> to vector<64x1xf32>
    %310 = math.sqrt %309 : vector<64x1xf32>
    %cst_133 = arith.constant 9.99999996E-13 : f32
    %311 = vector.broadcast %cst_133 : f32 to vector<64x1xf32>
    %312 = arith.maximumf %310, %311 : vector<64x1xf32>
    %313 = vector.broadcast %312 : vector<64x1xf32> to vector<64x32xf32>
    %314 = arith.divf %306, %313 : vector<64x32xf32>
    %315 = arith.subf %304, %314 : vector<64x32xf32>
    %316 = arith.mulf %315, %315 : vector<64x32xf32>
    %317 = vector.shape_cast %316 : vector<64x32xf32> to vector<1x64x32xf32>
    %cst_134 = arith.constant dense<0.000000e+00> : vector<1xf32>
    %318 = vector.multi_reduction <add>, %317, %cst_134 [1, 2] : vector<1x64x32xf32> to vector<1xf32>
    %319 = vector.shape_cast %318 : vector<1xf32> to vector<1x1x1xf32>
    %320 = vector.extract %319[0, 0, 0] : f32 from vector<1x1x1xf32>
    %321 = arith.addf %200, %320 : f32
    %cst_135 = arith.constant dense<0.000000e+00> : vector<64xf32>
    %322 = vector.multi_reduction <add>, %261, %cst_135 [1] : vector<64x32xf32> to vector<64xf32>
    %323 = vector.shape_cast %322 : vector<64xf32> to vector<64x1xf32>
    %cst_136 = arith.constant 3.200000e+01 : f32
    %324 = vector.broadcast %cst_136 : f32 to vector<64x1xf32>
    %325 = arith.divf %323, %324 : vector<64x1xf32>
    %cst_137 = arith.constant dense<0.000000e+00> : vector<64xf32>
    %326 = vector.multi_reduction <add>, %262, %cst_137 [1] : vector<64x32xf32> to vector<64xf32>
    %327 = vector.shape_cast %326 : vector<64xf32> to vector<64x1xf32>
    %cst_138 = arith.constant 3.200000e+01 : f32
    %328 = vector.broadcast %cst_138 : f32 to vector<64x1xf32>
    %329 = arith.divf %327, %328 : vector<64x1xf32>
    %330 = arith.mulf %325, %325 : vector<64x1xf32>
    %cst_139 = arith.constant dense<0.000000e+00> : vector<1xf32>
    %331 = vector.multi_reduction <add>, %330, %cst_139 [0] : vector<64x1xf32> to vector<1xf32>
    %332 = vector.shape_cast %331 : vector<1xf32> to vector<1x1xf32>
    %333 = math.sqrt %332 : vector<1x1xf32>
    %cst_140 = arith.constant 9.99999996E-13 : f32
    %334 = vector.broadcast %cst_140 : f32 to vector<1x1xf32>
    %335 = arith.maximumf %333, %334 : vector<1x1xf32>
    %336 = vector.broadcast %335 : vector<1x1xf32> to vector<64x1xf32>
    %337 = arith.divf %325, %336 : vector<64x1xf32>
    %338 = arith.mulf %329, %329 : vector<64x1xf32>
    %cst_141 = arith.constant dense<0.000000e+00> : vector<1xf32>
    %339 = vector.multi_reduction <add>, %338, %cst_141 [0] : vector<64x1xf32> to vector<1xf32>
    %340 = vector.shape_cast %339 : vector<1xf32> to vector<1x1xf32>
    %341 = math.sqrt %340 : vector<1x1xf32>
    %cst_142 = arith.constant 9.99999996E-13 : f32
    %342 = vector.broadcast %cst_142 : f32 to vector<1x1xf32>
    %343 = arith.maximumf %341, %342 : vector<1x1xf32>
    %344 = vector.broadcast %343 : vector<1x1xf32> to vector<64x1xf32>
    %345 = arith.divf %329, %344 : vector<64x1xf32>
    %346 = arith.subf %337, %345 : vector<64x1xf32>
    %347 = arith.mulf %346, %346 : vector<64x1xf32>
    %348 = vector.shape_cast %347 : vector<64x1xf32> to vector<1x64x1xf32>
    %cst_143 = arith.constant dense<0.000000e+00> : vector<1xf32>
    %349 = vector.multi_reduction <add>, %348, %cst_143 [1, 2] : vector<1x64x1xf32> to vector<1xf32>
    %350 = vector.shape_cast %349 : vector<1xf32> to vector<1x1x1xf32>
    %351 = vector.extract %350[0, 0, 0] : f32 from vector<1x1x1xf32>
    %cst_144 = arith.constant 3.200000e+01 : f32
    %352 = arith.mulf %cst_144, %351 : f32
    %353 = arith.addf %232, %352 : f32
    %354 = vector.broadcast %325 : vector<64x1xf32> to vector<64x32xf32>
    %355 = arith.subf %261, %354 : vector<64x32xf32>
    %356 = arith.mulf %355, %355 : vector<64x32xf32>
    %cst_145 = arith.constant dense<0.000000e+00> : vector<32xf32>
    %357 = vector.multi_reduction <add>, %356, %cst_145 [0] : vector<64x32xf32> to vector<32xf32>
    %358 = vector.shape_cast %357 : vector<32xf32> to vector<1x32xf32>
    %359 = math.sqrt %358 : vector<1x32xf32>
    %cst_146 = arith.constant 9.99999996E-13 : f32
    %360 = vector.broadcast %cst_146 : f32 to vector<1x32xf32>
    %361 = arith.maximumf %359, %360 : vector<1x32xf32>
    %362 = vector.broadcast %361 : vector<1x32xf32> to vector<64x32xf32>
    %363 = arith.divf %355, %362 : vector<64x32xf32>
    %364 = vector.broadcast %329 : vector<64x1xf32> to vector<64x32xf32>
    %365 = arith.subf %262, %364 : vector<64x32xf32>
    %366 = arith.mulf %365, %365 : vector<64x32xf32>
    %cst_147 = arith.constant dense<0.000000e+00> : vector<32xf32>
    %367 = vector.multi_reduction <add>, %366, %cst_147 [0] : vector<64x32xf32> to vector<32xf32>
    %368 = vector.shape_cast %367 : vector<32xf32> to vector<1x32xf32>
    %369 = math.sqrt %368 : vector<1x32xf32>
    %cst_148 = arith.constant 9.99999996E-13 : f32
    %370 = vector.broadcast %cst_148 : f32 to vector<1x32xf32>
    %371 = arith.maximumf %369, %370 : vector<1x32xf32>
    %372 = vector.broadcast %371 : vector<1x32xf32> to vector<64x32xf32>
    %373 = arith.divf %365, %372 : vector<64x32xf32>
    %374 = arith.subf %363, %373 : vector<64x32xf32>
    %375 = arith.mulf %374, %374 : vector<64x32xf32>
    %376 = vector.shape_cast %375 : vector<64x32xf32> to vector<1x64x32xf32>
    %cst_149 = arith.constant dense<0.000000e+00> : vector<1xf32>
    %377 = vector.multi_reduction <add>, %376, %cst_149 [1, 2] : vector<1x64x32xf32> to vector<1xf32>
    %378 = vector.shape_cast %377 : vector<1xf32> to vector<1x1x1xf32>
    %379 = vector.extract %378[0, 0, 0] : f32 from vector<1x1x1xf32>
    %380 = arith.addf %259, %379 : f32
    %c0_150 = arith.constant 0 : index
    %381 = memref.load %arg27[%c0_150] : memref<4xf32, #tpu.memory_space<smem>>
    memref.store %294, %arg27[%c0_150] : memref<4xf32, #tpu.memory_space<smem>>
    %c1 = arith.constant 1 : index
    %382 = memref.load %arg27[%c1] : memref<4xf32, #tpu.memory_space<smem>>
    memref.store %321, %arg27[%c1] : memref<4xf32, #tpu.memory_space<smem>>
    %c2 = arith.constant 2 : index
    %383 = memref.load %arg27[%c2] : memref<4xf32, #tpu.memory_space<smem>>
    memref.store %353, %arg27[%c2] : memref<4xf32, #tpu.memory_space<smem>>
    %c3 = arith.constant 3 : index
    %384 = memref.load %arg27[%c3] : memref<4xf32, #tpu.memory_space<smem>>
    memref.store %380, %arg27[%c3] : memref<4xf32, #tpu.memory_space<smem>>
    return
  }
}

</mosaic_0001>

<bundles_post_ra>
// kernel: tile.19
= control target key start
LH: loop header
LB: loop body
LE: loop exit
PB: predicated region body
PF: predicated region fallthrough
CT: control target
= control target key end

     0   :  { %vm82_vm0 = vcmask 1047556   ;;  %vm84_vm1 = vcmask 523264   ;;  %vm103_vm2 = vcmask 1048064   ;;  %s225_s0 = inlined_call_operand.vmem [shape: f32[2,64,16], index: 0, kind: input, shape index: {}]   ;;  %s226_s1 = inlined_call_operand.vmem [shape: f32[128,16], index: 1, kind: output, shape index: {}]  }
   0x1   :  { %v138_v0 = vld [vmem:[%s225_s0 + $0xe] sm:$0x3]  ;;  %v139_v1 = vld [vmem:[%s225_s0 + $0xc] sm:$0x3]  ;;  %v140_v2 = vld [vmem:[%s225_s0 + $0xa] sm:$0x3] }
   0x2   :  { %48 = vst [vmem:[#allocation0 + $0x38] sm:$0x3] %v138_v0  ;;  %53 = vst [vmem:[#allocation0 + $0x30] sm:$0x3] %v139_v1  ;;  %v141_v3 = vld [vmem:[%s225_s0 + $0x8] sm:$0x3] }
   0x3   :  { %58 = vst [vmem:[#allocation0 + $0x28] sm:$0x3] %v140_v2  ;;  %v142_v4 = vld [vmem:[%s225_s0 + $0x6] sm:$0x3]  ;;  %v143_v5 = vld [vmem:[%s225_s0 + $0x4] sm:$0x3] }
   0x4   :  { %63 = vst [vmem:[#allocation0 + $0x20] sm:$0x3] %v141_v3  ;;  %68 = vst [vmem:[#allocation0 + $0x18] sm:$0x3] %v142_v4  ;;  %v144_v6 = vld [vmem:[%s225_s0 + $0x2] sm:$0x3] }
   0x5   :  { %73 = vst [vmem:[#allocation0 + $0x10] sm:$0x3] %v143_v5  ;;  %v78_v7 = vld [vmem:[%s225_s0] sm:$0x3]  ;;  %77 = vst [vmem:[#allocation0 + $0x8] sm:$0x3] %v144_v6 }
   0x6   :  { %79 = vst [vmem:[#allocation0] sm:$0x3] %v78_v7  ;;  %v130_v8 = vld [vmem:[%s225_s0 + $0x1e] sm:$0x3]  ;;  %v131_v9 = vld [vmem:[%s225_s0 + $0x1c] sm:$0x3] }
   0x7   :  { %v132_v10 = vld [vmem:[%s225_s0 + $0x1a] sm:$0x3]  ;;  %8 = vst [vmem:[#allocation0 + $0x78] sm:$0x3] %v130_v8  ;;  %13 = vst [vmem:[#allocation0 + $0x70] sm:$0x3] %v131_v9 }
   0x8   :  { %18 = vst [vmem:[#allocation0 + $0x68] sm:$0x3] %v132_v10  ;;  %v133_v11 = vld [vmem:[%s225_s0 + $0x18] sm:$0x3]  ;;  %v134_v12 = vld [vmem:[%s225_s0 + $0x16] sm:$0x3] }
   0x9   :  { %v135_v13 = vld [vmem:[%s225_s0 + $0x14] sm:$0x3]  ;;  %23 = vst [vmem:[#allocation0 + $0x60] sm:$0x3] %v133_v11  ;;  %28 = vst [vmem:[#allocation0 + $0x58] sm:$0x3] %v134_v12 }
   0xa   :  { %33 = vst [vmem:[#allocation0 + $0x50] sm:$0x3] %v135_v13  ;;  %v136_v14 = vld [vmem:[%s225_s0 + $0x12] sm:$0x3]  ;;  %v137_v15 = vld [vmem:[%s225_s0 + $0x10] sm:$0x3] }
   0xb   :  { %38 = vst [vmem:[#allocation0 + $0x48] sm:$0x3] %v136_v14  ;;  %43 = vst [vmem:[#allocation0 + $0x40] sm:$0x3] %v137_v15  ;;  %s148_s0 = smov 64  }
   0xc   :  { %v98_v16 = vld [vmem:[#allocation0 + $0x1] ss:$8 sm:$0xf0]   ;;  %v81_v17 = vld [vmem:[#allocation0] ss:$8 sm:$0xf0]  }
   0xd   :  { %v96_v18 = vld [vmem:[#allocation0 + $0x1] ss:$8 sm:$0xf]   ;;  %v80_v19 = vld [vmem:[#allocation0] ss:$8 sm:$0xf]  }
   0xe   :  { %v100_v20 = vsel %vm82_vm0, %v98_v16, %v96_v18  ;;  %v83_v21 = vsel %vm82_vm0, %v81_v17, %v80_v19 }
   0xf   :  { %101 = vrot.lane.b32.xlu0 %v100_v20, %s148_s0  ;;  %85 = vst.msk [vmem:[%s226_s1] sm:$0xff] %vm84_vm1, %v83_v21  }
  0x10   :  { %v108_v22 = vld [vmem:[#allocation0 + $0x41] ss:$8 sm:$0xf0]   ;;  %v89_v23 = vld [vmem:[#allocation0 + $0x40] ss:$8 sm:$0xf0]  }
  0x12   :  { %v106_v24 = vld [vmem:[#allocation0 + $0x41] ss:$8 sm:$0xf]   ;;  %v87_v25 = vld [vmem:[#allocation0 + $0x40] ss:$8 sm:$0xf]  }
  0x13   :  { %v110_v26 = vsel %vm82_vm0, %v108_v22, %v106_v24  ;;  %v91_v27 = vsel %vm82_vm0, %v89_v23, %v87_v25 }
  0x14   :  { %145 = vst.msk [vmem:[%s226_s1 + $0x8] sm:$0xff] %vm84_vm1, %v91_v27   ;;  %111 = vrot.lane.b32.xlu0 %v110_v26, %s148_s0 }
  0x81   :  { %v102_v28 = vpop.permute.xlu0 %101  }
  0x82   :  { %104 = vst.msk [vmem:[%s226_s1] sm:$0xff] %vm103_vm2, %v102_v28  }
  0x86   :  { %v112_v29 = vpop.permute.xlu0 %111  }
  0x87   :  { %146 = vst.msk [vmem:[%s226_s1 + $0x8] sm:$0xff] %vm103_vm2, %v112_v29  }

// kernel: _lambda_.1
= control target key start
LH: loop header
LB: loop body
LE: loop exit
PB: predicated region body
PF: predicated region fallthrough
CT: control target
= control target key end

     0   :  { %s16591_s0 = inlined_call_operand.vmem [shape: f32[128,144], index: 0, kind: input, shape index: {}]   ;;  %s16592_s1 = inlined_call_operand.vmem [shape: f32[128,32], index: 1, kind: input, shape index: {}]   ;;  %s16593_s2 = inlined_call_operand.vmem [shape: f32[144,32], index: 2, kind: input, shape index: {}]   ;;  %s16594_s3 = inlined_call_operand.vmem [shape: f32[1,32], index: 3, kind: input, shape index: {}]   ;;  %s16595_s4 = inlined_call_operand.vmem [shape: f32[1,32], index: 4, kind: input, shape index: {}]   ;;  %s16596_s5 = inlined_call_operand.vmem [shape: f32[1,32], index: 5, kind: input, shape index: {}]   ;;  %s16597_s6 = inlined_call_operand.vmem [shape: f32[64,64], index: 6, kind: input, shape index: {}]   ;;  %s16598_s7 = inlined_call_operand.vmem [shape: f32[64,64], index: 7, kind: input, shape index: {}]   ;;  %s16599_s8 = inlined_call_operand.vmem [shape: f32[1,64], index: 8, kind: input, shape index: {}]   ;;  %s16600_s9 = inlined_call_operand.vmem [shape: f32[64,64], index: 9, kind: input, shape index: {}]   ;;  %s16601_s10 = inlined_call_operand.vmem [shape: f32[1,64], index: 10, kind: input, shape index: {}]   ;;  %s16602_s11 = inlined_call_operand.vmem [shape: f32[32,128], index: 11, kind: input, shape index: {}]   ;;  %s16603_s12 = inlined_call_operand.vmem [shape: f32[1,128], index: 12, kind: input, shape index: {}]   ;;  %s16604_s13 = inlined_call_operand.vmem [shape: f32[64,64], index: 13, kind: input, shape index: {}]   ;;  %s16605_s14 = inlined_call_operand.vmem [shape: f32[1,64], index: 14, kind: input, shape index: {}]   ;;  %s16606_s15 = inlined_call_operand.vmem [shape: f32[1,64], index: 15, kind: input, shape index: {}]   ;;  %s16607_s16 = inlined_call_operand.vmem [shape: f32[1,64], index: 16, kind: input, shape index: {}]   ;;  %s16608_s17 = inlined_call_operand.vmem [shape: f32[64,256], index: 17, kind: input, shape index: {}]   ;;  %s16609_s18 = inlined_call_operand.vmem [shape: f32[1,256], index: 18, kind: input, shape index: {}]   ;;  %s16610_s19 = inlined_call_operand.vmem [shape: f32[256,64], index: 19, kind: input, shape index: {}]   ;;  %s16611_s20 = inlined_call_operand.vmem [shape: f32[1,64], index: 20, kind: input, shape index: {}]   ;;  %s16612_s21 = inlined_call_operand.vmem [shape: f32[64,2], index: 21, kind: input, shape index: {}]   ;;  %s16613_s22 = inlined_call_operand.vmem [shape: f32[2,64], index: 22, kind: input, shape index: {}]   ;;  %s16614_s23 = inlined_call_operand.vmem [shape: f32[512,64], index: 23, kind: input, shape index: {}]   ;;  %s16615_s24 = inlined_call_operand.vmem [shape: f32[512,8], index: 24, kind: input, shape index: {}]   ;;  %s16616_s25 = inlined_call_operand.vmem [shape: f32[8,512], index: 25, kind: input, shape index: {}]   ;;  %s16617_s26 = inlined_call_operand.vmem [shape: f32[128,32], index: 26, kind: input, shape index: {}]   ;;  %s16618_s27 = inlined_call_operand.vmem [shape: f32[4], index: 27, kind: output, shape index: {}]  }
   0x1   :  { %16887 = sst [smem:[#allocation129_spill]] %s16591_s0 }
   0x2   :  { %16888 = sst [smem:[#allocation130_spill]] %s16592_s1 }
   0x3   :  { %16889 = sst [smem:[#allocation131_spill]] %s16593_s2 }
   0x4   :  { %16890 = sst [smem:[#allocation132_spill]] %s16594_s3 }
   0x5   :  { %16891 = sst [smem:[#allocation133_spill]] %s16595_s4 }
   0x6   :  { %16892 = sst [smem:[#allocation134_spill]] %s16596_s5 }
   0x7   :  { %16893 = sst [smem:[#allocation135_spill]] %s16597_s6 }
   0x8   :  { %16894 = sst [smem:[#allocation136_spill]] %s16598_s7 }
   0x9   :  { %16895 = sst [smem:[#allocation137_spill]] %s16599_s8 }
   0xa   :  { %16896 = sst [smem:[#allocation138_spill]] %s16600_s9 }
   0xb   :  { %16897 = sst [smem:[#allocation139_spill]] %s16601_s10 }
   0xc   :  { %16898 = sst [smem:[#allocation140_spill]] %s16602_s11 }
   0xd   :  { %s16899_s8 = sld [smem:[#allocation131_spill]]  ;;  %v11002_v3 = vmov 0.0|0.0   ;;  %vm144_vm0 = vcmask 130048   ;;  %s16900_s7 = sld [smem:[#allocation129_spill]]  ;;  %vm583_vm1 = vcmask 523264  }
   0xe   :  { %9565 = vmatprep.subr.bf16.mxu0 %v11002_v3  ;;  %s16901_s30 = sld [smem:[#allocation136_spill]]  ;;  %s16902_s9 = sld [smem:[#allocation135_spill]] }
  0x13   :  { %v119_v0 = vld [vmem:[%s16899_s8] sm:$0xff]  ;;  %v120_v1 = vld [vmem:[%s16899_s8 + $0x8] sm:$0xff]  ;;  %v121_v2 = vld [vmem:[%s16899_s8 + $0x10] sm:$0xff] }
  0x14   :  { %v9566_v4 = vpack.c.bf16 %v120_v1, %v119_v0  ;;  %v122_v5 = vld [vmem:[%s16899_s8 + $0x18] sm:$0xff]  ;;  %v123_v7 = vld [vmem:[%s16899_s8 + $0x20] sm:$0xff]  ;;  %v124_v8 = vld [vmem:[%s16899_s8 + $0x28] sm:$0xff] }
  0x15   :  { %v9569_v6 = vpack.c.bf16 %v122_v5, %v121_v2  ;;  %v88_v9 = vld [vmem:[%s16900_s7 + $0x8] sm:$0xff]  ;;  %v9572_v10 = vpack.c.bf16 %v124_v8, %v123_v7  ;;  %v125_v11 = vld [vmem:[%s16899_s8 + $0x30] sm:$0xff]  ;;  %v126_v12 = vld [vmem:[%s16899_s8 + $0x38] sm:$0xff] }
  0x16   :  { %9567 = vmatpush1.bf16.msra.mxu0 %v9566_v4  ;;  %8080 = vmatprep.mubr.msk.f32.mxu0 %vm144_vm0, %v88_v9  ;;  %v9575_v13 = vpack.c.bf16 %v126_v12, %v125_v11  ;;  %v127_v14 = vld [vmem:[%s16899_s8 + $0x40] sm:$0xff]  ;;  %v128_v15 = vld [vmem:[%s16899_s8 + $0x48] sm:$0xff]  ;;  %v129_v17 = vld [vmem:[%s16899_s8 + $0x50] sm:$0xff] }
  0x17   :  { %9568 = vmatprep.subr.bf16.mxu0 %v11002_v3  ;;  %v9578_v16 = vpack.c.bf16 %v128_v15, %v127_v14  ;;  %v130_v18 = vld [vmem:[%s16899_s8 + $0x58] sm:$0xff]  ;;  %v568_v19 = vld [vmem:[%s16901_s30] sm:$0xff]  ;;  %v569_v20 = vld [vmem:[%s16901_s30 + $0x8] sm:$0xff] }
  0x18   :  { %v570_v21 = vld [vmem:[%s16901_s30 + $0x10] sm:$0xff]  ;;  %v571_v22 = vld [vmem:[%s16901_s30 + $0x18] sm:$0xff]  ;;  %v9592_v23 = vpack.c.bf16 %v569_v20, %v568_v19  ;;  %v9581_v25 = vpack.c.bf16 %v130_v18, %v129_v17  ;;  %v572_v26 = vld [vmem:[%s16901_s30 + $0x20] sm:$0xff] }
  0x19   :  { %v9596_v24 = vpack.c.bf16 %v571_v22, %v570_v21  ;;  %v573_v27 = vld [vmem:[%s16901_s30 + $0x28] sm:$0xff]  ;;  %v560_v28 = vld [vmem:[%s16902_s9] sm:$0xff] }
  0x1a   :  { %9570 = vmatpush1.bf16.msra.mxu0 %v9569_v6  ;;  %v131_v29 = vld [vmem:[%s16899_s8 + $0x60] sm:$0xff]  ;;  %v132_v30 = vld [vmem:[%s16899_s8 + $0x68] sm:$0xff]  ;;  %9593 = vmatprep.subr.bf16.mxu1 %v9592_v23  ;;  %v9600_v31 = vpack.c.bf16 %v573_v27, %v572_v26 }
  0x1b   :  { %9571 = vmatprep.subr.bf16.mxu0 %v11002_v3  ;;  %9595 = vmatpush3.bf16.msra.mxu1 %v9592_v23 }
  0x1c   :  { %9321 = vmatprep.mubr.msk.f32.mxu1 %vm583_vm1, %v560_v28  ;;  %9597 = vmatprep.subr.bf16.mxu1 %v9596_v24 }
  0x1e   :  { %9573 = vmatpush1.bf16.msra.mxu0 %v9572_v10 }
  0x1f   :  { %9574 = vmatprep.subr.bf16.mxu0 %v11002_v3 }
  0x22   :  { %9576 = vmatpush1.bf16.msra.mxu0 %v9575_v13 }
  0x23   :  { %9577 = vmatprep.subr.bf16.mxu0 %v11002_v3 }
  0x26   :  { %9579 = vmatpush1.bf16.msra.mxu0 %v9578_v16 }
  0x27   :  { %9580 = vmatprep.subr.bf16.mxu0 %v11002_v3 }
  0x28   :  { %32 = vsyncpa [#allocation3], 0  ;;  %v9584_v32 = vpack.c.bf16 %v132_v30, %v131_v29  ;;  %v574_v33 = vld [vmem:[%s16901_s30 + $0x30] sm:$0xff]  ;;  %v575_v34 = vld [vmem:[%s16901_s30 + $0x38] sm:$0xff]  ;;  %9599 = vmatpush3.bf16.msra.mxu1 %v9596_v24  ;;  %s16903_s28 = sld [smem:[#allocation138_spill]]  ;;  %s16904_s2 = sld [smem:[#allocation132_spill]] }
  0x29   :  { %v133_v35 = vld [vmem:[%s16899_s8 + $0x70] sm:$0xff]  ;;  %v134_v36 = vld [vmem:[%s16899_s8 + $0x78] sm:$0xff]  ;;  %9601 = vmatprep.subr.bf16.mxu1 %v9600_v31  ;;  %v9604_v37 = vpack.c.bf16 %v575_v34, %v574_v33  ;;  %v135_v39 = vld [vmem:[%s16899_s8 + $0x80] sm:$0xff]  ;;  %vm338_vm2 = vcmask 261120   ;;  %s16905_s6 = sld [smem:[#allocation137_spill]]  ;;  %s16906_s11 = sld [smem:[#allocation140_spill]] }
  0x2a   :  { %9582 = vmatpush1.bf16.msra.mxu0 %v9581_v25  ;;  %v9587_v38 = vpack.c.bf16 %v134_v36, %v133_v35  ;;  %v136_v40 = vld [vmem:[%s16899_s8 + $0x88] sm:$0xff]  ;;  %v562_v43 = vld [vmem:[%s16902_s9 + $0x10] sm:$0xff]  ;;  %v87_v44 = vld [vmem:[%s16900_s7] sm:$0xff]  ;;  %s16907_s10 = sld [smem:[#allocation133_spill]]  ;;  %s16910_s4 = sld [smem:[#allocation139_spill]]  ;;  %vm2413_vm4 = vcmask 64512  }
  0x2b   :  { %9583 = vmatprep.subr.bf16.mxu0 %v11002_v3  ;;  %v9590_v41 = vpack.c.bf16 %v136_v40, %v135_v39  ;;  %v561_v42 = vld [vmem:[%s16902_s9 + $0x8] sm:$0xff]  ;;  %v90_v45 = vld [vmem:[%s16900_s7 + $0x18] sm:$0xff]  ;;  %v564_v47 = vld [vmem:[%s16902_s9 + $0x20] sm:$0xff]  ;;  %s11003_s0 = smov 64   ;;  %vm5317_vm5 = vcmask 1041408   ;;  %vm5268_vm6 = vcmask 15360  }
  0x2c   :  { %9603 = vmatpush3.bf16.msra.mxu1 %v9600_v31  ;;  %v563_v46 = vld [vmem:[%s16902_s9 + $0x18] sm:$0xff]  ;;  %v89_v48 = vld [vmem:[%s16900_s7 + $0x10] sm:$0xff]  ;;  %v92_v49 = vld [vmem:[%s16900_s7 + $0x28] sm:$0xff]  ;;  %vm7072_vm11 = vcmask 523520  }
  0x2d   :  { %9605 = vmatprep.subr.bf16.mxu1 %v9604_v37  ;;  %v565_v50 = vld [vmem:[%s16902_s9 + $0x28] sm:$0xff]  ;;  %v566_v51 = vld [vmem:[%s16902_s9 + $0x30] sm:$0xff]  ;;  %v91_v52 = vld [vmem:[%s16900_s7 + $0x20] sm:$0xff] }
  0x2e   :  { %9585 = vmatpush1.bf16.msra.mxu0 %v9584_v32  ;;  %v94_v53 = vld [vmem:[%s16900_s7 + $0x38] sm:$0xff]  ;;  %v93_v55 = vld [vmem:[%s16900_s7 + $0x30] sm:$0xff]  ;;  %v96_v56 = vld [vmem:[%s16900_s7 + $0x48] sm:$0xff] }
  0x2f   :  { %9586 = vmatprep.subr.bf16.mxu0 %v11002_v3  ;;  %v567_v54 = vld [vmem:[%s16902_s9 + $0x38] sm:$0xff]  ;;  %v95_v57 = vld [vmem:[%s16900_s7 + $0x40] sm:$0xff]  ;;  %v97_v59 = vld [vmem:[%s16900_s7 + $0x50] sm:$0xff] }
  0x30   :  { %9607 = vmatpush3.bf16.msra.mxu1 %v9604_v37  ;;  %v98_v58 = vld [vmem:[%s16900_s7 + $0x58] sm:$0xff]  ;;  %v100_v60 = vld [vmem:[%s16900_s7 + $0x68] sm:$0xff]  ;;  %v99_v61 = vld [vmem:[%s16900_s7 + $0x60] sm:$0xff] }
  0x31   :  { %v102_v62 = vld [vmem:[%s16900_s7 + $0x78] sm:$0xff]  ;;  %v101_v63 = vld [vmem:[%s16900_s7 + $0x70] sm:$0xff]  ;;  %v104_v0 = vld [vmem:[%s16900_s7 + $0x88] sm:$0xff] }
  0x32   :  { %9588 = vmatpush1.bf16.msra.mxu0 %v9587_v38  ;;  %v103_v1 = vld [vmem:[%s16900_s7 + $0x80] sm:$0xff]  ;;  %v106_v2 = vld [vmem:[%s16900_s7 + $0x98] sm:$0xff]  ;;  %v108_v4 = vld [vmem:[%s16900_s7 + $0xa8] sm:$0xff] }
  0x33   :  { %9589 = vmatprep.subr.bf16.mxu0 %v11002_v3  ;;  %9322 = vmatmul.mubr.msk.f32.vlgmr.msra.gmra.mrb[0].mxu1 %vm583_vm1, %v561_v42  ;;  %v105_v3 = vld [vmem:[%s16900_s7 + $0x90] sm:$0xff]  ;;  %v107_v5 = vld [vmem:[%s16900_s7 + $0xa0] sm:$0xff]  ;;  %v110_v6 = vld [vmem:[%s16900_s7 + $0xb8] sm:$0xff] }
  0x34   :  { %9324 = vmatprep.mubr.msk.f32.mxu1 %vm583_vm1, %v562_v43  ;;  %v109_v7 = vld [vmem:[%s16900_s7 + $0xb0] sm:$0xff]  ;;  %v112_v8 = vld [vmem:[%s16900_s7 + $0xc8] sm:$0xff]  ;;  %v111_v9 = vld [vmem:[%s16900_s7 + $0xc0] sm:$0xff] }
  0x35   :  { %v114_v10 = vld [vmem:[%s16900_s7 + $0xd8] sm:$0xff]  ;;  %v113_v11 = vld [vmem:[%s16900_s7 + $0xd0] sm:$0xff]  ;;  %v116_v12 = vld [vmem:[%s16900_s7 + $0xe8] sm:$0xff] }
  0x36   :  { %9591 = vmatpush1.bf16.msra.mxu0 %v9590_v41  ;;  %v115_v13 = vld [vmem:[%s16900_s7 + $0xe0] sm:$0xff]  ;;  %v118_v14 = vld [vmem:[%s16900_s7 + $0xf8] sm:$0xff]  ;;  %v117_v15 = vld [vmem:[%s16900_s7 + $0xf0] sm:$0xff] }
  0x37   :  { %9325 = vmatmul.mubr.msk.f32.gmra.mrb[2].mxu1 %vm583_vm1, %v563_v46  ;;  %v721_v16 = vld [vmem:[%s16903_s28] sm:$0xff]  ;;  %v722_v17 = vld [vmem:[%s16903_s28 + $0x8] sm:$0xff]  ;;  %v723_v19 = vld [vmem:[%s16903_s28 + $0x10] sm:$0xff] }
  0x38   :  { %9327 = vmatprep.mubr.msk.f32.mxu1 %vm583_vm1, %v564_v47  ;;  %v9608_v18 = vpack.c.bf16 %v722_v17, %v721_v16  ;;  %v724_v20 = vld [vmem:[%s16903_s28 + $0x18] sm:$0xff]  ;;  %v11394_v21 = vld [vmem:[%s16904_s2] ss:$0 sm:$0xff]  ;;  %v726_v27 = vld [vmem:[%s16903_s28 + $0x28] sm:$0xff]  ;;  %s8070_s2 = sshll.u32 %s16618_s27, 4  ;;  %s8071_s2 = int_to_ptr.vmem [resolvable:$true] %s8070_s2 }
  0x39   :  { %258 = vmatmul.mubr.f32.vlgmr.msra.gmra.mrb[0].mxu0 %v87_v44  ;;  %v9612_v23 = vpack.c.bf16 %v724_v20, %v723_v19  ;;  %v725_v26 = vld [vmem:[%s16903_s28 + $0x20] sm:$0xff]  ;;  %v727_v35 = vld [vmem:[%s16903_s28 + $0x30] sm:$0xff]  ;;  %v728_v36 = vld [vmem:[%s16903_s28 + $0x38] sm:$0xff]  ;;  %p10993_p1 = scmp.lt.s32.totalorder %s8071_s2, %s8071_s2 }
  0x3a   :  { %8081 = vmatprep.mubr.msk.f32.mxu0 %vm144_vm0, %v90_v45  ;;  %9609 = vmatprep.subr.bf16.mxu1 %v9608_v18  ;;  %v9616_v29 = vpack.c.bf16 %v726_v27, %v725_v26  ;;  %v8098_v39 = vld [vmem:[%s16905_s6] ss:$0 sm:$0xff]  ;;  %v9620_v41 = vpack.c.bf16 %v728_v36, %v727_v35  ;;  %v868_v26 = vld [vmem:[%s16906_s11 + $0x18] sm:$0xff]  ;;  %s16908_s6 = sld [smem:[#allocation134_spill]]  ;;  %vm11796_vm3 = vmpackc.low %vm583_vm1, %vm583_vm1 }
  0x3b   :  { %9328 = vmatmul.mubr.msk.f32.gmra.mrb[4].mxu1 %vm583_vm1, %v565_v50 }
  0x3c   :  { %9330 = vmatprep.mubr.msk.f32.mxu1 %vm583_vm1, %v566_v51  ;;  %9611 = vmatpush3.bf16.msra.mxu1 %v9608_v18 }
  0x3d   :  { %263 = vmatmul.mubr.f32.gmra.mrb[2].mxu0 %v89_v48  ;;  %9613 = vmatprep.subr.bf16.mxu1 %v9612_v23 }
  0x3e   :  { %8082 = vmatprep.mubr.msk.f32.mxu0 %vm144_vm0, %v92_v49 }
  0x3f   :  { %9331 = vmatmul.mubr.msk.f32.gmra.mrb[6].mxu1 %vm583_vm1, %v567_v54 }
  0x40   :  { %9615 = vmatpush3.bf16.msra.mxu1 %v9612_v23 }
  0x41   :  { %268 = vmatmul.mubr.f32.gmra.mrb[4].mxu0 %v91_v52  ;;  %9617 = vmatprep.subr.bf16.mxu1 %v9616_v29 }
  0x42   :  { %8083 = vmatprep.mubr.msk.f32.mxu0 %vm144_vm0, %v94_v53 }
  0x44   :  { %9619 = vmatpush3.bf16.msra.mxu1 %v9616_v29 }
  0x45   :  { %273 = vmatmul.mubr.f32.gmra.mrb[6].mxu0 %v93_v55  ;;  %9621 = vmatprep.subr.bf16.mxu1 %v9620_v41 }
  0x46   :  { %8084 = vmatprep.mubr.msk.f32.mxu0 %vm144_vm0, %v96_v56 }
  0x48   :  { %9623 = vmatpush3.bf16.msra.mxu1 %v9620_v41 }
  0x49   :  { %278 = vmatmul.mubr.f32.gmra.mrb[8].mxu0 %v95_v57 }
  0x4a   :  { %8085 = vmatprep.mubr.msk.f32.mxu0 %vm144_vm0, %v98_v58 }
  0x4d   :  { %283 = vmatmul.mubr.f32.gmra.mrb[10].mxu0 %v97_v59 }
  0x4e   :  { %8086 = vmatprep.mubr.msk.f32.mxu0 %vm144_vm0, %v100_v60 }
  0x51   :  { %288 = vmatmul.mubr.f32.gmra.mrb[12].mxu0 %v99_v61 }
  0x52   :  { %8087 = vmatprep.mubr.msk.f32.mxu0 %vm144_vm0, %v102_v62 }
  0x55   :  { %293 = vmatmul.mubr.f32.gmra.mrb[14].mxu0 %v101_v63 }
  0x56   :  { %8088 = vmatprep.mubr.msk.f32.mxu0 %vm144_vm0, %v104_v0 }
  0x59   :  { %298 = vmatmul.mubr.f32.gmra.mrb[16].mxu0 %v103_v1 }
  0x5a   :  { %8089 = vmatprep.mubr.msk.f32.mxu0 %vm144_vm0, %v106_v2 }
  0x5d   :  { %303 = vmatmul.mubr.f32.gmra.mrb[18].mxu0 %v105_v3 }
  0x5e   :  { %8090 = vmatprep.mubr.msk.f32.mxu0 %vm144_vm0, %v108_v4 }
  0x61   :  { %308 = vmatmul.mubr.f32.gmra.mrb[20].mxu0 %v107_v5 }
  0x62   :  { %8091 = vmatprep.mubr.msk.f32.mxu0 %vm144_vm0, %v110_v6 }
  0x65   :  { %313 = vmatmul.mubr.f32.gmra.mrb[22].mxu0 %v109_v7 }
  0x66   :  { %8092 = vmatprep.mubr.msk.f32.mxu0 %vm144_vm0, %v112_v8 }
  0x69   :  { %318 = vmatmul.mubr.f32.gmra.mrb[24].mxu0 %v111_v9 }
  0x6a   :  { %8093 = vmatprep.mubr.msk.f32.mxu0 %vm144_vm0, %v114_v10 }
  0x6d   :  { %323 = vmatmul.mubr.f32.gmra.mrb[26].mxu0 %v113_v11 }
  0x6e   :  { %8094 = vmatprep.mubr.msk.f32.mxu0 %vm144_vm0, %v116_v12 }
  0x71   :  { %328 = vmatmul.mubr.f32.gmra.mrb[28].mxu0 %v115_v13 }
  0x72   :  { %8095 = vmatprep.mubr.msk.f32.mxu0 %vm144_vm0, %v118_v14  ;;  %v865_v14 = vld [vmem:[%s16906_s11] sm:$0xff] }
  0x75   :  { %333 = vmatmul.mubr.f32.gmra.mrb[30].mxu0 %v117_v15  ;;  %v866_v15 = vld [vmem:[%s16906_s11 + $0x8] sm:$0xff] }
  0x76   :  { %v9624_v18 = vpack.c.bf16 %v866_v15, %v865_v14 }
  0x78   :  { %9625 = vmatprep.subr.bf16.mxu1 %v9624_v18 }
 0x106   :  { %v9323_v34 = vpop.f32.mrb[0].mxu1 }
 0x107   :  { %v674_v40 = vpop.f32.mrb[1].mxu1  ;;  %v680_v45 = vadd.f32 %v9323_v34, %v8098_v39 }
 0x108   :  { %v675_v44 = vadd.f32 %v8098_v39, %v674_v40 }
 0x109   :  { %v714_v51 = vmax.f32 %v680_v45, 0.0 }
 0x10a   :  { %v713_v47 = vmax.f32 %v675_v44, 0.0  ;;  %v9326_v48 = vpop.f32.mrb[2].mxu1 }
 0x10b   :  { %v684_v52 = vpop.f32.mrb[3].mxu1  ;;  %v690_v56 = vadd.f32 %v9326_v48, %v8098_v39 }
 0x10c   :  { %v259_v22 = vpop.f32.mrb[0].mxu0  ;;  %v685_v55 = vadd.f32 %v8098_v39, %v684_v52  ;;  %9349 = vmatprep.mubr.msk.f32.mxu1 %vm583_vm1, %v713_v47 }
 0x10d   :  { %v261_v24 = vpop.f32.mrb[1].mxu0  ;;  %v11397_v25 = vadd.f32 %v11394_v21, %v259_v22  ;;  %9350 = vmatmul.mubr.msk.f32.vlgmr.msra.gmra.mrb[8].mxu1 %vm583_vm1, %v714_v51  ;;  %v716_v62 = vmax.f32 %v690_v56, 0.0 }
 0x10e   :  { %v715_v58 = vmax.f32 %v685_v55, 0.0  ;;  %v9329_v59 = vpop.f32.mrb[4].mxu1  ;;  %v867_v24 = vld [vmem:[%s16906_s11 + $0x10] sm:$0xff]  ;;  %9627 = vmatpush3.bf16.msra.mxu1 %v9624_v18  ;;  %s16909_s11 = sld [smem:[#allocation130_spill]] }
 0x10f   :  { %v339_v32 = vsel %vm338_vm2, %v11397_v25, 0.0  ;;  %v694_v63 = vpop.f32.mrb[5].mxu1  ;;  %v700_v3 = vadd.f32 %v9329_v59, %v8098_v39  ;;  %v9628_v29 = vpack.c.bf16 %v868_v26, %v867_v24 }
 0x110   :  { %v264_v28 = vpop.f32.mrb[2].mxu0  ;;  %v695_v2 = vadd.f32 %v8098_v39, %v694_v63  ;;  %9352 = vmatprep.mubr.msk.f32.mxu1 %vm583_vm1, %v715_v58 }
 0x111   :  { %v11406_v30 = vadd.f32 %v11394_v21, %v264_v28  ;;  %v266_v31 = vpop.f32.mrb[3].mxu0  ;;  %9353 = vmatmul.mubr.msk.f32.gmra.mrb[10].mxu1 %vm583_vm1, %v716_v62  ;;  %v718_v9 = vmax.f32 %v700_v3, 0.0  ;;  %9629 = vmatprep.subr.bf16.mxu1 %v9628_v29 }
 0x112   :  { %v717_v5 = vmax.f32 %v695_v2, 0.0  ;;  %v9332_v6 = vpop.f32.mrb[6].mxu1  ;;  %9631 = vmatpush3.bf16.msra.mxu1 %v9628_v29 }
 0x113   :  { %v340_v33 = vsel %vm338_vm2, %v11406_v30, 0.0  ;;  %v704_v10 = vpop.f32.mrb[7].mxu1  ;;  %v710_v16 = vadd.f32 %v9332_v6, %v8098_v39 }
 0x114   :  { %v341_v37 = vadd.f32 %v340_v33, %v339_v32  ;;  %v269_v38 = vpop.f32.mrb[4].mxu0  ;;  %v705_v13 = vadd.f32 %v8098_v39, %v704_v10  ;;  %9355 = vmatprep.mubr.msk.f32.mxu1 %vm583_vm1, %v717_v5 }
 0x115   :  { %v11422_v42 = vadd.f32 %v11394_v21, %v269_v38  ;;  %v271_v43 = vpop.f32.mrb[5].mxu0  ;;  %9356 = vmatmul.mubr.msk.f32.gmra.mrb[12].mxu1 %vm583_vm1, %v718_v9  ;;  %v720_v23 = vmax.f32 %v710_v16, 0.0 }
 0x116   :  { %v719_v19 = vmax.f32 %v705_v13, 0.0 }
 0x117   :  { %v342_v46 = vsel %vm338_vm2, %v11422_v42, 0.0 }
 0x118   :  { %v343_v49 = vadd.f32 %v342_v46, %v341_v37  ;;  %v274_v50 = vpop.f32.mrb[6].mxu0  ;;  %9358 = vmatprep.mubr.msk.f32.mxu1 %vm583_vm1, %v719_v19 }
 0x119   :  { %v11427_v53 = vadd.f32 %v11394_v21, %v274_v50  ;;  %v276_v54 = vpop.f32.mrb[7].mxu0  ;;  %9359 = vmatmul.mubr.msk.f32.gmra.mrb[14].mxu1 %vm583_vm1, %v720_v23 }
 0x11b   :  { %v344_v57 = vsel %vm338_vm2, %v11427_v53, 0.0 }
 0x11c   :  { %v345_v60 = vadd.f32 %v344_v57, %v343_v49  ;;  %v279_v61 = vpop.f32.mrb[8].mxu0 }
 0x11d   :  { %v11434_v0 = vadd.f32 %v11394_v21, %v279_v61  ;;  %v281_v1 = vpop.f32.mrb[9].mxu0 }
 0x11f   :  { %v346_v4 = vsel %vm338_vm2, %v11434_v0, 0.0 }
 0x120   :  { %v347_v7 = vadd.f32 %v346_v4, %v345_v60  ;;  %v284_v8 = vpop.f32.mrb[10].mxu0 }
 0x121   :  { %v11441_v11 = vadd.f32 %v11394_v21, %v284_v8  ;;  %v286_v12 = vpop.f32.mrb[11].mxu0 }
 0x123   :  { %v348_v17 = vsel %vm338_vm2, %v11441_v11, 0.0 }
 0x124   :  { %v349_v20 = vadd.f32 %v348_v17, %v347_v7  ;;  %v289_v22 = vpop.f32.mrb[12].mxu0 }
 0x125   :  { %v11460_v27 = vadd.f32 %v11394_v21, %v289_v22  ;;  %v291_v28 = vpop.f32.mrb[13].mxu0 }
 0x127   :  { %v350_v31 = vsel %vm338_vm2, %v11460_v27, 0.0 }
 0x128   :  { %v351_v32 = vadd.f32 %v350_v31, %v349_v20  ;;  %v294_v33 = vpop.f32.mrb[14].mxu0 }
 0x129   :  { %v295_v34 = vadd.f32 %v11394_v21, %v294_v33  ;;  %v296_v35 = vpop.f32.mrb[15].mxu0 }
 0x12b   :  { %v352_v36 = vsel %vm338_vm2, %v295_v34, 0.0 }
 0x12c   :  { %v353_v37 = vadd.f32 %v352_v36, %v351_v32  ;;  %v299_v38 = vpop.f32.mrb[16].mxu0 }
 0x12d   :  { %v300_v39 = vadd.f32 %v11394_v21, %v299_v38  ;;  %v301_v40 = vpop.f32.mrb[17].mxu0 }
 0x12f   :  { %v354_v41 = vsel %vm338_vm2, %v300_v39, 0.0 }
 0x130   :  { %v355_v43 = vadd.f32 %v354_v41, %v353_v37  ;;  %v304_v44 = vpop.f32.mrb[18].mxu0 }
 0x131   :  { %v305_v45 = vadd.f32 %v11394_v21, %v304_v44  ;;  %v306_v46 = vpop.f32.mrb[19].mxu0 }
 0x133   :  { %v356_v47 = vsel %vm338_vm2, %v305_v45, 0.0 }
 0x134   :  { %v357_v48 = vadd.f32 %v356_v47, %v355_v43  ;;  %v309_v49 = vpop.f32.mrb[20].mxu0 }
 0x135   :  { %v310_v50 = vadd.f32 %v11394_v21, %v309_v49  ;;  %v311_v51 = vpop.f32.mrb[21].mxu0 }
 0x137   :  { %v358_v52 = vsel %vm338_vm2, %v310_v50, 0.0 }
 0x138   :  { %v359_v54 = vadd.f32 %v358_v52, %v357_v48  ;;  %v314_v55 = vpop.f32.mrb[22].mxu0 }
 0x139   :  { %v315_v56 = vadd.f32 %v11394_v21, %v314_v55  ;;  %v316_v57 = vpop.f32.mrb[23].mxu0 }
 0x13b   :  { %v360_v58 = vsel %vm338_vm2, %v315_v56, 0.0 }
 0x13c   :  { %v361_v59 = vadd.f32 %v360_v58, %v359_v54  ;;  %v319_v60 = vpop.f32.mrb[24].mxu0 }
 0x13d   :  { %v320_v61 = vadd.f32 %v11394_v21, %v319_v60  ;;  %v321_v62 = vpop.f32.mrb[25].mxu0 }
 0x13f   :  { %v362_v63 = vsel %vm338_vm2, %v320_v61, 0.0 }
 0x140   :  { %v363_v1 = vadd.f32 %v362_v63, %v361_v59  ;;  %v324_v2 = vpop.f32.mrb[26].mxu0 }
 0x141   :  { %v325_v3 = vadd.f32 %v11394_v21, %v324_v2  ;;  %v326_v4 = vpop.f32.mrb[27].mxu0 }
 0x143   :  { %v364_v5 = vsel %vm338_vm2, %v325_v3, 0.0 }
 0x144   :  { %v365_v6 = vadd.f32 %v364_v5, %v363_v1  ;;  %v329_v7 = vpop.f32.mrb[28].mxu0 }
 0x145   :  { %v330_v8 = vadd.f32 %v11394_v21, %v329_v7  ;;  %v331_v9 = vpop.f32.mrb[29].mxu0 }
 0x147   :  { %v366_v10 = vsel %vm338_vm2, %v330_v8, 0.0 }
 0x148   :  { %v367_v12 = vadd.f32 %v366_v10, %v365_v6  ;;  %v334_v13 = vpop.f32.mrb[30].mxu0 }
 0x149   :  { %v335_v14 = vadd.f32 %v11394_v21, %v334_v13  ;;  %v336_v15 = vpop.f32.mrb[31].mxu0 }
 0x14b   :  { %v368_v16 = vsel %vm338_vm2, %v335_v14, 0.0 }
 0x14c   :  { %v369_v17 = vadd.f32 %v368_v16, %v367_v12 }
 0x14e   :  { %v370_v18 = vrot.slane %v369_v17, 4 }
 0x150   :  { %v371_v19 = vadd.f32 %v370_v18, %v369_v17 }
 0x152   :  { %v372_v20 = vrot.slane %v371_v19, 2 }
 0x154   :  { %v373_v22 = vadd.f32 %v372_v20, %v371_v19 }
 0x156   :  { %v374_v23 = vrot.slane %v373_v22, 1 }
 0x158   :  { %v375_v24 = vadd.f32 %v374_v23, %v373_v22 }
 0x15a   :  { %v377_v26 = vmul.f32 0.0078125, %v375_v24 }
 0x15c   :  { %v11485_v28 = vsub.f32 %v11397_v25, %v377_v26  ;;  %v11488_v29 = vsub.f32 %v11406_v30, %v377_v26  ;;  %v11491_v31 = vsub.f32 %v11422_v42, %v377_v26  ;;  %v11494_v21 = vsub.f32 %v11427_v53, %v377_v26 }
 0x15d   :  { %v11497_v32 = vsub.f32 %v11434_v0, %v377_v26  ;;  %v11500_v33 = vsub.f32 %v11441_v11, %v377_v26  ;;  %v11503_v35 = vsub.f32 %v11460_v27, %v377_v26  ;;  %v11505_v25 = vsub.f32 %v295_v34, %v377_v26 }
 0x15e   :  { %v11507_v36 = vsub.f32 %v300_v39, %v377_v26  ;;  %v11509_v30 = vsub.f32 %v305_v45, %v377_v26  ;;  %v11511_v42 = vsub.f32 %v310_v50, %v377_v26  ;;  %v11513_v37 = vsub.f32 %v315_v56, %v377_v26 }
 0x15f   :  { %v11515_v53 = vsub.f32 %v320_v61, %v377_v26  ;;  %v11517_v0 = vsub.f32 %v325_v3, %v377_v26  ;;  %v11519_v38 = vsub.f32 %v330_v8, %v377_v26  ;;  %v393_v11 = vsub.f32 %v335_v14, %v377_v26 }
 0x160   :  { %v394_v27 = vmul.f32 %v11485_v28, %v11485_v28  ;;  %v395_v34 = vmul.f32 %v11488_v29, %v11488_v29  ;;  %v396_v39 = vmul.f32 %v11491_v31, %v11491_v31  ;;  %v397_v40 = vmul.f32 %v11494_v21, %v11494_v21 }
 0x161   :  { %v398_v45 = vmul.f32 %v11497_v32, %v11497_v32  ;;  %v399_v48 = vmul.f32 %v11500_v33, %v11500_v33  ;;  %v400_v51 = vmul.f32 %v11503_v35, %v11503_v35  ;;  %v401_v55 = vmul.f32 %v11505_v25, %v11505_v25 }
 0x162   :  { %v410_v41 = vsel %vm338_vm2, %v394_v27, 0.0  ;;  %v411_v43 = vsel %vm338_vm2, %v395_v34, 0.0  ;;  %v413_v46 = vsel %vm338_vm2, %v396_v39, 0.0  ;;  %v415_v49 = vsel %vm338_vm2, %v397_v40, 0.0 }
 0x163   :  { %v412_v44 = vadd.f32 %v411_v43, %v410_v41  ;;  %v417_v52 = vsel %vm338_vm2, %v398_v45, 0.0  ;;  %v419_v56 = vsel %vm338_vm2, %v399_v48, 0.0  ;;  %v402_v58 = vmul.f32 %v11507_v36, %v11507_v36 }
 0x164   :  { %v421_v59 = vsel %vm338_vm2, %v400_v51, 0.0  ;;  %v403_v61 = vmul.f32 %v11509_v30, %v11509_v30  ;;  %v423_v62 = vsel %vm338_vm2, %v401_v55, 0.0  ;;  %v404_v1 = vmul.f32 %v11511_v42, %v11511_v42  ;;  %v11580_v51 = vld [vmem:[%s16908_s6] ss:$0 sm:$0xff] }
 0x165   :  { %v414_v47 = vadd.f32 %v413_v46, %v412_v44  ;;  %v425_v2 = vsel %vm338_vm2, %v402_v58, 0.0  ;;  %v405_v4 = vmul.f32 %v11513_v37, %v11513_v37  ;;  %v406_v7 = vmul.f32 %v11515_v53, %v11515_v53  ;;  %v11570_v46 = vld [vmem:[%s16907_s10] ss:$0 sm:$0xff] }
 0x166   :  { %v427_v5 = vsel %vm338_vm2, %v403_v61, 0.0  ;;  %v429_v8 = vsel %vm338_vm2, %v404_v1, 0.0  ;;  %v407_v10 = vmul.f32 %v11517_v0, %v11517_v0  ;;  %v408_v14 = vmul.f32 %v11519_v38, %v11519_v38 }
 0x167   :  { %v416_v50 = vadd.f32 %v415_v49, %v414_v47  ;;  %v431_v12 = vsel %vm338_vm2, %v405_v4, 0.0  ;;  %v433_v15 = vsel %vm338_vm2, %v406_v7, 0.0  ;;  %v409_v17 = vmul.f32 %v393_v11, %v393_v11 }
 0x168   :  { %v435_v18 = vsel %vm338_vm2, %v407_v10, 0.0  ;;  %v437_v20 = vsel %vm338_vm2, %v408_v14, 0.0 }
 0x169   :  { %v418_v54 = vadd.f32 %v417_v52, %v416_v50  ;;  %v439_v23 = vsel %vm338_vm2, %v409_v17, 0.0 }
 0x16b   :  { %v420_v57 = vadd.f32 %v419_v56, %v418_v54 }
 0x16d   :  { %v422_v60 = vadd.f32 %v421_v59, %v420_v57  ;;  %v529_v59 = vld [vmem:[%s16909_s11 + $0x8] sm:$0xff] }
 0x16f   :  { %v424_v63 = vadd.f32 %v423_v62, %v422_v60 }
 0x171   :  { %v426_v3 = vadd.f32 %v425_v2, %v424_v63 }
 0x173   :  { %v428_v6 = vadd.f32 %v427_v5, %v426_v3  ;;  %v530_v3 = vld [vmem:[%s16909_s11 + $0x10] sm:$0xff] }
 0x175   :  { %v430_v9 = vadd.f32 %v429_v8, %v428_v6 }
 0x177   :  { %v432_v13 = vadd.f32 %v431_v12, %v430_v9 }
 0x179   :  { %v434_v16 = vadd.f32 %v433_v15, %v432_v13  ;;  %v531_v13 = vld [vmem:[%s16909_s11 + $0x18] sm:$0xff] }
 0x17b   :  { %v436_v19 = vadd.f32 %v435_v18, %v434_v16 }
 0x17d   :  { %v438_v22 = vadd.f32 %v437_v20, %v436_v19 }
 0x17f   :  { %v440_v24 = vadd.f32 %v439_v23, %v438_v22 }
 0x181   :  { %v441_v26 = vrot.slane %v440_v24, 4 }
 0x183   :  { %v442_v27 = vadd.f32 %v441_v26, %v440_v24 }
 0x185   :  { %v443_v34 = vrot.slane %v442_v27, 2 }
 0x187   :  { %v444_v39 = vadd.f32 %v443_v34, %v442_v27  ;;  %v534_v27 = vld [vmem:[%s16909_s11 + $0x30] sm:$0xff] }
 0x189   :  { %v445_v40 = vrot.slane %v444_v39, 1 }
 0x18b   :  { %v446_v41 = vadd.f32 %v445_v40, %v444_v39 }
 0x18d   :  { %v447_v43 = vmul.f32 0.0078125, %v446_v41 }
 0x18f   :  { %v448_v44 = vadd.f32 1e-05, %v447_v43 }
 0x191   :  { %10534 = vrsqrt.f32 %v448_v44  ;;  %v535_v44 = vld [vmem:[%s16909_s11 + $0x38] sm:$0xff] }
 0x19b   :  { %v10535_v45 = vpop.eup %10534 }
 0x19c   :  { %v11572_v47 = vmul.f32 %v10535_v45, %v393_v11  ;;  %v450_v48 = vmul.f32 %v10535_v45, %v11485_v28  ;;  %v451_v49 = vmul.f32 %v10535_v45, %v11488_v29  ;;  %v452_v50 = vmul.f32 %v10535_v45, %v11491_v31 }
 0x19d   :  { %v453_v52 = vmul.f32 %v10535_v45, %v11494_v21  ;;  %v454_v54 = vmul.f32 %v10535_v45, %v11497_v32  ;;  %v455_v55 = vmul.f32 %v10535_v45, %v11500_v33  ;;  %v456_v11 = vmul.f32 %v10535_v45, %v11503_v35  ;;  %v528_v35 = vld [vmem:[%s16909_s11] sm:$0xff] }
 0x19e   :  { %v473_v56 = vmul.f32 %v11570_v46, %v450_v48  ;;  %v474_v28 = vmul.f32 %v11570_v46, %v451_v49  ;;  %v475_v29 = vmul.f32 %v11570_v46, %v452_v50  ;;  %v457_v7 = vmul.f32 %v10535_v45, %v11505_v25  ;;  %v532_v25 = vld [vmem:[%s16909_s11 + $0x20] sm:$0xff] }
 0x19f   :  { %v476_v31 = vmul.f32 %v11570_v46, %v453_v52  ;;  %v477_v57 = vmul.f32 %v11570_v46, %v454_v54  ;;  %v478_v33 = vmul.f32 %v11570_v46, %v455_v55  ;;  %v479_v62 = vmul.f32 %v11570_v46, %v456_v11  ;;  %v536_v50 = vld [vmem:[%s16909_s11 + $0x40] sm:$0xff] }
 0x1a0   :  { %v496_v58 = vadd.f32 %v11580_v51, %v473_v56  ;;  %v497_v21 = vadd.f32 %v11580_v51, %v474_v28  ;;  %v498_v32 = vadd.f32 %v11580_v51, %v475_v29  ;;  %v480_v14 = vmul.f32 %v11570_v46, %v457_v7  ;;  %v537_v28 = vld [vmem:[%s16909_s11 + $0x48] sm:$0xff] }
 0x1a1   :  { %v499_v60 = vadd.f32 %v11580_v51, %v476_v31  ;;  %v500_v61 = vadd.f32 %v11580_v51, %v477_v57  ;;  %v501_v6 = vadd.f32 %v11580_v51, %v478_v33  ;;  %v502_v12 = vadd.f32 %v11580_v51, %v479_v62 }
 0x1a2   :  { %v512_v63 = vmax.f32 %v496_v58, 0.0  ;;  %v513_v1 = vmax.f32 %v497_v21, 0.0  ;;  %v514_v2 = vmax.f32 %v498_v32, 0.0  ;;  %v458_v15 = vmul.f32 %v10535_v45, %v11507_v36  ;;  %v538_v58 = vld [vmem:[%s16909_s11 + $0x50] sm:$0xff] }
 0x1a3   :  { %v515_v9 = vmax.f32 %v499_v60, 0.0  ;;  %v516_v10 = vmax.f32 %v500_v61, 0.0  ;;  %v459_v16 = vmul.f32 %v10535_v45, %v11509_v30  ;;  %v460_v17 = vmul.f32 %v10535_v45, %v11511_v42  ;;  %v539_v60 = vld [vmem:[%s16909_s11 + $0x58] sm:$0xff] }
 0x1a4   :  { %v544_v4 = vadd.f32 %v528_v35, %v512_v63  ;;  %v545_v5 = vadd.f32 %v529_v59, %v513_v1  ;;  %v546_v8 = vadd.f32 %v530_v3, %v514_v2  ;;  %v461_v18 = vmul.f32 %v10535_v45, %v11513_v37  ;;  %v533_v37 = vld [vmem:[%s16909_s11 + $0x28] sm:$0xff]  ;;  %v540_v63 = vld [vmem:[%s16909_s11 + $0x60] sm:$0xff] }
 0x1a5   :  { %v462_v19 = vmul.f32 %v10535_v45, %v11515_v53  ;;  %v463_v20 = vmul.f32 %v10535_v45, %v11517_v0  ;;  %v464_v22 = vmul.f32 %v10535_v45, %v11519_v38  ;;  %v481_v36 = vmul.f32 %v11570_v46, %v458_v15  ;;  %v541_v3 = vld [vmem:[%s16909_s11 + $0x68] sm:$0xff] }
 0x1a6   :  { %9369 = vmatprep.mubr.msk.f32.mxu1 %vm338_vm2, %v544_v4  ;;  %v547_v30 = vadd.f32 %v531_v13, %v515_v9  ;;  %v517_v42 = vmax.f32 %v501_v6, 0.0  ;;  %v503_v23 = vadd.f32 %v11580_v51, %v480_v14  ;;  %v482_v24 = vmul.f32 %v11570_v46, %v459_v16 }
 0x1a7   :  { %9370 = vmatmul.mubr.msk.f32.vlgmr.msra.gmra.mrb[16].mxu1 %vm338_vm2, %v545_v5  ;;  %v548_v26 = vadd.f32 %v532_v25, %v516_v10  ;;  %v518_v53 = vmax.f32 %v502_v12, 0.0  ;;  %v504_v0 = vadd.f32 %v11580_v51, %v481_v36  ;;  %v483_v38 = vmul.f32 %v11570_v46, %v460_v17  ;;  %v542_v5 = vld [vmem:[%s16909_s11 + $0x70] sm:$0xff]  ;;  %v8107_v10 = vld [vmem:[%s16910_s4] ss:$0 sm:$0xff]  ;;  %s11006_s4 = smov 32  }
 0x1a8   :  { %9372 = vmatprep.mubr.msk.f32.mxu1 %vm338_vm2, %v546_v8  ;;  %v549_v34 = vadd.f32 %v533_v37, %v517_v42  ;;  %v519_v39 = vmax.f32 %v503_v23, 0.0  ;;  %v505_v40 = vadd.f32 %v11580_v51, %v482_v24  ;;  %v484_v41 = vmul.f32 %v11570_v46, %v461_v18  ;;  %v11722_v37 = vld [vmem:[%s16614_s23 + $0x80] sm:$0xff] }
 0x1a9   :  { %v550_v43 = vadd.f32 %v534_v27, %v518_v53  ;;  %v520_v45 = vmax.f32 %v504_v0, 0.0  ;;  %v506_v48 = vadd.f32 %v11580_v51, %v483_v38  ;;  %v485_v49 = vmul.f32 %v11570_v46, %v462_v19  ;;  %v11727_v53 = vld [vmem:[%s16614_s23 + $0x88] sm:$0xff] }
 0x1aa   :  { %v551_v52 = vadd.f32 %v535_v44, %v519_v39  ;;  %v521_v54 = vmax.f32 %v505_v40, 0.0  ;;  %v507_v55 = vadd.f32 %v11580_v51, %v484_v41  ;;  %v486_v11 = vmul.f32 %v11570_v46, %v463_v20  ;;  %v11732_v38 = vld [vmem:[%s16614_s23 + $0x188] sm:$0xff]  ;;  %v11750_v41 = vld [vmem:[%s16614_s23 + $0x180] sm:$0xff] }
 0x1ab   :  { %9373 = vmatmul.mubr.msk.f32.gmra.mrb[18].mxu1 %vm338_vm2, %v547_v30  ;;  %v552_v56 = vadd.f32 %v536_v50, %v520_v45  ;;  %v522_v29 = vmax.f32 %v506_v48, 0.0  ;;  %v508_v31 = vadd.f32 %v11580_v51, %v485_v49  ;;  %v487_v57 = vmul.f32 %v11570_v46, %v464_v22  ;;  %v11737_v27 = vld [vmem:[%s16614_s23 + $0x8] sm:$0xff]  ;;  %v11760_v44 = vld [vmem:[%s16614_s23 + $0x100] sm:$0xff] }
 0x1ac   :  { %9375 = vmatprep.mubr.msk.f32.mxu1 %vm338_vm2, %v548_v26  ;;  %v488_v21 = vmul.f32 %v11570_v46, %v11572_v47  ;;  %v553_v32 = vadd.f32 %v537_v28, %v521_v54  ;;  %v523_v33 = vmax.f32 %v507_v55, 0.0  ;;  %v509_v35 = vadd.f32 %v11580_v51, %v486_v11  ;;  %v11717_v26 = vld [vmem:[%s16603_s12] ss:$0 sm:$0xff] }
 0x1ad   :  { %v554_v59 = vadd.f32 %v538_v58, %v522_v29  ;;  %v524_v61 = vmax.f32 %v508_v31, 0.0  ;;  %v510_v62 = vadd.f32 %v11580_v51, %v487_v57  ;;  %v11784_v29 = vld [vmem:[%s16614_s23 + $0x98] sm:$0xff] }
 0x1ae   :  { %v511_v46 = vadd.f32 %v11580_v51, %v488_v21  ;;  %v555_v47 = vadd.f32 %v539_v60, %v523_v33  ;;  %v525_v1 = vmax.f32 %v509_v35, 0.0  ;;  %v543_v51 = vld [vmem:[%s16909_s11 + $0x78] sm:$0xff]  ;;  %v16922_v21 = vmov 0  ;;  %v11808_v33 = vld [vmem:[%s16614_s23 + $0x190] sm:$0xff] }
 0x1af   :  { %9376 = vmatmul.mubr.msk.f32.gmra.mrb[20].mxu1 %vm338_vm2, %v549_v34  ;;  %v556_v2 = vadd.f32 %v540_v63, %v524_v61  ;;  %v526_v4 = vmax.f32 %v510_v62, 0.0  ;;  %v11742_v34 = vld [vmem:[%s16614_s23 + $0x108] sm:$0xff]  ;;  %v11789_v31 = vld [vmem:[%s16614_s23 + $0x198] sm:$0xff]  ;;  %v16923_v21 = vsel %vm11796_vm3, 4294967295, %v16922_v21 }
 0x1b0   :  { %9378 = vmatprep.mubr.msk.f32.mxu1 %vm338_vm2, %v550_v43  ;;  %v527_v6 = vmax.f32 %v511_v46, 0.0  ;;  %v557_v7 = vadd.f32 %v541_v3, %v525_v1  ;;  %v11755_v43 = vld [vmem:[%s16614_s23] sm:$0xff]  ;;  %16924 = vst [vmem:[#allocation16_spill] sm:$0xff] %v16923_v21  ;;  %v11825_v1 = vld [vmem:[%s16614_s23 + $0x118] sm:$0xff] }
 0x1b1   :  { %v558_v8 = vadd.f32 %v542_v5, %v526_v4  ;;  %v11838_v5 = vld [vmem:[%s16614_s23 + $0x10] sm:$0xff] }
 0x1b2   :  { %v559_v9 = vadd.f32 %v543_v51, %v527_v6  ;;  %v11843_v6 = vld [vmem:[%s16614_s23 + $0x110] sm:$0xff] }
 0x1b3   :  { %9379 = vmatmul.mubr.msk.f32.gmra.mrb[22].mxu1 %vm338_vm2, %v551_v52 }
 0x1b4   :  { %9381 = vmatprep.mubr.msk.f32.mxu1 %vm338_vm2, %v552_v56 }
 0x1b7   :  { %9382 = vmatmul.mubr.msk.f32.gmra.mrb[24].mxu1 %vm338_vm2, %v553_v32  ;;  %v11803_v32 = vld [vmem:[%s16614_s23 + $0x90] sm:$0xff] }
 0x1b8   :  { %9384 = vmatprep.mubr.msk.f32.mxu1 %vm338_vm2, %v554_v59 }
 0x1bb   :  { %9385 = vmatmul.mubr.msk.f32.gmra.mrb[26].mxu1 %vm338_vm2, %v555_v47  ;;  %v11820_v47 = vld [vmem:[%s16614_s23 + $0x18] sm:$0xff] }
 0x1bc   :  { %9387 = vmatprep.mubr.msk.f32.mxu1 %vm338_vm2, %v556_v2 }
 0x1bf   :  { %9388 = vmatmul.mubr.msk.f32.gmra.mrb[28].mxu1 %vm338_vm2, %v557_v7  ;;  %v11848_v7 = vld [vmem:[%s16614_s23 + $0xa8] sm:$0xff] }
 0x1c0   :  { %9390 = vmatprep.mubr.msk.f32.mxu1 %vm338_vm2, %v558_v8 }
 0x1c3   :  { %9391 = vmatmul.mubr.msk.f32.gmra.mrb[30].mxu1 %vm338_vm2, %v559_v9  ;;  %v11860_v9 = vld [vmem:[%s16614_s23 + $0xa0] sm:$0xff] }
 0x1e0   :  { %v9351_v12 = vpop.f32.mrb[8].mxu1 }
 0x1e1   :  { %v11694_v13 = vadd.f32 %v9351_v12, %v8107_v10  ;;  %v826_v14 = vpop.f32.mrb[9].mxu1  ;;  %v11870_v12 = vld [vmem:[%s16614_s23 + $0x1a8] sm:$0xff] }
 0x1e2   :  { %v11696_v15 = vadd.f32 %v8107_v10, %v826_v14 }
 0x1e3   :  { %16911 = vst [vmem:[#allocation5_spill] sm:$0xff] %v11694_v13 }
 0x1e4   :  { %16912 = vst [vmem:[#allocation6_spill] sm:$0xff] %v11696_v15  ;;  %v9354_v16 = vpop.f32.mrb[10].mxu1  ;;  %8511 = vmatprep.mubr.msk.f32.mxu0 %vm583_vm1, %v11696_v15  ;;  %8559 = vmatprep.mubr.msk.f32.mxu1 %vm583_vm1, %v11696_v15 }
 0x1e5   :  { %v11702_v17 = vadd.f32 %v9354_v16, %v8107_v10  ;;  %v836_v25 = vpop.f32.mrb[11].mxu1 }
 0x1e6   :  { %v11704_v18 = vadd.f32 %v8107_v10, %v836_v25 }
 0x1e7   :  { %16913 = vst [vmem:[#allocation7_spill] sm:$0xff] %v11702_v17 }
 0x1e8   :  { %16914 = vst [vmem:[#allocation8_spill] sm:$0xff] %v11704_v18  ;;  %v9357_v19 = vpop.f32.mrb[12].mxu1 }
 0x1e9   :  { %v11706_v20 = vadd.f32 %v9357_v19, %v8107_v10  ;;  %v846_v22 = vpop.f32.mrb[13].mxu1 }
 0x1ea   :  { %v11708_v36 = vadd.f32 %v8107_v10, %v846_v22 }
 0x1eb   :  { %16915 = vst [vmem:[#allocation9_spill] sm:$0xff] %v11706_v20 }
 0x1ec   :  { %16916 = vst [vmem:[#allocation10_spill] sm:$0xff] %v11708_v36  ;;  %v9360_v30 = vpop.f32.mrb[14].mxu1 }
 0x1ed   :  { %v11710_v42 = vadd.f32 %v9360_v30, %v8107_v10  ;;  %v856_v23 = vpop.f32.mrb[15].mxu1 }
 0x1ee   :  { %v11712_v24 = vadd.f32 %v8107_v10, %v856_v23  ;;  %v11865_v10 = vld [vmem:[%s16614_s23 + $0x1a0] sm:$0xff] }
 0x1ef   :  { %16917 = vst [vmem:[#allocation11_spill] sm:$0xff] %v11710_v42 }
 0x1f0   :  { %16918 = vst [vmem:[#allocation12_spill] sm:$0xff] %v11712_v24 }
 0x27a   :  { %v9371_v0 = vpop.f32.mrb[16].mxu1 }
 0x27b   :  { %v11745_v39 = vadd.f32 %v9371_v0, %v11717_v26  ;;  %v990_v40 = vpop.f32.mrb[17].mxu1 }
 0x27c   :  { %v11763_v45 = vadd.f32 %v11717_v26, %v990_v40 }
 0x27d   :  { %16919 = vst [vmem:[#allocation13_spill] sm:$0xff] %v11745_v39  ;;  %v1218_v48 = vmul.f32 %v11727_v53, %v11745_v39  ;;  %v1250_v49 = vmul.f32 %v11732_v38, %v11745_v39  ;;  %v1202_v50 = vmul.f32 %v11737_v27, %v11745_v39  ;;  %v1234_v52 = vmul.f32 %v11742_v34, %v11745_v39 }
 0x27e   :  { %16920 = vst [vmem:[#allocation14_spill] sm:$0xff] %v11763_v45  ;;  %v9374_v54 = vpop.f32.mrb[18].mxu1  ;;  %v1217_v55 = vmul.f32 %v11722_v37, %v11763_v45  ;;  %v1249_v11 = vmul.f32 %v11750_v41, %v11763_v45  ;;  %v1201_v56 = vmul.f32 %v11755_v43, %v11763_v45  ;;  %v1233_v28 = vmul.f32 %v11760_v44, %v11763_v45 }
 0x27f   :  { %v11792_v57 = vadd.f32 %v9374_v54, %v11717_v26  ;;  %v1000_v58 = vpop.f32.mrb[19].mxu1 }
 0x280   :  { %v11811_v35 = vadd.f32 %v11717_v26, %v1000_v58  ;;  %v9632_v59 = vpack.c.bf16 %v1218_v48, %v1217_v55  ;;  %v9680_v60 = vpack.c.bf16 %v1250_v49, %v1249_v11  ;;  %v9635_v61 = vpack.c.bf16 %v1202_v50, %v1201_v56  ;;  %v11898_v11 = vld [vmem:[%s16614_s23 + $0x28] sm:$0xff] }
 0x281   :  { %16921 = vst [vmem:[#allocation15_spill] sm:$0xff] %v11792_v57  ;;  %v9683_v62 = vpack.c.bf16 %v1234_v52, %v1233_v28  ;;  %v1220_v63 = vmul.f32 %v11784_v29, %v11792_v57  ;;  %v1252_v46 = vmul.f32 %v11789_v31, %v11792_v57  ;;  %v1204_v19 = vmul.f32 %v11820_v47, %v11792_v57  ;;  %v11903_v56 = vld [vmem:[%s16614_s23 + $0x128] sm:$0xff] }
 0x282   :  { %16925 = vst [vmem:[#allocation17_spill] sm:$0xff] %v11811_v35  ;;  %v9377_v2 = vpop.f32.mrb[20].mxu1  ;;  %9634 = vmatprep.subr.msk.bf16.mxu0 %vm11796_vm3, %v9632_v59  ;;  %9682 = vmatprep.subr.msk.bf16.mxu1 %vm11796_vm3, %v9680_v60  ;;  %v1219_v3 = vmul.f32 %v11803_v32, %v11811_v35  ;;  %v1251_v4 = vmul.f32 %v11808_v33, %v11811_v35 }
 0x283   :  { %v11851_v8 = vadd.f32 %v9377_v2, %v11717_v26  ;;  %v1010_v51 = vpop.f32.mrb[21].mxu1  ;;  %9637 = vmatpush3.bf16.xpose.msk.msra.mxu0 %vm11796_vm3, %v9635_v61  ;;  %9685 = vmatpush3.bf16.xpose.msk.msra.mxu1 %vm11796_vm3, %v9683_v62  ;;  %v1203_v22 = vmul.f32 %v11838_v5, %v11811_v35  ;;  %v1235_v30 = vmul.f32 %v11843_v6, %v11811_v35  ;;  %v11914_v62 = vld [vmem:[%s16614_s23 + $0x20] sm:$0xff] }
 0x284   :  { %v11873_v14 = vadd.f32 %v11717_v26, %v1010_v51  ;;  %v9638_v16 = vpack.c.bf16 %v1220_v63, %v1219_v3  ;;  %v9686_v25 = vpack.c.bf16 %v1252_v46, %v1251_v4  ;;  %v1236_v23 = vmul.f32 %v11825_v1, %v11792_v57  ;;  %v11919_v63 = vld [vmem:[%s16614_s23 + $0x120] sm:$0xff]  ;;  %v11924_v46 = vld [vmem:[%s16614_s23 + $0xb8] sm:$0xff]  ;;  %v11936_v4 = vld [vmem:[%s16614_s23 + $0xb0] sm:$0xff] }
 0x285   :  { %16926 = vst [vmem:[#allocation18_spill] sm:$0xff] %v11851_v8  ;;  %v1222_v0 = vmul.f32 %v11848_v7, %v11851_v8  ;;  %v1254_v50 = vmul.f32 %v11870_v12, %v11851_v8  ;;  %v9641_v54 = vpack.c.bf16 %v1204_v19, %v1203_v22  ;;  %v11941_v51 = vld [vmem:[%s16614_s23 + $0x1b0] sm:$0xff]  ;;  %v1206_v22 = vmul.f32 %v11898_v11, %v11851_v8 }
 0x286   :  { %16927 = vst [vmem:[#allocation19_spill] sm:$0xff] %v11873_v14  ;;  %v9380_v40 = vpop.f32.mrb[22].mxu1  ;;  %9640 = vmatprep.subr.msk.bf16.mxu0 %vm11796_vm3, %v9638_v16  ;;  %9688 = vmatprep.subr.msk.bf16.mxu1 %vm11796_vm3, %v9686_v25  ;;  %v1221_v48 = vmul.f32 %v11860_v9, %v11873_v14  ;;  %v1253_v49 = vmul.f32 %v11865_v10, %v11873_v14  ;;  %v11946_v16 = vld [vmem:[%s16614_s23 + $0x1b8] sm:$0xff] }
 0x287   :  { %v1020_v52 = vpop.f32.mrb[23].mxu1  ;;  %v9689_v55 = vpack.c.bf16 %v1236_v23, %v1235_v30  ;;  %v11906_v28 = vadd.f32 %v9380_v40, %v11717_v26  ;;  %16931 = vst [vmem:[#allocation23_spill] sm:$0xff] %v11946_v16  ;;  %v1205_v19 = vmul.f32 %v11914_v62, %v11873_v14  ;;  %v1237_v30 = vmul.f32 %v11919_v63, %v11873_v14 }
 0x288   :  { %v11909_v58 = vadd.f32 %v11717_v26, %v1020_v52  ;;  %v9644_v60 = vpack.c.bf16 %v1222_v0, %v1221_v48  ;;  %v9692_v61 = vpack.c.bf16 %v1254_v50, %v1253_v49  ;;  %v1238_v23 = vmul.f32 %v11903_v56, %v11851_v8 }
 0x289   :  { %16928 = vst [vmem:[#allocation20_spill] sm:$0xff] %v11906_v28  ;;  %v1224_v48 = vmul.f32 %v11924_v46, %v11906_v28  ;;  %v1256_v50 = vmul.f32 %v11946_v16, %v11906_v28 }
 0x28a   :  { %16929 = vst [vmem:[#allocation21_spill] sm:$0xff] %v11909_v58  ;;  %v9383_v59 = vpop.f32.mrb[24].mxu1  ;;  %v1223_v40 = vmul.f32 %v11936_v4, %v11909_v58  ;;  %v1255_v49 = vmul.f32 %v11941_v51, %v11909_v58 }
 0x28b   :  { %v11927_v2 = vadd.f32 %v9383_v59, %v11717_v26  ;;  %v1030_v3 = vpop.f32.mrb[25].mxu1  ;;  %9643 = vmatpush3.bf16.xpose.msk.msra.mxu0 %vm11796_vm3, %v9641_v54  ;;  %9691 = vmatpush3.bf16.xpose.msk.msra.mxu1 %vm11796_vm3, %v9689_v55  ;;  %v9647_v59 = vpack.c.bf16 %v1206_v22, %v1205_v19  ;;  %v11995_v19 = vld [vmem:[%s16614_s23 + $0x130] sm:$0xff]  ;;  %v12000_v22 = vld [vmem:[%s16614_s23 + $0x138] sm:$0xff] }
 0x28c   :  { %v11949_v25 = vadd.f32 %v11717_v26, %v1030_v3  ;;  %9646 = vmatprep.subr.msk.bf16.mxu0 %vm11796_vm3, %v9644_v60  ;;  %9694 = vmatprep.subr.msk.bf16.mxu1 %vm11796_vm3, %v9692_v61  ;;  %v9695_v60 = vpack.c.bf16 %v1238_v23, %v1237_v30  ;;  %v11980_v61 = vld [vmem:[%s16614_s23 + $0x38] sm:$0xff]  ;;  %v11985_v3 = vld [vmem:[%s16614_s23 + $0xc0] sm:$0xff]  ;;  %16937 = vst [vmem:[#allocation29_spill] sm:$0xff] %v11995_v19  ;;  %16938 = vst [vmem:[#allocation30_spill] sm:$0xff] %v12000_v22 }
 0x28d   :  { %16930 = vst [vmem:[#allocation22_spill] sm:$0xff] %v11927_v2  ;;  %16935 = vst [vmem:[#allocation27_spill] sm:$0xff] %v11980_v61 }
 0x28e   :  { %16932 = vst [vmem:[#allocation24_spill] sm:$0xff] %v11949_v25  ;;  %v9386_v0 = vpop.f32.mrb[26].mxu1  ;;  %16936 = vst [vmem:[#allocation28_spill] sm:$0xff] %v11985_v3  ;;  %v9650_v25 = vpack.c.bf16 %v1224_v48, %v1223_v40  ;;  %v12012_v40 = vld [vmem:[%s16614_s23 + $0xc8] sm:$0xff]  ;;  %v12017_v48 = vld [vmem:[%s16614_s23 + $0x1c0] sm:$0xff] }
 0x28f   :  { %v11972_v52 = vadd.f32 %v9386_v0, %v11717_v26  ;;  %v1040_v54 = vpop.f32.mrb[27].mxu1  ;;  %v9698_v0 = vpack.c.bf16 %v1256_v50, %v1255_v49  ;;  %16940 = vst [vmem:[#allocation32_spill] sm:$0xff] %v12012_v40  ;;  %16941 = vst [vmem:[#allocation33_spill] sm:$0xff] %v12017_v48 }
 0x290   :  { %v11975_v55 = vadd.f32 %v11717_v26, %v1040_v54  ;;  %v11990_v54 = vld [vmem:[%s16614_s23 + $0x30] sm:$0xff] }
 0x291   :  { %16933 = vst [vmem:[#allocation25_spill] sm:$0xff] %v11972_v52  ;;  %v1207_v50 = vmul.f32 %v11990_v54, %v11909_v58 }
 0x292   :  { %16934 = vst [vmem:[#allocation26_spill] sm:$0xff] %v11975_v55  ;;  %v9389_v2 = vpop.f32.mrb[28].mxu1 }
 0x293   :  { %v12003_v30 = vadd.f32 %v9389_v2, %v11717_v26  ;;  %v1050_v23 = vpop.f32.mrb[29].mxu1  ;;  %9649 = vmatpush3.bf16.xpose.msk.msra.mxu0 %vm11796_vm3, %v9647_v59  ;;  %9697 = vmatpush3.bf16.xpose.msk.msra.mxu1 %vm11796_vm3, %v9695_v60  ;;  %v12022_v2 = vld [vmem:[%s16614_s23 + $0x1c8] sm:$0xff]  ;;  %v1208_v59 = vmul.f32 %v11980_v61, %v11906_v28  ;;  %v1239_v60 = vmul.f32 %v11995_v19, %v11909_v58 }
 0x294   :  { %16942 = vst [vmem:[#allocation34_spill] sm:$0xff] %v12022_v2  ;;  %v12025_v49 = vadd.f32 %v11717_v26, %v1050_v23  ;;  %9652 = vmatprep.subr.msk.bf16.mxu0 %vm11796_vm3, %v9650_v25  ;;  %9700 = vmatprep.subr.msk.bf16.mxu1 %vm11796_vm3, %v9698_v0  ;;  %v1226_v25 = vmul.f32 %v12012_v40, %v11745_v39 }
 0x295   :  { %16939 = vst [vmem:[#allocation31_spill] sm:$0xff] %v12003_v30  ;;  %v1240_v30 = vmul.f32 %v12000_v22, %v11906_v28  ;;  %v1257_v0 = vmul.f32 %v12017_v48, %v11763_v45  ;;  %v1258_v52 = vmul.f32 %v12022_v2, %v11745_v39  ;;  %v9653_v22 = vpack.c.bf16 %v1208_v59, %v1207_v50  ;;  %v12061_v48 = vld [vmem:[%s16614_s23 + $0x48] sm:$0xff] }
 0x296   :  { %16943 = vst [vmem:[#allocation35_spill] sm:$0xff] %v12025_v49  ;;  %v9392_v23 = vpop.f32.mrb[30].mxu1  ;;  %v1225_v49 = vmul.f32 %v11985_v3, %v11763_v45  ;;  %v12056_v3 = vld [vmem:[%s16614_s23 + $0x40] sm:$0xff] }
 0x297   :  { %v12048_v55 = vadd.f32 %v9392_v23, %v11717_v26  ;;  %v1060_v19 = vpop.f32.mrb[31].mxu1  ;;  %v9701_v61 = vpack.c.bf16 %v1240_v30, %v1239_v60  ;;  %v9704_v40 = vpack.c.bf16 %v1258_v52, %v1257_v0  ;;  %v12066_v23 = vld [vmem:[%s16614_s23 + $0x140] sm:$0xff]  ;;  %v12085_v52 = vld [vmem:[%s16614_s23 + $0xd0] sm:$0xff] }
 0x298   :  { %v12051_v16 = vadd.f32 %v11717_v26, %v1060_v19  ;;  %v9656_v2 = vpack.c.bf16 %v1226_v25, %v1225_v49  ;;  %v12071_v26 = vld [vmem:[%s16614_s23 + $0x148] sm:$0xff]  ;;  %v12076_v19 = vld [vmem:[%s16614_s23 + $0xd8] sm:$0xff]  ;;  %v12090_v30 = vld [vmem:[%s16614_s23 + $0x1d0] sm:$0xff]  ;;  %v1241_v50 = vmul.f32 %v12066_v23, %v11763_v45  ;;  %v1227_v60 = vmul.f32 %v12085_v52, %v11811_v35 }
 0x299   :  { %16944 = vst [vmem:[#allocation36_spill] sm:$0xff] %v12048_v55  ;;  %16946 = vst [vmem:[#allocation38_spill] sm:$0xff] %v12071_v26  ;;  %v12095_v49 = vld [vmem:[%s16614_s23 + $0x1d8] sm:$0xff]  ;;  %v1242_v59 = vmul.f32 %v12071_v26, %v11745_v39 }
 0x29a   :  { %16945 = vst [vmem:[#allocation37_spill] sm:$0xff] %v12051_v16  ;;  %16947 = vst [vmem:[#allocation39_spill] sm:$0xff] %v12090_v30  ;;  %v1260_v25 = vmul.f32 %v12095_v49, %v11792_v57  ;;  %v12120_v16 = vld [vmem:[%s16614_s23 + $0x50] sm:$0xff] }
 0x29b   :  { %9655 = vmatpush3.bf16.xpose.msk.msra.mxu0 %vm11796_vm3, %v9653_v22  ;;  %9703 = vmatpush3.bf16.xpose.msk.msra.mxu1 %vm11796_vm3, %v9701_v61  ;;  %16948 = vst [vmem:[#allocation40_spill] sm:$0xff] %v12095_v49  ;;  %v1209_v61 = vmul.f32 %v12056_v3, %v11763_v45  ;;  %v1210_v22 = vmul.f32 %v12061_v48, %v11745_v39  ;;  %16949 = vst [vmem:[#allocation41_spill] sm:$0xff] %v12120_v16  ;;  %v12125_v39 = vld [vmem:[%s16614_s23 + $0x58] sm:$0xff] }
 0x29c   :  { %9658 = vmatprep.subr.msk.bf16.mxu0 %vm11796_vm3, %v9656_v2  ;;  %9706 = vmatprep.subr.msk.bf16.mxu1 %vm11796_vm3, %v9704_v40  ;;  %v1228_v2 = vmul.f32 %v12076_v19, %v11792_v57  ;;  %v1259_v40 = vmul.f32 %v12090_v30, %v11811_v35  ;;  %v9707_v55 = vpack.c.bf16 %v1242_v59, %v1241_v50  ;;  %v12130_v30 = vld [vmem:[%s16614_s23 + $0x150] sm:$0xff]  ;;  %v12149_v50 = vld [vmem:[%s16614_s23 + $0xe8] sm:$0xff]  ;;  %v12154_v59 = vld [vmem:[%s16614_s23 + $0x1e0] sm:$0xff] }
 0x29d   :  { %v9659_v0 = vpack.c.bf16 %v1210_v22, %v1209_v61  ;;  %16950 = vst [vmem:[#allocation42_spill] sm:$0xff] %v12125_v39  ;;  %v12135_v61 = vld [vmem:[%s16614_s23 + $0x158] sm:$0xff]  ;;  %v12140_v22 = vld [vmem:[%s16614_s23 + $0xe0] sm:$0xff]  ;;  %16952 = vst [vmem:[#allocation44_spill] sm:$0xff] %v12149_v50 }
 0x29e   :  { %v9662_v45 = vpack.c.bf16 %v1228_v2, %v1227_v60  ;;  %v9710_v26 = vpack.c.bf16 %v1260_v25, %v1259_v40  ;;  %16951 = vst [vmem:[#allocation43_spill] sm:$0xff] %v12135_v61  ;;  %16953 = vst [vmem:[#allocation45_spill] sm:$0xff] %v12154_v59  ;;  %v12159_v60 = vld [vmem:[%s16614_s23 + $0x1e8] sm:$0xff]  ;;  %v1212_v2 = vmul.f32 %v12125_v39, %v11792_v57 }
 0x29f   :  { %16954 = vst [vmem:[#allocation46_spill] sm:$0xff] %v12159_v60  ;;  %v1243_v40 = vmul.f32 %v12130_v30, %v11811_v35  ;;  %v1244_v25 = vmul.f32 %v12135_v61, %v11792_v57  ;;  %v1262_v49 = vmul.f32 %v12159_v60, %v11851_v8  ;;  %v12189_v57 = vld [vmem:[%s16614_s23 + $0x68] sm:$0xff] }
 0x2a0   :  { %16956 = vst [vmem:[#allocation48_spill] sm:$0xff] %v12189_v57 }
 0x2a1   :  { %v9713_v39 = vpack.c.bf16 %v1244_v25, %v1243_v40  ;;  %v12218_v40 = vld [vmem:[%s16614_s23 + $0x1f0] sm:$0xff]  ;;  %v12223_v25 = vld [vmem:[%s16614_s23 + $0x1f8] sm:$0xff] }
 0x2a2   :  { %16961 = vst [vmem:[#allocation53_spill] sm:$0xff] %v12218_v40  ;;  %16962 = vst [vmem:[#allocation54_spill] sm:$0xff] %v12223_v25  ;;  %v1264_v60 = vmul.f32 %v12223_v25, %v11906_v28 }
 0x2a3   :  { %9661 = vmatpush3.bf16.xpose.msk.msra.mxu0 %vm11796_vm3, %v9659_v0  ;;  %9709 = vmatpush3.bf16.xpose.msk.msra.mxu1 %vm11796_vm3, %v9707_v55  ;;  %v1211_v55 = vmul.f32 %v12120_v16, %v11811_v35  ;;  %v1229_v0 = vmul.f32 %v12140_v22, %v11873_v14  ;;  %v12184_v35 = vld [vmem:[%s16614_s23 + $0x60] sm:$0xff] }
 0x2a4   :  { %9664 = vmatprep.subr.msk.bf16.mxu0 %vm11796_vm3, %v9662_v45  ;;  %9712 = vmatprep.subr.msk.bf16.mxu1 %vm11796_vm3, %v9710_v26  ;;  %v1230_v45 = vmul.f32 %v12149_v50, %v11851_v8  ;;  %v1261_v26 = vmul.f32 %v12154_v59, %v11873_v14  ;;  %16955 = vst [vmem:[#allocation47_spill] sm:$0xff] %v12184_v35  ;;  %v12194_v59 = vld [vmem:[%s16614_s23 + $0x160] sm:$0xff] }
 0x2a5   :  { %v9665_v16 = vpack.c.bf16 %v1212_v2, %v1211_v55  ;;  %16957 = vst [vmem:[#allocation49_spill] sm:$0xff] %v12194_v59  ;;  %v12199_v55 = vld [vmem:[%s16614_s23 + $0x168] sm:$0xff]  ;;  %v12204_v2 = vld [vmem:[%s16614_s23 + $0xf8] sm:$0xff] }
 0x2a6   :  { %v9668_v61 = vpack.c.bf16 %v1230_v45, %v1229_v0  ;;  %v9716_v50 = vpack.c.bf16 %v1262_v49, %v1261_v26  ;;  %16958 = vst [vmem:[#allocation50_spill] sm:$0xff] %v12199_v55  ;;  %16959 = vst [vmem:[#allocation51_spill] sm:$0xff] %v12204_v2  ;;  %v12213_v49 = vld [vmem:[%s16614_s23 + $0xf0] sm:$0xff]  ;;  %v1245_v0 = vmul.f32 %v12194_v59, %v11873_v14 }
 0x2a7   :  { %16960 = vst [vmem:[#allocation52_spill] sm:$0xff] %v12213_v49  ;;  %v1246_v45 = vmul.f32 %v12199_v55, %v11851_v8  ;;  %v1231_v26 = vmul.f32 %v12213_v49, %v11909_v58  ;;  %v12253_v59 = vld [vmem:[%s16614_s23 + $0x70] sm:$0xff] }
 0x2a8   :  { %16964 = vst [vmem:[#allocation56_spill] sm:$0xff] %v12253_v59 }
 0x2ab   :  { %9667 = vmatpush3.bf16.xpose.msk.msra.mxu0 %vm11796_vm3, %v9665_v16  ;;  %9715 = vmatpush3.bf16.xpose.msk.msra.mxu1 %vm11796_vm3, %v9713_v39  ;;  %v1213_v39 = vmul.f32 %v12184_v35, %v11873_v14  ;;  %v1214_v16 = vmul.f32 %v12189_v57, %v11851_v8  ;;  %v9719_v57 = vpack.c.bf16 %v1246_v45, %v1245_v0  ;;  %v12248_v14 = vld [vmem:[%s16614_s23 + $0x78] sm:$0xff] }
 0x2ac   :  { %9670 = vmatprep.subr.msk.bf16.mxu0 %vm11796_vm3, %v9668_v61  ;;  %9718 = vmatprep.subr.msk.bf16.mxu1 %vm11796_vm3, %v9716_v50  ;;  %v1232_v61 = vmul.f32 %v12204_v2, %v11906_v28  ;;  %v1263_v50 = vmul.f32 %v12218_v40, %v11909_v58  ;;  %16963 = vst [vmem:[#allocation55_spill] sm:$0xff] %v12248_v14  ;;  %v12258_v40 = vld [vmem:[%s16614_s23 + $0x170] sm:$0xff] }
 0x2ad   :  { %v9671_v35 = vpack.c.bf16 %v1214_v16, %v1213_v39  ;;  %16965 = vst [vmem:[#allocation57_spill] sm:$0xff] %v12258_v40  ;;  %v12263_v39 = vld [vmem:[%s16614_s23 + $0x178] sm:$0xff]  ;;  %v1216_v16 = vmul.f32 %v12248_v14, %v11906_v28  ;;  %v1247_v0 = vmul.f32 %v12258_v40, %v11909_v58  ;;  %v1155_v14 = vld [vmem:[%s16615_s24 + $0xb0] sm:$0xff] }
 0x2ae   :  { %v9674_v8 = vpack.c.bf16 %v1232_v61, %v1231_v26  ;;  %v9722_v55 = vpack.c.bf16 %v1264_v60, %v1263_v50  ;;  %16966 = vst [vmem:[#allocation58_spill] sm:$0xff] %v12263_v39  ;;  %v1215_v60 = vmul.f32 %v12253_v59, %v11909_v58  ;;  %v1181_v26 = vld [vmem:[%s16615_s24 + $0x180] sm:$0xff]  ;;  %v1182_v50 = vld [vmem:[%s16615_s24 + $0x188] sm:$0xff]  ;;  %v1171_v59 = vld [vmem:[%s16615_s24 + $0x130] sm:$0xff] }
 0x2af   :  { %v1138_v58 = vld [vmem:[%s16615_s24 + $0x28] sm:$0xff] }
 0x2b0   :  { %v9677_v45 = vpack.c.bf16 %v1216_v16, %v1215_v60  ;;  %v12359_v60 = vpack.c.bf16 %v1182_v50, %v1181_v26 }
 0x2b2   :  { %16968 = vst [vmem:[#allocation60_spill] sm:$0xff] %v12359_v60 }
 0x2b3   :  { %9673 = vmatpush3.bf16.xpose.msk.msra.mxu0 %vm11796_vm3, %v9671_v35  ;;  %9721 = vmatpush3.bf16.xpose.msk.msra.mxu1 %vm11796_vm3, %v9719_v57  ;;  %v1248_v35 = vmul.f32 %v12263_v39, %v11906_v28  ;;  %v1137_v28 = vld [vmem:[%s16615_s24 + $0x20] sm:$0xff] }
 0x2b4   :  { %9676 = vmatprep.subr.msk.bf16.mxu0 %vm11796_vm3, %v9674_v8  ;;  %9724 = vmatprep.subr.msk.bf16.mxu1 %vm11796_vm3, %v9722_v55  ;;  %v1149_v8 = vld [vmem:[%s16615_s24 + $0x80] sm:$0xff]  ;;  %v1150_v55 = vld [vmem:[%s16615_s24 + $0x88] sm:$0xff] }
 0x2b5   :  { %v9725_v57 = vpack.c.bf16 %v1248_v35, %v1247_v0  ;;  %v12354_v61 = vpack.c.bf16 %v1150_v55, %v1149_v8  ;;  %v1133_v35 = vld [vmem:[%s16615_s24] sm:$0xff] }
 0x2b6   :  { %v1169_v39 = vld [vmem:[%s16615_s24 + $0x120] sm:$0xff] }
 0x2b7   :  { %16967 = vst [vmem:[#allocation59_spill] sm:$0xff] %v12354_v61 }
 0x2bb   :  { %9679 = vmatpush3.bf16.xpose.msk.msra.mxu0 %vm11796_vm3, %v9677_v45  ;;  %9727 = vmatpush3.bf16.xpose.msk.msra.mxu1 %vm11796_vm3, %v9725_v57  ;;  %v1134_v45 = vld [vmem:[%s16615_s24 + $0x8] sm:$0xff]  ;;  %v1165_v57 = vld [vmem:[%s16615_s24 + $0x100] sm:$0xff] }
 0x2bc   :  { %9729 = vmatprep.subr.bf16.mxu0 %v12354_v61  ;;  %9761 = vmatprep.subr.bf16.mxu1 %v12359_v60  ;;  %v12374_v50 = vpack.c.bf16 %v1134_v45, %v1133_v35  ;;  %v1152_v35 = vld [vmem:[%s16615_s24 + $0x98] sm:$0xff]  ;;  %v1183_v45 = vld [vmem:[%s16615_s24 + $0x190] sm:$0xff] }
 0x2bd   :  { %v1167_v60 = vld [vmem:[%s16615_s24 + $0x110] sm:$0xff] }
 0x2be   :  { %16969 = vst [vmem:[#allocation61_spill] sm:$0xff] %v12374_v50 }
 0x2c2   :  { %8512 = vmatmul.mubr.msk.f32.vlgmr.msra.gmra.mrb[32].mxu0 %vm583_vm1, %v11696_v15  ;;  %8560 = vmatmul.mubr.msk.f32.vlgmr.msra.gmra.mrb[32].mxu1 %vm583_vm1, %v11696_v15 }
 0x2c3   :  { %8513 = vmatprep.mubr.msk.f32.mxu0 %vm583_vm1, %v11694_v13  ;;  %8561 = vmatprep.mubr.msk.f32.mxu1 %vm583_vm1, %v11694_v13 }
 0x2c4   :  { %9731 = vmatpush3.bf16.msra.mxu0 %v12374_v50 }
 0x2c6   :  { %8514 = vmatmul.mubr.msk.f32.gmra.mrb[34].mxu0 %vm583_vm1, %v11694_v13  ;;  %8562 = vmatmul.mubr.msk.f32.gmra.mrb[34].mxu1 %vm583_vm1, %v11694_v13  ;;  %v1136_v13 = vld [vmem:[%s16615_s24 + $0x18] sm:$0xff] }
 0x2c7   :  { %8515 = vmatprep.mubr.msk.f32.mxu0 %vm583_vm1, %v11704_v18  ;;  %8563 = vmatprep.mubr.msk.f32.mxu1 %vm583_vm1, %v11704_v18 }
 0x2ca   :  { %8516 = vmatmul.mubr.msk.f32.gmra.mrb[36].mxu0 %vm583_vm1, %v11704_v18  ;;  %8564 = vmatmul.mubr.msk.f32.gmra.mrb[36].mxu1 %vm583_vm1, %v11704_v18 }
 0x2cb   :  { %8517 = vmatprep.mubr.msk.f32.mxu0 %vm583_vm1, %v11702_v17  ;;  %8565 = vmatprep.mubr.msk.f32.mxu1 %vm583_vm1, %v11702_v17 }
 0x2ce   :  { %8518 = vmatmul.mubr.msk.f32.gmra.mrb[38].mxu0 %vm583_vm1, %v11702_v17  ;;  %8566 = vmatmul.mubr.msk.f32.gmra.mrb[38].mxu1 %vm583_vm1, %v11702_v17 }
 0x2cf   :  { %8519 = vmatprep.mubr.msk.f32.mxu0 %vm583_vm1, %v11708_v36  ;;  %8567 = vmatprep.mubr.msk.f32.mxu1 %vm583_vm1, %v11708_v36 }
 0x2d2   :  { %8520 = vmatmul.mubr.msk.f32.gmra.mrb[40].mxu0 %vm583_vm1, %v11708_v36  ;;  %8568 = vmatmul.mubr.msk.f32.gmra.mrb[40].mxu1 %vm583_vm1, %v11708_v36 }
 0x2d3   :  { %8521 = vmatprep.mubr.msk.f32.mxu0 %vm583_vm1, %v11706_v20  ;;  %8569 = vmatprep.mubr.msk.f32.mxu1 %vm583_vm1, %v11706_v20 }
 0x2d6   :  { %8522 = vmatmul.mubr.msk.f32.gmra.mrb[42].mxu0 %vm583_vm1, %v11706_v20  ;;  %8570 = vmatmul.mubr.msk.f32.gmra.mrb[42].mxu1 %vm583_vm1, %v11706_v20  ;;  %v1151_v20 = vld [vmem:[%s16615_s24 + $0x90] sm:$0xff] }
 0x2d7   :  { %8523 = vmatprep.mubr.msk.f32.mxu0 %vm583_vm1, %v11712_v24  ;;  %8571 = vmatprep.mubr.msk.f32.mxu1 %vm583_vm1, %v11712_v24  ;;  %v12400_v50 = vpack.c.bf16 %v1152_v35, %v1151_v20 }
 0x2d9   :  { %16971 = vst [vmem:[#allocation63_spill] sm:$0xff] %v12400_v50  ;;  %9733 = vmatprep.subr.bf16.mxu0 %v12400_v50 }
 0x2da   :  { %8524 = vmatmul.mubr.msk.f32.gmra.mrb[44].mxu0 %vm583_vm1, %v11712_v24  ;;  %8572 = vmatmul.mubr.msk.f32.gmra.mrb[44].mxu1 %vm583_vm1, %v11712_v24  ;;  %v1166_v24 = vld [vmem:[%s16615_s24 + $0x108] sm:$0xff] }
 0x2db   :  { %8525 = vmatprep.mubr.msk.f32.mxu0 %vm583_vm1, %v11710_v42  ;;  %8573 = vmatprep.mubr.msk.f32.mxu1 %vm583_vm1, %v11710_v42 }
 0x2de   :  { %8526 = vmatmul.mubr.msk.f32.gmra.mrb[46].mxu0 %vm583_vm1, %v11710_v42  ;;  %8574 = vmatmul.mubr.msk.f32.gmra.mrb[46].mxu1 %vm583_vm1, %v11710_v42 }
 0x395   :  { %v1867_v16 = vpop.f32.mrb[32].mxu0  ;;  %v1980_v0 = vpop.f32.mrb[32].mxu1 }
 0x396   :  { %v12372_v8 = vmul.f32 0.35355338, %v1867_v16  ;;  %v1869_v55 = vpop.f32.mrb[33].mxu0  ;;  %v1982_v26 = vpop.f32.mrb[33].mxu1  ;;  %v12384_v36 = vmul.f32 0.35355338, %v1980_v0  ;;  %v12387_v16 = vpack.c.bf16 %v1166_v24, %v1165_v57 }
 0x397   :  { %v12376_v42 = vmul.f32 0.35355338, %v1869_v55  ;;  %v1184_v55 = vld [vmem:[%s16615_s24 + $0x198] sm:$0xff]  ;;  %v1135_v57 = vld [vmem:[%s16615_s24 + $0x10] sm:$0xff]  ;;  %v12418_v35 = vmul.f32 0.35355338, %v1982_v26 }
 0x398   :  { %16970 = vst [vmem:[#allocation62_spill] sm:$0xff] %v12387_v16  ;;  %v12402_v24 = vpack.c.bf16 %v1184_v55, %v1183_v45  ;;  %9763 = vmatpush3.bf16.msra.mxu1 %v12387_v16  ;;  %v12416_v20 = vpack.c.bf16 %v1136_v13, %v1135_v57  ;;  %v1153_v16 = vld [vmem:[%s16615_s24 + $0xa0] sm:$0xff]  ;;  %v1154_v26 = vld [vmem:[%s16615_s24 + $0xa8] sm:$0xff] }
 0x399   :  { %v2059_v0 = vmax.f32 %v12372_v8, %v12376_v42  ;;  %v1873_v17 = vpop.f32.mrb[34].mxu0  ;;  %v1986_v18 = vpop.f32.mrb[34].mxu1  ;;  %v1186_v57 = vld [vmem:[%s16615_s24 + $0x1a8] sm:$0xff] }
 0x39a   :  { %16972 = vst [vmem:[#allocation64_spill] sm:$0xff] %v12402_v24  ;;  %v12413_v61 = vmul.f32 0.35355338, %v1873_v17  ;;  %v1875_v15 = vpop.f32.mrb[35].mxu0  ;;  %v1988_v21 = vpop.f32.mrb[35].mxu1  ;;  %16973 = vst [vmem:[#allocation65_spill] sm:$0xff] %v12416_v20  ;;  %9765 = vmatprep.subr.bf16.mxu1 %v12402_v24  ;;  %9735 = vmatpush3.bf16.msra.mxu0 %v12416_v20 }
 0x39b   :  { %v12420_v45 = vmul.f32 0.35355338, %v1875_v15  ;;  %v2060_v55 = vmax.f32 %v2059_v0, %v12384_v36  ;;  %v1168_v17 = vld [vmem:[%s16615_s24 + $0x118] sm:$0xff]  ;;  %v12431_v13 = vmul.f32 0.35355338, %v1986_v18  ;;  %v1185_v0 = vld [vmem:[%s16615_s24 + $0x1a0] sm:$0xff] }
 0x39c   :  { %v12434_v15 = vpack.c.bf16 %v1168_v17, %v1167_v60  ;;  %v12448_v17 = vpack.c.bf16 %v1154_v26, %v1153_v16  ;;  %v12450_v20 = vpack.c.bf16 %v1186_v57, %v1185_v0  ;;  %v12464_v16 = vpack.c.bf16 %v1138_v58, %v1137_v28  ;;  %v1156_v28 = vld [vmem:[%s16615_s24 + $0xb8] sm:$0xff]  ;;  %v1187_v58 = vld [vmem:[%s16615_s24 + $0x1b0] sm:$0xff] }
 0x39d   :  { %v2064_v18 = vmax.f32 %v12413_v61, %v12420_v45  ;;  %v1879_v24 = vpop.f32.mrb[36].mxu0  ;;  %v1992_v50 = vpop.f32.mrb[36].mxu1  ;;  %v2061_v60 = vmax.f32 %v2060_v55, %v12418_v35  ;;  %v12466_v26 = vmul.f32 0.35355338, %v1988_v21 }
 0x39e   :  { %16974 = vst [vmem:[#allocation66_spill] sm:$0xff] %v12434_v15  ;;  %16975 = vst [vmem:[#allocation67_spill] sm:$0xff] %v12448_v17  ;;  %v12461_v25 = vmul.f32 0.35355338, %v1879_v24  ;;  %v1881_v40 = vpop.f32.mrb[37].mxu0  ;;  %v1994_v55 = vpop.f32.mrb[37].mxu1  ;;  %9767 = vmatpush3.bf16.msra.mxu1 %v12434_v15  ;;  %9737 = vmatprep.subr.bf16.mxu0 %v12448_v17 }
 0x39f   :  { %16976 = vst [vmem:[#allocation68_spill] sm:$0xff] %v12450_v20  ;;  %16977 = vst [vmem:[#allocation69_spill] sm:$0xff] %v12464_v16  ;;  %v12468_v0 = vmul.f32 0.35355338, %v1881_v40  ;;  %2062 = vmax.xlane.f32.xlu0 %v2061_v60  ;;  %v2065_v57 = vmax.f32 %v2064_v18, %v12431_v13  ;;  %v1170_v24 = vld [vmem:[%s16615_s24 + $0x128] sm:$0xff]  ;;  %9769 = vmatprep.subr.bf16.mxu1 %v12450_v20  ;;  %v1188_v40 = vld [vmem:[%s16615_s24 + $0x1b8] sm:$0xff] }
 0x3a0   :  { %v12478_v15 = vmul.f32 0.35355338, %v1992_v50  ;;  %9739 = vmatpush3.bf16.msra.mxu0 %v12464_v16  ;;  %v12482_v21 = vpack.c.bf16 %v1170_v24, %v1169_v39  ;;  %v12496_v24 = vpack.c.bf16 %v1156_v28, %v1155_v14  ;;  %v12498_v16 = vpack.c.bf16 %v1188_v40, %v1187_v58  ;;  %v1139_v20 = vld [vmem:[%s16615_s24 + $0x30] sm:$0xff]  ;;  %v1140_v17 = vld [vmem:[%s16615_s24 + $0x38] sm:$0xff] }
 0x3a1   :  { %v2069_v50 = vmax.f32 %v12461_v25, %v12468_v0  ;;  %v1885_v18 = vpop.f32.mrb[38].mxu0  ;;  %v1998_v60 = vpop.f32.mrb[38].mxu1  ;;  %v2066_v39 = vmax.f32 %v2065_v57, %v12466_v26  ;;  %v12512_v14 = vpack.c.bf16 %v1140_v17, %v1139_v20  ;;  %v12514_v28 = vmul.f32 0.35355338, %v1994_v55 }
 0x3a2   :  { %16978 = vst [vmem:[#allocation70_spill] sm:$0xff] %v12478_v15  ;;  %16979 = vst [vmem:[#allocation71_spill] sm:$0xff] %v12482_v21  ;;  %v12509_v2 = vmul.f32 0.35355338, %v1885_v18  ;;  %v1887_v49 = vpop.f32.mrb[39].mxu0  ;;  %v2000_v57 = vpop.f32.mrb[39].mxu1  ;;  %9771 = vmatpush3.bf16.msra.mxu1 %v12482_v21  ;;  %9741 = vmatprep.subr.bf16.mxu0 %v12496_v24 }
 0x3a3   :  { %16980 = vst [vmem:[#allocation72_spill] sm:$0xff] %v12496_v24  ;;  %16981 = vst [vmem:[#allocation73_spill] sm:$0xff] %v12498_v16  ;;  %v12516_v58 = vmul.f32 0.35355338, %v1887_v49  ;;  %2067 = vmax.xlane.f32.xlu0 %v2066_v39  ;;  %v2070_v40 = vmax.f32 %v2069_v50, %v12478_v15  ;;  %v1172_v18 = vld [vmem:[%s16615_s24 + $0x138] sm:$0xff]  ;;  %9773 = vmatprep.subr.bf16.mxu1 %v12498_v16 }
 0x3a4   :  { %16982 = vst [vmem:[#allocation74_spill] sm:$0xff] %v12509_v2  ;;  %16983 = vst [vmem:[#allocation75_spill] sm:$0xff] %v12512_v14  ;;  %9743 = vmatpush3.bf16.msra.mxu0 %v12512_v14  ;;  %v12525_v21 = vpack.c.bf16 %v1172_v18, %v1171_v59  ;;  %v12527_v20 = vmul.f32 0.35355338, %v1998_v60  ;;  %v12535_v16 = vmul.f32 0.35355338, %v2000_v57 }
 0x3a5   :  { %16984 = vst [vmem:[#allocation76_spill] sm:$0xff] %v12514_v28  ;;  %16985 = vst [vmem:[#allocation77_spill] sm:$0xff] %v12516_v58  ;;  %v2074_v49 = vmax.f32 %v12509_v2, %v12516_v58  ;;  %v1891_v17 = vpop.f32.mrb[40].mxu0  ;;  %v2004_v55 = vpop.f32.mrb[40].mxu1  ;;  %v2071_v50 = vmax.f32 %v2070_v40, %v12514_v28 }
 0x3a6   :  { %16986 = vst [vmem:[#allocation78_spill] sm:$0xff] %v12525_v21  ;;  %16987 = vst [vmem:[#allocation79_spill] sm:$0xff] %v12527_v20  ;;  %v12532_v39 = vmul.f32 0.35355338, %v1891_v17  ;;  %v1893_v24 = vpop.f32.mrb[41].mxu0  ;;  %v2006_v15 = vpop.f32.mrb[41].mxu1  ;;  %9775 = vmatpush3.bf16.msra.mxu1 %v12525_v21 }
 0x3a7   :  { %16989 = vst [vmem:[#allocation81_spill] sm:$0xff] %v12535_v16  ;;  %v12537_v14 = vmul.f32 0.35355338, %v1893_v24  ;;  %2072 = vmax.xlane.f32.xlu1 %v2071_v50  ;;  %v2075_v59 = vmax.f32 %v2074_v49, %v12527_v20  ;;  %v12540_v60 = vmul.f32 0.35355338, %v2004_v55 }
 0x3a8   :  { %16988 = vst [vmem:[#allocation80_spill] sm:$0xff] %v12532_v39  ;;  %v12547_v57 = vmul.f32 0.35355338, %v2006_v15 }
 0x3a9   :  { %16990 = vst [vmem:[#allocation82_spill] sm:$0xff] %v12537_v14  ;;  %16991 = vst [vmem:[#allocation83_spill] sm:$0xff] %v12540_v60  ;;  %v2079_v18 = vmax.f32 %v12532_v39, %v12537_v14  ;;  %v1897_v58 = vpop.f32.mrb[42].mxu0  ;;  %v2010_v40 = vpop.f32.mrb[42].mxu1  ;;  %v2076_v17 = vmax.f32 %v2075_v59, %v12535_v16 }
 0x3aa   :  { %v12545_v2 = vmul.f32 0.35355338, %v1897_v58  ;;  %v1899_v28 = vpop.f32.mrb[43].mxu0  ;;  %v2012_v21 = vpop.f32.mrb[43].mxu1  ;;  %16993 = vst [vmem:[#allocation85_spill] sm:$0xff] %v12547_v57 }
 0x3ab   :  { %v12549_v24 = vmul.f32 0.35355338, %v1899_v28  ;;  %2077 = vmax.xlane.f32.xlu1 %v2076_v17  ;;  %v2080_v49 = vmax.f32 %v2079_v18, %v12540_v60  ;;  %v12552_v55 = vmul.f32 0.35355338, %v2010_v40  ;;  %v12559_v15 = vmul.f32 0.35355338, %v2012_v21 }
 0x3ac   :  { %16992 = vst [vmem:[#allocation84_spill] sm:$0xff] %v12545_v2 }
 0x3ad   :  { %16994 = vst [vmem:[#allocation86_spill] sm:$0xff] %v12549_v24  ;;  %v2084_v50 = vmax.f32 %v12545_v2, %v12549_v24  ;;  %v1903_v14 = vpop.f32.mrb[44].mxu0  ;;  %v2016_v39 = vpop.f32.mrb[44].mxu1  ;;  %v2081_v59 = vmax.f32 %v2080_v49, %v12547_v57 }
 0x3ae   :  { %v12557_v58 = vmul.f32 0.35355338, %v1903_v14  ;;  %v1905_v16 = vpop.f32.mrb[45].mxu0  ;;  %v2018_v20 = vpop.f32.mrb[45].mxu1  ;;  %v12564_v40 = vmul.f32 0.35355338, %v2016_v39 }
 0x3af   :  { %v12561_v28 = vmul.f32 0.35355338, %v1905_v16  ;;  %2082 = vmax.xlane.f32.xlu0 %v2081_v59  ;;  %v2085_v18 = vmax.f32 %v2084_v50, %v12552_v55  ;;  %v12571_v21 = vmul.f32 0.35355338, %v2018_v20  ;;  %v1157_v39 = vld [vmem:[%s16615_s24 + $0xc0] sm:$0xff]  ;;  %v1158_v59 = vld [vmem:[%s16615_s24 + $0xc8] sm:$0xff] }
 0x3b0   :  { %16995 = vst [vmem:[#allocation87_spill] sm:$0xff] %v12557_v58  ;;  %16997 = vst [vmem:[#allocation89_spill] sm:$0xff] %v12564_v40 }
 0x3b1   :  { %16996 = vst [vmem:[#allocation88_spill] sm:$0xff] %v12561_v28  ;;  %v2089_v17 = vmax.f32 %v12557_v58, %v12561_v28  ;;  %v1909_v24 = vpop.f32.mrb[46].mxu0  ;;  %v2022_v2 = vpop.f32.mrb[46].mxu1  ;;  %v2086_v49 = vmax.f32 %v2085_v18, %v12559_v15 }
 0x3b2   :  { %v12569_v14 = vmul.f32 0.35355338, %v1909_v24  ;;  %v1911_v57 = vpop.f32.mrb[47].mxu0  ;;  %v2024_v60 = vpop.f32.mrb[47].mxu1  ;;  %v1189_v24 = vld [vmem:[%s16615_s24 + $0x1c0] sm:$0xff] }
 0x3b3   :  { %v12573_v16 = vmul.f32 0.35355338, %v1911_v57  ;;  %2087 = vmax.xlane.f32.xlu1 %v2086_v49  ;;  %v2090_v50 = vmax.f32 %v2089_v17, %v12564_v40  ;;  %v12585_v18 = vmul.f32 0.35355338, %v2022_v2  ;;  %v12590_v17 = vpack.c.bf16 %v1158_v59, %v1157_v39  ;;  %v1190_v49 = vld [vmem:[%s16615_s24 + $0x1c8] sm:$0xff]  ;;  %v1141_v40 = vld [vmem:[%s16615_s24 + $0x40] sm:$0xff] }
 0x3b4   :  { %16998 = vst [vmem:[#allocation90_spill] sm:$0xff] %v12569_v14  ;;  %v1142_v2 = vld [vmem:[%s16615_s24 + $0x48] sm:$0xff]  ;;  %v12601_v28 = vpack.c.bf16 %v1190_v49, %v1189_v24  ;;  %v12611_v59 = vmul.f32 0.35355338, %v2024_v60  ;;  %v1160_v60 = vld [vmem:[%s16615_s24 + $0xd8] sm:$0xff]  ;;  %v1191_v24 = vld [vmem:[%s16615_s24 + $0x1d0] sm:$0xff] }
 0x3b5   :  { %16999 = vst [vmem:[#allocation91_spill] sm:$0xff] %v12573_v16  ;;  %v2094_v20 = vmax.f32 %v12569_v14, %v12573_v16  ;;  %v2091_v57 = vmax.f32 %v2090_v50, %v12571_v21  ;;  %17000 = vst [vmem:[#allocation92_spill] sm:$0xff] %v12590_v17  ;;  %v12603_v58 = vpack.c.bf16 %v1142_v2, %v1141_v40  ;;  %v1173_v50 = vld [vmem:[%s16615_s24 + $0x140] sm:$0xff]  ;;  %v1174_v39 = vld [vmem:[%s16615_s24 + $0x148] sm:$0xff]  ;;  %9745 = vmatprep.subr.bf16.mxu0 %v12590_v17 }
 0x3b6   :  { %17001 = vst [vmem:[#allocation93_spill] sm:$0xff] %v12601_v28  ;;  %v12615_v14 = vpack.c.bf16 %v1174_v39, %v1173_v50  ;;  %9777 = vmatprep.subr.bf16.mxu1 %v12601_v28  ;;  %v1159_v40 = vld [vmem:[%s16615_s24 + $0xd0] sm:$0xff]  ;;  %v1192_v49 = vld [vmem:[%s16615_s24 + $0x1d8] sm:$0xff] }
 0x3b7   :  { %17002 = vst [vmem:[#allocation94_spill] sm:$0xff] %v12603_v58  ;;  %2092 = vmax.xlane.f32.xlu0 %v2091_v57  ;;  %v2095_v16 = vmax.f32 %v2094_v20, %v12585_v18  ;;  %9747 = vmatpush3.bf16.msra.mxu0 %v12603_v58  ;;  %v12630_v57 = vpack.c.bf16 %v1160_v60, %v1159_v40  ;;  %v1143_v2 = vld [vmem:[%s16615_s24 + $0x50] sm:$0xff]  ;;  %v1144_v50 = vld [vmem:[%s16615_s24 + $0x58] sm:$0xff] }
 0x3b8   :  { %17003 = vst [vmem:[#allocation95_spill] sm:$0xff] %v12615_v14  ;;  %9779 = vmatpush3.bf16.msra.mxu1 %v12615_v14  ;;  %v12641_v39 = vpack.c.bf16 %v1192_v49, %v1191_v24  ;;  %v12643_v58 = vpack.c.bf16 %v1144_v50, %v1143_v2  ;;  %v1176_v40 = vld [vmem:[%s16615_s24 + $0x158] sm:$0xff]  ;;  %v1161_v24 = vld [vmem:[%s16615_s24 + $0xe0] sm:$0xff]  ;;  %v1162_v49 = vld [vmem:[%s16615_s24 + $0xe8] sm:$0xff] }
 0x3b9   :  { %v2096_v20 = vmax.f32 %v2095_v16, %v12611_v59  ;;  %17004 = vst [vmem:[#allocation96_spill] sm:$0xff] %v12630_v57  ;;  %v1175_v16 = vld [vmem:[%s16615_s24 + $0x150] sm:$0xff]  ;;  %9749 = vmatprep.subr.bf16.mxu0 %v12630_v57  ;;  %v12666_v2 = vpack.c.bf16 %v1162_v49, %v1161_v24  ;;  %v1194_v50 = vld [vmem:[%s16615_s24 + $0x1e8] sm:$0xff]  ;;  %v1177_v24 = vld [vmem:[%s16615_s24 + $0x160] sm:$0xff] }
 0x3ba   :  { %17005 = vst [vmem:[#allocation97_spill] sm:$0xff] %v12641_v39  ;;  %17006 = vst [vmem:[#allocation98_spill] sm:$0xff] %v12643_v58  ;;  %v12652_v60 = vpack.c.bf16 %v1176_v40, %v1175_v16  ;;  %9781 = vmatprep.subr.bf16.mxu1 %v12641_v39  ;;  %v1145_v16 = vld [vmem:[%s16615_s24 + $0x60] sm:$0xff]  ;;  %v1146_v40 = vld [vmem:[%s16615_s24 + $0x68] sm:$0xff] }
 0x3bb   :  { %2097 = vmax.xlane.f32.xlu1 %v2096_v20  ;;  %9751 = vmatpush3.bf16.msra.mxu0 %v12643_v58  ;;  %v1193_v20 = vld [vmem:[%s16615_s24 + $0x1e0] sm:$0xff]  ;;  %17008 = vst [vmem:[#allocation100_spill] sm:$0xff] %v12666_v2  ;;  %v12679_v39 = vpack.c.bf16 %v1146_v40, %v1145_v16  ;;  %v1178_v49 = vld [vmem:[%s16615_s24 + $0x168] sm:$0xff]  ;;  %v1195_v16 = vld [vmem:[%s16615_s24 + $0x1f0] sm:$0xff] }
 0x3bc   :  { %17007 = vst [vmem:[#allocation99_spill] sm:$0xff] %v12652_v60  ;;  %9783 = vmatpush3.bf16.msra.mxu1 %v12652_v60  ;;  %v12677_v58 = vpack.c.bf16 %v1194_v50, %v1193_v20  ;;  %9753 = vmatprep.subr.bf16.mxu0 %v12666_v2  ;;  %v12688_v60 = vpack.c.bf16 %v1178_v49, %v1177_v24  ;;  %v1163_v20 = vld [vmem:[%s16615_s24 + $0xf0] sm:$0xff]  ;;  %v1164_v50 = vld [vmem:[%s16615_s24 + $0xf8] sm:$0xff] }
 0x3bd   :  { %17010 = vst [vmem:[#allocation102_spill] sm:$0xff] %v12679_v39  ;;  %v12702_v40 = vpack.c.bf16 %v1164_v50, %v1163_v20  ;;  %v1196_v24 = vld [vmem:[%s16615_s24 + $0x1f8] sm:$0xff]  ;;  %v1147_v49 = vld [vmem:[%s16615_s24 + $0x70] sm:$0xff] }
 0x3be   :  { %17009 = vst [vmem:[#allocation101_spill] sm:$0xff] %v12677_v58  ;;  %17011 = vst [vmem:[#allocation103_spill] sm:$0xff] %v12688_v60  ;;  %9785 = vmatprep.subr.bf16.mxu1 %v12677_v58  ;;  %v12713_v58 = vpack.c.bf16 %v1196_v24, %v1195_v16  ;;  %v1179_v20 = vld [vmem:[%s16615_s24 + $0x170] sm:$0xff]  ;;  %v1180_v50 = vld [vmem:[%s16615_s24 + $0x178] sm:$0xff] }
 0x3bf   :  { %9755 = vmatpush3.bf16.msra.mxu0 %v12679_v39  ;;  %17012 = vst [vmem:[#allocation104_spill] sm:$0xff] %v12702_v40  ;;  %v1148_v39 = vld [vmem:[%s16615_s24 + $0x78] sm:$0xff] }
 0x3c0   :  { %9787 = vmatpush3.bf16.msra.mxu1 %v12688_v60  ;;  %17013 = vst [vmem:[#allocation105_spill] sm:$0xff] %v12713_v58  ;;  %v12715_v2 = vpack.c.bf16 %v1148_v39, %v1147_v49  ;;  %9757 = vmatprep.subr.bf16.mxu0 %v12702_v40  ;;  %v12724_v60 = vpack.c.bf16 %v1180_v50, %v1179_v20 }
 0x3c1   :  { %9789 = vmatprep.subr.bf16.mxu1 %v12713_v58 }
 0x3c2   :  { %17014 = vst [vmem:[#allocation106_spill] sm:$0xff] %v12715_v2  ;;  %17015 = vst [vmem:[#allocation107_spill] sm:$0xff] %v12724_v60 }
 0x3c3   :  { %9759 = vmatpush3.bf16.msra.mxu0 %v12715_v2 }
 0x3c4   :  { %9791 = vmatpush3.bf16.msra.mxu1 %v12724_v60 }
 0x3cc   :  { %1363 = vrot.lane.b32.xlu1 %v11727_v53, %s11003_s0  ;;  %v17017_v53 = vld [vmem:[#allocation28_spill] sm:$0xff] }
 0x3cd   :  { %1361 = vrot.lane.b32.xlu0 %v11722_v37, %s11003_s0  ;;  %v17016_v37 = vld [vmem:[#allocation27_spill] sm:$0xff] }
 0x3d0   :  { %1329 = vrot.lane.b32.xlu1 %v11755_v43, %s11003_s0  ;;  %v17022_v43 = vld [vmem:[#allocation33_spill] sm:$0xff] }
 0x3d1   :  { %1425 = vrot.lane.b32.xlu0 %v11750_v41, %s11003_s0  ;;  %v17021_v41 = vld [vmem:[#allocation30_spill] sm:$0xff] }
 0x3d4   :  { %1331 = vrot.lane.b32.xlu1 %v11737_v27, %s11003_s0  ;;  %v17019_v27 = vld [vmem:[#allocation29_spill] sm:$0xff] }
 0x3d5   :  { %1365 = vrot.lane.b32.xlu0 %v11803_v32, %s11003_s0  ;;  %v17026_v32 = vld [vmem:[#allocation39_spill] sm:$0xff] }
 0x3d8   :  { %1427 = vrot.lane.b32.xlu1 %v11732_v38, %s11003_s0  ;;  %v17018_v38 = vld [vmem:[#allocation23_spill] sm:$0xff] }
 0x3d9   :  { %1393 = vrot.lane.b32.xlu0 %v11760_v44, %s11003_s0  ;;  %v17023_v44 = vld [vmem:[#allocation34_spill] sm:$0xff] }
 0x3dc   :  { %1367 = vrot.lane.b32.xlu1 %v11784_v29, %s11003_s0  ;;  %v17024_v29 = vld [vmem:[#allocation41_spill] sm:$0xff] }
 0x3dd   :  { %1333 = vrot.lane.b32.xlu0 %v11838_v5, %s11003_s0  ;;  %v17029_v5 = vld [vmem:[#allocation44_spill] sm:$0xff] }
 0x3e0   :  { %1395 = vrot.lane.b32.xlu1 %v11742_v34, %s11003_s0  ;;  %v17020_v34 = vld [vmem:[#allocation32_spill] sm:$0xff] }
 0x3e1   :  { %1429 = vrot.lane.b32.xlu0 %v11808_v33, %s11003_s0  ;;  %v17027_v33 = vld [vmem:[#allocation42_spill] sm:$0xff] }
 0x3e4   :  { %1335 = vrot.lane.b32.xlu1 %v11820_v47, %s11003_s0  ;;  %v17028_v47 = vld [vmem:[#allocation40_spill] sm:$0xff] }
 0x3e5   :  { %1369 = vrot.lane.b32.xlu0 %v11860_v9, %s11003_s0 }
 0x3e8   :  { %1431 = vrot.lane.b32.xlu1 %v11789_v31, %s11003_s0  ;;  %v17025_v31 = vld [vmem:[#allocation38_spill] sm:$0xff] }
 0x3e9   :  { %1397 = vrot.lane.b32.xlu0 %v11843_v6, %s11003_s0 }
 0x3ec   :  { %1371 = vrot.lane.b32.xlu1 %v11848_v7, %s11003_s0 }
 0x3ed   :  { %1337 = vrot.lane.b32.xlu0 %v11914_v62, %s11003_s0 }
 0x3f0   :  { %1399 = vrot.lane.b32.xlu1 %v11825_v1, %s11003_s0 }
 0x3f1   :  { %1433 = vrot.lane.b32.xlu0 %v11865_v10, %s11003_s0 }
 0x3f4   :  { %1339 = vrot.lane.b32.xlu1 %v11898_v11, %s11003_s0 }
 0x3f5   :  { %1373 = vrot.lane.b32.xlu0 %v11936_v4, %s11003_s0  ;;  %v17031_v4 = vld [vmem:[#allocation43_spill] sm:$0xff] }
 0x3f8   :  { %1435 = vrot.lane.b32.xlu1 %v11870_v12, %s11003_s0  ;;  %v17030_v12 = vld [vmem:[#allocation47_spill] sm:$0xff] }
 0x3f9   :  { %1401 = vrot.lane.b32.xlu0 %v11919_v63, %s11003_s0 }
 0x3fc   :  { %1375 = vrot.lane.b32.xlu1 %v11924_v46, %s11003_s0 }
 0x3fd   :  { %1341 = vrot.lane.b32.xlu0 %v11990_v54, %s11003_s0 }
 0x400   :  { %1403 = vrot.lane.b32.xlu1 %v11903_v56, %s11003_s0 }
 0x401   :  { %1437 = vrot.lane.b32.xlu0 %v11941_v51, %s11003_s0 }
 0x404   :  { %1343 = vrot.lane.b32.xlu1 %v17016_v37, %s11003_s0  ;;  %v17037_v37 = vld [vmem:[#allocation46_spill] sm:$0xff] }
 0x405   :  { %1377 = vrot.lane.b32.xlu0 %v17017_v53, %s11003_s0  ;;  %v17039_v53 = vld [vmem:[#allocation77_spill] sm:$0xff] }
 0x408   :  { %1439 = vrot.lane.b32.xlu1 %v17018_v38, %s11003_s0 }
 0x409   :  { %1405 = vrot.lane.b32.xlu0 %v17019_v27, %s11003_s0  ;;  %v17040_v27 = vld [vmem:[#allocation79_spill] sm:$0xff] }
 0x40c   :  { %1379 = vrot.lane.b32.xlu1 %v17020_v34, %s11003_s0 }
 0x40d   :  { %1345 = vrot.lane.b32.xlu0 %v12056_v3, %s11003_s0  ;;  %v17032_v3 = vld [vmem:[#allocation45_spill] sm:$0xff] }
 0x410   :  { %1407 = vrot.lane.b32.xlu1 %v17021_v41, %s11003_s0  ;;  %v17041_v41 = vld [vmem:[#allocation49_spill] sm:$0xff] }
 0x411   :  { %1441 = vrot.lane.b32.xlu0 %v17022_v43, %s11003_s0  ;;  %v17042_v43 = vld [vmem:[#allocation81_spill] sm:$0xff] }
 0x414   :  { %1347 = vrot.lane.b32.xlu1 %v12061_v48, %s11003_s0 }
 0x415   :  { %1381 = vrot.lane.b32.xlu0 %v12085_v52, %s11003_s0 }
 0x418   :  { %1443 = vrot.lane.b32.xlu1 %v17023_v44, %s11003_s0 }
 0x419   :  { %1409 = vrot.lane.b32.xlu0 %v12066_v23, %s11003_s0 }
 0x41c   :  { %1383 = vrot.lane.b32.xlu1 %v12076_v19, %s11003_s0 }
 0x41d   :  { %1349 = vrot.lane.b32.xlu0 %v17024_v29, %s11003_s0 }
 0x420   :  { %1411 = vrot.lane.b32.xlu1 %v17025_v31, %s11003_s0 }
 0x421   :  { %1445 = vrot.lane.b32.xlu0 %v17026_v32, %s11003_s0 }
 0x424   :  { %1351 = vrot.lane.b32.xlu1 %v17027_v33, %s11003_s0 }
 0x425   :  { %1385 = vrot.lane.b32.xlu0 %v12140_v22, %s11003_s0  ;;  %v17033_v22 = vld [vmem:[#allocation48_spill] sm:$0xff] }
 0x428   :  { %1447 = vrot.lane.b32.xlu1 %v17028_v47, %s11003_s0 }
 0x429   :  { %1413 = vrot.lane.b32.xlu0 %v12130_v30, %s11003_s0 }
 0x42c   :  { %v2063_v1 = vpop.xlane.xlu0 %2062  ;;  %1387 = vrot.lane.b32.xlu1 %v17029_v5, %s11003_s0 }
 0x42d   :  { %v2099_v6 = vsub.f32 %v12372_v8, %v2063_v1  ;;  %v2100_v7 = vsub.f32 %v12376_v42, %v2063_v1  ;;  %v2101_v9 = vsub.f32 %v12384_v36, %v2063_v1  ;;  %v2102_v10 = vsub.f32 %v12418_v35, %v2063_v1  ;;  %1353 = vrot.lane.b32.xlu0 %v17030_v12, %s11003_s0  ;;  %v17034_v35 = vld [vmem:[#allocation70_spill] sm:$0xff] }
 0x42e   :  { %v17045_v12 = vld [vmem:[#allocation82_spill] sm:$0xff] }
 0x42f   :  { %v2131_v11 = vmul.f32 1.442695, %v2099_v6  ;;  %v2133_v56 = vmul.f32 1.442695, %v2100_v7  ;;  %v2135_v62 = vmul.f32 1.442695, %v2101_v9 }
 0x430   :  { %v2137_v63 = vmul.f32 1.442695, %v2102_v10  ;;  %v2068_v46 = vpop.xlane.xlu0 %2067  ;;  %1415 = vrot.lane.b32.xlu1 %v17031_v4, %s11003_s0  ;;  %v17043_v6 = vld [vmem:[#allocation51_spill] sm:$0xff]  ;;  %v17044_v9 = vld [vmem:[#allocation80_spill] sm:$0xff]  ;;  %v17048_v4 = vld [vmem:[#allocation85_spill] sm:$0xff] }
 0x431   :  { %10536 = vpow2.f32 %v2131_v11  ;;  %v2103_v51 = vsub.f32 %v12413_v61, %v2068_v46  ;;  %v2104_v42 = vsub.f32 %v12420_v45, %v2068_v46  ;;  %v2105_v36 = vsub.f32 %v12431_v13, %v2068_v46  ;;  %1449 = vrot.lane.b32.xlu0 %v17032_v3, %s11003_s0  ;;  %v17035_v13 = vld [vmem:[#allocation52_spill] sm:$0xff] }
 0x432   :  { %10538 = vpow2.f32 %v2133_v56  ;;  %v2106_v54 = vsub.f32 %v12466_v26, %v2068_v46  ;;  %v17036_v26 = vld [vmem:[#allocation76_spill] sm:$0xff]  ;;  %v17046_v56 = vld [vmem:[#allocation83_spill] sm:$0xff] }
 0x433   :  { %10540 = vpow2.f32 %v2135_v62  ;;  %v2139_v48 = vmul.f32 1.442695, %v2103_v51  ;;  %v2141_v23 = vmul.f32 1.442695, %v2104_v42  ;;  %v2143_v19 = vmul.f32 1.442695, %v2105_v36 }
 0x434   :  { %10542 = vpow2.f32 %v2137_v63  ;;  %v2145_v52 = vmul.f32 1.442695, %v2106_v54  ;;  %v2073_v30 = vpop.xlane.xlu1 %2072  ;;  %1355 = vrot.lane.b32.xlu1 %v17033_v22, %s11003_s0  ;;  %v17047_v63 = vld [vmem:[#allocation56_spill] sm:$0xff] }
 0x435   :  { %10544 = vpow2.f32 %v2139_v48  ;;  %v2107_v61 = vsub.f32 %v12461_v25, %v2073_v30  ;;  %v2108_v8 = vsub.f32 %v12468_v0, %v2073_v30  ;;  %v2109_v45 = vsub.f32 %v17034_v35, %v2073_v30  ;;  %1389 = vrot.lane.b32.xlu0 %v17035_v13, %s11003_s0  ;;  %v17038_v25 = vld [vmem:[#allocation74_spill] sm:$0xff]  ;;  %v17050_v22 = vld [vmem:[#allocation84_spill] sm:$0xff]  ;;  %v17052_v13 = vld [vmem:[#allocation53_spill] sm:$0xff] }
 0x436   :  { %10546 = vpow2.f32 %v2141_v23  ;;  %v2110_v39 = vsub.f32 %v17036_v26, %v2073_v30 }
 0x437   :  { %10548 = vpow2.f32 %v2143_v19  ;;  %v2147_v16 = vmul.f32 1.442695, %v2107_v61  ;;  %v2149_v24 = vmul.f32 1.442695, %v2108_v8  ;;  %v2151_v49 = vmul.f32 1.442695, %v2109_v45 }
 0x438   :  { %10550 = vpow2.f32 %v2145_v52  ;;  %v2153_v20 = vmul.f32 1.442695, %v2110_v39  ;;  %v2078_v50 = vpop.xlane.xlu1 %2077  ;;  %1451 = vrot.lane.b32.xlu1 %v17037_v37, %s11003_s0  ;;  %v17049_v52 = vld [vmem:[#allocation50_spill] sm:$0xff] }
 0x439   :  { %10552 = vpow2.f32 %v2147_v16  ;;  %v2111_v0 = vsub.f32 %v17038_v25, %v2078_v50  ;;  %v2112_v38 = vsub.f32 %v17039_v53, %v2078_v50  ;;  %v2113_v34 = vsub.f32 %v17040_v27, %v2078_v50  ;;  %1417 = vrot.lane.b32.xlu0 %v17041_v41, %s11003_s0  ;;  %v17051_v8 = vld [vmem:[#allocation86_spill] sm:$0xff]  ;;  %v17053_v25 = vld [vmem:[#allocation55_spill] sm:$0xff] }
 0x43a   :  { %10554 = vpow2.f32 %v2149_v24  ;;  %v2114_v44 = vsub.f32 %v17042_v43, %v2078_v50  ;;  %v17057_v43 = vld [vmem:[#allocation57_spill] sm:$0xff] }
 0x43b   :  { %v12857_v29 = vpop.eup %10536  ;;  %10556 = vpow2.f32 %v2151_v49  ;;  %v2155_v31 = vmul.f32 1.442695, %v2111_v0  ;;  %v2157_v32 = vmul.f32 1.442695, %v2112_v38  ;;  %v2159_v33 = vmul.f32 1.442695, %v2113_v34 }
 0x43c   :  { %v12859_v47 = vpop.eup %10538  ;;  %10558 = vpow2.f32 %v2153_v20  ;;  %v2161_v1 = vmul.f32 1.442695, %v2114_v44  ;;  %v2083_v5 = vpop.xlane.xlu0 %2082  ;;  %1391 = vrot.lane.b32.xlu1 %v17043_v6, %s11003_s0  ;;  %v17054_v0 = vld [vmem:[#allocation87_spill] sm:$0xff]  ;;  %v17055_v38 = vld [vmem:[#allocation88_spill] sm:$0xff]  ;;  %v17056_v34 = vld [vmem:[#allocation89_spill] sm:$0xff] }
 0x43d   :  { %v12863_v7 = vpop.eup %10540  ;;  %10560 = vpow2.f32 %v2155_v31  ;;  %2259 = vmatprep.mubr.f32.mxu0 %v12859_v47  ;;  %v2115_v10 = vsub.f32 %v17044_v9, %v2083_v5  ;;  %v2116_v11 = vsub.f32 %v17045_v12, %v2083_v5  ;;  %v2117_v62 = vsub.f32 %v17046_v56, %v2083_v5  ;;  %1357 = vrot.lane.b32.xlu0 %v17047_v63, %s11003_s0  ;;  %v1197_v56 = vld [vmem:[%s16616_s25] sm:$0xff]  ;;  %v17060_v63 = vld [vmem:[#allocation90_spill] sm:$0xff] }
 0x43e   :  { %v12871_v46 = vpop.eup %10542  ;;  %10562 = vpow2.f32 %v2157_v32  ;;  %v2118_v51 = vsub.f32 %v17048_v4, %v2083_v5  ;;  %2260 = vmatmul.mubr.f32.vlgmr.msra.gmra.mrb[48].mxu0 %v12857_v29 }
 0x43f   :  { %v12875_v42 = vpop.eup %10544  ;;  %10564 = vpow2.f32 %v2159_v33  ;;  %2364 = vmatprep.mubr.f32.mxu1 %v12871_v46  ;;  %v2163_v36 = vmul.f32 1.442695, %v2115_v10  ;;  %v2165_v3 = vmul.f32 1.442695, %v2116_v11  ;;  %v2167_v54 = vmul.f32 1.442695, %v2117_v62 }
 0x440   :  { %v12878_v48 = vpop.eup %10546  ;;  %10566 = vpow2.f32 %v2161_v1  ;;  %v2169_v23 = vmul.f32 1.442695, %v2118_v51  ;;  %2365 = vmatmul.mubr.f32.vlgmr.msra.gmra.mrb[48].mxu1 %v12863_v7  ;;  %v2088_v19 = vpop.xlane.xlu1 %2087  ;;  %1419 = vrot.lane.b32.xlu1 %v17049_v52, %s11003_s0  ;;  %v1198_v11 = vld [vmem:[%s16616_s25 + $0x8] sm:$0xff] }
 0x441   :  { %v12883_v30 = vpop.eup %10548  ;;  %10568 = vpow2.f32 %v2163_v36  ;;  %2264 = vmatprep.mubr.f32.mxu0 %v12878_v48  ;;  %v2119_v61 = vsub.f32 %v17050_v22, %v2088_v19  ;;  %v2120_v35 = vsub.f32 %v17051_v8, %v2088_v19  ;;  %v2121_v45 = vsub.f32 %v12552_v55, %v2088_v19  ;;  %1453 = vrot.lane.b32.xlu0 %v17052_v13, %s11003_s0  ;;  %v17061_v36 = vld [vmem:[#allocation91_spill] sm:$0xff] }
 0x442   :  { %v12891_v26 = vpop.eup %10550  ;;  %10570 = vpow2.f32 %v2165_v3  ;;  %v2122_v39 = vsub.f32 %v12559_v15, %v2088_v19  ;;  %2265 = vmatmul.mubr.f32.gmra.mrb[50].mxu0 %v12875_v42  ;;  %2438 = vmatprep.subr.mxu0 %v1198_v11 }
 0x443   :  { %v12895_v16 = vpop.eup %10552  ;;  %10572 = vpow2.f32 %v2167_v54  ;;  %2369 = vmatprep.mubr.f32.mxu1 %v12891_v26  ;;  %v2171_v24 = vmul.f32 1.442695, %v2119_v61  ;;  %v2173_v49 = vmul.f32 1.442695, %v2120_v35  ;;  %v2175_v20 = vmul.f32 1.442695, %v2121_v45  ;;  %2439 = vmatpush1.msra.mxu0 %v1197_v56 }
 0x444   :  { %v12898_v50 = vpop.eup %10554  ;;  %10574 = vpow2.f32 %v2169_v23  ;;  %v2177_v55 = vmul.f32 1.442695, %v2122_v39  ;;  %2370 = vmatmul.mubr.f32.gmra.mrb[50].mxu1 %v12883_v30  ;;  %v2093_v37 = vpop.xlane.xlu0 %2092  ;;  %1359 = vrot.lane.b32.xlu1 %v17053_v25, %s11003_s0  ;;  %v17064_v45 = vld [vmem:[#allocation58_spill] sm:$0xff] }
 0x445   :  { %v12903_v15 = vpop.eup %10556  ;;  %10576 = vpow2.f32 %v2171_v24  ;;  %2269 = vmatprep.mubr.f32.mxu0 %v12898_v50  ;;  %v2123_v53 = vsub.f32 %v17054_v0, %v2093_v37  ;;  %v2124_v27 = vsub.f32 %v17055_v38, %v2093_v37  ;;  %v2125_v41 = vsub.f32 %v17056_v34, %v2093_v37  ;;  %1421 = vrot.lane.b32.xlu0 %v17057_v43, %s11003_s0  ;;  %v17065_v24 = vld [vmem:[#allocation14_spill] sm:$0xff]  ;;  %v1200_v43 = vld [vmem:[%s16616_s25 + $0x18] sm:$0xff] }
 0x446   :  { %v12911_v44 = vpop.eup %10558  ;;  %10578 = vpow2.f32 %v2173_v49  ;;  %v2126_v31 = vsub.f32 %v12571_v21, %v2093_v37  ;;  %2270 = vmatmul.mubr.f32.gmra.mrb[52].mxu0 %v12895_v16  ;;  %v17059_v21 = vld [vmem:[#allocation54_spill] sm:$0xff]  ;;  %2551 = vmatprep.subr.mxu1 %v1200_v43 }
 0x447   :  { %v12915_v32 = vpop.eup %10560  ;;  %10580 = vpow2.f32 %v2175_v20  ;;  %2374 = vmatprep.mubr.f32.mxu1 %v12911_v44  ;;  %v2179_v33 = vmul.f32 1.442695, %v2123_v53  ;;  %v2181_v1 = vmul.f32 1.442695, %v2124_v27  ;;  %v2183_v5 = vmul.f32 1.442695, %v2125_v41 }
 0x448   :  { %v12918_v6 = vpop.eup %10562  ;;  %10582 = vpow2.f32 %v2177_v55  ;;  %v2185_v9 = vmul.f32 1.442695, %v2126_v31  ;;  %2375 = vmatmul.mubr.f32.gmra.mrb[52].mxu1 %v12903_v15  ;;  %v12921_v10 = vpop.permute.xlu0 %1361  ;;  %1455 = vrot.lane.b32.xlu1 %v17059_v21, %s11003_s0  ;;  %v17066_v20 = vld [vmem:[#allocation13_spill] sm:$0xff]  ;;  %v1199_v31 = vld [vmem:[%s16616_s25 + $0x10] sm:$0xff] }
 0x449   :  { %17058 = vst [vmem:[#allocation27_spill] sm:$0xff] %v12921_v10  ;;  %v2098_v12 = vpop.xlane.xlu1 %2097  ;;  %v12931_v62 = vpop.eup %10564  ;;  %10584 = vpow2.f32 %v2179_v33  ;;  %2274 = vmatprep.mubr.f32.mxu0 %v12918_v6  ;;  %v1537_v49 = vmul.f32 %v12921_v10, %v17065_v24  ;;  %2552 = vmatpush1.msra.mxu1 %v1199_v31 }
 0x44a   :  { %v2127_v4 = vsub.f32 %v17060_v63, %v2098_v12  ;;  %v12935_v51 = vpop.eup %10566  ;;  %10586 = vpow2.f32 %v2181_v1  ;;  %v2128_v3 = vsub.f32 %v17061_v36, %v2098_v12  ;;  %v2129_v54 = vsub.f32 %v12585_v18, %v2098_v12  ;;  %2275 = vmatmul.mubr.f32.gmra.mrb[54].mxu0 %v12915_v32 }
 0x44b   :  { %v2130_v23 = vsub.f32 %v12611_v59, %v2098_v12  ;;  %v12941_v19 = vpop.eup %10568  ;;  %10588 = vpow2.f32 %v2183_v5  ;;  %2379 = vmatprep.mubr.f32.mxu1 %v12935_v51 }
 0x44c   :  { %v2187_v52 = vmul.f32 1.442695, %v2127_v4  ;;  %v12944_v22 = vpop.eup %10570  ;;  %10590 = vpow2.f32 %v2185_v9  ;;  %v2189_v61 = vmul.f32 1.442695, %v2128_v3  ;;  %v2191_v8 = vmul.f32 1.442695, %v2129_v54  ;;  %2380 = vmatmul.mubr.f32.gmra.mrb[54].mxu1 %v12931_v62  ;;  %v12947_v18 = vpop.permute.xlu0 %1425  ;;  %1423 = vrot.lane.b32.xlu1 %v17064_v45, %s11003_s0 }
 0x44d   :  { %v2193_v35 = vmul.f32 1.442695, %v2130_v23  ;;  %17062 = vst [vmem:[#allocation28_spill] sm:$0xff] %v12947_v18  ;;  %v12949_v59 = vpop.permute.xlu1 %1363  ;;  %v12953_v13 = vpop.eup %10572  ;;  %2279 = vmatprep.mubr.f32.mxu0 %v12944_v22  ;;  %v1569_v23 = vmul.f32 %v12947_v18, %v17065_v24 }
 0x44e   :  { %17063 = vst [vmem:[#allocation23_spill] sm:$0xff] %v12949_v59  ;;  %10592 = vpow2.f32 %v2187_v52  ;;  %v12956_v39 = vpop.eup %10574  ;;  %v1538_v55 = vmul.f32 %v12949_v59, %v17066_v20  ;;  %2280 = vmatmul.mubr.f32.gmra.mrb[56].mxu0 %v12941_v19 }
 0x44f   :  { %10594 = vpow2.f32 %v2189_v61  ;;  %v12963_v37 = vpop.eup %10576  ;;  %2384 = vmatprep.mubr.f32.mxu1 %v12956_v39 }
 0x450   :  { %17067 = vst [vmem:[#allocation29_spill] sm:$0xff] %v12963_v37  ;;  %10596 = vpow2.f32 %v2191_v8  ;;  %v12966_v25 = vpop.eup %10578  ;;  %2385 = vmatmul.mubr.f32.gmra.mrb[56].mxu1 %v12953_v13  ;;  %v12969_v0 = vpop.permute.xlu0 %1365  ;;  %v10214_v38 = vpack.i.bf16 %v1538_v55, %v1537_v49  ;;  %v17086_v49 = vld [vmem:[#allocation17_spill] sm:$0xff] }
 0x451   :  { %10598 = vpow2.f32 %v2193_v35  ;;  %17068 = vst [vmem:[#allocation32_spill] sm:$0xff] %v12969_v0  ;;  %v12971_v53 = vpop.permute.xlu1 %1329  ;;  %v12973_v27 = vpop.eup %10580  ;;  %2284 = vmatprep.mubr.f32.mxu0 %v12966_v25  ;;  %v1539_v55 = vmul.f32 %v12969_v0, %v17086_v49 }
 0x452   :  { %17069 = vst [vmem:[#allocation30_spill] sm:$0xff] %v12971_v53  ;;  %17070 = vst [vmem:[#allocation33_spill] sm:$0xff] %v12973_v27  ;;  %v12976_v34 = vpop.eup %10582  ;;  %2285 = vmatmul.mubr.f32.gmra.mrb[58].mxu0 %v12963_v37  ;;  %10215 = vrot.lane.b32.xlu0 %v10214_v38, %s11003_s0  ;;  %v1521_v12 = vmul.f32 %v12971_v53, %v17065_v24  ;;  %v17087_v38 = vld [vmem:[#allocation15_spill] sm:$0xff] }
 0x453   :  { %17071 = vst [vmem:[#allocation34_spill] sm:$0xff] %v12976_v34  ;;  %v12980_v41 = vpop.eup %10584  ;;  %2389 = vmatprep.mubr.f32.mxu1 %v12976_v34 }
 0x454   :  { %17072 = vst [vmem:[#allocation41_spill] sm:$0xff] %v12980_v41  ;;  %v12989_v33 = vpop.eup %10586  ;;  %2390 = vmatmul.mubr.f32.gmra.mrb[58].mxu1 %v12973_v27  ;;  %v12992_v1 = vpop.permute.xlu0 %1393 }
 0x455   :  { %17073 = vst [vmem:[#allocation38_spill] sm:$0xff] %v12989_v33  ;;  %17074 = vst [vmem:[#allocation39_spill] sm:$0xff] %v12992_v1  ;;  %v12994_v5 = vpop.permute.xlu1 %1331  ;;  %v12996_v9 = vpop.eup %10588  ;;  %2289 = vmatprep.mubr.f32.mxu0 %v12989_v33 }
 0x456   :  { %17075 = vst [vmem:[#allocation42_spill] sm:$0xff] %v12994_v5  ;;  %17076 = vst [vmem:[#allocation40_spill] sm:$0xff] %v12996_v9  ;;  %v1522_v21 = vmul.f32 %v12994_v5, %v17066_v20  ;;  %v13003_v11 = vpop.eup %10590  ;;  %2290 = vmatmul.mubr.f32.gmra.mrb[60].mxu0 %v12980_v41 }
 0x457   :  { %17077 = vst [vmem:[#allocation44_spill] sm:$0xff] %v13003_v11  ;;  %2394 = vmatprep.mubr.f32.mxu1 %v13003_v11 }
 0x458   :  { %v13006_v56 = vpop.eup %10592  ;;  %v10219_v63 = vpack.i.bf16 %v1522_v21, %v1521_v12  ;;  %2395 = vmatmul.mubr.f32.gmra.mrb[60].mxu1 %v12996_v9  ;;  %v13012_v36 = vpop.permute.xlu0 %1333 }
 0x459   :  { %17078 = vst [vmem:[#allocation47_spill] sm:$0xff] %v13006_v56  ;;  %v13009_v4 = vpop.eup %10594  ;;  %17080 = vst [vmem:[#allocation45_spill] sm:$0xff] %v13012_v36  ;;  %v13014_v3 = vpop.permute.xlu1 %1427 }
 0x45a   :  { %17079 = vst [vmem:[#allocation43_spill] sm:$0xff] %v13009_v4  ;;  %17081 = vst [vmem:[#allocation48_spill] sm:$0xff] %v13014_v3  ;;  %v13016_v54 = vpop.eup %10596  ;;  %2294 = vmatprep.mubr.f32.mxu0 %v13009_v4  ;;  %v1570_v52 = vmul.f32 %v13014_v3, %v17066_v20  ;;  %10220 = vrot.lane.b32.xlu1 %v10219_v63, %s11003_s0  ;;  %v1553_v63 = vmul.f32 %v12992_v1, %v17065_v24 }
 0x45b   :  { %17082 = vst [vmem:[#allocation70_spill] sm:$0xff] %v13016_v54  ;;  %v13023_v61 = vpop.eup %10598  ;;  %2295 = vmatmul.mubr.f32.gmra.mrb[62].mxu0 %v13006_v56 }
 0x45c   :  { %17083 = vst [vmem:[#allocation52_spill] sm:$0xff] %v13023_v61  ;;  %2399 = vmatprep.mubr.f32.mxu1 %v13023_v61  ;;  %v10224_v8 = vpack.i.bf16 %v1570_v52, %v1569_v23  ;;  %v13029_v35 = vpop.permute.xlu0 %1429 }
 0x45d   :  { %2400 = vmatmul.mubr.f32.gmra.mrb[62].mxu1 %v13016_v54  ;;  %17084 = vst [vmem:[#allocation76_spill] sm:$0xff] %v13029_v35  ;;  %v13031_v45 = vpop.permute.xlu1 %1367 }
 0x45e   :  { %17085 = vst [vmem:[#allocation46_spill] sm:$0xff] %v13031_v45  ;;  %v1540_v43 = vmul.f32 %v13031_v45, %v17087_v38  ;;  %10225 = vrot.lane.b32.xlu0 %v10224_v8, %s11003_s0  ;;  %v1523_v8 = vmul.f32 %v13012_v36, %v17086_v49 }
 0x460   :  { %v10229_v31 = vpack.i.bf16 %v1540_v43, %v1539_v55  ;;  %v13038_v12 = vpop.permute.xlu0 %1369 }
 0x461   :  { %17088 = vst [vmem:[#allocation74_spill] sm:$0xff] %v13038_v12  ;;  %v13040_v21 = vpop.permute.xlu1 %1395 }
 0x462   :  { %17089 = vst [vmem:[#allocation77_spill] sm:$0xff] %v13040_v21  ;;  %v1554_v23 = vmul.f32 %v13040_v21, %v17066_v20  ;;  %10230 = vrot.lane.b32.xlu1 %v10229_v31, %s11003_s0  ;;  %v1571_v31 = vmul.f32 %v13029_v35, %v17086_v49 }
 0x464   :  { %v10234_v52 = vpack.i.bf16 %v1554_v23, %v1553_v63  ;;  %v13047_v0 = vpop.permute.xlu0 %1397 }
 0x465   :  { %17090 = vst [vmem:[#allocation79_spill] sm:$0xff] %v13047_v0  ;;  %v13049_v53 = vpop.permute.xlu1 %1335 }
 0x466   :  { %17091 = vst [vmem:[#allocation49_spill] sm:$0xff] %v13049_v53  ;;  %v1524_v55 = vmul.f32 %v13049_v53, %v17087_v38  ;;  %10235 = vrot.lane.b32.xlu0 %v10234_v52, %s11003_s0  ;;  %v17096_v53 = vld [vmem:[#allocation19_spill] sm:$0xff] }
 0x467   :  { %v1541_v52 = vmul.f32 %v13038_v12, %v17096_v53 }
 0x468   :  { %v10239_v43 = vpack.i.bf16 %v1524_v55, %v1523_v8  ;;  %v13056_v1 = vpop.permute.xlu0 %1337  ;;  %v17097_v8 = vld [vmem:[#allocation18_spill] sm:$0xff] }
 0x469   :  { %17092 = vst [vmem:[#allocation81_spill] sm:$0xff] %v13056_v1  ;;  %v13058_v45 = vpop.permute.xlu1 %1431 }
 0x46a   :  { %17093 = vst [vmem:[#allocation51_spill] sm:$0xff] %v13058_v45  ;;  %v1572_v63 = vmul.f32 %v13058_v45, %v17087_v38  ;;  %10240 = vrot.lane.b32.xlu1 %v10239_v43, %s11003_s0  ;;  %v1555_v43 = vmul.f32 %v13047_v0, %v17086_v49 }
 0x46c   :  { %v10244_v23 = vpack.i.bf16 %v1572_v63, %v1571_v31  ;;  %v13065_v36 = vpop.permute.xlu0 %1433 }
 0x46d   :  { %17094 = vst [vmem:[#allocation80_spill] sm:$0xff] %v13065_v36  ;;  %v13067_v21 = vpop.permute.xlu1 %1371 }
 0x46e   :  { %17095 = vst [vmem:[#allocation82_spill] sm:$0xff] %v13067_v21  ;;  %v1542_v55 = vmul.f32 %v13067_v21, %v17097_v8  ;;  %10245 = vrot.lane.b32.xlu0 %v10244_v23, %s11003_s0  ;;  %v1525_v23 = vmul.f32 %v13056_v1, %v17096_v53 }
 0x470   :  { %v10249_v5 = vpack.i.bf16 %v1542_v55, %v1541_v52  ;;  %v13074_v35 = vpop.permute.xlu0 %1373 }
 0x471   :  { %17098 = vst [vmem:[#allocation83_spill] sm:$0xff] %v13074_v35  ;;  %v13076_v10 = vpop.permute.xlu1 %1399 }
 0x472   :  { %17099 = vst [vmem:[#allocation56_spill] sm:$0xff] %v13076_v10  ;;  %v1556_v31 = vmul.f32 %v13076_v10, %v17087_v38  ;;  %10250 = vrot.lane.b32.xlu1 %v10249_v5, %s11003_s0  ;;  %v1573_v5 = vmul.f32 %v13065_v36, %v17096_v53 }
 0x474   :  { %v10254_v63 = vpack.i.bf16 %v1556_v31, %v1555_v43  ;;  %v13083_v12 = vpop.permute.xlu0 %1401 }
 0x475   :  { %17100 = vst [vmem:[#allocation85_spill] sm:$0xff] %v13083_v12  ;;  %v13085_v45 = vpop.permute.xlu1 %1339 }
 0x476   :  { %17101 = vst [vmem:[#allocation50_spill] sm:$0xff] %v13085_v45  ;;  %v1526_v52 = vmul.f32 %v13085_v45, %v17097_v8  ;;  %10255 = vrot.lane.b32.xlu0 %v10254_v63, %s11003_s0  ;;  %v17106_v45 = vld [vmem:[#allocation21_spill] sm:$0xff] }
 0x477   :  { %v1543_v63 = vmul.f32 %v13074_v35, %v17106_v45 }
 0x478   :  { %v10259_v55 = vpack.i.bf16 %v1526_v52, %v1525_v23  ;;  %v13092_v0 = vpop.permute.xlu0 %1341  ;;  %v17107_v23 = vld [vmem:[#allocation20_spill] sm:$0xff] }
 0x479   :  { %17102 = vst [vmem:[#allocation84_spill] sm:$0xff] %v13092_v0  ;;  %v13094_v21 = vpop.permute.xlu1 %1435 }
 0x47a   :  { %17103 = vst [vmem:[#allocation86_spill] sm:$0xff] %v13094_v21  ;;  %v1574_v43 = vmul.f32 %v13094_v21, %v17097_v8  ;;  %10260 = vrot.lane.b32.xlu1 %v10259_v55, %s11003_s0  ;;  %v1557_v55 = vmul.f32 %v13083_v12, %v17096_v53 }
 0x47c   :  { %v10264_v31 = vpack.i.bf16 %v1574_v43, %v1573_v5  ;;  %v13101_v1 = vpop.permute.xlu0 %1437 }
 0x47d   :  { %17104 = vst [vmem:[#allocation53_spill] sm:$0xff] %v13101_v1  ;;  %v13103_v10 = vpop.permute.xlu1 %1375 }
 0x47e   :  { %17105 = vst [vmem:[#allocation55_spill] sm:$0xff] %v13103_v10  ;;  %v1544_v52 = vmul.f32 %v13103_v10, %v17107_v23  ;;  %10265 = vrot.lane.b32.xlu0 %v10264_v31, %s11003_s0  ;;  %v1527_v31 = vmul.f32 %v13092_v0, %v17106_v45 }
 0x480   :  { %v10269_v18 = vpack.i.bf16 %v1544_v52, %v1543_v63  ;;  %v13110_v36 = vpop.permute.xlu0 %1377 }
 0x481   :  { %17108 = vst [vmem:[#allocation87_spill] sm:$0xff] %v13110_v36  ;;  %v13112_v59 = vpop.permute.xlu1 %1403 }
 0x482   :  { %17109 = vst [vmem:[#allocation88_spill] sm:$0xff] %v13112_v59  ;;  %v1558_v5 = vmul.f32 %v13112_v59, %v17097_v8  ;;  %10270 = vrot.lane.b32.xlu1 %v10269_v18, %s11003_s0  ;;  %v1575_v18 = vmul.f32 %v13101_v1, %v17106_v45 }
 0x484   :  { %v10274_v43 = vpack.i.bf16 %v1558_v5, %v1557_v55  ;;  %v13119_v35 = vpop.permute.xlu0 %1405 }
 0x485   :  { %17110 = vst [vmem:[#allocation89_spill] sm:$0xff] %v13119_v35  ;;  %v13121_v21 = vpop.permute.xlu1 %1343 }
 0x486   :  { %17111 = vst [vmem:[#allocation57_spill] sm:$0xff] %v13121_v21  ;;  %v1528_v63 = vmul.f32 %v13121_v21, %v17107_v23  ;;  %10275 = vrot.lane.b32.xlu0 %v10274_v43, %s11003_s0  ;;  %v1545_v43 = vmul.f32 %v13110_v36, %v17065_v24 }
 0x488   :  { %v10279_v52 = vpack.i.bf16 %v1528_v63, %v1527_v31  ;;  %v13128_v12 = vpop.permute.xlu0 %1345 }
 0x489   :  { %17112 = vst [vmem:[#allocation54_spill] sm:$0xff] %v13128_v12  ;;  %v13130_v10 = vpop.permute.xlu1 %1439 }
 0x48a   :  { %17113 = vst [vmem:[#allocation90_spill] sm:$0xff] %v13130_v10  ;;  %v1576_v55 = vmul.f32 %v13130_v10, %v17107_v23  ;;  %10280 = vrot.lane.b32.xlu1 %v10279_v52, %s11003_s0  ;;  %v1559_v52 = vmul.f32 %v13119_v35, %v17106_v45 }
 0x48c   :  { %v10284_v5 = vpack.i.bf16 %v1576_v55, %v1575_v18  ;;  %v13137_v0 = vpop.permute.xlu0 %1441 }
 0x48d   :  { %17114 = vst [vmem:[#allocation91_spill] sm:$0xff] %v13137_v0  ;;  %v13139_v59 = vpop.permute.xlu1 %1379 }
 0x48e   :  { %17115 = vst [vmem:[#allocation58_spill] sm:$0xff] %v13139_v59  ;;  %v1546_v31 = vmul.f32 %v13139_v59, %v17066_v20  ;;  %10285 = vrot.lane.b32.xlu0 %v10284_v5, %s11003_s0  ;;  %v1529_v5 = vmul.f32 %v13128_v12, %v17065_v24 }
 0x490   :  { %v10289_v63 = vpack.i.bf16 %v1546_v31, %v1545_v43  ;;  %v13146_v1 = vpop.permute.xlu0 %1381 }
 0x491   :  { %17116 = vst [vmem:[#allocation14_spill] sm:$0xff] %v13146_v1  ;;  %v13148_v21 = vpop.permute.xlu1 %1407 }
 0x492   :  { %17117 = vst [vmem:[#allocation13_spill] sm:$0xff] %v13148_v21  ;;  %v1560_v18 = vmul.f32 %v13148_v21, %v17107_v23  ;;  %10290 = vrot.lane.b32.xlu1 %v10289_v63, %s11003_s0  ;;  %v1577_v63 = vmul.f32 %v13137_v0, %v17065_v24 }
 0x494   :  { %v10294_v55 = vpack.i.bf16 %v1560_v18, %v1559_v52  ;;  %v13155_v36 = vpop.permute.xlu0 %1409 }
 0x495   :  { %17118 = vst [vmem:[#allocation17_spill] sm:$0xff] %v13155_v36  ;;  %v13157_v10 = vpop.permute.xlu1 %1347 }
 0x496   :  { %17119 = vst [vmem:[#allocation15_spill] sm:$0xff] %v13157_v10  ;;  %v1530_v43 = vmul.f32 %v13157_v10, %v17066_v20  ;;  %10295 = vrot.lane.b32.xlu0 %v10294_v55, %s11003_s0  ;;  %v1547_v55 = vmul.f32 %v13146_v1, %v17086_v49 }
 0x498   :  { %v10299_v31 = vpack.i.bf16 %v1530_v43, %v1529_v5  ;;  %v13164_v35 = vpop.permute.xlu0 %1349 }
 0x499   :  { %17120 = vst [vmem:[#allocation19_spill] sm:$0xff] %v13164_v35  ;;  %v13166_v59 = vpop.permute.xlu1 %1443 }
 0x49a   :  { %17121 = vst [vmem:[#allocation18_spill] sm:$0xff] %v13166_v59  ;;  %v1578_v52 = vmul.f32 %v13166_v59, %v17066_v20  ;;  %10300 = vrot.lane.b32.xlu1 %v10299_v31, %s11003_s0  ;;  %v1561_v31 = vmul.f32 %v13155_v36, %v17065_v24  ;;  %v16777_v24 = vmov 0.0  }
 0x49b   :  { %2502 = vmatprep.mubr.f32.mxu0 %v16777_v24  ;;  %2615 = vmatprep.mubr.f32.mxu1 %v16777_v24 }
 0x49c   :  { %v10304_v18 = vpack.i.bf16 %v1578_v52, %v1577_v63  ;;  %v13173_v12 = vpop.permute.xlu0 %1445 }
 0x49d   :  { %17122 = vst [vmem:[#allocation21_spill] sm:$0xff] %v13173_v12  ;;  %v13175_v21 = vpop.permute.xlu1 %1383 }
 0x49e   :  { %17123 = vst [vmem:[#allocation20_spill] sm:$0xff] %v13175_v21  ;;  %v1548_v5 = vmul.f32 %v13175_v21, %v17087_v38  ;;  %10305 = vrot.lane.b32.xlu0 %v10304_v18, %s11003_s0  ;;  %v1531_v18 = vmul.f32 %v13164_v35, %v17086_v49 }
 0x4a0   :  { %v10309_v43 = vpack.i.bf16 %v1548_v5, %v1547_v55  ;;  %v13182_v0 = vpop.permute.xlu0 %1385 }
 0x4a1   :  { %17124 = vst [vmem:[#allocation108_spill] sm:$0xff] %v13182_v0  ;;  %v13184_v10 = vpop.permute.xlu1 %1411 }
 0x4a2   :  { %17125 = vst [vmem:[#allocation109_spill] sm:$0xff] %v13184_v10  ;;  %v1562_v63 = vmul.f32 %v13184_v10, %v17066_v20  ;;  %10310 = vrot.lane.b32.xlu1 %v10309_v43, %s11003_s0 }
 0x4a4   :  { %v10314_v52 = vpack.i.bf16 %v1562_v63, %v1561_v31  ;;  %v13191_v1 = vpop.permute.xlu0 %1413  ;;  %v1579_v31 = vmul.f32 %v13173_v12, %v17086_v49 }
 0x4a5   :  { %17126 = vst [vmem:[#allocation110_spill] sm:$0xff] %v13191_v1  ;;  %v13193_v59 = vpop.permute.xlu1 %1351 }
 0x4a6   :  { %17127 = vst [vmem:[#allocation111_spill] sm:$0xff] %v13193_v59  ;;  %v1532_v55 = vmul.f32 %v13193_v59, %v17087_v38  ;;  %10315 = vrot.lane.b32.xlu0 %v10314_v52, %s11003_s0 }
 0x4a8   :  { %v10319_v5 = vpack.i.bf16 %v1532_v55, %v1531_v18  ;;  %v13202_v20 = vpop.permute.xlu0 %1353  ;;  %v1549_v55 = vmul.f32 %v13182_v0, %v17096_v53 }
 0x4a9   :  { %17128 = vst [vmem:[#allocation112_spill] sm:$0xff] %v13202_v20  ;;  %v13204_v43 = vpop.permute.xlu1 %1447 }
 0x4aa   :  { %17129 = vst [vmem:[#allocation113_spill] sm:$0xff] %v13204_v43  ;;  %v1580_v63 = vmul.f32 %v13204_v43, %v17087_v38  ;;  %10320 = vrot.lane.b32.xlu1 %v10319_v5, %s11003_s0  ;;  %v1563_v5 = vmul.f32 %v13191_v1, %v17086_v49 }
 0x4ac   :  { %v10324_v35 = vpack.i.bf16 %v1580_v63, %v1579_v31  ;;  %v13211_v52 = vpop.permute.xlu0 %1449 }
 0x4ad   :  { %17130 = vst [vmem:[#allocation114_spill] sm:$0xff] %v13211_v52  ;;  %v13213_v18 = vpop.permute.xlu1 %1387 }
 0x4ae   :  { %17131 = vst [vmem:[#allocation115_spill] sm:$0xff] %v13213_v18  ;;  %v1550_v24 = vmul.f32 %v13213_v18, %v17097_v8  ;;  %10325 = vrot.lane.b32.xlu0 %v10324_v35, %s11003_s0  ;;  %v1533_v35 = vmul.f32 %v13202_v20, %v17096_v53 }
 0x4b0   :  { %v10329_v36 = vpack.i.bf16 %v1550_v24, %v1549_v55  ;;  %v13220_v12 = vpop.permute.xlu0 %1389 }
 0x4b1   :  { %17132 = vst [vmem:[#allocation116_spill] sm:$0xff] %v13220_v12  ;;  %v13222_v59 = vpop.permute.xlu1 %1415 }
 0x4b2   :  { %17133 = vst [vmem:[#allocation117_spill] sm:$0xff] %v13222_v59  ;;  %v1564_v31 = vmul.f32 %v13222_v59, %v17087_v38  ;;  %10330 = vrot.lane.b32.xlu1 %v10329_v36, %s11003_s0  ;;  %v1581_v36 = vmul.f32 %v13211_v52, %v17096_v53 }
 0x4b4   :  { %v10334_v63 = vpack.i.bf16 %v1564_v31, %v1563_v5  ;;  %v13229_v0 = vpop.permute.xlu0 %1417 }
 0x4b5   :  { %17134 = vst [vmem:[#allocation118_spill] sm:$0xff] %v13229_v0  ;;  %v13231_v43 = vpop.permute.xlu1 %1355 }
 0x4b6   :  { %17135 = vst [vmem:[#allocation119_spill] sm:$0xff] %v13231_v43  ;;  %v1534_v24 = vmul.f32 %v13231_v43, %v17097_v8  ;;  %10335 = vrot.lane.b32.xlu0 %v10334_v63, %s11003_s0  ;;  %v1551_v63 = vmul.f32 %v13220_v12, %v17106_v45 }
 0x4b8   :  { %v10339_v55 = vpack.i.bf16 %v1534_v24, %v1533_v35  ;;  %v13238_v49 = vpop.permute.xlu0 %1357 }
 0x4b9   :  { %17136 = vst [vmem:[#allocation120_spill] sm:$0xff] %v13238_v49  ;;  %v13240_v1 = vpop.permute.xlu1 %1451 }
 0x4ba   :  { %17137 = vst [vmem:[#allocation121_spill] sm:$0xff] %v13240_v1  ;;  %v1582_v38 = vmul.f32 %v13240_v1, %v17097_v8  ;;  %10340 = vrot.lane.b32.xlu1 %v10339_v55, %s11003_s0  ;;  %v1565_v55 = vmul.f32 %v13229_v0, %v17096_v53 }
 0x4bc   :  { %v10344_v5 = vpack.i.bf16 %v1582_v38, %v1581_v36  ;;  %v13247_v31 = vpop.permute.xlu0 %1453 }
 0x4bd   :  { %17138 = vst [vmem:[#allocation122_spill] sm:$0xff] %v13247_v31  ;;  %v13249_v20 = vpop.permute.xlu1 %1391 }
 0x4be   :  { %17139 = vst [vmem:[#allocation123_spill] sm:$0xff] %v13249_v20  ;;  %v1552_v35 = vmul.f32 %v13249_v20, %v17107_v23  ;;  %10345 = vrot.lane.b32.xlu0 %v10344_v5, %s11003_s0  ;;  %v1535_v5 = vmul.f32 %v13238_v49, %v17106_v45 }
 0x4c0   :  { %v10349_v24 = vpack.i.bf16 %v1552_v35, %v1551_v63  ;;  %v13256_v52 = vpop.permute.xlu0 %1421 }
 0x4c1   :  { %17140 = vst [vmem:[#allocation124_spill] sm:$0xff] %v13256_v52  ;;  %v13258_v43 = vpop.permute.xlu1 %1419 }
 0x4c2   :  { %17141 = vst [vmem:[#allocation125_spill] sm:$0xff] %v13258_v43  ;;  %v1566_v36 = vmul.f32 %v13258_v43, %v17097_v8  ;;  %10350 = vrot.lane.b32.xlu1 %v10349_v24, %s11003_s0  ;;  %v1583_v8 = vmul.f32 %v13247_v31, %v17106_v45 }
 0x4c4   :  { %v10354_v38 = vpack.i.bf16 %v1566_v36, %v1565_v55  ;;  %v10216_v12 = vpop.permute.xlu0 %10215  ;;  %v1567_v36 = vmul.f32 %v13256_v52, %v17106_v45 }
 0x4c5   :  { %v13265_v1 = vpop.permute.xlu1 %1359  ;;  %v10218_v63 = vunpack.i.h.bf16 %v10216_v12  ;;  %v10217_v35 = vunpack.i.l.bf16 %v10216_v12 }
 0x4c6   :  { %17142 = vst [vmem:[#allocation126_spill] sm:$0xff] %v13265_v1  ;;  %v1536_v20 = vmul.f32 %v13265_v1, %v17107_v23  ;;  %10355 = vrot.lane.b32.xlu0 %v10354_v38, %s11003_s0 }
 0x4c7   :  { %v9792_v0 = vpack.c.bf16 %v10218_v63, %v10217_v35 }
 0x4c8   :  { %v10359_v53 = vpack.i.bf16 %v1536_v20, %v1535_v5 }
 0x4c9   :  { %v13272_v59 = vpop.permute.xlu1 %1455  ;;  %9793 = vmatprep.subr.bf16.mxu0 %v9792_v0 }
 0x4ca   :  { %17143 = vst [vmem:[#allocation127_spill] sm:$0xff] %v13272_v59  ;;  %v1584_v24 = vmul.f32 %v13272_v59, %v17107_v23  ;;  %10360 = vrot.lane.b32.xlu1 %v10359_v53, %s11003_s0 }
 0x4cc   :  { %v10364_v55 = vpack.i.bf16 %v1584_v24, %v1583_v8 }
 0x4cd   :  { %v13279_v12 = vpop.permute.xlu1 %1423 }
 0x4ce   :  { %17144 = vst [vmem:[#allocation128_spill] sm:$0xff] %v13279_v12  ;;  %v1568_v20 = vmul.f32 %v13279_v12, %v17107_v23  ;;  %10365 = vrot.lane.b32.xlu0 %v10364_v55, %s11003_s0 }
 0x4d0   :  { %v10369_v38 = vpack.i.bf16 %v1568_v20, %v1567_v36  ;;  %v10226_v5 = vpop.permute.xlu0 %10225 }
 0x4d1   :  { %v10228_v63 = vunpack.i.h.bf16 %v10226_v5  ;;  %v10227_v35 = vunpack.i.l.bf16 %v10226_v5  ;;  %v10221_v53 = vpop.permute.xlu1 %10220 }
 0x4d2   :  { %10370 = vrot.lane.b32.xlu1 %v10369_v38, %s11003_s0 }
 0x4d3   :  { %v9824_v0 = vpack.c.bf16 %v10228_v63, %v10227_v35 }
 0x4d5   :  { %9825 = vmatprep.subr.bf16.mxu1 %v9824_v0  ;;  %v13287_v24 = vpop.permute.xlu1 %10230 }
 0x4d8   :  { %v10236_v8 = vpop.permute.xlu0 %10235 }
 0x4d9   :  { %v10238_v40 = vunpack.i.h.bf16 %v10236_v8  ;;  %v10237_v57 = vunpack.i.l.bf16 %v10236_v8 }
 0x4dc   :  { %v13291_v45 = vpop.permute.xlu1 %10240 }
 0x4e0   :  { %v13289_v31 = vpop.permute.xlu0 %10245 }
 0x4e1   :  { %v10248_v56 = vunpack.i.h.bf16 %v13289_v31 }
 0x4e4   :  { %v13295_v23 = vpop.permute.xlu1 %10250 }
 0x4e8   :  { %v13293_v52 = vpop.permute.xlu0 %10255 }
 0x4ec   :  { %v13299_v36 = vpop.permute.xlu1 %10260 }
 0x4f0   :  { %v13297_v55 = vpop.permute.xlu0 %10265 }
 0x4f4   :  { %v13303_v12 = vpop.permute.xlu1 %10270 }
 0x4f8   :  { %v13301_v35 = vpop.permute.xlu0 %10275 }
 0x4f9   :  { %v10278_v4 = vunpack.i.h.bf16 %v13301_v35  ;;  %v10277_v9 = vunpack.i.l.bf16 %v13301_v35 }
 0x4fc   :  { %v13307_v60 = vpop.permute.xlu1 %10280 }
 0x500   :  { %v13305_v21 = vpop.permute.xlu0 %10285 }
 0x508   :  { %v13309_v17 = vpop.permute.xlu0 %10295 }
 0x511   :  { %v8607_v20 = vpop.f32.mrb[48].mxu0 }
 0x512   :  { %v8608_v38 = vpop.f32.mrb[49].mxu0 }
 0x513   :  { %v8663_v5 = vpop.f32.mrb[48].mxu1  ;;  %v8609_v63 = vadd.f32 %v8608_v38, %v8607_v20  ;;  %v10223_v20 = vunpack.i.h.bf16 %v10221_v53  ;;  %v10222_v38 = vunpack.i.l.bf16 %v10221_v53  ;;  %v9826_v53 = vpack.c.bf16 %v10238_v40, %v10237_v57 }
 0x514   :  { %v8664_v0 = vpop.f32.mrb[49].mxu1  ;;  %v10258_v57 = vunpack.i.h.bf16 %v13293_v52  ;;  %v10257_v40 = vunpack.i.l.bf16 %v13293_v52 }
 0x515   :  { %v8665_v59 = vadd.f32 %v8664_v0, %v8663_v5  ;;  %v8610_v49 = vpop.f32.mrb[50].mxu0 }
 0x516   :  { %v8611_v1 = vpop.f32.mrb[51].mxu0 }
 0x517   :  { %v2367_v43 = vadd.f32 %v8665_v59, %v8609_v63  ;;  %v8666_v18 = vpop.f32.mrb[50].mxu1  ;;  %v8612_v10 = vadd.f32 %v8611_v1, %v8610_v49  ;;  %v13311_v1 = vpop.permute.xlu1 %10290 }
 0x518   :  { %v8667_v3 = vpop.f32.mrb[51].mxu1 }
 0x519   :  { %10600 = vrcp.f32 %v2367_v43  ;;  %v8668_v2 = vadd.f32 %v8667_v3, %v8666_v18  ;;  %v8613_v58 = vpop.f32.mrb[52].mxu0  ;;  %v9794_v43 = vpack.c.bf16 %v10223_v20, %v10222_v38  ;;  %v10233_v3 = vunpack.i.h.bf16 %v13287_v24  ;;  %v13321_v38 = vpop.permute.xlu0 %10305 }
 0x51a   :  { %v8614_v14 = vpop.f32.mrb[53].mxu0  ;;  %v10232_v18 = vunpack.i.l.bf16 %v13287_v24  ;;  %v10252_v20 = vunpack.i.l.bf16 %v13295_v23 }
 0x51b   :  { %v2372_v28 = vadd.f32 %v8668_v2, %v8612_v10  ;;  %v8669_v5 = vpop.f32.mrb[52].mxu1  ;;  %v8615_v0 = vadd.f32 %v8614_v14, %v8613_v58  ;;  %v10243_v2 = vunpack.i.h.bf16 %v13291_v45  ;;  %v10242_v58 = vunpack.i.l.bf16 %v13291_v45 }
 0x51c   :  { %v8670_v59 = vpop.f32.mrb[53].mxu1 }
 0x51d   :  { %10602 = vrcp.f32 %v2372_v28  ;;  %v8671_v49 = vadd.f32 %v8670_v59, %v8669_v5  ;;  %v8616_v63 = vpop.f32.mrb[54].mxu0  ;;  %v10247_v28 = vunpack.i.l.bf16 %v13289_v31  ;;  %v10253_v5 = vunpack.i.h.bf16 %v13295_v23  ;;  %v13325_v59 = vpop.permute.xlu1 %10300 }
 0x51e   :  { %v8617_v8 = vpop.f32.mrb[55].mxu0  ;;  %v10262_v31 = vunpack.i.l.bf16 %v13299_v36  ;;  %v10267_v23 = vunpack.i.l.bf16 %v13297_v55  ;;  %v9798_v33 = vpack.c.bf16 %v10243_v2, %v10242_v58  ;;  %v17145_v58 = vmov 0.0  }
 0x51f   :  { %v2377_v14 = vadd.f32 %v8671_v49, %v8615_v0  ;;  %v8672_v10 = vpop.f32.mrb[54].mxu1  ;;  %v8618_v54 = vadd.f32 %v8617_v8, %v8616_v63  ;;  %v10263_v49 = vunpack.i.h.bf16 %v13299_v36  ;;  %v10268_v63 = vunpack.i.h.bf16 %v13297_v55 }
 0x520   :  { %v8673_v24 = vpop.f32.mrb[55].mxu1  ;;  %v9796_v36 = vpack.c.bf16 %v10233_v3, %v10232_v18  ;;  %v9834_v3 = vpack.c.bf16 %v10278_v4, %v10277_v9  ;;  %v10292_v9 = vunpack.i.l.bf16 %v13311_v1  ;;  %v10298_v4 = vunpack.i.h.bf16 %v13309_v17 }
 0x521   :  { %10604 = vrcp.f32 %v2377_v14  ;;  %v8674_v45 = vadd.f32 %v8673_v24, %v8672_v10  ;;  %v8619_v0 = vpop.f32.mrb[56].mxu0  ;;  %v13333_v14 = vpop.permute.xlu0 %10315  ;;  %v9828_v24 = vpack.c.bf16 %v10248_v56, %v10247_v28  ;;  %v9832_v34 = vpack.c.bf16 %v10268_v63, %v10267_v23 }
 0x522   :  { %v8620_v8 = vpop.f32.mrb[57].mxu0  ;;  %v13337_v55 = vpop.permute.xlu1 %10310  ;;  %v10272_v56 = vunpack.i.l.bf16 %v13303_v12  ;;  %v10288_v28 = vunpack.i.h.bf16 %v13305_v21  ;;  %v10307_v63 = vunpack.i.l.bf16 %v13321_v38 }
 0x523   :  { %v10601_v61 = vpop.eup %10600  ;;  %v2382_v52 = vadd.f32 %v8674_v45, %v8618_v54  ;;  %v8675_v41 = vpop.f32.mrb[56].mxu1  ;;  %v8621_v11 = vadd.f32 %v8620_v8, %v8619_v0  ;;  %v9800_v54 = vpack.c.bf16 %v10253_v5, %v10252_v20  ;;  %v9830_v45 = vpack.c.bf16 %v10258_v57, %v10257_v40 }
 0x524   :  { %v8676_v10 = vpop.f32.mrb[57].mxu1  ;;  %8213 = vmatmul.mubr.msk.f32.vlgmr.msra.gmra.mrb[64].mxu0 %vm2413_vm4, %v10601_v61  ;;  %8221 = vmatmul.mubr.msk.f32.vlgmr.msra.gmra.mrb[64].mxu1 %vm2413_vm4, %v10601_v61  ;;  %v9802_v0 = vpack.c.bf16 %v10263_v49, %v10262_v31  ;;  %v10273_v8 = vunpack.i.h.bf16 %v13303_v12  ;;  %v10287_v5 = vunpack.i.l.bf16 %v13305_v21  ;;  %v10297_v21 = vunpack.i.l.bf16 %v13309_v17 }
 0x525   :  { %10606 = vrcp.f32 %v2382_v52  ;;  %v8677_v27 = vadd.f32 %v8676_v10, %v8675_v41  ;;  %9795 = vmatpush3.bf16.msra.mxu0 %v9794_v43  ;;  %9827 = vmatpush3.bf16.msra.mxu1 %v9826_v53  ;;  %v8622_v35 = vpop.f32.mrb[58].mxu0  ;;  %v10283_v43 = vunpack.i.h.bf16 %v13307_v60  ;;  %v10282_v53 = vunpack.i.l.bf16 %v13307_v60  ;;  %v13347_v20 = vpop.permute.xlu0 %10325 }
 0x526   :  { %9797 = vmatprep.subr.bf16.mxu0 %v9796_v36  ;;  %9829 = vmatprep.subr.bf16.mxu1 %v9828_v24  ;;  %v8623_v37 = vpop.f32.mrb[59].mxu0  ;;  %v10303_v12 = vunpack.i.h.bf16 %v13325_v59  ;;  %v10302_v40 = vunpack.i.l.bf16 %v13325_v59  ;;  %v9836_v59 = vpack.c.bf16 %v10288_v28, %v10287_v5  ;;  %v10318_v24 = vunpack.i.h.bf16 %v13333_v14 }
 0x527   :  { %v10603_v61 = vpop.eup %10602  ;;  %v2387_v18 = vadd.f32 %v8677_v27, %v8621_v11  ;;  %v8678_v2 = vpop.f32.mrb[58].mxu1  ;;  %2508 = vmatprep.mubr.f32.mxu0 %v17145_v58  ;;  %2621 = vmatprep.mubr.f32.mxu1 %v17145_v58  ;;  %v8624_v41 = vadd.f32 %v8623_v37, %v8622_v35  ;;  %v10293_v27 = vunpack.i.h.bf16 %v13311_v1  ;;  %v10308_v1 = vunpack.i.h.bf16 %v13321_v38 }
 0x528   :  { %v8679_v57 = vpop.f32.mrb[59].mxu1  ;;  %8214 = vmatmul.mubr.msk.f32.gmra.mrb[66].mxu0 %vm2413_vm4, %v10603_v61  ;;  %8222 = vmatmul.mubr.msk.f32.gmra.mrb[66].mxu1 %vm2413_vm4, %v10603_v61  ;;  %v13353_v37 = vpop.permute.xlu1 %10320  ;;  %v9806_v17 = vpack.c.bf16 %v10283_v43, %v10282_v53  ;;  %v10317_v38 = vunpack.i.l.bf16 %v13333_v14  ;;  %v9838_v61 = vpack.c.bf16 %v10298_v4, %v10297_v21  ;;  %v10313_v28 = vunpack.i.h.bf16 %v13337_v55 }
 0x529   :  { %10608 = vrcp.f32 %v2387_v18  ;;  %v8680_v11 = vadd.f32 %v8679_v57, %v8678_v2  ;;  %9799 = vmatpush3.bf16.msra.mxu0 %v9798_v33  ;;  %9831 = vmatpush3.bf16.msra.mxu1 %v9830_v45  ;;  %v8625_v60 = vpop.f32.mrb[60].mxu0  ;;  %v13363_v10 = vpop.permute.xlu0 %10335  ;;  %v9810_v18 = vpack.c.bf16 %v10303_v12, %v10302_v40  ;;  %v10327_v5 = vunpack.i.l.bf16 %v13347_v20 }
 0x52a   :  { %9801 = vmatprep.subr.bf16.mxu0 %v9800_v54  ;;  %9833 = vmatprep.subr.bf16.mxu1 %v9832_v34  ;;  %v8626_v49 = vpop.f32.mrb[61].mxu0  ;;  %v9804_v34 = vpack.c.bf16 %v10273_v8, %v10272_v56  ;;  %v9840_v56 = vpack.c.bf16 %v10308_v1, %v10307_v63 }
 0x52b   :  { %v10605_v31 = vpop.eup %10604  ;;  %v2392_v23 = vadd.f32 %v8680_v11, %v8624_v41  ;;  %v8681_v33 = vpop.f32.mrb[60].mxu1  ;;  %2514 = vmatprep.mubr.f32.mxu0 %v17145_v58  ;;  %2627 = vmatprep.mubr.f32.mxu1 %v17145_v58  ;;  %v8627_v52 = vadd.f32 %v8626_v49, %v8625_v60  ;;  %v9808_v41 = vpack.c.bf16 %v10293_v27, %v10292_v9  ;;  %v10323_v11 = vunpack.i.h.bf16 %v13353_v37 }
 0x52c   :  { %v8682_v36 = vpop.f32.mrb[61].mxu1  ;;  %8215 = vmatmul.mubr.msk.f32.gmra.mrb[68].mxu0 %vm2413_vm4, %v10605_v31  ;;  %8223 = vmatmul.mubr.msk.f32.gmra.mrb[68].mxu1 %vm2413_vm4, %v10605_v31  ;;  %v10331_v35 = vpop.permute.xlu1 %10330  ;;  %v9842_v9 = vpack.c.bf16 %v10318_v24, %v10317_v38  ;;  %v10337_v49 = vunpack.i.l.bf16 %v13363_v10 }
 0x52d   :  { %10610 = vrcp.f32 %v2392_v23  ;;  %v8683_v54 = vadd.f32 %v8682_v36, %v8681_v33  ;;  %9803 = vmatpush3.bf16.msra.mxu0 %v9802_v0  ;;  %9835 = vmatpush3.bf16.msra.mxu1 %v9834_v3  ;;  %v10312_v0 = vunpack.i.l.bf16 %v13337_v55  ;;  %v10328_v3 = vunpack.i.h.bf16 %v13347_v20 }
 0x52e   :  { %v8628_v45 = vpop.f32.mrb[62].mxu0  ;;  %9805 = vmatprep.subr.bf16.mxu0 %v9804_v34  ;;  %9837 = vmatprep.subr.bf16.mxu1 %v9836_v59  ;;  %v10322_v55 = vunpack.i.l.bf16 %v13353_v37  ;;  %v10333_v21 = vunpack.i.h.bf16 %v10331_v35  ;;  %v10332_v12 = vunpack.i.l.bf16 %v10331_v35  ;;  %v10338_v20 = vunpack.i.h.bf16 %v13363_v10 }
 0x52f   :  { %v8629_v2 = vpop.f32.mrb[63].mxu0  ;;  %v10607_v43 = vpop.eup %10606  ;;  %v2397_v53 = vadd.f32 %v8683_v54, %v8627_v52  ;;  %2520 = vmatprep.mubr.f32.mxu0 %v17145_v58  ;;  %2633 = vmatprep.mubr.f32.mxu1 %v17145_v58  ;;  %v9812_v37 = vpack.c.bf16 %v10313_v28, %v10312_v0  ;;  %v9844_v23 = vpack.c.bf16 %v10328_v3, %v10327_v5  ;;  %v10905_v3 = vld [vmem:[%s16614_s23 + $0x88] sm:$0xff] }
 0x530   :  { %v8684_v8 = vpop.f32.mrb[62].mxu1  ;;  %v8630_v14 = vadd.f32 %v8629_v2, %v8628_v45  ;;  %8216 = vmatmul.mubr.msk.f32.gmra.mrb[70].mxu0 %vm2413_vm4, %v10607_v43  ;;  %8224 = vmatmul.mubr.msk.f32.gmra.mrb[70].mxu1 %vm2413_vm4, %v10607_v43  ;;  %v10346_v27 = vpop.permute.xlu0 %10345  ;;  %v9814_v52 = vpack.c.bf16 %v10323_v11, %v10322_v55  ;;  %v9846_v36 = vpack.c.bf16 %v10338_v20, %v10337_v49  ;;  %v17147_v5 = vld [vmem:[#allocation22_spill] sm:$0xff] }
 0x531   :  { %v8685_v57 = vpop.f32.mrb[63].mxu1  ;;  %10612 = vrcp.f32 %v2397_v53  ;;  %v10341_v60 = vpop.permute.xlu1 %10340  ;;  %9807 = vmatpush3.bf16.msra.mxu0 %v9806_v17  ;;  %9839 = vmatpush3.bf16.msra.mxu1 %v9838_v61  ;;  %v10348_v1 = vunpack.i.h.bf16 %v10346_v27  ;;  %v10347_v63 = vunpack.i.l.bf16 %v10346_v27  ;;  %v9816_v17 = vpack.c.bf16 %v10333_v21, %v10332_v12  ;;  %v10904_v53 = vld [vmem:[%s16614_s23 + $0x80] sm:$0xff]  ;;  %v17171_v21 = vld [vmem:[#allocation62_spill] sm:$0xff] }
 0x532   :  { %v8686_v4 = vadd.f32 %v8685_v57, %v8684_v8  ;;  %9809 = vmatprep.subr.bf16.mxu0 %v9808_v41  ;;  %9841 = vmatprep.subr.bf16.mxu1 %v9840_v56  ;;  %v10343_v34 = vunpack.i.h.bf16 %v10341_v60  ;;  %v10342_v59 = vunpack.i.l.bf16 %v10341_v60  ;;  %v17146_v8 = vld [vmem:[#allocation24_spill] sm:$0xff]  ;;  %v3179_v57 = vmul.f32 %v10905_v3, %v17147_v5 }
 0x533   :  { %v10609_v40 = vpop.eup %10608  ;;  %2526 = vmatprep.mubr.f32.mxu0 %v17145_v58  ;;  %2639 = vmatprep.mubr.f32.mxu1 %v17145_v58  ;;  %v9848_v24 = vpack.c.bf16 %v10348_v1, %v10347_v63 }
 0x534   :  { %v2402_v31 = vadd.f32 %v8686_v4, %v8630_v14  ;;  %8217 = vmatmul.mubr.msk.f32.gmra.mrb[72].mxu0 %vm2413_vm4, %v10609_v40  ;;  %8225 = vmatmul.mubr.msk.f32.gmra.mrb[72].mxu1 %vm2413_vm4, %v10609_v40  ;;  %v9818_v2 = vpack.c.bf16 %v10343_v34, %v10342_v59  ;;  %v3178_v14 = vmul.f32 %v10904_v53, %v17146_v8  ;;  %v10906_v40 = vld [vmem:[%s16614_s23 + $0x180] sm:$0xff]  ;;  %v10909_v34 = vld [vmem:[%s16614_s23 + $0x8] sm:$0xff] }
 0x535   :  { %9811 = vmatpush3.bf16.msra.mxu0 %v9810_v18  ;;  %9843 = vmatpush3.bf16.msra.mxu1 %v9842_v9  ;;  %v10351_v33 = vpop.permute.xlu1 %10350  ;;  %v3210_v49 = vmul.f32 %v10906_v40, %v17146_v8  ;;  %v3163_v59 = vmul.f32 %v10909_v34, %v17147_v5  ;;  %v17150_v53 = vld [vmem:[#allocation25_spill] sm:$0xff] }
 0x536   :  { %10614 = vrcp.f32 %v2402_v31  ;;  %9813 = vmatprep.subr.bf16.mxu0 %v9812_v37  ;;  %9845 = vmatprep.subr.bf16.mxu1 %v9844_v23  ;;  %v10353_v35 = vunpack.i.h.bf16 %v10351_v33  ;;  %v10352_v54 = vunpack.i.l.bf16 %v10351_v33  ;;  %v9856_v55 = vpack.c.bf16 %v3179_v57, %v3178_v14  ;;  %v10907_v31 = vld [vmem:[%s16614_s23 + $0x188] sm:$0xff] }
 0x537   :  { %v10611_v10 = vpop.eup %10610  ;;  %2532 = vmatprep.mubr.f32.mxu0 %v17145_v58  ;;  %2645 = vmatprep.mubr.f32.mxu1 %v17145_v58  ;;  %v3211_v1 = vmul.f32 %v10907_v31, %v17147_v5 }
 0x538   :  { %v10356_v38 = vpop.permute.xlu0 %10355  ;;  %8218 = vmatmul.mubr.msk.f32.gmra.mrb[74].mxu0 %vm2413_vm4, %v10611_v10  ;;  %8226 = vmatmul.mubr.msk.f32.gmra.mrb[74].mxu1 %vm2413_vm4, %v10611_v10  ;;  %v9820_v56 = vpack.c.bf16 %v10353_v35, %v10352_v54  ;;  %v10908_v10 = vld [vmem:[%s16614_s23] sm:$0xff]  ;;  %v10911_v35 = vld [vmem:[%s16614_s23 + $0x108] sm:$0xff] }
 0x539   :  { %v10358_v45 = vunpack.i.h.bf16 %v10356_v38  ;;  %v10357_v61 = vunpack.i.l.bf16 %v10356_v38  ;;  %9815 = vmatpush3.bf16.msra.mxu0 %v9814_v52  ;;  %9847 = vmatpush3.bf16.msra.mxu1 %v9846_v36  ;;  %v9904_v33 = vpack.c.bf16 %v3211_v1, %v3210_v49  ;;  %v3162_v36 = vmul.f32 %v10908_v10, %v17146_v8  ;;  %v17151_v10 = vld [vmem:[#allocation35_spill] sm:$0xff] }
 0x53a   :  { %9817 = vmatprep.subr.bf16.mxu0 %v9816_v17  ;;  %9849 = vmatprep.subr.bf16.mxu1 %v9848_v24  ;;  %v10910_v24 = vld [vmem:[%s16614_s23 + $0x100] sm:$0xff]  ;;  %v3195_v54 = vmul.f32 %v10911_v35, %v17147_v5 }
 0x53b   :  { %v10613_v18 = vpop.eup %10612  ;;  %v9850_v41 = vpack.c.bf16 %v10358_v45, %v10357_v61  ;;  %2538 = vmatprep.mubr.f32.mxu0 %v17145_v58  ;;  %2651 = vmatprep.mubr.f32.mxu1 %v17145_v58  ;;  %v3194_v38 = vmul.f32 %v10910_v24, %v17146_v8  ;;  %v10921_v24 = vld [vmem:[%s16614_s23 + $0xa8] sm:$0xff] }
 0x53c   :  { %v10361_v43 = vpop.permute.xlu1 %10360  ;;  %8219 = vmatmul.mubr.msk.f32.gmra.mrb[76].mxu0 %vm2413_vm4, %v10613_v18  ;;  %8227 = vmatmul.mubr.msk.f32.gmra.mrb[76].mxu1 %vm2413_vm4, %v10613_v18  ;;  %v10912_v18 = vld [vmem:[%s16614_s23 + $0x90] sm:$0xff] }
 0x53d   :  { %v10363_v28 = vunpack.i.h.bf16 %v10361_v43  ;;  %v10362_v0 = vunpack.i.l.bf16 %v10361_v43  ;;  %9819 = vmatpush3.bf16.msra.mxu0 %v9818_v2  ;;  %2544 = vmatprep.mubr.f32.mxu0 %v17145_v58  ;;  %v17149_v2 = vld [vmem:[#allocation26_spill] sm:$0xff]  ;;  %v10913_v43 = vld [vmem:[%s16614_s23 + $0x98] sm:$0xff] }
 0x53e   :  { %9821 = vmatprep.subr.bf16.mxu0 %v9820_v56  ;;  %2657 = vmatprep.mubr.f32.mxu1 %v17145_v58  ;;  %v3181_v14 = vmul.f32 %v10913_v43, %v17150_v53  ;;  %v10914_v56 = vld [vmem:[%s16614_s23 + $0x190] sm:$0xff] }
 0x53f   :  { %v9822_v27 = vpack.c.bf16 %v10363_v28, %v10362_v0  ;;  %9851 = vmatpush3.bf16.msra.mxu1 %v9850_v41  ;;  %v3180_v41 = vmul.f32 %v10912_v18, %v17149_v2  ;;  %v3212_v28 = vmul.f32 %v10914_v56, %v17149_v2  ;;  %v10915_v0 = vld [vmem:[%s16614_s23 + $0x198] sm:$0xff] }
 0x540   :  { %v10615_v9 = vpop.eup %10614  ;;  %v10366_v11 = vpop.permute.xlu0 %10365  ;;  %v3213_v3 = vmul.f32 %v10915_v0, %v17150_v53 }
 0x541   :  { %8220 = vmatmul.mubr.msk.f32.gmra.mrb[78].mxu0 %vm2413_vm4, %v10615_v9  ;;  %8228 = vmatmul.mubr.msk.f32.gmra.mrb[78].mxu1 %vm2413_vm4, %v10615_v9  ;;  %v10368_v60 = vunpack.i.h.bf16 %v10366_v11  ;;  %v10367_v4 = vunpack.i.l.bf16 %v10366_v11  ;;  %v9862_v49 = vpack.c.bf16 %v3181_v14, %v3180_v41 }
 0x542   :  { %9823 = vmatpush3.bf16.msra.mxu0 %v9822_v27  ;;  %v9910_v31 = vpack.c.bf16 %v3213_v3, %v3212_v28 }
 0x543   :  { %9858 = vmatprep.subr.msk.bf16.mxu0 %vm11796_vm3, %v9856_v55  ;;  %v9852_v12 = vpack.c.bf16 %v10368_v60, %v10367_v4  ;;  %v9859_v55 = vpack.c.bf16 %v3163_v59, %v3162_v36 }
 0x544   :  { %v10371_v20 = vpop.permute.xlu1 %10370 }
 0x545   :  { %v10373_v63 = vunpack.i.h.bf16 %v10371_v20  ;;  %v10372_v37 = vunpack.i.l.bf16 %v10371_v20  ;;  %9853 = vmatprep.subr.bf16.mxu1 %v9852_v12  ;;  %v9907_v12 = vpack.c.bf16 %v3195_v54, %v3194_v38  ;;  %v17152_v38 = vld [vmem:[#allocation31_spill] sm:$0xff]  ;;  %v10922_v54 = vld [vmem:[%s16614_s23 + $0x1a0] sm:$0xff] }
 0x546   :  { %v3183_v35 = vmul.f32 %v10921_v24, %v17152_v38 }
 0x547   :  { %v9854_v23 = vpack.c.bf16 %v10373_v63, %v10372_v37 }
 0x549   :  { %9855 = vmatpush3.bf16.msra.mxu1 %v9854_v23 }
 0x54a   :  { %9906 = vmatprep.subr.msk.bf16.mxu1 %vm11796_vm3, %v9904_v33  ;;  %v10919_v33 = vld [vmem:[%s16614_s23 + $0x118] sm:$0xff] }
 0x5f7   :  { %v2504_v52 = vpop.f32.mrb[64].mxu0  ;;  %v2617_v17 = vpop.f32.mrb[64].mxu1 }
 0x5f8   :  { %v2506_v45 = vpop.f32.mrb[65].mxu0  ;;  %v2619_v61 = vpop.f32.mrb[65].mxu1  ;;  %v2664_v9 = vmul.f32 %v12857_v29, %v2504_v52  ;;  %v2666_v11 = vmul.f32 %v12863_v7, %v2617_v17  ;;  %v10916_v29 = vld [vmem:[%s16614_s23 + $0x10] sm:$0xff]  ;;  %v3197_v52 = vmul.f32 %v10919_v33, %v17150_v53  ;;  %v10920_v17 = vld [vmem:[%s16614_s23 + $0xa0] sm:$0xff] }
 0x5f9   :  { %v2665_v57 = vmul.f32 %v12859_v47, %v2506_v45  ;;  %v2667_v27 = vmul.f32 %v12871_v46, %v2619_v61  ;;  %v3164_v7 = vmul.f32 %v10916_v29, %v17149_v2  ;;  %v3182_v36 = vmul.f32 %v10920_v17, %v17151_v10  ;;  %v10923_v61 = vld [vmem:[%s16614_s23 + $0x1a8] sm:$0xff] }
 0x5fa   :  { %v3214_v45 = vmul.f32 %v10922_v54, %v17151_v10  ;;  %v3215_v18 = vmul.f32 %v10923_v61, %v17152_v38 }
 0x5fb   :  { %v2510_v60 = vpop.f32.mrb[66].mxu0  ;;  %v2623_v4 = vpop.f32.mrb[66].mxu1  ;;  %3016 = vmatprep.mubr.f32.mxu0 %v2665_v57  ;;  %3121 = vmatprep.mubr.f32.mxu1 %v2667_v27 }
 0x5fc   :  { %v2512_v20 = vpop.f32.mrb[67].mxu0  ;;  %v2625_v40 = vpop.f32.mrb[67].mxu1  ;;  %3017 = vmatmul.mubr.f32.vlgmr.msra.gmra.mrb[80].mxu0 %v2664_v9  ;;  %3122 = vmatmul.mubr.f32.vlgmr.msra.gmra.mrb[80].mxu1 %v2666_v11  ;;  %v2668_v1 = vmul.f32 %v12875_v42, %v2510_v60  ;;  %v2670_v63 = vmul.f32 %v12883_v30, %v2623_v4  ;;  %v10918_v42 = vld [vmem:[%s16614_s23 + $0x110] sm:$0xff]  ;;  %v9868_v11 = vpack.c.bf16 %v3183_v35, %v3182_v36 }
 0x5fd   :  { %v2669_v47 = vmul.f32 %v12878_v48, %v2512_v20  ;;  %v2671_v46 = vmul.f32 %v12891_v26, %v2625_v40  ;;  %9861 = vmatpush3.bf16.xpose.msk.msra.mxu0 %vm11796_vm3, %v9859_v55  ;;  %9909 = vmatpush3.bf16.xpose.msk.msra.mxu1 %vm11796_vm3, %v9907_v12  ;;  %v10917_v48 = vld [vmem:[%s16614_s23 + $0x18] sm:$0xff]  ;;  %v3196_v30 = vmul.f32 %v10918_v42, %v17149_v2  ;;  %v10927_v40 = vld [vmem:[%s16614_s23 + $0x128] sm:$0xff] }
 0x5fe   :  { %9864 = vmatprep.subr.msk.bf16.mxu0 %vm11796_vm3, %v9862_v49  ;;  %9912 = vmatprep.subr.msk.bf16.mxu1 %vm11796_vm3, %v9910_v31  ;;  %v3165_v26 = vmul.f32 %v10917_v48, %v17150_v53  ;;  %v9916_v60 = vpack.c.bf16 %v3215_v18, %v3214_v45  ;;  %v3199_v49 = vmul.f32 %v10927_v40, %v17152_v38  ;;  %v10928_v31 = vld [vmem:[%s16614_s23 + $0xb0] sm:$0xff]  ;;  %v17155_v18 = vld [vmem:[#allocation34_spill] sm:$0xff] }
 0x5ff   :  { %v2516_v37 = vpop.f32.mrb[68].mxu0  ;;  %v2629_v23 = vpop.f32.mrb[68].mxu1  ;;  %3021 = vmatprep.mubr.f32.mxu0 %v2669_v47  ;;  %3126 = vmatprep.mubr.f32.mxu1 %v2671_v46  ;;  %v9913_v57 = vpack.c.bf16 %v3197_v52, %v3196_v30  ;;  %v17153_v47 = vld [vmem:[#allocation37_spill] sm:$0xff] }
 0x600   :  { %v2518_v34 = vpop.f32.mrb[69].mxu0  ;;  %v2631_v59 = vpop.f32.mrb[69].mxu1  ;;  %3022 = vmatmul.mubr.f32.gmra.mrb[82].mxu0 %v2668_v1  ;;  %3127 = vmatmul.mubr.f32.gmra.mrb[82].mxu1 %v2670_v63  ;;  %v2672_v14 = vmul.f32 %v12895_v16, %v2516_v37  ;;  %v2674_v56 = vmul.f32 %v12903_v15, %v2629_v23  ;;  %v9865_v3 = vpack.c.bf16 %v3165_v26, %v3164_v7  ;;  %v10924_v16 = vld [vmem:[%s16614_s23 + $0x20] sm:$0xff]  ;;  %v10929_v1 = vld [vmem:[%s16614_s23 + $0xb8] sm:$0xff]  ;;  %v10930_v26 = vld [vmem:[%s16614_s23 + $0x1b0] sm:$0xff] }
 0x601   :  { %v2673_v41 = vmul.f32 %v12898_v50, %v2518_v34  ;;  %v2675_v43 = vmul.f32 %v12911_v44, %v2631_v59  ;;  %v3166_v15 = vmul.f32 %v10924_v16, %v17151_v10  ;;  %v3184_v46 = vmul.f32 %v10928_v31, %v17153_v47  ;;  %v17154_v63 = vld [vmem:[#allocation36_spill] sm:$0xff] }
 0x602   :  { %v3185_v48 = vmul.f32 %v10929_v1, %v17154_v63  ;;  %v3216_v37 = vmul.f32 %v10930_v26, %v17153_v47  ;;  %v10931_v23 = vld [vmem:[%s16614_s23 + $0x1b8] sm:$0xff] }
 0x603   :  { %v2522_v28 = vpop.f32.mrb[70].mxu0  ;;  %v2635_v0 = vpop.f32.mrb[70].mxu1  ;;  %3026 = vmatprep.mubr.f32.mxu0 %v2673_v41  ;;  %3131 = vmatprep.mubr.f32.mxu1 %v2675_v43  ;;  %v3217_v42 = vmul.f32 %v10931_v23, %v17154_v63  ;;  %v17156_v41 = vld [vmem:[#allocation29_spill] sm:$0xff] }
 0x604   :  { %v2524_v27 = vpop.f32.mrb[71].mxu0  ;;  %v2637_v9 = vpop.f32.mrb[71].mxu1  ;;  %3027 = vmatmul.mubr.f32.gmra.mrb[84].mxu0 %v2672_v14  ;;  %3132 = vmatmul.mubr.f32.gmra.mrb[84].mxu1 %v2674_v56  ;;  %v2676_v4 = vmul.f32 %v12915_v32, %v2522_v28  ;;  %v2678_v55 = vmul.f32 %v12931_v62, %v2635_v0  ;;  %v10926_v32 = vld [vmem:[%s16614_s23 + $0x120] sm:$0xff]  ;;  %v9874_v45 = vpack.c.bf16 %v3185_v48, %v3184_v46  ;;  %v17161_v46 = vld [vmem:[#allocation40_spill] sm:$0xff] }
 0x605   :  { %v2677_v50 = vmul.f32 %v12918_v6, %v2524_v27  ;;  %v2679_v44 = vmul.f32 %v12935_v51, %v2637_v9  ;;  %9867 = vmatpush3.bf16.xpose.msk.msra.mxu0 %vm11796_vm3, %v9865_v3  ;;  %9915 = vmatpush3.bf16.xpose.msk.msra.mxu1 %vm11796_vm3, %v9913_v57  ;;  %v10925_v6 = vld [vmem:[%s16614_s23 + $0x28] sm:$0xff]  ;;  %v3198_v62 = vmul.f32 %v10926_v32, %v17151_v10  ;;  %v17157_v14 = vld [vmem:[#allocation33_spill] sm:$0xff]  ;;  %v10934_v57 = vld [vmem:[%s16614_s23 + $0x130] sm:$0xff] }
 0x606   :  { %9870 = vmatprep.subr.msk.bf16.mxu0 %vm11796_vm3, %v9868_v11  ;;  %9918 = vmatprep.subr.msk.bf16.mxu1 %vm11796_vm3, %v9916_v60  ;;  %v3167_v51 = vmul.f32 %v10925_v6, %v17152_v38  ;;  %v9922_v61 = vpack.c.bf16 %v3217_v42, %v3216_v37  ;;  %v3200_v27 = vmul.f32 %v10934_v57, %v17153_v47  ;;  %v10935_v9 = vld [vmem:[%s16614_s23 + $0x138] sm:$0xff]  ;;  %v10936_v60 = vld [vmem:[%s16614_s23 + $0xc0] sm:$0xff]  ;;  %v17166_v57 = vld [vmem:[#allocation6_spill] sm:$0xff] }
 0x607   :  { %v2528_v12 = vpop.f32.mrb[72].mxu0  ;;  %v2641_v20 = vpop.f32.mrb[72].mxu1  ;;  %3031 = vmatprep.mubr.f32.mxu0 %v2677_v50  ;;  %3136 = vmatprep.mubr.f32.mxu1 %v2679_v44  ;;  %v9919_v24 = vpack.c.bf16 %v3199_v49, %v3198_v62  ;;  %v3201_v11 = vmul.f32 %v10935_v9, %v17154_v63  ;;  %v3186_v50 = vmul.f32 %v10936_v60, %v17146_v8  ;;  %v17159_v62 = vld [vmem:[#allocation44_spill] sm:$0xff]  ;;  %v17160_v49 = vld [vmem:[#allocation41_spill] sm:$0xff] }
 0x608   :  { %v2530_v29 = vpop.f32.mrb[73].mxu0  ;;  %v2643_v7 = vpop.f32.mrb[73].mxu1  ;;  %3032 = vmatmul.mubr.f32.gmra.mrb[86].mxu0 %v2676_v4  ;;  %3137 = vmatmul.mubr.f32.gmra.mrb[86].mxu1 %v2678_v55  ;;  %v2680_v52 = vmul.f32 %v12941_v19, %v2528_v12  ;;  %v2682_v17 = vmul.f32 %v12953_v13, %v2641_v20  ;;  %v9871_v59 = vpack.c.bf16 %v3167_v51, %v3166_v15  ;;  %v10932_v19 = vld [vmem:[%s16614_s23 + $0x30] sm:$0xff]  ;;  %v10937_v15 = vld [vmem:[%s16614_s23 + $0xc8] sm:$0xff]  ;;  %v10938_v55 = vld [vmem:[%s16614_s23 + $0x1c0] sm:$0xff] }
 0x609   :  { %v2681_v30 = vmul.f32 %v12944_v22, %v2530_v29  ;;  %v2683_v33 = vmul.f32 %v12956_v39, %v2643_v7  ;;  %v3168_v13 = vmul.f32 %v10932_v19, %v17153_v47  ;;  %v3187_v4 = vmul.f32 %v10937_v15, %v17147_v5  ;;  %v10939_v51 = vld [vmem:[%s16614_s23 + $0x1c8] sm:$0xff] }
 0x60a   :  { %v3218_v6 = vmul.f32 %v10938_v55, %v17146_v8  ;;  %v3219_v12 = vmul.f32 %v10939_v51, %v17147_v5  ;;  %v17158_v20 = vld [vmem:[#allocation38_spill] sm:$0xff]  ;;  %v9925_v26 = vpack.c.bf16 %v3201_v11, %v3200_v27 }
 0x60b   :  { %v2534_v36 = vpop.f32.mrb[74].mxu0  ;;  %v2647_v34 = vpop.f32.mrb[74].mxu1  ;;  %3036 = vmatprep.mubr.f32.mxu0 %v2681_v30  ;;  %3141 = vmatprep.mubr.f32.mxu1 %v2683_v33  ;;  %v9880_v42 = vpack.c.bf16 %v3187_v4, %v3186_v50  ;;  %v17162_v33 = vld [vmem:[#allocation43_spill] sm:$0xff]  ;;  %v10943_v19 = vld [vmem:[%s16614_s23 + $0x148] sm:$0xff] }
 0x60c   :  { %v2536_v35 = vpop.f32.mrb[75].mxu0  ;;  %v2649_v54 = vpop.f32.mrb[75].mxu1  ;;  %3037 = vmatmul.mubr.f32.gmra.mrb[88].mxu0 %v2680_v52  ;;  %3142 = vmatmul.mubr.f32.gmra.mrb[88].mxu1 %v2682_v17  ;;  %v2684_v43 = vmul.f32 %v17156_v41, %v2534_v36  ;;  %v2686_v56 = vmul.f32 %v17157_v14, %v2647_v34  ;;  %v9928_v30 = vpack.c.bf16 %v3219_v12, %v3218_v6  ;;  %v17163_v17 = vld [vmem:[#allocation52_spill] sm:$0xff]  ;;  %v10940_v34 = vld [vmem:[%s16614_s23 + $0x40] sm:$0xff]  ;;  %v10944_v41 = vld [vmem:[%s16614_s23 + $0xd0] sm:$0xff] }
 0x60d   :  { %v2685_v22 = vmul.f32 %v12966_v25, %v2536_v35  ;;  %v2687_v39 = vmul.f32 %v17155_v18, %v2649_v54  ;;  %9873 = vmatpush3.bf16.xpose.msk.msra.mxu0 %vm11796_vm3, %v9871_v59  ;;  %9921 = vmatpush3.bf16.xpose.msk.msra.mxu1 %vm11796_vm3, %v9919_v24  ;;  %v10933_v25 = vld [vmem:[%s16614_s23 + $0x38] sm:$0xff]  ;;  %v3170_v59 = vmul.f32 %v10940_v34, %v17146_v8  ;;  %v17164_v24 = vld [vmem:[#allocation47_spill] sm:$0xff]  ;;  %v17165_v54 = vld [vmem:[#allocation70_spill] sm:$0xff] }
 0x60e   :  { %9876 = vmatprep.subr.msk.bf16.mxu0 %vm11796_vm3, %v9874_v45  ;;  %9924 = vmatprep.subr.msk.bf16.mxu1 %vm11796_vm3, %v9922_v61  ;;  %v3169_v28 = vmul.f32 %v10933_v25, %v17154_v63  ;;  %v10941_v61 = vld [vmem:[%s16614_s23 + $0x48] sm:$0xff]  ;;  %v10942_v18 = vld [vmem:[%s16614_s23 + $0x140] sm:$0xff]  ;;  %v10945_v14 = vld [vmem:[%s16614_s23 + $0xd8] sm:$0xff] }
 0x60f   :  { %v2540_v0 = vpop.f32.mrb[76].mxu0  ;;  %v2653_v3 = vpop.f32.mrb[76].mxu1  ;;  %3041 = vmatprep.mubr.f32.mxu0 %v2685_v22  ;;  %3146 = vmatprep.mubr.f32.mxu1 %v2687_v39  ;;  %v3171_v22 = vmul.f32 %v10941_v61, %v17147_v5  ;;  %v3202_v39 = vmul.f32 %v10942_v18, %v17146_v8  ;;  %v10946_v25 = vld [vmem:[%s16614_s23 + $0x1d0] sm:$0xff]  ;;  %v10951_v6 = vld [vmem:[%s16614_s23 + $0x158] sm:$0xff]  ;;  %v10952_v12 = vld [vmem:[%s16614_s23 + $0xe0] sm:$0xff] }
 0x610   :  { %v2542_v44 = vpop.f32.mrb[77].mxu0  ;;  %v2655_v16 = vpop.f32.mrb[77].mxu1  ;;  %3042 = vmatmul.mubr.f32.gmra.mrb[90].mxu0 %v2684_v43  ;;  %3147 = vmatmul.mubr.f32.gmra.mrb[90].mxu1 %v2686_v56  ;;  %v2688_v31 = vmul.f32 %v17160_v49, %v2540_v0  ;;  %v2690_v29 = vmul.f32 %v17161_v46, %v2653_v3  ;;  %v9877_v48 = vpack.c.bf16 %v3169_v28, %v3168_v13  ;;  %v10947_v0 = vld [vmem:[%s16614_s23 + $0x1d8] sm:$0xff]  ;;  %v10948_v50 = vld [vmem:[%s16614_s23 + $0x50] sm:$0xff] }
 0x611   :  { %v2689_v32 = vmul.f32 %v17158_v20, %v2542_v44  ;;  %v2691_v40 = vmul.f32 %v17159_v62, %v2655_v16  ;;  %v3203_v13 = vmul.f32 %v10943_v19, %v17147_v5  ;;  %v3188_v43 = vmul.f32 %v10944_v41, %v17149_v2  ;;  %v10949_v16 = vld [vmem:[%s16614_s23 + $0x58] sm:$0xff]  ;;  %v10950_v4 = vld [vmem:[%s16614_s23 + $0x150] sm:$0xff] }
 0x612   :  { %v3189_v56 = vmul.f32 %v10945_v14, %v17150_v53  ;;  %v3220_v28 = vmul.f32 %v10946_v25, %v17149_v2  ;;  %v3221_v3 = vmul.f32 %v10947_v0, %v17150_v53  ;;  %v9883_v27 = vpack.c.bf16 %v3171_v22, %v3170_v59  ;;  %v10961_v59 = vld [vmem:[%s16614_s23 + $0xf8] sm:$0xff] }
 0x613   :  { %3046 = vmatprep.mubr.f32.mxu0 %v2689_v32  ;;  %3151 = vmatprep.mubr.f32.mxu1 %v2691_v40  ;;  %v9931_v9 = vpack.c.bf16 %v3203_v13, %v3202_v39  ;;  %v3172_v44 = vmul.f32 %v10948_v50, %v17149_v2  ;;  %v3173_v15 = vmul.f32 %v10949_v16, %v17150_v53  ;;  %v10953_v32 = vld [vmem:[%s16614_s23 + $0xe8] sm:$0xff]  ;;  %v10954_v40 = vld [vmem:[%s16614_s23 + $0x1e0] sm:$0xff]  ;;  %v10964_v13 = vld [vmem:[%s16614_s23 + $0x70] sm:$0xff] }
 0x614   :  { %v2546_v7 = vpop.f32.mrb[78].mxu0  ;;  %v2659_v1 = vpop.f32.mrb[78].mxu1  ;;  %3047 = vmatmul.mubr.f32.gmra.mrb[92].mxu0 %v2688_v31  ;;  %3152 = vmatmul.mubr.f32.gmra.mrb[92].mxu1 %v2690_v29  ;;  %v9886_v11 = vpack.c.bf16 %v3189_v56, %v3188_v43  ;;  %v9934_v60 = vpack.c.bf16 %v3221_v3, %v3220_v28  ;;  %v3204_v55 = vmul.f32 %v10950_v4, %v17149_v2  ;;  %v10955_v31 = vld [vmem:[%s16614_s23 + $0x1e8] sm:$0xff]  ;;  %v10965_v43 = vld [vmem:[%s16614_s23 + $0x78] sm:$0xff]  ;;  %v10966_v56 = vld [vmem:[%s16614_s23 + $0x170] sm:$0xff] }
 0x615   :  { %v2548_v37 = vpop.f32.mrb[79].mxu0  ;;  %v2661_v23 = vpop.f32.mrb[79].mxu1  ;;  %9879 = vmatpush3.bf16.xpose.msk.msra.mxu0 %vm11796_vm3, %v9877_v48  ;;  %9927 = vmatpush3.bf16.xpose.msk.msra.mxu1 %vm11796_vm3, %v9925_v26  ;;  %v2692_v35 = vmul.f32 %v17164_v24, %v2546_v7  ;;  %v2694_v45 = vmul.f32 %v17165_v54, %v2659_v1  ;;  %v3205_v51 = vmul.f32 %v10951_v6, %v17150_v53  ;;  %v10956_v26 = vld [vmem:[%s16614_s23 + $0x60] sm:$0xff]  ;;  %v10967_v28 = vld [vmem:[%s16614_s23 + $0x178] sm:$0xff]  ;;  %v17176_v4 = vld [vmem:[#allocation66_spill] sm:$0xff] }
 0x616   :  { %v2693_v52 = vmul.f32 %v17162_v33, %v2548_v37  ;;  %v2695_v36 = vmul.f32 %v17163_v17, %v2661_v23  ;;  %9882 = vmatprep.subr.msk.bf16.mxu0 %vm11796_vm3, %v9880_v42  ;;  %9930 = vmatprep.subr.msk.bf16.mxu1 %vm11796_vm3, %v9928_v30  ;;  %v3190_v20 = vmul.f32 %v10952_v12, %v17151_v10  ;;  %v10957_v23 = vld [vmem:[%s16614_s23 + $0x68] sm:$0xff]  ;;  %v10958_v30 = vld [vmem:[%s16614_s23 + $0x160] sm:$0xff]  ;;  %v17173_v16 = vld [vmem:[#allocation64_spill] sm:$0xff] }
 0x617   :  { %v3191_v62 = vmul.f32 %v10953_v32, %v17152_v38  ;;  %v3222_v49 = vmul.f32 %v10954_v40, %v17151_v10  ;;  %v3223_v46 = vmul.f32 %v10955_v31, %v17152_v38  ;;  %v9889_v29 = vpack.c.bf16 %v3173_v15, %v3172_v44  ;;  %v17170_v50 = vld [vmem:[#allocation61_spill] sm:$0xff]  ;;  %v17172_v44 = vld [vmem:[#allocation63_spill] sm:$0xff]  ;;  %v17178_v6 = vld [vmem:[#allocation68_spill] sm:$0xff] }
 0x618   :  { %3051 = vmatprep.mubr.f32.mxu0 %v2693_v52  ;;  %3156 = vmatprep.mubr.f32.mxu1 %v2695_v36  ;;  %v9937_v7 = vpack.c.bf16 %v3205_v51, %v3204_v55  ;;  %v3174_v37 = vmul.f32 %v10956_v26, %v17151_v10  ;;  %v3175_v42 = vmul.f32 %v10957_v23, %v17152_v38  ;;  %v10959_v52 = vld [vmem:[%s16614_s23 + $0x168] sm:$0xff]  ;;  %v10960_v36 = vld [vmem:[%s16614_s23 + $0xf0] sm:$0xff]  ;;  %v17175_v15 = vld [vmem:[#allocation65_spill] sm:$0xff] }
 0x619   :  { %3052 = vmatmul.mubr.f32.gmra.mrb[94].mxu0 %v2692_v35  ;;  %3157 = vmatmul.mubr.f32.gmra.mrb[94].mxu1 %v2694_v45  ;;  %v9892_v1 = vpack.c.bf16 %v3191_v62, %v3190_v20  ;;  %v9940_v48 = vpack.c.bf16 %v3223_v46, %v3222_v49  ;;  %v3206_v33 = vmul.f32 %v10958_v30, %v17151_v10  ;;  %v10962_v35 = vld [vmem:[%s16614_s23 + $0x1f0] sm:$0xff]  ;;  %v10963_v45 = vld [vmem:[%s16614_s23 + $0x1f8] sm:$0xff]  ;;  %v17180_v12 = vld [vmem:[#allocation69_spill] sm:$0xff] }
 0x61a   :  { %8831 = vmatprep.mubr.msk.f32.mxu0 %vm583_vm1, %v17166_v57  ;;  %8879 = vmatprep.mubr.msk.f32.mxu1 %vm583_vm1, %v17166_v57  ;;  %v3207_v17 = vmul.f32 %v10959_v52, %v17152_v38  ;;  %v3192_v34 = vmul.f32 %v10960_v36, %v17153_v47  ;;  %v3193_v24 = vmul.f32 %v10961_v59, %v17154_v63  ;;  %v17177_v55 = vld [vmem:[#allocation67_spill] sm:$0xff]  ;;  %v17182_v32 = vld [vmem:[#allocation72_spill] sm:$0xff]  ;;  %v17183_v62 = vld [vmem:[#allocation73_spill] sm:$0xff] }
 0x61b   :  { %v3224_v54 = vmul.f32 %v10962_v35, %v17153_v47  ;;  %v3225_v61 = vmul.f32 %v10963_v45, %v17154_v63  ;;  %v9895_v22 = vpack.c.bf16 %v3175_v42, %v3174_v37  ;;  %v3176_v41 = vmul.f32 %v10964_v13, %v17153_v47  ;;  %v17179_v51 = vld [vmem:[#allocation7_spill] sm:$0xff]  ;;  %v17184_v40 = vld [vmem:[#allocation10_spill] sm:$0xff]  ;;  %v17187_v46 = vld [vmem:[#allocation92_spill] sm:$0xff] }
 0x61c   :  { %v9943_v18 = vpack.c.bf16 %v3207_v17, %v3206_v33  ;;  %v9898_v39 = vpack.c.bf16 %v3193_v24, %v3192_v34  ;;  %v3177_v14 = vmul.f32 %v10965_v43, %v17154_v63  ;;  %v3208_v25 = vmul.f32 %v10966_v56, %v17153_v47  ;;  %v17181_v20 = vld [vmem:[#allocation71_spill] sm:$0xff]  ;;  %v17186_v31 = vld [vmem:[#allocation78_spill] sm:$0xff]  ;;  %v17192_v26 = vld [vmem:[#allocation96_spill] sm:$0xff] }
 0x61d   :  { %9885 = vmatpush3.bf16.xpose.msk.msra.mxu0 %vm11796_vm3, %v9883_v27  ;;  %9933 = vmatpush3.bf16.xpose.msk.msra.mxu1 %vm11796_vm3, %v9931_v9  ;;  %v9946_v19 = vpack.c.bf16 %v3225_v61, %v3224_v54  ;;  %v3209_v0 = vmul.f32 %v10967_v28, %v17154_v63  ;;  %v17167_v9 = vld [vmem:[#allocation59_spill] sm:$0xff]  ;;  %v17193_v37 = vld [vmem:[#allocation97_spill] sm:$0xff]  ;;  %v17194_v23 = vld [vmem:[#allocation12_spill] sm:$0xff] }
 0x61e   :  { %9888 = vmatprep.subr.msk.bf16.mxu0 %vm11796_vm3, %v9886_v11  ;;  %9936 = vmatprep.subr.msk.bf16.mxu1 %vm11796_vm3, %v9934_v60  ;;  %v9901_v3 = vpack.c.bf16 %v3177_v14, %v3176_v41  ;;  %v17168_v11 = vld [vmem:[#allocation60_spill] sm:$0xff]  ;;  %v17169_v60 = vld [vmem:[#allocation5_spill] sm:$0xff]  ;;  %v17185_v49 = vld [vmem:[#allocation75_spill] sm:$0xff] }
 0x61f   :  { %v9949_v27 = vpack.c.bf16 %v3209_v0, %v3208_v25  ;;  %v17195_v42 = vld [vmem:[#allocation98_spill] sm:$0xff]  ;;  %v17196_v30 = vld [vmem:[#allocation99_spill] sm:$0xff]  ;;  %v17197_v33 = vld [vmem:[#allocation100_spill] sm:$0xff] }
 0x620   :  { %v17198_v52 = vld [vmem:[#allocation101_spill] sm:$0xff]  ;;  %v17199_v17 = vld [vmem:[#allocation11_spill] sm:$0xff]  ;;  %v17200_v36 = vld [vmem:[#allocation102_spill] sm:$0xff] }
 0x621   :  { %v17201_v34 = vld [vmem:[#allocation103_spill] sm:$0xff]  ;;  %v17202_v59 = vld [vmem:[#allocation104_spill] sm:$0xff]  ;;  %v17203_v24 = vld [vmem:[#allocation105_spill] sm:$0xff] }
 0x622   :  { %v17204_v35 = vld [vmem:[#allocation106_spill] sm:$0xff]  ;;  %v17205_v54 = vld [vmem:[#allocation107_spill] sm:$0xff]  ;;  %v10969_v61 = vld [vmem:[%s16616_s25 + $0x18] sm:$0xff] }
 0x623   :  { %v10968_v45 = vld [vmem:[%s16616_s25 + $0x8] sm:$0xff] }
 0x625   :  { %9891 = vmatpush3.bf16.xpose.msk.msra.mxu0 %vm11796_vm3, %v9889_v29  ;;  %9939 = vmatpush3.bf16.xpose.msk.msra.mxu1 %vm11796_vm3, %v9937_v7  ;;  %v17188_v29 = vld [vmem:[#allocation93_spill] sm:$0xff] }
 0x626   :  { %9894 = vmatprep.subr.msk.bf16.mxu0 %vm11796_vm3, %v9892_v1  ;;  %9942 = vmatprep.subr.msk.bf16.mxu1 %vm11796_vm3, %v9940_v48  ;;  %v17189_v7 = vld [vmem:[#allocation9_spill] sm:$0xff]  ;;  %v17190_v1 = vld [vmem:[#allocation94_spill] sm:$0xff]  ;;  %v17191_v48 = vld [vmem:[#allocation95_spill] sm:$0xff] }
 0x62d   :  { %9897 = vmatpush3.bf16.xpose.msk.msra.mxu0 %vm11796_vm3, %v9895_v22  ;;  %9945 = vmatpush3.bf16.xpose.msk.msra.mxu1 %vm11796_vm3, %v9943_v18 }
 0x62e   :  { %9900 = vmatprep.subr.msk.bf16.mxu0 %vm11796_vm3, %v9898_v39  ;;  %9948 = vmatprep.subr.msk.bf16.mxu1 %vm11796_vm3, %v9946_v19 }
 0x635   :  { %9903 = vmatpush3.bf16.xpose.msk.msra.mxu0 %vm11796_vm3, %v9901_v3  ;;  %9951 = vmatpush3.bf16.xpose.msk.msra.mxu1 %vm11796_vm3, %v9949_v27  ;;  %vm7029_vm3 = vcmask 7168  }
 0x636   :  { %9953 = vmatprep.subr.bf16.mxu0 %v17167_v9  ;;  %9985 = vmatprep.subr.bf16.mxu1 %v17168_v11 }
 0x63c   :  { %8832 = vmatmul.mubr.msk.f32.vlgmr.msra.gmra.mrb[96].mxu0 %vm583_vm1, %v17166_v57  ;;  %8880 = vmatmul.mubr.msk.f32.vlgmr.msra.gmra.mrb[96].mxu1 %vm583_vm1, %v17166_v57  ;;  %v17174_v57 = vld [vmem:[#allocation8_spill] sm:$0xff] }
 0x63d   :  { %8833 = vmatprep.mubr.msk.f32.mxu0 %vm583_vm1, %v17169_v60  ;;  %8881 = vmatprep.mubr.msk.f32.mxu1 %vm583_vm1, %v17169_v60 }
 0x63e   :  { %9955 = vmatpush3.bf16.msra.mxu0 %v17170_v50  ;;  %9987 = vmatpush3.bf16.msra.mxu1 %v17171_v21 }
 0x63f   :  { %9957 = vmatprep.subr.bf16.mxu0 %v17172_v44  ;;  %9989 = vmatprep.subr.bf16.mxu1 %v17173_v16 }
 0x640   :  { %8834 = vmatmul.mubr.msk.f32.gmra.mrb[98].mxu0 %vm583_vm1, %v17169_v60  ;;  %8882 = vmatmul.mubr.msk.f32.gmra.mrb[98].mxu1 %vm583_vm1, %v17169_v60 }
 0x641   :  { %8835 = vmatprep.mubr.msk.f32.mxu0 %vm583_vm1, %v17174_v57  ;;  %8883 = vmatprep.mubr.msk.f32.mxu1 %vm583_vm1, %v17174_v57 }
 0x642   :  { %9959 = vmatpush3.bf16.msra.mxu0 %v17175_v15  ;;  %9991 = vmatpush3.bf16.msra.mxu1 %v17176_v4 }
 0x643   :  { %9961 = vmatprep.subr.bf16.mxu0 %v17177_v55  ;;  %9993 = vmatprep.subr.bf16.mxu1 %v17178_v6 }
 0x644   :  { %8836 = vmatmul.mubr.msk.f32.gmra.mrb[100].mxu0 %vm583_vm1, %v17174_v57  ;;  %8884 = vmatmul.mubr.msk.f32.gmra.mrb[100].mxu1 %vm583_vm1, %v17174_v57 }
 0x645   :  { %8837 = vmatprep.mubr.msk.f32.mxu0 %vm583_vm1, %v17179_v51  ;;  %8885 = vmatprep.mubr.msk.f32.mxu1 %vm583_vm1, %v17179_v51 }
 0x646   :  { %9963 = vmatpush3.bf16.msra.mxu0 %v17180_v12  ;;  %9995 = vmatpush3.bf16.msra.mxu1 %v17181_v20 }
 0x647   :  { %9965 = vmatprep.subr.bf16.mxu0 %v17182_v32  ;;  %9997 = vmatprep.subr.bf16.mxu1 %v17183_v62 }
 0x648   :  { %8838 = vmatmul.mubr.msk.f32.gmra.mrb[102].mxu0 %vm583_vm1, %v17179_v51  ;;  %8886 = vmatmul.mubr.msk.f32.gmra.mrb[102].mxu1 %vm583_vm1, %v17179_v51 }
 0x649   :  { %8839 = vmatprep.mubr.msk.f32.mxu0 %vm583_vm1, %v17184_v40  ;;  %8887 = vmatprep.mubr.msk.f32.mxu1 %vm583_vm1, %v17184_v40 }
 0x64a   :  { %9967 = vmatpush3.bf16.msra.mxu0 %v17185_v49  ;;  %9999 = vmatpush3.bf16.msra.mxu1 %v17186_v31 }
 0x64b   :  { %9969 = vmatprep.subr.bf16.mxu0 %v17187_v46  ;;  %10001 = vmatprep.subr.bf16.mxu1 %v17188_v29 }
 0x64c   :  { %8840 = vmatmul.mubr.msk.f32.gmra.mrb[104].mxu0 %vm583_vm1, %v17184_v40  ;;  %8888 = vmatmul.mubr.msk.f32.gmra.mrb[104].mxu1 %vm583_vm1, %v17184_v40 }
 0x64d   :  { %8841 = vmatprep.mubr.msk.f32.mxu0 %vm583_vm1, %v17189_v7  ;;  %8889 = vmatprep.mubr.msk.f32.mxu1 %vm583_vm1, %v17189_v7 }
 0x64e   :  { %9971 = vmatpush3.bf16.msra.mxu0 %v17190_v1  ;;  %10003 = vmatpush3.bf16.msra.mxu1 %v17191_v48 }
 0x64f   :  { %9973 = vmatprep.subr.bf16.mxu0 %v17192_v26  ;;  %10005 = vmatprep.subr.bf16.mxu1 %v17193_v37 }
 0x650   :  { %8842 = vmatmul.mubr.msk.f32.gmra.mrb[106].mxu0 %vm583_vm1, %v17189_v7  ;;  %8890 = vmatmul.mubr.msk.f32.gmra.mrb[106].mxu1 %vm583_vm1, %v17189_v7 }
 0x651   :  { %8843 = vmatprep.mubr.msk.f32.mxu0 %vm583_vm1, %v17194_v23  ;;  %8891 = vmatprep.mubr.msk.f32.mxu1 %vm583_vm1, %v17194_v23 }
 0x652   :  { %9975 = vmatpush3.bf16.msra.mxu0 %v17195_v42  ;;  %10007 = vmatpush3.bf16.msra.mxu1 %v17196_v30 }
 0x653   :  { %9977 = vmatprep.subr.bf16.mxu0 %v17197_v33  ;;  %10009 = vmatprep.subr.bf16.mxu1 %v17198_v52 }
 0x654   :  { %8844 = vmatmul.mubr.msk.f32.gmra.mrb[108].mxu0 %vm583_vm1, %v17194_v23  ;;  %8892 = vmatmul.mubr.msk.f32.gmra.mrb[108].mxu1 %vm583_vm1, %v17194_v23 }
 0x655   :  { %8845 = vmatprep.mubr.msk.f32.mxu0 %vm583_vm1, %v17199_v17  ;;  %8893 = vmatprep.mubr.msk.f32.mxu1 %vm583_vm1, %v17199_v17 }
 0x656   :  { %9979 = vmatpush3.bf16.msra.mxu0 %v17200_v36  ;;  %10011 = vmatpush3.bf16.msra.mxu1 %v17201_v34 }
 0x657   :  { %9981 = vmatprep.subr.bf16.mxu0 %v17202_v59  ;;  %10013 = vmatprep.subr.bf16.mxu1 %v17203_v24 }
 0x658   :  { %8846 = vmatmul.mubr.msk.f32.gmra.mrb[110].mxu0 %vm583_vm1, %v17199_v17  ;;  %8894 = vmatmul.mubr.msk.f32.gmra.mrb[110].mxu1 %vm583_vm1, %v17199_v17 }
 0x65a   :  { %9983 = vmatpush3.bf16.msra.mxu0 %v17204_v35  ;;  %10015 = vmatpush3.bf16.msra.mxu1 %v17205_v54 }
 0x65b   :  { %4118 = vmatprep.subr.mxu0 %v10968_v45  ;;  %4231 = vmatprep.subr.mxu1 %v10969_v61 }
 0x6cf   :  { %v8719_v22 = vpop.f32.mrb[80].mxu0  ;;  %v8775_v18 = vpop.f32.mrb[80].mxu1 }
 0x6d0   :  { %v8720_v39 = vpop.f32.mrb[81].mxu0  ;;  %v8776_v19 = vpop.f32.mrb[81].mxu1 }
 0x6d1   :  { %v8721_v13 = vadd.f32 %v8720_v39, %v8719_v22  ;;  %v8777_v41 = vadd.f32 %v8776_v19, %v8775_v18 }
 0x6d3   :  { %v13851_v43 = vadd.f32 %v8777_v41, %v8721_v13  ;;  %v8722_v14 = vpop.f32.mrb[82].mxu0  ;;  %v8778_v56 = vpop.f32.mrb[82].mxu1 }
 0x6d4   :  { %v8723_v25 = vpop.f32.mrb[83].mxu0  ;;  %v8779_v28 = vpop.f32.mrb[83].mxu1 }
 0x6d5   :  { %17206 = vst [vmem:[#allocation24_spill] sm:$0xff] %v13851_v43  ;;  %v8724_v0 = vadd.f32 %v8723_v25, %v8722_v14  ;;  %v8780_v3 = vadd.f32 %v8779_v28, %v8778_v56 }
 0x6d7   :  { %v13853_v27 = vadd.f32 %v8780_v3, %v8724_v0  ;;  %v8725_v9 = vpop.f32.mrb[84].mxu0  ;;  %v8781_v11 = vpop.f32.mrb[84].mxu1 }
 0x6d8   :  { %v8726_v60 = vpop.f32.mrb[85].mxu0  ;;  %v8782_v50 = vpop.f32.mrb[85].mxu1 }
 0x6d9   :  { %17207 = vst [vmem:[#allocation22_spill] sm:$0xff] %v13853_v27  ;;  %v8727_v21 = vadd.f32 %v8726_v60, %v8725_v9  ;;  %v8783_v44 = vadd.f32 %v8782_v50, %v8781_v11 }
 0x6db   :  { %v13855_v16 = vadd.f32 %v8783_v44, %v8727_v21  ;;  %v8728_v57 = vpop.f32.mrb[86].mxu0  ;;  %v8784_v15 = vpop.f32.mrb[86].mxu1 }
 0x6dc   :  { %v8729_v4 = vpop.f32.mrb[87].mxu0  ;;  %v8785_v55 = vpop.f32.mrb[87].mxu1 }
 0x6dd   :  { %17208 = vst [vmem:[#allocation16_spill] sm:$0xff] %v13855_v16  ;;  %v8730_v6 = vadd.f32 %v8729_v4, %v8728_v57  ;;  %v8786_v51 = vadd.f32 %v8785_v55, %v8784_v15 }
 0x6df   :  { %v13857_v12 = vadd.f32 %v8786_v51, %v8730_v6  ;;  %v8731_v20 = vpop.f32.mrb[88].mxu0  ;;  %v8787_v32 = vpop.f32.mrb[88].mxu1 }
 0x6e0   :  { %v8732_v62 = vpop.f32.mrb[89].mxu0  ;;  %v8788_v40 = vpop.f32.mrb[89].mxu1 }
 0x6e1   :  { %17209 = vst [vmem:[#allocation26_spill] sm:$0xff] %v13857_v12  ;;  %v8733_v49 = vadd.f32 %v8732_v62, %v8731_v20  ;;  %v8789_v31 = vadd.f32 %v8788_v40, %v8787_v32 }
 0x6e3   :  { %v13859_v46 = vadd.f32 %v8789_v31, %v8733_v49  ;;  %v8734_v29 = vpop.f32.mrb[90].mxu0  ;;  %v8790_v7 = vpop.f32.mrb[90].mxu1 }
 0x6e4   :  { %v8735_v1 = vpop.f32.mrb[91].mxu0  ;;  %v8791_v48 = vpop.f32.mrb[91].mxu1 }
 0x6e5   :  { %17210 = vst [vmem:[#allocation25_spill] sm:$0xff] %v13859_v46  ;;  %v8736_v26 = vadd.f32 %v8735_v1, %v8734_v29  ;;  %v8792_v37 = vadd.f32 %v8791_v48, %v8790_v7 }
 0x6e7   :  { %v13861_v23 = vadd.f32 %v8792_v37, %v8736_v26  ;;  %v8737_v42 = vpop.f32.mrb[92].mxu0  ;;  %v8793_v30 = vpop.f32.mrb[92].mxu1 }
 0x6e8   :  { %v8738_v33 = vpop.f32.mrb[93].mxu0  ;;  %v8794_v52 = vpop.f32.mrb[93].mxu1 }
 0x6e9   :  { %17211 = vst [vmem:[#allocation35_spill] sm:$0xff] %v13861_v23  ;;  %v8739_v17 = vadd.f32 %v8738_v33, %v8737_v42  ;;  %v8795_v36 = vadd.f32 %v8794_v52, %v8793_v30 }
 0x6eb   :  { %v13863_v34 = vadd.f32 %v8795_v36, %v8739_v17 }
 0x6ec   :  { %v8740_v59 = vpop.f32.mrb[94].mxu0  ;;  %v8796_v24 = vpop.f32.mrb[94].mxu1 }
 0x6ed   :  { %17212 = vst [vmem:[#allocation31_spill] sm:$0xff] %v13863_v34  ;;  %v8741_v35 = vpop.f32.mrb[95].mxu0  ;;  %v8797_v54 = vpop.f32.mrb[95].mxu1 }
 0x6ee   :  { %v8742_v45 = vadd.f32 %v8741_v35, %v8740_v59  ;;  %v8798_v61 = vadd.f32 %v8797_v54, %v8796_v24 }
 0x6f0   :  { %v13865_v22 = vadd.f32 %v8798_v61, %v8742_v45 }
 0x6f2   :  { %17213 = vst [vmem:[#allocation37_spill] sm:$0xff] %v13865_v22 }
 0x70f   :  { %v3548_v18 = vpop.f32.mrb[96].mxu0  ;;  %v3661_v39 = vpop.f32.mrb[96].mxu1 }
 0x710   :  { %v13867_v19 = vmul.f32 0.35355338, %v3548_v18  ;;  %v3550_v13 = vpop.f32.mrb[97].mxu0  ;;  %v3663_v41 = vpop.f32.mrb[97].mxu1  ;;  %v13871_v56 = vmul.f32 0.35355338, %v3661_v39 }
 0x711   :  { %v13869_v14 = vmul.f32 0.35355338, %v3550_v13  ;;  %v13877_v60 = vmul.f32 0.35355338, %v3663_v41 }
 0x713   :  { %v3740_v25 = vmax.f32 %v13867_v19, %v13869_v14  ;;  %v3554_v28 = vpop.f32.mrb[98].mxu0  ;;  %v3667_v0 = vpop.f32.mrb[98].mxu1 }
 0x714   :  { %v13875_v3 = vmul.f32 0.35355338, %v3554_v28  ;;  %v3556_v9 = vpop.f32.mrb[99].mxu0  ;;  %v3669_v11 = vpop.f32.mrb[99].mxu1  ;;  %v13883_v57 = vmul.f32 0.35355338, %v3667_v0 }
 0x715   :  { %v3741_v50 = vmax.f32 %v3740_v25, %v13871_v56  ;;  %v13880_v21 = vmul.f32 0.35355338, %v3556_v9  ;;  %v13889_v32 = vmul.f32 0.35355338, %v3669_v11 }
 0x717   :  { %v3742_v44 = vmax.f32 %v3741_v50, %v13877_v60  ;;  %v3745_v15 = vmax.f32 %v13875_v3, %v13880_v21  ;;  %v3560_v4 = vpop.f32.mrb[100].mxu0  ;;  %v3673_v55 = vpop.f32.mrb[100].mxu1 }
 0x718   :  { %v13887_v6 = vmul.f32 0.35355338, %v3560_v4  ;;  %v3562_v51 = vpop.f32.mrb[101].mxu0  ;;  %v3675_v20 = vpop.f32.mrb[101].mxu1  ;;  %v13895_v31 = vmul.f32 0.35355338, %v3673_v55 }
 0x719   :  { %v3746_v62 = vmax.f32 %v3745_v15, %v13883_v57  ;;  %v13892_v40 = vmul.f32 0.35355338, %v3562_v51  ;;  %3743 = vmax.xlane.f32.xlu0 %v3742_v44  ;;  %v13901_v42 = vmul.f32 0.35355338, %v3675_v20 }
 0x71b   :  { %v3747_v49 = vmax.f32 %v3746_v62, %v13889_v32  ;;  %v3750_v29 = vmax.f32 %v13887_v6, %v13892_v40  ;;  %v3566_v7 = vpop.f32.mrb[102].mxu0  ;;  %v3679_v1 = vpop.f32.mrb[102].mxu1 }
 0x71c   :  { %v13899_v48 = vmul.f32 0.35355338, %v3566_v7  ;;  %v3568_v26 = vpop.f32.mrb[103].mxu0  ;;  %v3681_v37 = vpop.f32.mrb[103].mxu1  ;;  %v13907_v17 = vmul.f32 0.35355338, %v3679_v1 }
 0x71d   :  { %v3751_v30 = vmax.f32 %v3750_v29, %v13895_v31  ;;  %v13904_v33 = vmul.f32 0.35355338, %v3568_v26  ;;  %3748 = vmax.xlane.f32.xlu1 %v3747_v49  ;;  %v13913_v61 = vmul.f32 0.35355338, %v3681_v37 }
 0x71f   :  { %v3752_v52 = vmax.f32 %v3751_v30, %v13901_v42  ;;  %v3755_v36 = vmax.f32 %v13899_v48, %v13904_v33  ;;  %v3572_v59 = vpop.f32.mrb[104].mxu0  ;;  %v3685_v24 = vpop.f32.mrb[104].mxu1 }
 0x720   :  { %v13911_v35 = vmul.f32 0.35355338, %v3572_v59  ;;  %v3574_v54 = vpop.f32.mrb[105].mxu0  ;;  %v3687_v45 = vpop.f32.mrb[105].mxu1  ;;  %v13919_v41 = vmul.f32 0.35355338, %v3685_v24 }
 0x721   :  { %v3756_v18 = vmax.f32 %v3755_v36, %v13907_v17  ;;  %v13916_v39 = vmul.f32 0.35355338, %v3574_v54  ;;  %3753 = vmax.xlane.f32.xlu0 %v3752_v52  ;;  %v13925_v44 = vmul.f32 0.35355338, %v3687_v45 }
 0x723   :  { %v3757_v13 = vmax.f32 %v3756_v18, %v13913_v61  ;;  %v3760_v25 = vmax.f32 %v13911_v35, %v13916_v39  ;;  %v3578_v28 = vpop.f32.mrb[106].mxu0  ;;  %v3691_v0 = vpop.f32.mrb[106].mxu1 }
 0x724   :  { %v13923_v9 = vmul.f32 0.35355338, %v3578_v28  ;;  %v3580_v11 = vpop.f32.mrb[107].mxu0  ;;  %v3693_v50 = vpop.f32.mrb[107].mxu1  ;;  %v13931_v51 = vmul.f32 0.35355338, %v3691_v0 }
 0x725   :  { %v3761_v15 = vmax.f32 %v3760_v25, %v13919_v41  ;;  %v13928_v4 = vmul.f32 0.35355338, %v3580_v11  ;;  %3758 = vmax.xlane.f32.xlu0 %v3757_v13  ;;  %v13937_v26 = vmul.f32 0.35355338, %v3693_v50 }
 0x727   :  { %v3762_v55 = vmax.f32 %v3761_v15, %v13925_v44  ;;  %v3765_v20 = vmax.f32 %v13923_v9, %v13928_v4  ;;  %v3584_v62 = vpop.f32.mrb[108].mxu0  ;;  %v3697_v49 = vpop.f32.mrb[108].mxu1 }
 0x728   :  { %v13935_v29 = vmul.f32 0.35355338, %v3584_v62  ;;  %v3586_v7 = vpop.f32.mrb[109].mxu0  ;;  %v3699_v1 = vpop.f32.mrb[109].mxu1  ;;  %v13943_v36 = vmul.f32 0.35355338, %v3697_v49 }
 0x729   :  { %v3766_v37 = vmax.f32 %v3765_v20, %v13931_v51  ;;  %v13940_v30 = vmul.f32 0.35355338, %v3586_v7  ;;  %3763 = vmax.xlane.f32.xlu0 %v3762_v55  ;;  %v13949_v25 = vmul.f32 0.35355338, %v3699_v1  ;;  %v17214_v49 = vld [vmem:[#allocation48_spill] sm:$0xff]  ;;  %v17215_v1 = vld [vmem:[#allocation23_spill] sm:$0xff] }
 0x72a   :  { %v3275_v7 = vmul.f32 %v17214_v49, %v17147_v5 }
 0x72b   :  { %v3767_v52 = vmax.f32 %v3766_v37, %v13937_v26  ;;  %v3770_v59 = vmax.f32 %v13935_v29, %v13940_v30  ;;  %v3590_v24 = vpop.f32.mrb[110].mxu0  ;;  %v3703_v54 = vpop.f32.mrb[110].mxu1  ;;  %v3243_v37 = vmul.f32 %v17215_v1, %v17147_v5  ;;  %v17221_v1 = vld [vmem:[#allocation32_spill] sm:$0xff] }
 0x72c   :  { %v13947_v45 = vmul.f32 0.35355338, %v3590_v24  ;;  %v3592_v18 = vpop.f32.mrb[111].mxu0  ;;  %v3705_v13 = vpop.f32.mrb[111].mxu1  ;;  %v13955_v50 = vmul.f32 0.35355338, %v3703_v54  ;;  %v3244_v22 = vmul.f32 %v17221_v1, %v17149_v2 }
 0x72d   :  { %v3771_v28 = vmax.f32 %v3770_v59, %v13943_v36  ;;  %v13952_v0 = vmul.f32 0.35355338, %v3592_v18  ;;  %3768 = vmax.xlane.f32.xlu1 %v3767_v52  ;;  %v13959_v55 = vmul.f32 0.35355338, %v3705_v13  ;;  %v17216_v52 = vld [vmem:[#allocation28_spill] sm:$0xff]  ;;  %v17217_v24 = vld [vmem:[#allocation27_spill] sm:$0xff] }
 0x72e   :  { %v3274_v59 = vmul.f32 %v17216_v52, %v17146_v8  ;;  %v3242_v54 = vmul.f32 %v17217_v24, %v17146_v8  ;;  %v17218_v18 = vld [vmem:[#allocation42_spill] sm:$0xff]  ;;  %v17222_v24 = vld [vmem:[#allocation77_spill] sm:$0xff]  ;;  %v17228_v1 = vld [vmem:[#allocation76_spill] sm:$0xff] }
 0x72f   :  { %v3772_v11 = vmax.f32 %v3771_v28, %v13949_v25  ;;  %v3775_v15 = vmax.f32 %v13947_v45, %v13952_v0  ;;  %v3227_v13 = vmul.f32 %v17218_v18, %v17147_v5  ;;  %v3259_v34 = vmul.f32 %v17222_v24, %v17147_v5 }
 0x730   :  { %v10379_v28 = vpack.i.bf16 %v3275_v7, %v3274_v59  ;;  %v17223_v7 = vld [vmem:[#allocation49_spill] sm:$0xff]  ;;  %v17224_v59 = vld [vmem:[#allocation39_spill] sm:$0xff]  ;;  %v3276_v24 = vmul.f32 %v17228_v1, %v17149_v2 }
 0x731   :  { %v3776_v20 = vmax.f32 %v3775_v15, %v13955_v50  ;;  %3773 = vmax.xlane.f32.xlu0 %v3772_v11  ;;  %v10374_v11 = vpack.i.bf16 %v3243_v37, %v3242_v54  ;;  %v17219_v15 = vld [vmem:[#allocation46_spill] sm:$0xff]  ;;  %v3229_v37 = vmul.f32 %v17223_v7, %v17150_v53  ;;  %v3258_v54 = vmul.f32 %v17224_v59, %v17146_v8 }
 0x733   :  { %v3777_v62 = vmax.f32 %v3776_v20, %v13959_v55  ;;  %v3245_v20 = vmul.f32 %v17219_v15, %v17150_v53 }
 0x735   :  { %3778 = vmax.xlane.f32.xlu1 %v3777_v62  ;;  %v17220_v62 = vld [vmem:[#allocation30_spill] sm:$0xff]  ;;  %v10394_v18 = vpack.i.bf16 %v3245_v20, %v3244_v22 }
 0x736   :  { %v3226_v49 = vmul.f32 %v17220_v62, %v17146_v8  ;;  %v10389_v62 = vpack.i.bf16 %v3259_v34, %v3258_v54  ;;  %v17227_v22 = vld [vmem:[#allocation82_spill] sm:$0xff]  ;;  %v17230_v34 = vld [vmem:[#allocation56_spill] sm:$0xff] }
 0x737   :  { %v3247_v20 = vmul.f32 %v17227_v22, %v17152_v38 }
 0x738   :  { %v10384_v52 = vpack.i.bf16 %v3227_v13, %v3226_v49  ;;  %v17226_v13 = vld [vmem:[#allocation51_spill] sm:$0xff] }
 0x746   :  { %10380 = vrot.lane.b32.xlu1 %v10379_v28, %s11003_s0  ;;  %v17225_v28 = vld [vmem:[#allocation45_spill] sm:$0xff] }
 0x747   :  { %10375 = vrot.lane.b32.xlu0 %v10374_v11, %s11003_s0  ;;  %v3228_v15 = vmul.f32 %v17225_v28, %v17149_v2  ;;  %v3277_v11 = vmul.f32 %v17226_v13, %v17150_v53 }
 0x749   :  { %v10404_v49 = vpack.i.bf16 %v3229_v37, %v3228_v15  ;;  %v10399_v59 = vpack.i.bf16 %v3277_v11, %v3276_v24  ;;  %v17231_v37 = vld [vmem:[#allocation50_spill] sm:$0xff]  ;;  %v17232_v15 = vld [vmem:[#allocation79_spill] sm:$0xff] }
 0x74a   :  { %10385 = vrot.lane.b32.xlu1 %v10384_v52, %s11003_s0  ;;  %v17229_v52 = vld [vmem:[#allocation74_spill] sm:$0xff]  ;;  %v3231_v28 = vmul.f32 %v17231_v37, %v17152_v38  ;;  %v3260_v13 = vmul.f32 %v17232_v15, %v17149_v2 }
 0x74b   :  { %10395 = vrot.lane.b32.xlu0 %v10394_v18, %s11003_s0  ;;  %v3246_v7 = vmul.f32 %v17229_v52, %v17151_v10  ;;  %v3261_v18 = vmul.f32 %v17230_v34, %v17150_v53  ;;  %v17234_v11 = vld [vmem:[#allocation86_spill] sm:$0xff] }
 0x74d   :  { %v10414_v54 = vpack.i.bf16 %v3247_v20, %v3246_v7  ;;  %v10409_v1 = vpack.i.bf16 %v3261_v18, %v3260_v13  ;;  %v17235_v20 = vld [vmem:[#allocation55_spill] sm:$0xff]  ;;  %v17236_v7 = vld [vmem:[#allocation80_spill] sm:$0xff] }
 0x74e   :  { %10390 = vrot.lane.b32.xlu1 %v10389_v62, %s11003_s0  ;;  %v17233_v62 = vld [vmem:[#allocation81_spill] sm:$0xff]  ;;  %v3249_v52 = vmul.f32 %v17235_v20, %v17154_v63  ;;  %v3278_v34 = vmul.f32 %v17236_v7, %v17151_v10  ;;  %v17238_v18 = vld [vmem:[#allocation88_spill] sm:$0xff] }
 0x74f   :  { %10405 = vrot.lane.b32.xlu0 %v10404_v49, %s11003_s0  ;;  %v3230_v22 = vmul.f32 %v17233_v62, %v17151_v10  ;;  %v3279_v49 = vmul.f32 %v17234_v11, %v17152_v38 }
 0x751   :  { %v10424_v24 = vpack.i.bf16 %v3231_v28, %v3230_v22  ;;  %v10419_v15 = vpack.i.bf16 %v3279_v49, %v3278_v34  ;;  %v17239_v28 = vld [vmem:[#allocation57_spill] sm:$0xff]  ;;  %v17242_v49 = vld [vmem:[#allocation90_spill] sm:$0xff] }
 0x752   :  { %10400 = vrot.lane.b32.xlu1 %v10399_v59, %s11003_s0  ;;  %v17237_v59 = vld [vmem:[#allocation83_spill] sm:$0xff]  ;;  %v3233_v62 = vmul.f32 %v17239_v28, %v17154_v63  ;;  %v17240_v22 = vld [vmem:[#allocation85_spill] sm:$0xff] }
 0x753   :  { %10415 = vrot.lane.b32.xlu0 %v10414_v54, %s11003_s0  ;;  %v3248_v37 = vmul.f32 %v17237_v59, %v17153_v47  ;;  %v3263_v54 = vmul.f32 %v17238_v18, %v17152_v38  ;;  %v3262_v11 = vmul.f32 %v17240_v22, %v17151_v10 }
 0x755   :  { %v10434_v13 = vpack.i.bf16 %v3249_v52, %v3248_v37  ;;  %v10429_v7 = vpack.i.bf16 %v3263_v54, %v3262_v11  ;;  %v17243_v52 = vld [vmem:[#allocation58_spill] sm:$0xff]  ;;  %v17244_v37 = vld [vmem:[#allocation53_spill] sm:$0xff] }
 0x756   :  { %10410 = vrot.lane.b32.xlu1 %v10409_v1, %s11003_s0  ;;  %v17241_v1 = vld [vmem:[#allocation84_spill] sm:$0xff]  ;;  %v3251_v59 = vmul.f32 %v17243_v52, %v17147_v5  ;;  %v3280_v18 = vmul.f32 %v17244_v37, %v17153_v47  ;;  %v17246_v54 = vld [vmem:[#allocation13_spill] sm:$0xff] }
 0x757   :  { %10425 = vrot.lane.b32.xlu0 %v10424_v24, %s11003_s0  ;;  %v3232_v20 = vmul.f32 %v17241_v1, %v17153_v47  ;;  %v3281_v24 = vmul.f32 %v17242_v49, %v17154_v63 }
 0x759   :  { %v10444_v34 = vpack.i.bf16 %v3233_v62, %v3232_v20  ;;  %v10439_v22 = vpack.i.bf16 %v3281_v24, %v3280_v18  ;;  %v17247_v62 = vld [vmem:[#allocation15_spill] sm:$0xff]  ;;  %v17248_v20 = vld [vmem:[#allocation89_spill] sm:$0xff]  ;;  %v17250_v24 = vld [vmem:[#allocation18_spill] sm:$0xff] }
 0x75a   :  { %10420 = vrot.lane.b32.xlu1 %v10419_v15, %s11003_s0  ;;  %v17245_v15 = vld [vmem:[#allocation87_spill] sm:$0xff]  ;;  %v3235_v1 = vmul.f32 %v17247_v62, %v17147_v5  ;;  %v3264_v49 = vmul.f32 %v17248_v20, %v17153_v47 }
 0x75b   :  { %10435 = vrot.lane.b32.xlu0 %v10434_v13, %s11003_s0  ;;  %v3250_v28 = vmul.f32 %v17245_v15, %v17146_v8  ;;  %v3265_v13 = vmul.f32 %v17246_v54, %v17154_v63 }
 0x75d   :  { %v10454_v11 = vpack.i.bf16 %v3251_v59, %v3250_v28  ;;  %v10449_v37 = vpack.i.bf16 %v3265_v13, %v3264_v49  ;;  %v17251_v59 = vld [vmem:[#allocation20_spill] sm:$0xff]  ;;  %v17252_v28 = vld [vmem:[#allocation91_spill] sm:$0xff]  ;;  %v17254_v13 = vld [vmem:[#allocation109_spill] sm:$0xff] }
 0x75e   :  { %10430 = vrot.lane.b32.xlu1 %v10429_v7, %s11003_s0  ;;  %v17249_v7 = vld [vmem:[#allocation54_spill] sm:$0xff]  ;;  %v3253_v15 = vmul.f32 %v17251_v59, %v17150_v53  ;;  %v3282_v54 = vmul.f32 %v17252_v28, %v17146_v8 }
 0x75f   :  { %10445 = vrot.lane.b32.xlu0 %v10444_v34, %s11003_s0  ;;  %v3234_v52 = vmul.f32 %v17249_v7, %v17146_v8  ;;  %v3283_v34 = vmul.f32 %v17250_v24, %v17147_v5 }
 0x761   :  { %v10464_v18 = vpack.i.bf16 %v3235_v1, %v3234_v52  ;;  %v10459_v20 = vpack.i.bf16 %v3283_v34, %v3282_v54  ;;  %v17255_v1 = vld [vmem:[#allocation111_spill] sm:$0xff]  ;;  %v17256_v52 = vld [vmem:[#allocation17_spill] sm:$0xff] }
 0x762   :  { %10440 = vrot.lane.b32.xlu1 %v10439_v22, %s11003_s0  ;;  %v17253_v22 = vld [vmem:[#allocation14_spill] sm:$0xff]  ;;  %v3237_v7 = vmul.f32 %v17255_v1, %v17150_v53  ;;  %v3266_v24 = vmul.f32 %v17256_v52, %v17146_v8  ;;  %v17258_v34 = vld [vmem:[#allocation113_spill] sm:$0xff]  ;;  %v17261_v8 = vld [vmem:[#allocation108_spill] sm:$0xff] }
 0x763   :  { %10455 = vrot.lane.b32.xlu0 %v10454_v11, %s11003_s0  ;;  %v3252_v62 = vmul.f32 %v17253_v22, %v17149_v2  ;;  %v3267_v11 = vmul.f32 %v17254_v13, %v17147_v5  ;;  %v17259_v5 = vld [vmem:[#allocation115_spill] sm:$0xff]  ;;  %v17260_v22 = vld [vmem:[#allocation21_spill] sm:$0xff] }
 0x765   :  { %v10474_v49 = vpack.i.bf16 %v3253_v15, %v3252_v62  ;;  %v10469_v28 = vpack.i.bf16 %v3267_v11, %v3266_v24  ;;  %v3255_v15 = vmul.f32 %v17259_v5, %v17152_v38  ;;  %v3284_v62 = vmul.f32 %v17260_v22, %v17149_v2  ;;  %v17262_v11 = vld [vmem:[#allocation117_spill] sm:$0xff]  ;;  %v17264_v24 = vld [vmem:[#allocation110_spill] sm:$0xff] }
 0x766   :  { %10450 = vrot.lane.b32.xlu1 %v10449_v37, %s11003_s0  ;;  %v17257_v37 = vld [vmem:[#allocation19_spill] sm:$0xff]  ;;  %v17268_v22 = vld [vmem:[#allocation114_spill] sm:$0xff] }
 0x767   :  { %10465 = vrot.lane.b32.xlu0 %v10464_v18, %s11003_s0  ;;  %v3236_v59 = vmul.f32 %v17257_v37, %v17149_v2  ;;  %v3285_v18 = vmul.f32 %v17258_v34, %v17150_v53  ;;  %v3268_v37 = vmul.f32 %v17264_v24, %v17149_v2  ;;  %v17269_v2 = vld [vmem:[#allocation116_spill] sm:$0xff] }
 0x769   :  { %v10484_v54 = vpack.i.bf16 %v3237_v7, %v3236_v59  ;;  %v10479_v13 = vpack.i.bf16 %v3285_v18, %v3284_v62  ;;  %v17263_v7 = vld [vmem:[#allocation119_spill] sm:$0xff]  ;;  %v17265_v59 = vld [vmem:[#allocation112_spill] sm:$0xff]  ;;  %v17266_v18 = vld [vmem:[#allocation121_spill] sm:$0xff]  ;;  %v3286_v62 = vmul.f32 %v17268_v22, %v17151_v10 }
 0x76a   :  { %10460 = vrot.lane.b32.xlu1 %v10459_v20, %s11003_s0  ;;  %v3254_v20 = vmul.f32 %v17261_v8, %v17151_v10  ;;  %v3239_v52 = vmul.f32 %v17263_v7, %v17152_v38  ;;  %v3256_v8 = vmul.f32 %v17269_v2, %v17153_v47  ;;  %v17277_v22 = vld [vmem:[#allocation124_spill] sm:$0xff] }
 0x76b   :  { %10475 = vrot.lane.b32.xlu0 %v10474_v49, %s11003_s0  ;;  %v3269_v49 = vmul.f32 %v17262_v11, %v17150_v53  ;;  %v17267_v53 = vld [vmem:[#allocation123_spill] sm:$0xff] }
 0x76c   :  { %v10494_v1 = vpack.i.bf16 %v3255_v15, %v3254_v20  ;;  %v3257_v15 = vmul.f32 %v17267_v53, %v17154_v63  ;;  %v17276_v53 = vld [vmem:[#allocation128_spill] sm:$0xff] }
 0x76d   :  { %v10489_v34 = vpack.i.bf16 %v3269_v49, %v3268_v37  ;;  %v17273_v37 = vld [vmem:[#allocation120_spill] sm:$0xff] }
 0x76e   :  { %10470 = vrot.lane.b32.xlu1 %v10469_v28, %s11003_s0  ;;  %v3238_v28 = vmul.f32 %v17265_v59, %v17151_v10  ;;  %v10514_v49 = vpack.i.bf16 %v3257_v15, %v3256_v8  ;;  %v3240_v59 = vmul.f32 %v17273_v37, %v17153_v47  ;;  %v3273_v15 = vmul.f32 %v17276_v53, %v17154_v63 }
 0x76f   :  { %10485 = vrot.lane.b32.xlu0 %v10484_v54, %s11003_s0  ;;  %v3287_v54 = vmul.f32 %v17266_v18, %v17152_v38 }
 0x770   :  { %v10504_v5 = vpack.i.bf16 %v3239_v52, %v3238_v28  ;;  %v17272_v52 = vld [vmem:[#allocation118_spill] sm:$0xff] }
 0x771   :  { %v10499_v20 = vpack.i.bf16 %v3287_v54, %v3286_v62  ;;  %v3270_v24 = vmul.f32 %v17272_v52, %v17151_v10  ;;  %v3272_v62 = vmul.f32 %v17277_v22, %v17153_v47 }
 0x772   :  { %10480 = vrot.lane.b32.xlu1 %v10479_v13, %s11003_s0  ;;  %v17270_v13 = vld [vmem:[#allocation125_spill] sm:$0xff] }
 0x773   :  { %10495 = vrot.lane.b32.xlu0 %v10494_v1, %s11003_s0  ;;  %v3271_v11 = vmul.f32 %v17270_v13, %v17152_v38  ;;  %v17271_v1 = vld [vmem:[#allocation126_spill] sm:$0xff]  ;;  %v10529_v2 = vpack.i.bf16 %v3273_v15, %v3272_v62 }
 0x774   :  { %v3241_v7 = vmul.f32 %v17271_v1, %v17154_v63  ;;  %v17275_v38 = vld [vmem:[#allocation122_spill] sm:$0xff] }
 0x775   :  { %v10509_v28 = vpack.i.bf16 %v3271_v11, %v3270_v24 }
 0x776   :  { %10490 = vrot.lane.b32.xlu1 %v10489_v34, %s11003_s0  ;;  %v17274_v34 = vld [vmem:[#allocation127_spill] sm:$0xff]  ;;  %v10524_v54 = vpack.i.bf16 %v3241_v7, %v3240_v59 }
 0x777   :  { %10505 = vrot.lane.b32.xlu0 %v10504_v5, %s11003_s0  ;;  %v3289_v18 = vmul.f32 %v17274_v34, %v17154_v63  ;;  %v3288_v5 = vmul.f32 %v17275_v38, %v17153_v47 }
 0x779   :  { %v10519_v10 = vpack.i.bf16 %v3289_v18, %v3288_v5 }
 0x77a   :  { %10500 = vrot.lane.b32.xlu1 %v10499_v20, %s11003_s0 }
 0x77b   :  { %10515 = vrot.lane.b32.xlu0 %v10514_v49, %s11003_s0 }
 0x77e   :  { %10510 = vrot.lane.b32.xlu1 %v10509_v28, %s11003_s0 }
 0x77f   :  { %10525 = vrot.lane.b32.xlu0 %v10524_v54, %s11003_s0 }
 0x782   :  { %10520 = vrot.lane.b32.xlu1 %v10519_v10, %s11003_s0 }
 0x786   :  { %10530 = vrot.lane.b32.xlu1 %v10529_v2, %s11003_s0  ;;  %s10988_s0 = scalar_lea.vmem %s8071_s2, 16 }
 0x787   :  { %p10989_p0 = scmp.ne.s32.totalorder %s8071_s2, %s10988_s0  ;;  %p10994_p2 = scmp.lt.s32.totalorder %s10988_s0, %s10988_s0 }
 0x789   :  { %p10995_p3 = por %p10994_p2, %p10993_p1 }
 0x78b   :  { %p10996_p4 = pnand %p10995_p3, %p10989_p0 }
 0x7a6   :  { %v3744_v8 = vpop.xlane.xlu0 %3743 }
 0x7a7   :  { %v3780_v20 = vsub.f32 %v13867_v19, %v3744_v8  ;;  %v3781_v13 = vsub.f32 %v13869_v14, %v3744_v8  ;;  %v3782_v11 = vsub.f32 %v13871_v56, %v3744_v8  ;;  %v3783_v49 = vsub.f32 %v13877_v60, %v3744_v8 }
 0x7a9   :  { %v3812_v1 = vmul.f32 1.442695, %v3780_v20  ;;  %v3814_v7 = vmul.f32 1.442695, %v3781_v13  ;;  %v3816_v63 = vmul.f32 1.442695, %v3782_v11 }
 0x7aa   :  { %v3818_v52 = vmul.f32 1.442695, %v3783_v49  ;;  %v3749_v24 = vpop.xlane.xlu1 %3748 }
 0x7ab   :  { %10616 = vpow2.f32 %v3812_v1  ;;  %v3784_v47 = vsub.f32 %v13875_v3, %v3749_v24  ;;  %v3785_v37 = vsub.f32 %v13880_v21, %v3749_v24  ;;  %v3786_v59 = vsub.f32 %v13883_v57, %v3749_v24 }
 0x7ac   :  { %10618 = vpow2.f32 %v3814_v7  ;;  %v3787_v19 = vsub.f32 %v13889_v32, %v3749_v24 }
 0x7ad   :  { %10620 = vpow2.f32 %v3816_v63  ;;  %v3820_v14 = vmul.f32 1.442695, %v3784_v47  ;;  %v3822_v56 = vmul.f32 1.442695, %v3785_v37  ;;  %v3824_v28 = vmul.f32 1.442695, %v3786_v59 }
 0x7ae   :  { %10622 = vpow2.f32 %v3818_v52  ;;  %v3826_v60 = vmul.f32 1.442695, %v3787_v19  ;;  %v3754_v34 = vpop.xlane.xlu0 %3753  ;;  %v10971_v59 = vld [vmem:[%s16616_s25 + $0x10] sm:$0xff] }
 0x7af   :  { %10624 = vpow2.f32 %v3820_v14  ;;  %v3788_v18 = vsub.f32 %v13887_v6, %v3754_v34  ;;  %v3789_v54 = vsub.f32 %v13892_v40, %v3754_v34  ;;  %v3790_v3 = vsub.f32 %v13895_v31, %v3754_v34 }
 0x7b0   :  { %10626 = vpow2.f32 %v3822_v56  ;;  %v3791_v21 = vsub.f32 %v13901_v42, %v3754_v34 }
 0x7b1   :  { %10628 = vpow2.f32 %v3824_v28  ;;  %v3828_v57 = vmul.f32 1.442695, %v3788_v18  ;;  %v3830_v32 = vmul.f32 1.442695, %v3789_v54  ;;  %v3832_v38 = vmul.f32 1.442695, %v3790_v3 }
 0x7b2   :  { %10630 = vpow2.f32 %v3826_v60  ;;  %v3834_v5 = vmul.f32 1.442695, %v3791_v21  ;;  %v3759_v10 = vpop.xlane.xlu0 %3758 }
 0x7b3   :  { %10632 = vpow2.f32 %v3828_v57  ;;  %v3792_v53 = vsub.f32 %v13899_v48, %v3759_v10  ;;  %v3793_v15 = vsub.f32 %v13904_v33, %v3759_v10  ;;  %v3794_v6 = vsub.f32 %v13907_v17, %v3759_v10 }
 0x7b4   :  { %10634 = vpow2.f32 %v3830_v32  ;;  %v3795_v40 = vsub.f32 %v13913_v61, %v3759_v10 }
 0x7b5   :  { %v14139_v31 = vpop.eup %10616  ;;  %10636 = vpow2.f32 %v3832_v38  ;;  %v3836_v42 = vmul.f32 1.442695, %v3792_v53  ;;  %v3838_v22 = vmul.f32 1.442695, %v3793_v15  ;;  %v3840_v62 = vmul.f32 1.442695, %v3794_v6 }
 0x7b6   :  { %v14141_v2 = vpop.eup %10618  ;;  %10638 = vpow2.f32 %v3834_v5  ;;  %v3842_v8 = vmul.f32 1.442695, %v3795_v40  ;;  %v3764_v20 = vpop.xlane.xlu0 %3763 }
 0x7b7   :  { %v14143_v13 = vpop.eup %10620  ;;  %10640 = vpow2.f32 %v3836_v42  ;;  %3940 = vmatprep.mubr.f32.mxu0 %v14141_v2  ;;  %v3796_v48 = vsub.f32 %v13911_v35, %v3764_v20  ;;  %v3797_v33 = vsub.f32 %v13916_v39, %v3764_v20  ;;  %v3798_v17 = vsub.f32 %v13919_v41, %v3764_v20  ;;  %v10970_v35 = vld [vmem:[%s16616_s25] sm:$0xff] }
 0x7b8   :  { %v14149_v61 = vpop.eup %10622  ;;  %10642 = vpow2.f32 %v3838_v22  ;;  %v3799_v11 = vsub.f32 %v13925_v44, %v3764_v20  ;;  %3941 = vmatmul.mubr.f32.vlgmr.msra.gmra.mrb[112].mxu0 %v14139_v31 }
 0x7b9   :  { %v14153_v49 = vpop.eup %10624  ;;  %10644 = vpow2.f32 %v3840_v62  ;;  %4045 = vmatprep.mubr.f32.mxu1 %v14149_v61  ;;  %v3844_v1 = vmul.f32 1.442695, %v3796_v48  ;;  %v3846_v7 = vmul.f32 1.442695, %v3797_v33  ;;  %v3848_v63 = vmul.f32 1.442695, %v3798_v17  ;;  %4119 = vmatpush1.msra.mxu0 %v10970_v35 }
 0x7ba   :  { %v14159_v39 = vpop.eup %10626  ;;  %10646 = vpow2.f32 %v3842_v8  ;;  %v3850_v41 = vmul.f32 1.442695, %v3799_v11  ;;  %4046 = vmatmul.mubr.f32.vlgmr.msra.gmra.mrb[112].mxu1 %v14143_v13  ;;  %v3769_v44 = vpop.xlane.xlu1 %3768 }
 0x7bb   :  { %v14162_v52 = vpop.eup %10628  ;;  %10648 = vpow2.f32 %v3844_v1  ;;  %3945 = vmatprep.mubr.f32.mxu0 %v14159_v39  ;;  %v3800_v24 = vsub.f32 %v13923_v9, %v3769_v44  ;;  %v3801_v47 = vsub.f32 %v13928_v4, %v3769_v44  ;;  %v3802_v37 = vsub.f32 %v13931_v51, %v3769_v44  ;;  %4232 = vmatpush1.msra.mxu1 %v10971_v59 }
 0x7bc   :  { %v14171_v19 = vpop.eup %10630  ;;  %10650 = vpow2.f32 %v3846_v7  ;;  %v3803_v14 = vsub.f32 %v13937_v26, %v3769_v44  ;;  %3946 = vmatmul.mubr.f32.gmra.mrb[114].mxu0 %v14153_v49 }
 0x7bd   :  { %v14175_v56 = vpop.eup %10632  ;;  %10652 = vpow2.f32 %v3848_v63  ;;  %4050 = vmatprep.mubr.f32.mxu1 %v14171_v19  ;;  %v3852_v9 = vmul.f32 1.442695, %v3800_v24  ;;  %v3854_v4 = vmul.f32 1.442695, %v3801_v47  ;;  %v3856_v51 = vmul.f32 1.442695, %v3802_v37 }
 0x7be   :  { %v14178_v28 = vpop.eup %10634  ;;  %10654 = vpow2.f32 %v3850_v41  ;;  %v3858_v60 = vmul.f32 1.442695, %v3803_v14  ;;  %4051 = vmatmul.mubr.f32.gmra.mrb[114].mxu1 %v14162_v52  ;;  %v3774_v34 = vpop.xlane.xlu0 %3773 }
 0x7bf   :  { %v14181_v18 = vpop.eup %10636  ;;  %10656 = vpow2.f32 %v3852_v9  ;;  %3950 = vmatprep.mubr.f32.mxu0 %v14178_v28  ;;  %v3804_v26 = vsub.f32 %v13935_v29, %v3774_v34  ;;  %v3805_v54 = vsub.f32 %v13940_v30, %v3774_v34  ;;  %v3806_v3 = vsub.f32 %v13943_v36, %v3774_v34 }
 0x7c0   :  { %v14187_v21 = vpop.eup %10638  ;;  %10658 = vpow2.f32 %v3854_v4  ;;  %v3807_v57 = vsub.f32 %v13949_v25, %v3774_v34  ;;  %3951 = vmatmul.mubr.f32.gmra.mrb[116].mxu0 %v14175_v56 }
 0x7c1   :  { %v14191_v32 = vpop.eup %10640  ;;  %10660 = vpow2.f32 %v3856_v51  ;;  %4055 = vmatprep.mubr.f32.mxu1 %v14187_v21  ;;  %v3860_v38 = vmul.f32 1.442695, %v3804_v26  ;;  %v3862_v5 = vmul.f32 1.442695, %v3805_v54  ;;  %v3864_v10 = vmul.f32 1.442695, %v3806_v3 }
 0x7c2   :  { %v14194_v29 = vpop.eup %10642  ;;  %10662 = vpow2.f32 %v3858_v60  ;;  %v3866_v30 = vmul.f32 1.442695, %v3807_v57  ;;  %4056 = vmatmul.mubr.f32.gmra.mrb[116].mxu1 %v14181_v18  ;;  %v10376_v36 = vpop.permute.xlu0 %10375 }
 0x7c3   :  { %v3779_v53 = vpop.xlane.xlu1 %3778  ;;  %v14197_v15 = vpop.eup %10644  ;;  %10664 = vpow2.f32 %v3860_v38  ;;  %3955 = vmatprep.mubr.f32.mxu0 %v14194_v29  ;;  %v10378_v25 = vunpack.i.h.bf16 %v10376_v36  ;;  %v10377_v6 = vunpack.i.l.bf16 %v10376_v36 }
 0x7c4   :  { %v3808_v40 = vsub.f32 %v13947_v45, %v3779_v53  ;;  %v14201_v42 = vpop.eup %10646  ;;  %10666 = vpow2.f32 %v3862_v5  ;;  %v3809_v22 = vsub.f32 %v13952_v0, %v3779_v53  ;;  %v3810_v62 = vsub.f32 %v13955_v50, %v3779_v53  ;;  %3956 = vmatmul.mubr.f32.gmra.mrb[118].mxu0 %v14191_v32 }
 0x7c5   :  { %v3811_v8 = vsub.f32 %v13959_v55, %v3779_v53  ;;  %v14207_v20 = vpop.eup %10648  ;;  %10668 = vpow2.f32 %v3864_v10  ;;  %4060 = vmatprep.mubr.f32.mxu1 %v14201_v42  ;;  %v10016_v33 = vpack.c.bf16 %v10378_v25, %v10377_v6 }
 0x7c6   :  { %17278 = vst [vmem:[#allocation36_spill] sm:$0xff] %v14207_v20  ;;  %v3868_v48 = vmul.f32 1.442695, %v3808_v40  ;;  %v14210_v17 = vpop.eup %10650  ;;  %10670 = vpow2.f32 %v3866_v30  ;;  %v3870_v45 = vmul.f32 1.442695, %v3809_v22  ;;  %4061 = vmatmul.mubr.f32.gmra.mrb[118].mxu1 %v14197_v15  ;;  %v14263_v3 = vpop.permute.xlu0 %10395 }
 0x7c7   :  { %17279 = vst [vmem:[#allocation34_spill] sm:$0xff] %v14210_v17  ;;  %v3872_v11 = vmul.f32 1.442695, %v3810_v62  ;;  %v3874_v1 = vmul.f32 1.442695, %v3811_v8  ;;  %v10381_v0 = vpop.permute.xlu1 %10380  ;;  %v14213_v50 = vpop.eup %10652  ;;  %3960 = vmatprep.mubr.f32.mxu0 %v14210_v17  ;;  %10017 = vmatprep.subr.bf16.mxu0 %v10016_v33 }
 0x7c8   :  { %17280 = vst [vmem:[#allocation29_spill] sm:$0xff] %v14213_v50  ;;  %10672 = vpow2.f32 %v3868_v48  ;;  %v10383_v55 = vunpack.i.h.bf16 %v10381_v0  ;;  %v14216_v7 = vpop.eup %10654  ;;  %v10382_v63 = vunpack.i.l.bf16 %v10381_v0  ;;  %3961 = vmatmul.mubr.f32.gmra.mrb[120].mxu0 %v14207_v20 }
 0x7c9   :  { %17281 = vst [vmem:[#allocation33_spill] sm:$0xff] %v14216_v7  ;;  %10674 = vpow2.f32 %v3870_v45  ;;  %v14219_v35 = vpop.eup %10656  ;;  %4065 = vmatprep.mubr.f32.mxu1 %v14216_v7 }
 0x7ca   :  { %17282 = vst [vmem:[#allocation38_spill] sm:$0xff] %v14219_v35  ;;  %10676 = vpow2.f32 %v3872_v11  ;;  %v14222_v41 = vpop.eup %10658  ;;  %4066 = vmatmul.mubr.f32.gmra.mrb[120].mxu1 %v14213_v50  ;;  %v10048_v44 = vpack.c.bf16 %v10383_v55, %v10382_v63  ;;  %v14267_v38 = vpop.permute.xlu0 %10405 }
 0x7cb   :  { %17283 = vst [vmem:[#allocation44_spill] sm:$0xff] %v14222_v41  ;;  %10678 = vpow2.f32 %v3874_v1  ;;  %v14225_v24 = vpop.eup %10660  ;;  %3965 = vmatprep.mubr.f32.mxu0 %v14222_v41  ;;  %v14259_v26 = vpop.permute.xlu1 %10385 }
 0x7cc   :  { %17284 = vst [vmem:[#allocation41_spill] sm:$0xff] %v14225_v24  ;;  %v14228_v47 = vpop.eup %10662  ;;  %3966 = vmatmul.mubr.f32.gmra.mrb[122].mxu0 %v14219_v35  ;;  %10049 = vmatprep.subr.bf16.mxu1 %v10048_v44 }
 0x7cd   :  { %17285 = vst [vmem:[#allocation40_spill] sm:$0xff] %v14228_v47  ;;  %v14231_v37 = vpop.eup %10664  ;;  %4070 = vmatprep.mubr.f32.mxu1 %v14228_v47 }
 0x7ce   :  { %17286 = vst [vmem:[#allocation43_spill] sm:$0xff] %v14231_v37  ;;  %v14234_v59 = vpop.eup %10666  ;;  %4071 = vmatmul.mubr.f32.gmra.mrb[122].mxu1 %v14225_v24  ;;  %v14271_v10 = vpop.permute.xlu0 %10415 }
 0x7cf   :  { %17287 = vst [vmem:[#allocation52_spill] sm:$0xff] %v14234_v59  ;;  %v14237_v14 = vpop.eup %10668  ;;  %3970 = vmatprep.mubr.f32.mxu0 %v14234_v59  ;;  %v14261_v54 = vpop.permute.xlu1 %10390  ;;  %v10418_v59 = vunpack.i.h.bf16 %v14271_v10 }
 0x7d0   :  { %17288 = vst [vmem:[#allocation47_spill] sm:$0xff] %v14237_v14  ;;  %v14240_v9 = vpop.eup %10670  ;;  %3971 = vmatmul.mubr.f32.gmra.mrb[124].mxu0 %v14231_v37 }
 0x7d1   :  { %17289 = vst [vmem:[#allocation70_spill] sm:$0xff] %v14240_v9  ;;  %4075 = vmatprep.mubr.f32.mxu1 %v14240_v9 }
 0x7d2   :  { %v14243_v4 = vpop.eup %10672  ;;  %4076 = vmatmul.mubr.f32.gmra.mrb[124].mxu1 %v14237_v14  ;;  %v14275_v36 = vpop.permute.xlu0 %10425 }
 0x7d3   :  { %17290 = vst [vmem:[#allocation6_spill] sm:$0xff] %v14243_v4  ;;  %v14246_v51 = vpop.eup %10674  ;;  %v14265_v57 = vpop.permute.xlu1 %10400 }
 0x7d4   :  { %17291 = vst [vmem:[#allocation59_spill] sm:$0xff] %v14246_v51  ;;  %v14249_v60 = vpop.eup %10676  ;;  %3975 = vmatprep.mubr.f32.mxu0 %v14246_v51 }
 0x7d5   :  { %17292 = vst [vmem:[#allocation60_spill] sm:$0xff] %v14249_v60  ;;  %v14252_v34 = vpop.eup %10678  ;;  %3976 = vmatmul.mubr.f32.gmra.mrb[126].mxu0 %v14243_v4 }
 0x7d6   :  { %17293 = vst [vmem:[#allocation5_spill] sm:$0xff] %v14252_v34  ;;  %4080 = vmatprep.mubr.f32.mxu1 %v14252_v34  ;;  %4182 = vmatprep.mubr.f32.mxu0 %v17145_v58  ;;  %v14279_v25 = vpop.permute.xlu0 %10435 }
 0x7d7   :  { %4081 = vmatmul.mubr.f32.gmra.mrb[126].mxu1 %v14249_v60  ;;  %v14269_v5 = vpop.permute.xlu1 %10410 }
 0x7d8   :  { %4295 = vmatprep.mubr.f32.mxu1 %v17145_v58 }
 0x7da   :  { %v14283_v40 = vpop.permute.xlu0 %10445 }
 0x7db   :  { %v14273_v30 = vpop.permute.xlu1 %10420 }
 0x7de   :  { %v14287_v62 = vpop.permute.xlu0 %10455 }
 0x7df   :  { %v14277_v53 = vpop.permute.xlu1 %10430 }
 0x7e2   :  { %v14291_v45 = vpop.permute.xlu0 %10465 }
 0x7e3   :  { %v14281_v6 = vpop.permute.xlu1 %10440 }
 0x7e6   :  { %v14295_v43 = vpop.permute.xlu0 %10475 }
 0x7e7   :  { %v14285_v22 = vpop.permute.xlu1 %10450 }
 0x7eb   :  { %v14289_v8 = vpop.permute.xlu1 %10460 }
 0x7ef   :  { %v14293_v0 = vpop.permute.xlu1 %10470 }
 0x7f3   :  { %v14297_v34 = vpop.permute.xlu1 %10480 }
 0x7f7   :  { %v14311_v9 = vpop.permute.xlu1 %10490 }
 0x88b   :  { %v8927_v48 = vpop.f32.mrb[112].mxu0 }
 0x88c   :  { %v8928_v33 = vpop.f32.mrb[113].mxu0 }
 0x88d   :  { %v8983_v11 = vpop.f32.mrb[112].mxu1  ;;  %v8929_v1 = vadd.f32 %v8928_v33, %v8927_v48 }
 0x88e   :  { %v8984_v55 = vpop.f32.mrb[113].mxu1 }
 0x88f   :  { %v8985_v63 = vadd.f32 %v8984_v55, %v8983_v11  ;;  %v8930_v44 = vpop.f32.mrb[114].mxu0 }
 0x890   :  { %v8931_v23 = vpop.f32.mrb[115].mxu0 }
 0x891   :  { %v4048_v46 = vadd.f32 %v8985_v63, %v8929_v1  ;;  %v8986_v12 = vpop.f32.mrb[114].mxu1  ;;  %v8932_v16 = vadd.f32 %v8931_v23, %v8930_v44  ;;  %v10398_v1 = vunpack.i.h.bf16 %v14263_v3  ;;  %v10397_v23 = vunpack.i.l.bf16 %v14263_v3 }
 0x892   :  { %v8987_v27 = vpop.f32.mrb[115].mxu1  ;;  %v10388_v63 = vunpack.i.h.bf16 %v14259_v26  ;;  %v10392_v44 = vunpack.i.l.bf16 %v14261_v54  ;;  %v10403_v3 = vunpack.i.h.bf16 %v14265_v57 }
 0x893   :  { %10680 = vrcp.f32 %v4048_v46  ;;  %v8988_v60 = vadd.f32 %v8987_v27, %v8986_v12  ;;  %v8933_v4 = vpop.f32.mrb[116].mxu0  ;;  %v10387_v46 = vunpack.i.l.bf16 %v14259_v26  ;;  %v10393_v12 = vunpack.i.h.bf16 %v14261_v54 }
 0x894   :  { %v8934_v51 = vpop.f32.mrb[117].mxu0  ;;  %v10417_v54 = vunpack.i.l.bf16 %v14271_v10  ;;  %v10423_v10 = vunpack.i.h.bf16 %v14273_v30 }
 0x895   :  { %v4053_v14 = vadd.f32 %v8988_v60, %v8932_v16  ;;  %v8989_v48 = vpop.f32.mrb[116].mxu1  ;;  %v8935_v33 = vadd.f32 %v8934_v51, %v8933_v4  ;;  %v14305_v16 = vpop.permute.xlu0 %10485  ;;  %v10407_v60 = vunpack.i.l.bf16 %v14267_v38  ;;  %v10018_v47 = vpack.c.bf16 %v10388_v63, %v10387_v46 }
 0x896   :  { %v8990_v37 = vpop.f32.mrb[117].mxu1  ;;  %v10050_v41 = vpack.c.bf16 %v10393_v12, %v10392_v44  ;;  %v10438_v46 = vunpack.i.h.bf16 %v14279_v25 }
 0x897   :  { %10682 = vrcp.f32 %v4053_v14  ;;  %v8991_v11 = vadd.f32 %v8990_v37, %v8989_v48  ;;  %v8936_v55 = vpop.f32.mrb[118].mxu0  ;;  %v10408_v37 = vunpack.i.h.bf16 %v14267_v38  ;;  %v10402_v48 = vunpack.i.l.bf16 %v14265_v57 }
 0x898   :  { %v8937_v27 = vpop.f32.mrb[119].mxu0  ;;  %v10413_v38 = vunpack.i.h.bf16 %v14269_v5 }
 0x899   :  { %v4058_v4 = vadd.f32 %v8991_v11, %v8935_v33  ;;  %v8992_v51 = vpop.f32.mrb[118].mxu1  ;;  %v8938_v14 = vadd.f32 %v8937_v27, %v8936_v55  ;;  %v10428_v11 = vunpack.i.h.bf16 %v14275_v36  ;;  %v10427_v55 = vunpack.i.l.bf16 %v14275_v36 }
 0x89a   :  { %v8993_v26 = vpop.f32.mrb[119].mxu1  ;;  %v10412_v27 = vunpack.i.l.bf16 %v14269_v5  ;;  %v10020_v36 = vpack.c.bf16 %v10398_v1, %v10397_v23  ;;  %v10022_v17 = vpack.c.bf16 %v10408_v37, %v10407_v60  ;;  %v14323_v5 = vpop.permute.xlu0 %10495  ;;  %v10433_v23 = vunpack.i.h.bf16 %v14277_v53 }
 0x89b   :  { %10684 = vrcp.f32 %v4058_v4  ;;  %v8994_v24 = vadd.f32 %v8993_v26, %v8992_v51  ;;  %v8939_v33 = vpop.f32.mrb[120].mxu0  ;;  %v10422_v4 = vunpack.i.l.bf16 %v14273_v30  ;;  %v10052_v26 = vpack.c.bf16 %v10403_v3, %v10402_v48  ;;  %v14326_v30 = vpop.permute.xlu1 %10500 }
 0x89c   :  { %v8940_v35 = vpop.f32.mrb[121].mxu0  ;;  %v10054_v12 = vpack.c.bf16 %v10413_v38, %v10412_v27  ;;  %v10432_v37 = vunpack.i.l.bf16 %v14277_v53  ;;  %v10443_v60 = vunpack.i.h.bf16 %v14281_v6  ;;  %v10442_v3 = vunpack.i.l.bf16 %v14281_v6 }
 0x89d   :  { %v10681_v57 = vpop.eup %10680  ;;  %v4063_v50 = vadd.f32 %v8994_v24, %v8938_v14  ;;  %v8995_v20 = vpop.f32.mrb[120].mxu1  ;;  %v8941_v7 = vadd.f32 %v8940_v35, %v8939_v33  ;;  %v10026_v35 = vpack.c.bf16 %v10428_v11, %v10427_v55  ;;  %v10024_v14 = vpack.c.bf16 %v10418_v59, %v10417_v54 }
 0x89e   :  { %v8996_v51 = vpop.f32.mrb[121].mxu1  ;;  %8309 = vmatmul.mubr.msk.f32.vlgmr.msra.gmra.mrb[128].mxu0 %vm2413_vm4, %v10681_v57  ;;  %8317 = vmatmul.mubr.msk.f32.vlgmr.msra.gmra.mrb[128].mxu1 %vm2413_vm4, %v10681_v57  ;;  %v10056_v59 = vpack.c.bf16 %v10423_v10, %v10422_v4  ;;  %v10447_v53 = vunpack.i.l.bf16 %v14283_v40  ;;  %v10457_v11 = vunpack.i.l.bf16 %v14287_v62  ;;  %v10453_v6 = vunpack.i.h.bf16 %v14285_v22  ;;  %v14343_v10 = vpop.permute.xlu0 %10505 }
 0x89f   :  { %10686 = vrcp.f32 %v4063_v50  ;;  %v8997_v63 = vadd.f32 %v8996_v51, %v8995_v20  ;;  %10019 = vmatpush3.bf16.msra.mxu0 %v10018_v47  ;;  %10051 = vmatpush3.bf16.msra.mxu1 %v10050_v41  ;;  %v8942_v24 = vpop.f32.mrb[122].mxu0  ;;  %v10437_v47 = vunpack.i.l.bf16 %v14279_v25  ;;  %v10458_v25 = vunpack.i.h.bf16 %v14287_v62 }
 0x8a0   :  { %10021 = vmatprep.subr.bf16.mxu0 %v10020_v36  ;;  %10053 = vmatprep.subr.bf16.mxu1 %v10052_v26  ;;  %v8943_v44 = vpop.f32.mrb[123].mxu0  ;;  %v10452_v55 = vunpack.i.l.bf16 %v14285_v22  ;;  %v10058_v57 = vpack.c.bf16 %v10433_v23, %v10432_v37  ;;  %v10463_v62 = vunpack.i.h.bf16 %v14289_v8  ;;  %v10462_v51 = vunpack.i.l.bf16 %v14289_v8  ;;  %v14349_v36 = vpop.permute.xlu1 %10510 }
 0x8a1   :  { %v10683_v1 = vpop.eup %10682  ;;  %v4068_v50 = vadd.f32 %v8997_v63, %v8941_v7  ;;  %v8998_v20 = vpop.f32.mrb[122].mxu1  ;;  %4188 = vmatprep.mubr.f32.mxu0 %v17145_v58  ;;  %4301 = vmatprep.mubr.f32.mxu1 %v17145_v58  ;;  %v8944_v41 = vadd.f32 %v8943_v44, %v8942_v24  ;;  %v10448_v7 = vunpack.i.h.bf16 %v14283_v40  ;;  %v10028_v26 = vpack.c.bf16 %v10438_v46, %v10437_v47 }
 0x8a2   :  { %v8999_v48 = vpop.f32.mrb[123].mxu1  ;;  %8310 = vmatmul.mubr.msk.f32.gmra.mrb[130].mxu0 %vm2413_vm4, %v10683_v1  ;;  %8318 = vmatmul.mubr.msk.f32.gmra.mrb[130].mxu1 %vm2413_vm4, %v10683_v1  ;;  %v10060_v63 = vpack.c.bf16 %v10443_v60, %v10442_v3  ;;  %v10468_v24 = vunpack.i.h.bf16 %v14291_v45  ;;  %v10478_v8 = vunpack.i.h.bf16 %v14295_v43  ;;  %v10062_v23 = vpack.c.bf16 %v10453_v6, %v10452_v55 }
 0x8a3   :  { %10688 = vrcp.f32 %v4068_v50  ;;  %v9000_v54 = vadd.f32 %v8999_v48, %v8998_v20  ;;  %10023 = vmatpush3.bf16.msra.mxu0 %v10022_v17  ;;  %10055 = vmatpush3.bf16.msra.mxu1 %v10054_v12  ;;  %v8945_v33 = vpop.f32.mrb[124].mxu0  ;;  %v10467_v12 = vunpack.i.l.bf16 %v14291_v45  ;;  %v10030_v1 = vpack.c.bf16 %v10448_v7, %v10447_v53  ;;  %v14365_v53 = vpop.permute.xlu0 %10515 }
 0x8a4   :  { %10025 = vmatprep.subr.bf16.mxu0 %v10024_v14  ;;  %10057 = vmatprep.subr.bf16.mxu1 %v10056_v59  ;;  %v8946_v38 = vpop.f32.mrb[125].mxu0  ;;  %v10032_v50 = vpack.c.bf16 %v10458_v25, %v10457_v11  ;;  %v10473_v46 = vunpack.i.h.bf16 %v14293_v0  ;;  %v10477_v60 = vunpack.i.l.bf16 %v14295_v43  ;;  %v10483_v3 = vunpack.i.h.bf16 %v14297_v34  ;;  %v10521_v11 = vpop.permute.xlu1 %10520 }
 0x8a5   :  { %v10685_v27 = vpop.eup %10684  ;;  %v4073_v40 = vadd.f32 %v9000_v54, %v8944_v41  ;;  %v9001_v4 = vpop.f32.mrb[124].mxu1  ;;  %4194 = vmatprep.mubr.f32.mxu0 %v17145_v58  ;;  %4307 = vmatprep.mubr.f32.mxu1 %v17145_v58  ;;  %v8947_v17 = vadd.f32 %v8946_v38, %v8945_v33  ;;  %v10472_v41 = vunpack.i.l.bf16 %v14293_v0  ;;  %v10482_v48 = vunpack.i.l.bf16 %v14297_v34 }
 0x8a6   :  { %v9002_v22 = vpop.f32.mrb[125].mxu1  ;;  %8311 = vmatmul.mubr.msk.f32.gmra.mrb[132].mxu0 %vm2413_vm4, %v10685_v27  ;;  %8319 = vmatmul.mubr.msk.f32.gmra.mrb[132].mxu1 %vm2413_vm4, %v10685_v27  ;;  %v10064_v7 = vpack.c.bf16 %v10463_v62, %v10462_v51  ;;  %v10034_v0 = vpack.c.bf16 %v10468_v24, %v10467_v12  ;;  %v10488_v33 = vunpack.i.h.bf16 %v14305_v16  ;;  %v10487_v43 = vunpack.i.l.bf16 %v14305_v16 }
 0x8a7   :  { %10690 = vrcp.f32 %v4073_v40  ;;  %v9003_v44 = vadd.f32 %v9002_v22, %v9001_v4  ;;  %10027 = vmatpush3.bf16.msra.mxu0 %v10026_v35  ;;  %10059 = vmatpush3.bf16.msra.mxu1 %v10058_v57  ;;  %v10498_v25 = vunpack.i.h.bf16 %v14323_v5  ;;  %v10497_v34 = vunpack.i.l.bf16 %v14323_v5 }
 0x8a8   :  { %v8948_v14 = vpop.f32.mrb[126].mxu0  ;;  %10029 = vmatprep.subr.bf16.mxu0 %v10028_v26  ;;  %10061 = vmatprep.subr.bf16.mxu1 %v10060_v63  ;;  %v10066_v55 = vpack.c.bf16 %v10473_v46, %v10472_v41  ;;  %v10493_v38 = vunpack.i.h.bf16 %v14311_v9  ;;  %v10492_v27 = vunpack.i.l.bf16 %v14311_v9  ;;  %v10503_v16 = vunpack.i.h.bf16 %v14326_v30  ;;  %v10526_v63 = vpop.permute.xlu0 %10525 }
 0x8a9   :  { %v8949_v37 = vpop.f32.mrb[127].mxu0  ;;  %v10687_v20 = vpop.eup %10686  ;;  %v4078_v47 = vadd.f32 %v9003_v44, %v8947_v17  ;;  %4200 = vmatprep.mubr.f32.mxu0 %v17145_v58  ;;  %4313 = vmatprep.mubr.f32.mxu1 %v17145_v58  ;;  %v10502_v40 = vunpack.i.l.bf16 %v14326_v30  ;;  %v10036_v5 = vpack.c.bf16 %v10478_v8, %v10477_v60  ;;  %v10068_v4 = vpack.c.bf16 %v10483_v3, %v10482_v48  ;;  %v4842_v48 = vld [vmem:[%s16604_s13] sm:$0xff] }
 0x8aa   :  { %v9004_v45 = vpop.f32.mrb[126].mxu1  ;;  %v8950_v35 = vadd.f32 %v8949_v37, %v8948_v14  ;;  %8312 = vmatmul.mubr.msk.f32.gmra.mrb[134].mxu0 %vm2413_vm4, %v10687_v20  ;;  %8320 = vmatmul.mubr.msk.f32.gmra.mrb[134].mxu1 %vm2413_vm4, %v10687_v20  ;;  %v10038_v17 = vpack.c.bf16 %v10488_v33, %v10487_v43  ;;  %v10508_v9 = vunpack.i.h.bf16 %v14343_v10  ;;  %v10507_v62 = vunpack.i.l.bf16 %v14343_v10  ;;  %v4845_v33 = vld [vmem:[%s16604_s13 + $0x18] sm:$0xff] }
 0x8ab   :  { %v9005_v59 = vpop.f32.mrb[127].mxu1  ;;  %10692 = vrcp.f32 %v4078_v47  ;;  %10031 = vmatpush3.bf16.msra.mxu0 %v10030_v1  ;;  %10063 = vmatpush3.bf16.msra.mxu1 %v10062_v23  ;;  %v10040_v51 = vpack.c.bf16 %v10498_v25, %v10497_v34  ;;  %v10518_v30 = vunpack.i.h.bf16 %v14365_v53  ;;  %v10070_v26 = vpack.c.bf16 %v10493_v38, %v10492_v27  ;;  %v10531_v1 = vpop.permute.xlu1 %10530 }
 0x8ac   :  { %v9006_v54 = vadd.f32 %v9005_v59, %v9004_v45  ;;  %10033 = vmatprep.subr.bf16.mxu0 %v10032_v50  ;;  %10065 = vmatprep.subr.bf16.mxu1 %v10064_v7  ;;  %v10513_v24 = vunpack.i.h.bf16 %v14349_v36  ;;  %v10512_v12 = vunpack.i.l.bf16 %v14349_v36  ;;  %v10517_v44 = vunpack.i.l.bf16 %v14365_v53  ;;  %v4843_v59 = vld [vmem:[%s16604_s13 + $0x8] sm:$0xff] }
 0x8ad   :  { %v10689_v6 = vpop.eup %10688  ;;  %4206 = vmatprep.mubr.f32.mxu0 %v17145_v58  ;;  %4319 = vmatprep.mubr.f32.mxu1 %v17145_v58  ;;  %v10523_v14 = vunpack.i.h.bf16 %v10521_v11  ;;  %v10522_v10 = vunpack.i.l.bf16 %v10521_v11  ;;  %v10072_v8 = vpack.c.bf16 %v10503_v16, %v10502_v40  ;;  %v10042_v23 = vpack.c.bf16 %v10508_v9, %v10507_v62  ;;  %v4846_v16 = vld [vmem:[%s16604_s13 + $0x20] sm:$0xff]  ;;  %v4847_v40 = vld [vmem:[%s16604_s13 + $0x28] sm:$0xff] }
 0x8ae   :  { %v4083_v57 = vadd.f32 %v9006_v54, %v8950_v35  ;;  %8313 = vmatmul.mubr.msk.f32.gmra.mrb[136].mxu0 %vm2413_vm4, %v10689_v6  ;;  %8321 = vmatmul.mubr.msk.f32.gmra.mrb[136].mxu1 %vm2413_vm4, %v10689_v6  ;;  %v10528_v37 = vunpack.i.h.bf16 %v10526_v63  ;;  %v10527_v50 = vunpack.i.l.bf16 %v10526_v63  ;;  %v10074_v20 = vpack.c.bf16 %v10513_v24, %v10512_v12  ;;  %v4844_v54 = vld [vmem:[%s16604_s13 + $0x10] sm:$0xff] }
 0x8af   :  { %10035 = vmatpush3.bf16.msra.mxu0 %v10034_v0  ;;  %10067 = vmatpush3.bf16.msra.mxu1 %v10066_v55  ;;  %v10533_v46 = vunpack.i.h.bf16 %v10531_v1  ;;  %v10532_v41 = vunpack.i.l.bf16 %v10531_v1  ;;  %v10044_v47 = vpack.c.bf16 %v10518_v30, %v10517_v44  ;;  %v10076_v45 = vpack.c.bf16 %v10523_v14, %v10522_v10 }
 0x8b0   :  { %10694 = vrcp.f32 %v4083_v57  ;;  %10037 = vmatprep.subr.bf16.mxu0 %v10036_v5  ;;  %10069 = vmatprep.subr.bf16.mxu1 %v10068_v4  ;;  %v10046_v60 = vpack.c.bf16 %v10528_v37, %v10527_v50  ;;  %v10080_v7 = vpack.c.bf16 %v4843_v59, %v4842_v48  ;;  %v10084_v38 = vpack.c.bf16 %v4845_v33, %v4844_v54  ;;  %v17294_v37 = vld [vmem:[#allocation34_spill] sm:$0xff]  ;;  %v17295_v50 = vld [vmem:[#allocation33_spill] sm:$0xff] }
 0x8b1   :  { %v10691_v22 = vpop.eup %10690  ;;  %4212 = vmatprep.mubr.f32.mxu0 %v17145_v58  ;;  %4325 = vmatprep.mubr.f32.mxu1 %v17145_v58  ;;  %v10078_v3 = vpack.c.bf16 %v10533_v46, %v10532_v41  ;;  %v17297_v46 = vld [vmem:[#allocation29_spill] sm:$0xff]  ;;  %v17300_v59 = vld [vmem:[#allocation38_spill] sm:$0xff] }
 0x8b2   :  { %8314 = vmatmul.mubr.msk.f32.gmra.mrb[138].mxu0 %vm2413_vm4, %v10691_v22  ;;  %8322 = vmatmul.mubr.msk.f32.gmra.mrb[138].mxu1 %vm2413_vm4, %v10691_v22 }
 0x8b3   :  { %10039 = vmatpush3.bf16.msra.mxu0 %v10038_v17  ;;  %10071 = vmatpush3.bf16.msra.mxu1 %v10070_v26  ;;  %v10088_v17 = vpack.c.bf16 %v4847_v40, %v4846_v16 }
 0x8b4   :  { %10041 = vmatprep.subr.bf16.mxu0 %v10040_v51  ;;  %10073 = vmatprep.subr.bf16.mxu1 %v10072_v8  ;;  %v4848_v51 = vld [vmem:[%s16604_s13 + $0x30] sm:$0xff] }
 0x8b5   :  { %v10693_v36 = vpop.eup %10692  ;;  %4218 = vmatprep.mubr.f32.mxu0 %v17145_v58  ;;  %4331 = vmatprep.mubr.f32.mxu1 %v17145_v58 }
 0x8b6   :  { %8315 = vmatmul.mubr.msk.f32.gmra.mrb[140].mxu0 %vm2413_vm4, %v10693_v36  ;;  %8323 = vmatmul.mubr.msk.f32.gmra.mrb[140].mxu1 %vm2413_vm4, %v10693_v36 }
 0x8b7   :  { %10043 = vmatpush3.bf16.msra.mxu0 %v10042_v23  ;;  %10075 = vmatpush3.bf16.msra.mxu1 %v10074_v20 }
 0x8b8   :  { %10045 = vmatprep.subr.bf16.mxu0 %v10044_v47  ;;  %10077 = vmatprep.subr.bf16.mxu1 %v10076_v45 }
 0x8b9   :  { %4224 = vmatprep.mubr.f32.mxu0 %v17145_v58  ;;  %4337 = vmatprep.mubr.f32.mxu1 %v17145_v58 }
 0x8ba   :  { %v10695_v35 = vpop.eup %10694 }
 0x8bb   :  { %8316 = vmatmul.mubr.msk.f32.gmra.mrb[142].mxu0 %vm2413_vm4, %v10695_v35  ;;  %8324 = vmatmul.mubr.msk.f32.gmra.mrb[142].mxu1 %vm2413_vm4, %v10695_v35  ;;  %v17298_v35 = vld [vmem:[#allocation44_spill] sm:$0xff] }
 0x8bc   :  { %10047 = vmatpush3.bf16.msra.mxu0 %v10046_v60  ;;  %10079 = vmatpush3.bf16.msra.mxu1 %v10078_v3  ;;  %v17299_v3 = vld [vmem:[#allocation40_spill] sm:$0xff] }
 0x8bd   :  { %10081 = vmatprep.subr.bf16.mxu0 %v10080_v7 }
 0x971   :  { %v4184_v0 = vpop.f32.mrb[128].mxu0  ;;  %v4297_v53 = vpop.f32.mrb[128].mxu1 }
 0x972   :  { %v4186_v43 = vpop.f32.mrb[129].mxu0  ;;  %v4299_v25 = vpop.f32.mrb[129].mxu1  ;;  %v4344_v6 = vmul.f32 %v14139_v31, %v4184_v0  ;;  %v4346_v55 = vmul.f32 %v14143_v13, %v4297_v53  ;;  %v17301_v0 = vld [vmem:[#allocation41_spill] sm:$0xff] }
 0x973   :  { %v4345_v34 = vmul.f32 %v14141_v2, %v4186_v43  ;;  %v4347_v11 = vmul.f32 %v14149_v61, %v4299_v25 }
 0x975   :  { %v4190_v27 = vpop.f32.mrb[130].mxu0  ;;  %v4303_v57 = vpop.f32.mrb[130].mxu1  ;;  %4696 = vmatprep.mubr.f32.mxu0 %v4345_v34  ;;  %4801 = vmatprep.mubr.f32.mxu1 %v4347_v11  ;;  %v17302_v34 = vld [vmem:[#allocation52_spill] sm:$0xff] }
 0x976   :  { %v4192_v2 = vpop.f32.mrb[131].mxu0  ;;  %v4305_v5 = vpop.f32.mrb[131].mxu1  ;;  %4697 = vmatmul.mubr.f32.vlgmr.msra.gmra.mrb[144].mxu0 %v4344_v6  ;;  %4802 = vmatmul.mubr.f32.vlgmr.msra.gmra.mrb[144].mxu1 %v4346_v55  ;;  %v4348_v61 = vmul.f32 %v14153_v49, %v4190_v27  ;;  %v4350_v4 = vmul.f32 %v14162_v52, %v4303_v57  ;;  %v17303_v6 = vld [vmem:[#allocation70_spill] sm:$0xff]  ;;  %v17305_v57 = vld [vmem:[#allocation47_spill] sm:$0xff] }
 0x977   :  { %v4349_v31 = vmul.f32 %v14159_v39, %v4192_v2  ;;  %v4351_v13 = vmul.f32 %v14171_v19, %v4305_v5  ;;  %10083 = vmatpush3.bf16.msra.mxu0 %v10080_v7  ;;  %v4849_v39 = vld [vmem:[%s16604_s13 + $0x38] sm:$0xff] }
 0x978   :  { %10085 = vmatprep.subr.bf16.mxu0 %v10084_v38  ;;  %v10092_v63 = vpack.c.bf16 %v4849_v39, %v4848_v51  ;;  %v17309_v51 = vld [vmem:[#allocation60_spill] sm:$0xff] }
 0x979   :  { %v4196_v9 = vpop.f32.mrb[132].mxu0  ;;  %v4309_v62 = vpop.f32.mrb[132].mxu1  ;;  %4701 = vmatprep.mubr.f32.mxu0 %v4349_v31  ;;  %4806 = vmatprep.mubr.f32.mxu1 %v4351_v13  ;;  %v17306_v13 = vld [vmem:[#allocation59_spill] sm:$0xff] }
 0x97a   :  { %v4198_v19 = vpop.f32.mrb[133].mxu0  ;;  %v4311_v22 = vpop.f32.mrb[133].mxu1  ;;  %4702 = vmatmul.mubr.f32.gmra.mrb[146].mxu0 %v4348_v61  ;;  %4807 = vmatmul.mubr.f32.gmra.mrb[146].mxu1 %v4350_v4  ;;  %v4352_v30 = vmul.f32 %v14175_v56, %v4196_v9  ;;  %v4354_v26 = vmul.f32 %v14181_v18, %v4309_v62  ;;  %v17307_v4 = vld [vmem:[#allocation5_spill] sm:$0xff]  ;;  %v17308_v9 = vld [vmem:[#allocation6_spill] sm:$0xff] }
 0x97b   :  { %v4353_v49 = vmul.f32 %v14178_v28, %v4198_v19  ;;  %v4355_v52 = vmul.f32 %v14187_v21, %v4311_v22  ;;  %10087 = vmatpush3.bf16.msra.mxu0 %v10084_v38  ;;  %v17304_v38 = vld [vmem:[#allocation43_spill] sm:$0xff]  ;;  %v17310_v19 = vld [vmem:[#allocation24_spill] sm:$0xff]  ;;  %v17311_v22 = vld [vmem:[#allocation22_spill] sm:$0xff] }
 0x97c   :  { %10089 = vmatprep.subr.bf16.mxu0 %v10088_v17 }
 0x97d   :  { %v4202_v24 = vpop.f32.mrb[134].mxu0  ;;  %v4315_v12 = vpop.f32.mrb[134].mxu1  ;;  %4706 = vmatprep.mubr.f32.mxu0 %v4353_v49  ;;  %4811 = vmatprep.mubr.f32.mxu1 %v4355_v52  ;;  %v17312_v49 = vld [vmem:[#allocation16_spill] sm:$0xff]  ;;  %v17313_v52 = vld [vmem:[#allocation26_spill] sm:$0xff] }
 0x97e   :  { %v4204_v44 = vpop.f32.mrb[135].mxu0  ;;  %v4317_v14 = vpop.f32.mrb[135].mxu1  ;;  %4707 = vmatmul.mubr.f32.gmra.mrb[148].mxu0 %v4352_v30  ;;  %4812 = vmatmul.mubr.f32.gmra.mrb[148].mxu1 %v4354_v26  ;;  %v4356_v21 = vmul.f32 %v14191_v32, %v4202_v24  ;;  %v4358_v56 = vmul.f32 %v14197_v15, %v4315_v12  ;;  %v17314_v30 = vld [vmem:[#allocation25_spill] sm:$0xff]  ;;  %v17315_v26 = vld [vmem:[#allocation35_spill] sm:$0xff] }
 0x97f   :  { %v4357_v10 = vmul.f32 %v14194_v29, %v4204_v44  ;;  %v4359_v28 = vmul.f32 %v14201_v42, %v4317_v14  ;;  %10091 = vmatpush3.bf16.msra.mxu0 %v10088_v17  ;;  %v17296_v42 = vld [vmem:[#allocation36_spill] sm:$0xff]  ;;  %v17317_v24 = vld [vmem:[#allocation37_spill] sm:$0xff]  ;;  %v5051_v44 = vld [vmem:[%s16612_s21 + $0x8] sm:$0xff] }
 0x980   :  { %10093 = vmatprep.subr.bf16.mxu0 %v10092_v63  ;;  %v5050_v12 = vld [vmem:[%s16612_s21] sm:$0xff] }
 0x981   :  { %v4208_v18 = vpop.f32.mrb[136].mxu0  ;;  %v4321_v1 = vpop.f32.mrb[136].mxu1  ;;  %4711 = vmatprep.mubr.f32.mxu0 %v4357_v10  ;;  %4816 = vmatprep.mubr.f32.mxu1 %v4359_v28  ;;  %v14475_v14 = vpack.c.bf16 %v5051_v44, %v5050_v12  ;;  %v5052_v10 = vld [vmem:[%s16612_s21 + $0x10] sm:$0xff]  ;;  %v5053_v28 = vld [vmem:[%s16612_s21 + $0x18] sm:$0xff] }
 0x982   :  { %v4210_v8 = vpop.f32.mrb[137].mxu0  ;;  %v4323_v23 = vpop.f32.mrb[137].mxu1  ;;  %4712 = vmatmul.mubr.f32.gmra.mrb[150].mxu0 %v4356_v21  ;;  %4817 = vmatmul.mubr.f32.gmra.mrb[150].mxu1 %v4358_v56  ;;  %v4360_v20 = vmul.f32 %v17296_v42, %v4208_v18  ;;  %v4362_v32 = vmul.f32 %v17297_v46, %v4321_v1  ;;  %v14485_v21 = vpack.c.bf16 %v5053_v28, %v5052_v10  ;;  %v5054_v56 = vld [vmem:[%s16612_s21 + $0x20] sm:$0xff]  ;;  %v5055_v18 = vld [vmem:[%s16612_s21 + $0x28] sm:$0xff] }
 0x983   :  { %v4361_v36 = vmul.f32 %v17294_v37, %v4210_v8  ;;  %v4363_v29 = vmul.f32 %v17295_v50, %v4323_v23  ;;  %10095 = vmatpush3.bf16.msra.mxu0 %v10092_v63  ;;  %v17316_v63 = vld [vmem:[#allocation31_spill] sm:$0xff]  ;;  %10097 = vmatprep.subr.bf16.mxu1 %v14475_v14  ;;  %v14495_v1 = vpack.c.bf16 %v5055_v18, %v5054_v56  ;;  %v5057_v23 = vld [vmem:[%s16612_s21 + $0x38] sm:$0xff]  ;;  %v8325_v56 = vld [vmem:[%s16605_s14] ss:$0 sm:$0xff] }
 0x984   :  { %10099 = vmatpush3.bf16.msra.mxu1 %v14475_v14  ;;  %v5056_v8 = vld [vmem:[%s16612_s21 + $0x30] sm:$0xff] }
 0x985   :  { %v4214_v41 = vpop.f32.mrb[138].mxu0  ;;  %v4327_v15 = vpop.f32.mrb[138].mxu1  ;;  %4716 = vmatprep.mubr.f32.mxu0 %v4361_v36  ;;  %4821 = vmatprep.mubr.f32.mxu1 %v4363_v29  ;;  %v14504_v37 = vpack.c.bf16 %v5057_v23, %v5056_v8 }
 0x986   :  { %v4216_v47 = vpop.f32.mrb[139].mxu0  ;;  %v4329_v45 = vpop.f32.mrb[139].mxu1  ;;  %4717 = vmatmul.mubr.f32.gmra.mrb[152].mxu0 %v4360_v20  ;;  %4822 = vmatmul.mubr.f32.gmra.mrb[152].mxu1 %v4362_v32  ;;  %v4364_v7 = vmul.f32 %v17300_v59, %v4214_v41  ;;  %v4366_v53 = vmul.f32 %v17301_v0, %v4327_v15 }
 0x987   :  { %v4365_v60 = vmul.f32 %v17298_v35, %v4216_v47  ;;  %v4367_v48 = vmul.f32 %v17299_v3, %v4329_v45  ;;  %10101 = vmatprep.subr.bf16.mxu1 %v14485_v21 }
 0x988   :  { %10103 = vmatpush3.bf16.msra.mxu1 %v14485_v21 }
 0x989   :  { %v4220_v54 = vpop.f32.mrb[140].mxu0  ;;  %v4333_v33 = vpop.f32.mrb[140].mxu1  ;;  %4721 = vmatprep.mubr.f32.mxu0 %v4365_v60  ;;  %4826 = vmatprep.mubr.f32.mxu1 %v4367_v48 }
 0x98a   :  { %v4222_v43 = vpop.f32.mrb[141].mxu0  ;;  %v4335_v25 = vpop.f32.mrb[141].mxu1  ;;  %4722 = vmatmul.mubr.f32.gmra.mrb[154].mxu0 %v4364_v7  ;;  %4827 = vmatmul.mubr.f32.gmra.mrb[154].mxu1 %v4366_v53  ;;  %v4368_v27 = vmul.f32 %v17304_v38, %v4220_v54  ;;  %v4370_v16 = vmul.f32 %v17305_v57, %v4333_v33 }
 0x98b   :  { %v4369_v11 = vmul.f32 %v17302_v34, %v4222_v43  ;;  %v4371_v55 = vmul.f32 %v17303_v6, %v4335_v25  ;;  %10105 = vmatprep.subr.bf16.mxu1 %v14495_v1 }
 0x98c   :  { %10107 = vmatpush3.bf16.msra.mxu1 %v14495_v1 }
 0x98d   :  { %4726 = vmatprep.mubr.f32.mxu0 %v4369_v11  ;;  %4831 = vmatprep.mubr.f32.mxu1 %v4371_v55 }
 0x98e   :  { %v4226_v40 = vpop.f32.mrb[142].mxu0  ;;  %v4339_v2 = vpop.f32.mrb[142].mxu1  ;;  %4727 = vmatmul.mubr.f32.gmra.mrb[156].mxu0 %v4368_v27  ;;  %4832 = vmatmul.mubr.f32.gmra.mrb[156].mxu1 %v4370_v16 }
 0x98f   :  { %v4228_v5 = vpop.f32.mrb[143].mxu0  ;;  %v4341_v31 = vpop.f32.mrb[143].mxu1  ;;  %v4372_v62 = vmul.f32 %v17308_v9, %v4226_v40  ;;  %v4374_v39 = vmul.f32 %v17309_v51, %v4339_v2  ;;  %10109 = vmatprep.subr.bf16.mxu1 %v14504_v37 }
 0x990   :  { %v4373_v61 = vmul.f32 %v17306_v13, %v4228_v5  ;;  %v4375_v17 = vmul.f32 %v17307_v4, %v4341_v31  ;;  %10111 = vmatpush3.bf16.msra.mxu1 %v14504_v37 }
 0x991   :  { %10113 = vmatprep.subr.bf16.mxu1 %v14475_v14 }
 0x992   :  { %4731 = vmatprep.mubr.f32.mxu0 %v4373_v61  ;;  %4836 = vmatprep.mubr.f32.mxu1 %v4375_v17 }
 0x993   :  { %4732 = vmatmul.mubr.f32.gmra.mrb[158].mxu0 %v4372_v62  ;;  %4837 = vmatmul.mubr.f32.gmra.mrb[158].mxu1 %v4374_v39 }
 0x994   :  { %9409 = vmatprep.mubr.msk.f32.mxu0 %vm583_vm1, %v17310_v19 }
 0x997   :  { %9410 = vmatmul.mubr.msk.f32.vlgmr.msra.gmra.mrb[160].mxu0 %vm583_vm1, %v17311_v22 }
 0x998   :  { %9412 = vmatprep.mubr.msk.f32.mxu0 %vm583_vm1, %v17312_v49 }
 0x99b   :  { %9413 = vmatmul.mubr.msk.f32.gmra.mrb[162].mxu0 %vm583_vm1, %v17313_v52 }
 0x99c   :  { %9415 = vmatprep.mubr.msk.f32.mxu0 %vm583_vm1, %v17314_v30 }
 0x99f   :  { %9416 = vmatmul.mubr.msk.f32.gmra.mrb[164].mxu0 %vm583_vm1, %v17315_v26 }
 0x9a0   :  { %9418 = vmatprep.mubr.msk.f32.mxu0 %vm583_vm1, %v17316_v63 }
 0x9a3   :  { %9419 = vmatmul.mubr.msk.f32.gmra.mrb[166].mxu0 %vm583_vm1, %v17317_v24 }
 0xa49   :  { %v9039_v36 = vpop.f32.mrb[144].mxu0  ;;  %v9095_v50 = vpop.f32.mrb[144].mxu1 }
 0xa4a   :  { %v9040_v29 = vpop.f32.mrb[145].mxu0  ;;  %v9096_v42 = vpop.f32.mrb[145].mxu1 }
 0xa4b   :  { %v9041_v20 = vadd.f32 %v9040_v29, %v9039_v36  ;;  %v9097_v46 = vadd.f32 %v9096_v42, %v9095_v50 }
 0xa4d   :  { %v4804_v32 = vadd.f32 %v9097_v46, %v9041_v20  ;;  %v9042_v41 = vpop.f32.mrb[146].mxu0  ;;  %v9098_v15 = vpop.f32.mrb[146].mxu1 }
 0xa4e   :  { %v9043_v47 = vpop.f32.mrb[147].mxu0  ;;  %v9099_v45 = vpop.f32.mrb[147].mxu1 }
 0xa4f   :  { %v9044_v35 = vadd.f32 %v9043_v47, %v9042_v41  ;;  %v9100_v60 = vadd.f32 %v9099_v45, %v9098_v15  ;;  %9421 = vmatprep.mubr.msk.f32.mxu0 %vm583_vm1, %v4804_v32 }
 0xa51   :  { %v4809_v3 = vadd.f32 %v9100_v60, %v9044_v35  ;;  %v9045_v48 = vpop.f32.mrb[148].mxu0  ;;  %v9101_v59 = vpop.f32.mrb[148].mxu1 }
 0xa52   :  { %v9046_v7 = vpop.f32.mrb[149].mxu0  ;;  %v9102_v0 = vpop.f32.mrb[149].mxu1 }
 0xa53   :  { %v9047_v53 = vadd.f32 %v9046_v7, %v9045_v48  ;;  %v9103_v54 = vadd.f32 %v9102_v0, %v9101_v59  ;;  %9422 = vmatmul.mubr.msk.f32.gmra.mrb[168].mxu0 %vm583_vm1, %v4809_v3 }
 0xa55   :  { %v4814_v33 = vadd.f32 %v9103_v54, %v9047_v53  ;;  %v9048_v43 = vpop.f32.mrb[150].mxu0  ;;  %v9104_v25 = vpop.f32.mrb[150].mxu1 }
 0xa56   :  { %v9049_v34 = vpop.f32.mrb[151].mxu0  ;;  %v9105_v11 = vpop.f32.mrb[151].mxu1 }
 0xa57   :  { %v9050_v6 = vadd.f32 %v9049_v34, %v9048_v43  ;;  %v9106_v55 = vadd.f32 %v9105_v11, %v9104_v25  ;;  %9424 = vmatprep.mubr.msk.f32.mxu0 %vm583_vm1, %v4814_v33 }
 0xa59   :  { %v4819_v38 = vadd.f32 %v9106_v55, %v9050_v6  ;;  %v9051_v27 = vpop.f32.mrb[152].mxu0  ;;  %v9107_v57 = vpop.f32.mrb[152].mxu1 }
 0xa5a   :  { %v9052_v16 = vpop.f32.mrb[153].mxu0  ;;  %v9108_v40 = vpop.f32.mrb[153].mxu1 }
 0xa5b   :  { %v9053_v2 = vadd.f32 %v9052_v16, %v9051_v27  ;;  %v9109_v5 = vadd.f32 %v9108_v40, %v9107_v57  ;;  %9425 = vmatmul.mubr.msk.f32.gmra.mrb[170].mxu0 %vm583_vm1, %v4819_v38 }
 0xa5d   :  { %v4824_v31 = vadd.f32 %v9109_v5, %v9053_v2  ;;  %v9054_v13 = vpop.f32.mrb[154].mxu0  ;;  %v9110_v61 = vpop.f32.mrb[154].mxu1 }
 0xa5e   :  { %v9055_v4 = vpop.f32.mrb[155].mxu0  ;;  %v9111_v17 = vpop.f32.mrb[155].mxu1 }
 0xa5f   :  { %v9056_v9 = vadd.f32 %v9055_v4, %v9054_v13  ;;  %v9112_v62 = vadd.f32 %v9111_v17, %v9110_v61  ;;  %9427 = vmatprep.mubr.msk.f32.mxu0 %vm583_vm1, %v4824_v31 }
 0xa61   :  { %v4829_v51 = vadd.f32 %v9112_v62, %v9056_v9  ;;  %v9057_v39 = vpop.f32.mrb[156].mxu0  ;;  %v9113_v19 = vpop.f32.mrb[156].mxu1 }
 0xa62   :  { %v9058_v22 = vpop.f32.mrb[157].mxu0  ;;  %v9114_v49 = vpop.f32.mrb[157].mxu1 }
 0xa63   :  { %v9059_v52 = vadd.f32 %v9058_v22, %v9057_v39  ;;  %v9115_v30 = vadd.f32 %v9114_v49, %v9113_v19  ;;  %9428 = vmatmul.mubr.msk.f32.gmra.mrb[172].mxu0 %vm583_vm1, %v4829_v51 }
 0xa65   :  { %v4834_v26 = vadd.f32 %v9115_v30, %v9059_v52 }
 0xa66   :  { %v9060_v63 = vpop.f32.mrb[158].mxu0  ;;  %v9116_v24 = vpop.f32.mrb[158].mxu1 }
 0xa67   :  { %v9061_v12 = vpop.f32.mrb[159].mxu0  ;;  %v9117_v44 = vpop.f32.mrb[159].mxu1  ;;  %9430 = vmatprep.mubr.msk.f32.mxu0 %vm583_vm1, %v4834_v26 }
 0xa68   :  { %v9062_v10 = vadd.f32 %v9061_v12, %v9060_v63  ;;  %v9118_v28 = vadd.f32 %v9117_v44, %v9116_v24 }
 0xa6a   :  { %v4839_v18 = vadd.f32 %v9118_v28, %v9062_v10  ;;  %v9411_v8 = vpop.f32.mrb[160].mxu0 }
 0xa6b   :  { %v4971_v23 = vpop.f32.mrb[161].mxu0  ;;  %v14523_v50 = vadd.f32 %v9411_v8, %v8325_v56 }
 0xa6c   :  { %v14520_v36 = vadd.f32 %v8325_v56, %v4971_v23  ;;  %9431 = vmatmul.mubr.msk.f32.gmra.mrb[174].mxu0 %vm583_vm1, %v4839_v18 }
 0xa6e   :  { %v9414_v29 = vpop.f32.mrb[162].mxu0  ;;  %9449 = vmatprep.mubr.msk.f32.mxu1 %vm583_vm1, %v14520_v36 }
 0xa6f   :  { %v4981_v42 = vpop.f32.mrb[163].mxu0  ;;  %9450 = vmatmul.mubr.msk.f32.vlgmr.msra.gmra.mrb[160].mxu1 %vm583_vm1, %v14523_v50  ;;  %v14532_v46 = vadd.f32 %v9414_v29, %v8325_v56 }
 0xa70   :  { %v14529_v20 = vadd.f32 %v8325_v56, %v4981_v42  ;;  %10115 = vmatpush3.bf16.msra.mxu1 %v14475_v14 }
 0xa71   :  { %10117 = vmatprep.subr.bf16.mxu1 %v14485_v21 }
 0xa72   :  { %v9417_v32 = vpop.f32.mrb[164].mxu0  ;;  %9452 = vmatprep.mubr.msk.f32.mxu1 %vm583_vm1, %v14529_v20 }
 0xa73   :  { %v4991_v41 = vpop.f32.mrb[165].mxu0  ;;  %9453 = vmatmul.mubr.msk.f32.gmra.mrb[162].mxu1 %vm583_vm1, %v14532_v46  ;;  %v14542_v47 = vadd.f32 %v9417_v32, %v8325_v56 }
 0xa74   :  { %v14539_v15 = vadd.f32 %v8325_v56, %v4991_v41  ;;  %10119 = vmatpush3.bf16.msra.mxu1 %v14485_v21  ;;  %v5058_v21 = vld [vmem:[%s16613_s22] sm:$0x3] }
 0xa75   :  { %10121 = vmatprep.subr.bf16.mxu1 %v14495_v1  ;;  %9473 = vmatprep.subr.msk.mxu0 %vm5317_vm5, %v5058_v21 }
 0xa76   :  { %v9420_v14 = vpop.f32.mrb[166].mxu0  ;;  %9455 = vmatprep.mubr.msk.f32.mxu1 %vm583_vm1, %v14539_v15  ;;  %9474 = vmatpush3.msk.msra.mxu0 %vm5317_vm5, %v5058_v21 }
 0xa77   :  { %v5001_v45 = vpop.f32.mrb[167].mxu0  ;;  %9456 = vmatmul.mubr.msk.f32.gmra.mrb[164].mxu1 %vm583_vm1, %v14542_v47  ;;  %v14552_v60 = vadd.f32 %v9420_v14, %v8325_v56  ;;  %9539 = vmatprep.subr.msk.mxu0 %vm5317_vm5, %v5058_v21 }
 0xa78   :  { %v14549_v35 = vadd.f32 %v8325_v56, %v5001_v45  ;;  %10123 = vmatpush3.bf16.msra.mxu1 %v14495_v1 }
 0xa79   :  { %10125 = vmatprep.subr.bf16.mxu1 %v14504_v37 }
 0xa7a   :  { %9458 = vmatprep.mubr.msk.f32.mxu1 %vm583_vm1, %v14549_v35 }
 0xa7b   :  { %9459 = vmatmul.mubr.msk.f32.gmra.mrb[166].mxu1 %vm583_vm1, %v14552_v60 }
 0xa7c   :  { %10127 = vmatpush3.bf16.msra.mxu1 %v14504_v37 }
 0xb26   :  { %v9423_v1 = vpop.f32.mrb[168].mxu0 }
 0xb27   :  { %v5011_v3 = vpop.f32.mrb[169].mxu0  ;;  %v14568_v59 = vadd.f32 %v9423_v1, %v8325_v56 }
 0xb28   :  { %v14566_v48 = vadd.f32 %v8325_v56, %v5011_v3 }
 0xb2a   :  { %9461 = vmatprep.mubr.msk.f32.mxu1 %vm583_vm1, %v14566_v48 }
 0xb2b   :  { %9462 = vmatmul.mubr.msk.f32.gmra.mrb[168].mxu1 %vm583_vm1, %v14568_v59 }
 0xb2e   :  { %v9426_v37 = vpop.f32.mrb[170].mxu0 }
 0xb2f   :  { %v5021_v7 = vpop.f32.mrb[171].mxu0  ;;  %v14576_v53 = vadd.f32 %v9426_v37, %v8325_v56 }
 0xb30   :  { %v14574_v0 = vadd.f32 %v8325_v56, %v5021_v7 }
 0xb32   :  { %9464 = vmatprep.mubr.msk.f32.mxu1 %vm583_vm1, %v14574_v0 }
 0xb33   :  { %9465 = vmatmul.mubr.msk.f32.gmra.mrb[170].mxu1 %vm583_vm1, %v14576_v53 }
 0xb36   :  { %v9429_v54 = vpop.f32.mrb[172].mxu0 }
 0xb37   :  { %v5031_v33 = vpop.f32.mrb[173].mxu0  ;;  %v14584_v25 = vadd.f32 %v9429_v54, %v8325_v56 }
 0xb38   :  { %v14582_v43 = vadd.f32 %v8325_v56, %v5031_v33 }
 0xb3a   :  { %9467 = vmatprep.mubr.msk.f32.mxu1 %vm583_vm1, %v14582_v43 }
 0xb3b   :  { %9468 = vmatmul.mubr.msk.f32.gmra.mrb[172].mxu1 %vm583_vm1, %v14584_v25 }
 0xb3f   :  { %v9432_v34 = vpop.f32.mrb[174].mxu0 }
 0xb40   :  { %v5041_v11 = vpop.f32.mrb[175].mxu0  ;;  %v14592_v55 = vadd.f32 %v9432_v34, %v8325_v56 }
 0xb41   :  { %v14590_v6 = vadd.f32 %v8325_v56, %v5041_v11 }
 0xb42   :  { %v9451_v38 = vpop.f32.mrb[160].mxu1 }
 0xb43   :  { %v5173_v27 = vpop.f32.mrb[161].mxu1  ;;  %9470 = vmatprep.mubr.msk.f32.mxu1 %vm583_vm1, %v14590_v6  ;;  %v5253_v16 = vmul.f32 0.03125, %v9451_v38 }
 0xb44   :  { %v5252_v57 = vmul.f32 0.03125, %v5173_v27  ;;  %9471 = vmatmul.mubr.msk.f32.gmra.mrb[174].mxu1 %vm583_vm1, %v14592_v55 }
 0xb46   :  { %v9454_v40 = vpop.f32.mrb[162].mxu1  ;;  %9475 = vmatprep.mubr.msk.f32.mxu0 %vm5268_vm6, %v5252_v57 }
 0xb47   :  { %v5183_v2 = vpop.f32.mrb[163].mxu1  ;;  %9476 = vmatmul.mubr.msk.f32.vlgmr.msra.gmra.mrb[176].mxu0 %vm5268_vm6, %v5253_v16  ;;  %v5255_v31 = vmul.f32 0.03125, %v9454_v40 }
 0xb48   :  { %v5254_v5 = vmul.f32 0.03125, %v5183_v2  ;;  %9540 = vmatpush3.msk.msra.mxu0 %vm5317_vm5, %v5058_v21 }
 0xb4a   :  { %v9457_v13 = vpop.f32.mrb[164].mxu1  ;;  %9478 = vmatprep.mubr.msk.f32.mxu0 %vm5268_vm6, %v5254_v5 }
 0xb4b   :  { %v5193_v61 = vpop.f32.mrb[165].mxu1  ;;  %9479 = vmatmul.mubr.msk.f32.gmra.mrb[178].mxu0 %vm5268_vm6, %v5255_v31  ;;  %v5257_v17 = vmul.f32 0.03125, %v9457_v13 }
 0xb4c   :  { %v5256_v4 = vmul.f32 0.03125, %v5193_v61 }
 0xb4e   :  { %v9460_v9 = vpop.f32.mrb[166].mxu1  ;;  %9481 = vmatprep.mubr.msk.f32.mxu0 %vm5268_vm6, %v5256_v4 }
 0xb4f   :  { %v5203_v62 = vpop.f32.mrb[167].mxu1  ;;  %9482 = vmatmul.mubr.msk.f32.gmra.mrb[180].mxu0 %vm5268_vm6, %v5257_v17  ;;  %v5259_v39 = vmul.f32 0.03125, %v9460_v9 }
 0xb50   :  { %v5258_v51 = vmul.f32 0.03125, %v5203_v62 }
 0xb52   :  { %9484 = vmatprep.mubr.msk.f32.mxu0 %vm5268_vm6, %v5258_v51 }
 0xb53   :  { %9485 = vmatmul.mubr.msk.f32.gmra.mrb[182].mxu0 %vm5268_vm6, %v5259_v39 }
 0xbfe   :  { %v9463_v19 = vpop.f32.mrb[168].mxu1 }
 0xbff   :  { %v5213_v22 = vpop.f32.mrb[169].mxu1  ;;  %v5261_v52 = vmul.f32 0.03125, %v9463_v19 }
 0xc00   :  { %v5260_v49 = vmul.f32 0.03125, %v5213_v22 }
 0xc02   :  { %9487 = vmatprep.mubr.msk.f32.mxu0 %vm5268_vm6, %v5260_v49 }
 0xc03   :  { %9488 = vmatmul.mubr.msk.f32.gmra.mrb[184].mxu0 %vm5268_vm6, %v5261_v52 }
 0xc06   :  { %v9466_v30 = vpop.f32.mrb[170].mxu1 }
 0xc07   :  { %v5223_v26 = vpop.f32.mrb[171].mxu1  ;;  %v5263_v24 = vmul.f32 0.03125, %v9466_v30 }
 0xc08   :  { %v5262_v63 = vmul.f32 0.03125, %v5223_v26 }
 0xc0a   :  { %9490 = vmatprep.mubr.msk.f32.mxu0 %vm5268_vm6, %v5262_v63 }
 0xc0b   :  { %9491 = vmatmul.mubr.msk.f32.gmra.mrb[186].mxu0 %vm5268_vm6, %v5263_v24 }
 0xc0e   :  { %v9469_v12 = vpop.f32.mrb[172].mxu1 }
 0xc0f   :  { %v5233_v44 = vpop.f32.mrb[173].mxu1  ;;  %v5265_v28 = vmul.f32 0.03125, %v9469_v12 }
 0xc10   :  { %v5264_v10 = vmul.f32 0.03125, %v5233_v44 }
 0xc12   :  { %9493 = vmatprep.mubr.msk.f32.mxu0 %vm5268_vm6, %v5264_v10 }
 0xc13   :  { %9494 = vmatmul.mubr.msk.f32.gmra.mrb[188].mxu0 %vm5268_vm6, %v5265_v28 }
 0xc17   :  { %v9472_v56 = vpop.f32.mrb[174].mxu1 }
 0xc18   :  { %v5243_v18 = vpop.f32.mrb[175].mxu1  ;;  %v5267_v23 = vmul.f32 0.03125, %v9472_v56 }
 0xc19   :  { %v5266_v8 = vmul.f32 0.03125, %v5243_v18 }
 0xc1a   :  { %v9477_v29 = vpop.f32.mrb[176].mxu0 }
 0xc1b   :  { %v14614_v42 = vsub.f32 %v14523_v50, %v9477_v29  ;;  %v5387_v32 = vpop.f32.mrb[177].mxu0  ;;  %9496 = vmatprep.mubr.msk.f32.mxu0 %vm5268_vm6, %v5266_v8 }
 0xc1c   :  { %v14618_v41 = vsub.f32 %v14520_v36, %v5387_v32  ;;  %9497 = vmatmul.mubr.msk.f32.gmra.mrb[190].mxu0 %vm5268_vm6, %v5267_v23 }
 0xc1d   :  { %v5483_v21 = vmul.f32 %v14614_v42, %v14614_v42 }
 0xc1e   :  { %v5482_v14 = vmul.f32 %v14618_v41, %v14618_v41  ;;  %v9480_v45 = vpop.f32.mrb[178].mxu0 }
 0xc1f   :  { %v14626_v1 = vsub.f32 %v14532_v46, %v9480_v45  ;;  %v5397_v50 = vpop.f32.mrb[179].mxu0 }
 0xc20   :  { %v14629_v3 = vsub.f32 %v14529_v20, %v5397_v50  ;;  %9515 = vmatprep.mubr.msk.f32.mxu1 %vm583_vm1, %v5482_v14 }
 0xc21   :  { %9516 = vmatmul.mubr.msk.f32.vlgmr.msra.gmra.mrb[176].mxu1 %vm583_vm1, %v5483_v21  ;;  %v5485_v7 = vmul.f32 %v14626_v1, %v14626_v1 }
 0xc22   :  { %v5484_v36 = vmul.f32 %v14629_v3, %v14629_v3  ;;  %v9483_v37 = vpop.f32.mrb[180].mxu0 }
 0xc23   :  { %v14638_v54 = vsub.f32 %v14542_v47, %v9483_v37  ;;  %v5407_v46 = vpop.f32.mrb[181].mxu0 }
 0xc24   :  { %v14641_v33 = vsub.f32 %v14539_v15, %v5407_v46  ;;  %9518 = vmatprep.mubr.msk.f32.mxu1 %vm583_vm1, %v5484_v36 }
 0xc25   :  { %9519 = vmatmul.mubr.msk.f32.gmra.mrb[178].mxu1 %vm583_vm1, %v5485_v7  ;;  %v5487_v11 = vmul.f32 %v14638_v54, %v14638_v54 }
 0xc26   :  { %v5486_v20 = vmul.f32 %v14641_v33, %v14641_v33  ;;  %v9486_v34 = vpop.f32.mrb[182].mxu0 }
 0xc27   :  { %v14650_v38 = vsub.f32 %v14552_v60, %v9486_v34  ;;  %v5417_v47 = vpop.f32.mrb[183].mxu0 }
 0xc28   :  { %v14653_v27 = vsub.f32 %v14549_v35, %v5417_v47  ;;  %9521 = vmatprep.mubr.msk.f32.mxu1 %vm583_vm1, %v5486_v20 }
 0xc29   :  { %9522 = vmatmul.mubr.msk.f32.gmra.mrb[180].mxu1 %vm583_vm1, %v5487_v11  ;;  %v5489_v57 = vmul.f32 %v14650_v38, %v14650_v38 }
 0xc2a   :  { %v5488_v15 = vmul.f32 %v14653_v27, %v14653_v27 }
 0xc2c   :  { %9524 = vmatprep.mubr.msk.f32.mxu1 %vm583_vm1, %v5488_v15 }
 0xc2d   :  { %9525 = vmatmul.mubr.msk.f32.gmra.mrb[182].mxu1 %vm583_vm1, %v5489_v57 }
 0xcd6   :  { %v9489_v60 = vpop.f32.mrb[184].mxu0 }
 0xcd7   :  { %v14664_v16 = vsub.f32 %v14568_v59, %v9489_v60  ;;  %v5427_v35 = vpop.f32.mrb[185].mxu0 }
 0xcd8   :  { %v14667_v40 = vsub.f32 %v14566_v48, %v5427_v35  ;;  %v5995_v35 = vld [vmem:[%s16608_s17 + $0x8] sm:$0xff] }
 0xcd9   :  { %v5491_v5 = vmul.f32 %v14664_v16, %v14664_v16 }
 0xcda   :  { %v5490_v2 = vmul.f32 %v14667_v40, %v14667_v40 }
 0xcdc   :  { %9527 = vmatprep.mubr.msk.f32.mxu1 %vm583_vm1, %v5490_v2  ;;  %v5997_v2 = vld [vmem:[%s16608_s17 + $0x18] sm:$0xff] }
 0xcdd   :  { %9528 = vmatmul.mubr.msk.f32.gmra.mrb[184].mxu1 %vm583_vm1, %v5491_v5  ;;  %v5994_v5 = vld [vmem:[%s16608_s17] sm:$0xff] }
 0xcde   :  { %v9492_v31 = vpop.f32.mrb[186].mxu0 }
 0xcdf   :  { %v14676_v13 = vsub.f32 %v14576_v53, %v9492_v31  ;;  %v5437_v59 = vpop.f32.mrb[187].mxu0  ;;  %v10128_v31 = vpack.c.bf16 %v5997_v2, %v5995_v35 }
 0xce0   :  { %v14679_v61 = vsub.f32 %v14574_v0, %v5437_v59  ;;  %v5996_v59 = vld [vmem:[%s16608_s17 + $0x10] sm:$0xff] }
 0xce1   :  { %v5493_v4 = vmul.f32 %v14676_v13, %v14676_v13  ;;  %10129 = vmatprep.subr.bf16.mxu1 %v10128_v31 }
 0xce2   :  { %v5492_v48 = vmul.f32 %v14679_v61, %v14679_v61 }
 0xce4   :  { %9530 = vmatprep.mubr.msk.f32.mxu1 %vm583_vm1, %v5492_v48  ;;  %v10130_v48 = vpack.c.bf16 %v5996_v59, %v5994_v5 }
 0xce5   :  { %9531 = vmatmul.mubr.msk.f32.gmra.mrb[186].mxu1 %vm583_vm1, %v5493_v4  ;;  %v5999_v4 = vld [vmem:[%s16608_s17 + $0x28] sm:$0xff] }
 0xce6   :  { %v9495_v17 = vpop.f32.mrb[188].mxu0  ;;  %10131 = vmatpush1.bf16.msra.mxu1 %v10130_v48 }
 0xce7   :  { %v14688_v9 = vsub.f32 %v14584_v25, %v9495_v17  ;;  %v5447_v53 = vpop.f32.mrb[189].mxu0  ;;  %v6001_v17 = vld [vmem:[%s16608_s17 + $0x38] sm:$0xff] }
 0xce8   :  { %v14691_v62 = vsub.f32 %v14582_v43, %v5447_v53  ;;  %v5998_v53 = vld [vmem:[%s16608_s17 + $0x20] sm:$0xff] }
 0xce9   :  { %v5495_v51 = vmul.f32 %v14688_v9, %v14688_v9 }
 0xcea   :  { %v5494_v0 = vmul.f32 %v14691_v62, %v14691_v62 }
 0xcec   :  { %9533 = vmatprep.mubr.msk.f32.mxu1 %vm583_vm1, %v5494_v0  ;;  %v10132_v0 = vpack.c.bf16 %v6001_v17, %v5999_v4 }
 0xced   :  { %9534 = vmatmul.mubr.msk.f32.gmra.mrb[188].mxu1 %vm583_vm1, %v5495_v51  ;;  %v6000_v51 = vld [vmem:[%s16608_s17 + $0x30] sm:$0xff] }
 0xcee   :  { %10133 = vmatprep.subr.bf16.mxu1 %v10132_v0 }
 0xcef   :  { %v9498_v39 = vpop.f32.mrb[190].mxu0 }
 0xcf0   :  { %v14700_v19 = vsub.f32 %v14592_v55, %v9498_v39  ;;  %v5457_v25 = vpop.f32.mrb[191].mxu0  ;;  %v10134_v39 = vpack.c.bf16 %v6000_v51, %v5998_v53  ;;  %v14777_v51 = vld [vmem:[%s16606_s15] ss:$0 sm:$0xff] }
 0xcf1   :  { %v14703_v22 = vsub.f32 %v14590_v6, %v5457_v25  ;;  %v6003_v25 = vld [vmem:[%s16608_s17 + $0x48] sm:$0xff] }
 0xcf2   :  { %v5497_v49 = vmul.f32 %v14700_v19, %v14700_v19  ;;  %10135 = vmatpush1.bf16.msra.mxu1 %v10134_v39 }
 0xcf3   :  { %v5496_v43 = vmul.f32 %v14703_v22, %v14703_v22 }
 0xcf4   :  { %v9517_v52 = vpop.f32.mrb[176].mxu1 }
 0xcf5   :  { %v5692_v30 = vmul.f32 0.03125, %v9517_v52  ;;  %v5612_v26 = vpop.f32.mrb[177].mxu1  ;;  %9536 = vmatprep.mubr.msk.f32.mxu1 %vm583_vm1, %v5496_v43  ;;  %v6005_v43 = vld [vmem:[%s16608_s17 + $0x58] sm:$0xff]  ;;  %v6002_v52 = vld [vmem:[%s16608_s17 + $0x40] sm:$0xff] }
 0xcf6   :  { %v5691_v63 = vmul.f32 0.03125, %v5612_v26  ;;  %9537 = vmatmul.mubr.msk.f32.gmra.mrb[190].mxu1 %vm583_vm1, %v5497_v49  ;;  %v10136_v49 = vpack.c.bf16 %v6005_v43, %v6003_v25 }
 0xcf7   :  { %v5708_v55 = vadd.f32 1e-05, %v5692_v30  ;;  %6134 = vmatprep.mubr.f32.mxu1 %v17145_v58  ;;  %v6004_v30 = vld [vmem:[%s16608_s17 + $0x50] sm:$0xff] }
 0xcf8   :  { %v5707_v24 = vadd.f32 1e-05, %v5691_v63  ;;  %v9520_v6 = vpop.f32.mrb[178].mxu1  ;;  %v10138_v26 = vpack.c.bf16 %v6004_v30, %v6002_v52  ;;  %10137 = vmatprep.subr.bf16.mxu1 %v10136_v49  ;;  %v6007_v63 = vld [vmem:[%s16608_s17 + $0x68] sm:$0xff]  ;;  %v14786_v49 = vld [vmem:[%s16607_s16] ss:$0 sm:$0xff] }
 0xcf9   :  { %v5694_v12 = vmul.f32 0.03125, %v9520_v6  ;;  %v5622_v44 = vpop.f32.mrb[179].mxu1  ;;  %v6006_v6 = vld [vmem:[%s16608_s17 + $0x60] sm:$0xff] }
 0xcfa   :  { %10696 = vrsqrt.f32 %v5707_v24  ;;  %v5693_v10 = vmul.f32 0.03125, %v5622_v44  ;;  %10139 = vmatpush1.bf16.msra.mxu1 %v10138_v26 }
 0xcfb   :  { %10698 = vrsqrt.f32 %v5708_v55  ;;  %v5710_v28 = vadd.f32 1e-05, %v5694_v12  ;;  %v6009_v55 = vld [vmem:[%s16608_s17 + $0x78] sm:$0xff]  ;;  %v6008_v12 = vld [vmem:[%s16608_s17 + $0x70] sm:$0xff] }
 0xcfc   :  { %v5709_v56 = vadd.f32 1e-05, %v5693_v10  ;;  %v9523_v18 = vpop.f32.mrb[180].mxu1  ;;  %v10140_v24 = vpack.c.bf16 %v6009_v55, %v6007_v63  ;;  %v10142_v44 = vpack.c.bf16 %v6008_v12, %v6006_v6 }
 0xcfd   :  { %v5696_v8 = vmul.f32 0.03125, %v9523_v18  ;;  %v5632_v23 = vpop.f32.mrb[181].mxu1 }
 0xcfe   :  { %10700 = vrsqrt.f32 %v5709_v56  ;;  %v5695_v29 = vmul.f32 0.03125, %v5632_v23  ;;  %10141 = vmatprep.subr.bf16.mxu1 %v10140_v24 }
 0xcff   :  { %10702 = vrsqrt.f32 %v5710_v28  ;;  %v5712_v32 = vadd.f32 1e-05, %v5696_v8  ;;  %10143 = vmatpush1.bf16.msra.mxu1 %v10142_v44 }
 0xd00   :  { %v5711_v14 = vadd.f32 1e-05, %v5695_v29  ;;  %v9526_v45 = vpop.f32.mrb[182].mxu1 }
 0xd01   :  { %v5698_v21 = vmul.f32 0.03125, %v9526_v45  ;;  %v5642_v50 = vpop.f32.mrb[183].mxu1 }
 0xd02   :  { %10704 = vrsqrt.f32 %v5711_v14  ;;  %v5697_v36 = vmul.f32 0.03125, %v5642_v50 }
 0xd03   :  { %10706 = vrsqrt.f32 %v5712_v32  ;;  %v5714_v37 = vadd.f32 1e-05, %v5698_v21 }
 0xd04   :  { %v10697_v7 = vpop.eup %10696  ;;  %v5713_v46 = vadd.f32 1e-05, %v5697_v36 }
 0xd05   :  { %v10699_v20 = vpop.eup %10698  ;;  %9541 = vmatprep.mubr.msk.f32.mxu0 %vm5268_vm6, %v10697_v7 }
 0xd06   :  { %10708 = vrsqrt.f32 %v5713_v46  ;;  %9542 = vmatmul.mubr.msk.f32.vlgmr.msra.gmra.mrb[192].mxu0 %vm5268_vm6, %v10699_v20 }
 0xd07   :  { %10710 = vrsqrt.f32 %v5714_v37 }
 0xd08   :  { %v10701_v34 = vpop.eup %10700 }
 0xd09   :  { %v10703_v11 = vpop.eup %10702  ;;  %9544 = vmatprep.mubr.msk.f32.mxu0 %vm5268_vm6, %v10701_v34 }
 0xd0a   :  { %9545 = vmatmul.mubr.msk.f32.gmra.mrb[194].mxu0 %vm5268_vm6, %v10703_v11 }
 0xd0c   :  { %v10705_v47 = vpop.eup %10704 }
 0xd0d   :  { %v10707_v15 = vpop.eup %10706  ;;  %9547 = vmatprep.mubr.msk.f32.mxu0 %vm5268_vm6, %v10705_v47 }
 0xd0e   :  { %9548 = vmatmul.mubr.msk.f32.gmra.mrb[196].mxu0 %vm5268_vm6, %v10707_v15 }
 0xd10   :  { %v10709_v57 = vpop.eup %10708 }
 0xd11   :  { %v10711_v60 = vpop.eup %10710  ;;  %9550 = vmatprep.mubr.msk.f32.mxu0 %vm5268_vm6, %v10709_v57 }
 0xd12   :  { %9551 = vmatmul.mubr.msk.f32.gmra.mrb[198].mxu0 %vm5268_vm6, %v10711_v60 }
 0xdb0   :  { %v9529_v10 = vpop.f32.mrb[184].mxu1 }
 0xdb1   :  { %v5700_v28 = vmul.f32 0.03125, %v9529_v10  ;;  %v5652_v56 = vpop.f32.mrb[185].mxu1 }
 0xdb2   :  { %v5699_v18 = vmul.f32 0.03125, %v5652_v56 }
 0xdb3   :  { %v5716_v8 = vadd.f32 1e-05, %v5700_v28 }
 0xdb4   :  { %v5715_v23 = vadd.f32 1e-05, %v5699_v18 }
 0xdb6   :  { %10712 = vrsqrt.f32 %v5715_v23 }
 0xdb7   :  { %10714 = vrsqrt.f32 %v5716_v8 }
 0xdb8   :  { %v9532_v29 = vpop.f32.mrb[186].mxu1 }
 0xdb9   :  { %v5702_v32 = vmul.f32 0.03125, %v9532_v29  ;;  %v5662_v14 = vpop.f32.mrb[187].mxu1 }
 0xdba   :  { %v5701_v45 = vmul.f32 0.03125, %v5662_v14 }
 0xdbb   :  { %v5718_v21 = vadd.f32 1e-05, %v5702_v32 }
 0xdbc   :  { %v5717_v50 = vadd.f32 1e-05, %v5701_v45 }
 0xdbe   :  { %10716 = vrsqrt.f32 %v5717_v50 }
 0xdbf   :  { %10718 = vrsqrt.f32 %v5718_v21 }
 0xdc0   :  { %v10713_v36 = vpop.eup %10712  ;;  %v9535_v37 = vpop.f32.mrb[188].mxu1 }
 0xdc1   :  { %v10715_v7 = vpop.eup %10714  ;;  %v5704_v46 = vmul.f32 0.03125, %v9535_v37  ;;  %v5672_v20 = vpop.f32.mrb[189].mxu1  ;;  %9553 = vmatprep.mubr.msk.f32.mxu0 %vm5268_vm6, %v10713_v36  ;;  %v6280_v36 = vld [vmem:[%s16610_s19 + $0x88] sm:$0xff]  ;;  %v6263_v37 = vld [vmem:[%s16610_s19] sm:$0xff] }
 0xdc2   :  { %v5703_v34 = vmul.f32 0.03125, %v5672_v20  ;;  %9554 = vmatmul.mubr.msk.f32.gmra.mrb[200].mxu0 %vm5268_vm6, %v10715_v7 }
 0xdc3   :  { %v5720_v11 = vadd.f32 1e-05, %v5704_v46  ;;  %v6264_v46 = vld [vmem:[%s16610_s19 + $0x8] sm:$0xff] }
 0xdc4   :  { %v5719_v47 = vadd.f32 1e-05, %v5703_v34  ;;  %v10146_v20 = vpack.c.bf16 %v6264_v46, %v6263_v37  ;;  %v6281_v34 = vld [vmem:[%s16610_s19 + $0x90] sm:$0xff]  ;;  %v14954_v46 = vld [vmem:[%s16617_s26 + $0x8] sm:$0xff] }
 0xdc6   :  { %10720 = vrsqrt.f32 %v5719_v47  ;;  %v6265_v47 = vld [vmem:[%s16610_s19 + $0x10] sm:$0xff] }
 0xdc7   :  { %10722 = vrsqrt.f32 %v5720_v11  ;;  %v6282_v11 = vld [vmem:[%s16610_s19 + $0x98] sm:$0xff] }
 0xdc8   :  { %v10717_v15 = vpop.eup %10716 }
 0xdc9   :  { %v9538_v57 = vpop.f32.mrb[190].mxu1  ;;  %v10719_v60 = vpop.eup %10718  ;;  %9556 = vmatprep.mubr.msk.f32.mxu0 %vm5268_vm6, %v10717_v15  ;;  %v10148_v15 = vpack.c.bf16 %v6282_v11, %v6281_v34  ;;  %v6503_v11 = vsel %vm338_vm2, %v14954_v46, 0.0 }
 0xdca   :  { %v5706_v35 = vmul.f32 0.03125, %v9538_v57  ;;  %v5682_v2 = vpop.f32.mrb[191].mxu1  ;;  %9557 = vmatmul.mubr.msk.f32.gmra.mrb[202].mxu0 %vm5268_vm6, %v10719_v60  ;;  %v6266_v57 = vld [vmem:[%s16610_s19 + $0x18] sm:$0xff]  ;;  %v6283_v60 = vld [vmem:[%s16610_s19 + $0xa0] sm:$0xff]  ;;  %6915 = vadd.xlane.f32.xlu1 %v6503_v11 }
 0xdcb   :  { %v5705_v5 = vmul.f32 0.03125, %v5682_v2  ;;  %v10150_v2 = vpack.c.bf16 %v6266_v57, %v6265_v47  ;;  %v14968_v47 = vld [vmem:[%s16617_s26 + $0x10] sm:$0xff] }
 0xdcc   :  { %v5722_v31 = vadd.f32 1e-05, %v5706_v35  ;;  %v6284_v35 = vld [vmem:[%s16610_s19 + $0xa8] sm:$0xff] }
 0xdcd   :  { %v5721_v59 = vadd.f32 1e-05, %v5705_v5  ;;  %v10152_v5 = vpack.c.bf16 %v6284_v35, %v6283_v60 }
 0xdcf   :  { %10724 = vrsqrt.f32 %v5721_v59  ;;  %v6268_v59 = vld [vmem:[%s16610_s19 + $0x28] sm:$0xff] }
 0xdd0   :  { %10726 = vrsqrt.f32 %v5722_v31  ;;  %v10721_v48 = vpop.eup %10720  ;;  %v6267_v31 = vld [vmem:[%s16610_s19 + $0x20] sm:$0xff] }
 0xdd1   :  { %v10723_v4 = vpop.eup %10722  ;;  %9559 = vmatprep.mubr.msk.f32.mxu0 %vm5268_vm6, %v10721_v48  ;;  %v10154_v48 = vpack.c.bf16 %v6268_v59, %v6267_v31  ;;  %v6505_v31 = vsel %vm338_vm2, %v14968_v47, 0.0 }
 0xdd2   :  { %9560 = vmatmul.mubr.msk.f32.gmra.mrb[204].mxu0 %vm5268_vm6, %v10723_v4  ;;  %v6285_v4 = vld [vmem:[%s16610_s19 + $0xb0] sm:$0xff]  ;;  %6917 = vadd.xlane.f32.xlu1 %v6505_v31 }
 0xdd9   :  { %v10725_v17 = vpop.eup %10724  ;;  %v9543_v53 = vpop.f32.mrb[192].mxu0 }
 0xdda   :  { %v10727_v0 = vpop.eup %10726  ;;  %v5853_v39 = vpop.f32.mrb[193].mxu0  ;;  %9562 = vmatprep.mubr.msk.f32.mxu0 %vm5268_vm6, %v10725_v17  ;;  %v5933_v25 = vmul.f32 %v9543_v53, %v14614_v42  ;;  %v6286_v17 = vld [vmem:[%s16610_s19 + $0xb8] sm:$0xff]  ;;  %v6269_v53 = vld [vmem:[%s16610_s19 + $0x30] sm:$0xff] }
 0xddb   :  { %v5932_v43 = vmul.f32 %v5853_v39, %v14618_v41  ;;  %9563 = vmatmul.mubr.msk.f32.gmra.mrb[206].mxu0 %vm5268_vm6, %v10727_v0  ;;  %v10156_v0 = vpack.c.bf16 %v6286_v17, %v6285_v4  ;;  %v6270_v39 = vld [vmem:[%s16610_s19 + $0x38] sm:$0xff] }
 0xddc   :  { %v5956_v63 = vmul.f32 %v14777_v51, %v5933_v25  ;;  %v6287_v25 = vld [vmem:[%s16610_s19 + $0xc0] sm:$0xff] }
 0xddd   :  { %v5955_v52 = vmul.f32 %v14777_v51, %v5932_v43  ;;  %v9546_v30 = vpop.f32.mrb[194].mxu0  ;;  %v6288_v43 = vld [vmem:[%s16610_s19 + $0xc8] sm:$0xff] }
 0xdde   :  { %v5863_v26 = vpop.f32.mrb[195].mxu0  ;;  %v14798_v6 = vadd.f32 %v14786_v49, %v5956_v63  ;;  %v5935_v12 = vmul.f32 %v9546_v30, %v14626_v1  ;;  %v10160_v30 = vpack.c.bf16 %v6288_v43, %v6287_v25  ;;  %v6272_v63 = vld [vmem:[%s16610_s19 + $0x48] sm:$0xff]  ;;  %v15008_v25 = vld [vmem:[%s16617_s26 + $0x60] sm:$0xff] }
 0xddf   :  { %v14791_v55 = vadd.f32 %v14786_v49, %v5955_v52  ;;  %v5934_v42 = vmul.f32 %v5863_v26, %v14629_v3  ;;  %v10158_v52 = vpack.c.bf16 %v6270_v39, %v6269_v53  ;;  %v6271_v26 = vld [vmem:[%s16610_s19 + $0x40] sm:$0xff] }
 0xde0   :  { %v5958_v3 = vmul.f32 %v14777_v51, %v5935_v12  ;;  %v6273_v12 = vld [vmem:[%s16610_s19 + $0x50] sm:$0xff]  ;;  %v15001_v53 = vld [vmem:[%s16617_s26 + $0x20] sm:$0xff] }
 0xde1   :  { %v9549_v24 = vpop.f32.mrb[196].mxu0  ;;  %8410 = vmatmul.mubr.msk.f32.vlgmr.msra.gmra.mrb[192].mxu1 %vm583_vm1, %v14791_v55  ;;  %v5957_v44 = vmul.f32 %v14777_v51, %v5934_v42  ;;  %v10162_v42 = vpack.c.bf16 %v6272_v63, %v6271_v26  ;;  %v6509_v26 = vsel %vm338_vm2, %v15001_v53, 0.0 }
 0xde2   :  { %v5873_v41 = vpop.f32.mrb[197].mxu0  ;;  %6140 = vmatprep.mubr.f32.mxu1 %v17145_v58  ;;  %v14814_v1 = vadd.f32 %v14786_v49, %v5958_v3  ;;  %v5937_v8 = vmul.f32 %v9549_v24, %v14638_v54  ;;  %v6289_v24 = vld [vmem:[%s16610_s19 + $0xd0] sm:$0xff]  ;;  %v6292_v3 = vld [vmem:[%s16610_s19 + $0xe8] sm:$0xff] }
 0xde3   :  { %v14807_v56 = vadd.f32 %v14786_v49, %v5957_v44  ;;  %v5936_v18 = vmul.f32 %v5873_v41, %v14641_v33  ;;  %v6290_v41 = vld [vmem:[%s16610_s19 + $0xd8] sm:$0xff] }
 0xde4   :  { %v5960_v29 = vmul.f32 %v14777_v51, %v5937_v8  ;;  %v10164_v44 = vpack.c.bf16 %v6290_v41, %v6289_v24  ;;  %v7299_v41 = vsel %vm338_vm2, %v15008_v25, 0.0 }
 0xde5   :  { %v9552_v10 = vpop.f32.mrb[198].mxu0  ;;  %8411 = vmatmul.mubr.msk.f32.gmra.mrb[194].mxu1 %vm583_vm1, %v14798_v6  ;;  %v5959_v23 = vmul.f32 %v14777_v51, %v5936_v18 }
 0xde6   :  { %v5883_v28 = vpop.f32.mrb[199].mxu0  ;;  %6146 = vmatprep.mubr.f32.mxu1 %v17145_v58  ;;  %v14830_v54 = vadd.f32 %v14786_v49, %v5960_v29  ;;  %v5939_v14 = vmul.f32 %v9552_v10, %v14650_v38  ;;  %v6279_v38 = vld [vmem:[%s16610_s19 + $0x80] sm:$0xff]  ;;  %v6274_v10 = vld [vmem:[%s16610_s19 + $0x58] sm:$0xff]  ;;  %v6276_v29 = vld [vmem:[%s16610_s19 + $0x68] sm:$0xff] }
 0xde7   :  { %v14823_v33 = vadd.f32 %v14786_v49, %v5959_v23  ;;  %v5938_v32 = vmul.f32 %v5883_v28, %v14653_v27  ;;  %v10144_v7 = vpack.c.bf16 %v6280_v36, %v6279_v38  ;;  %v6291_v28 = vld [vmem:[%s16610_s19 + $0xe0] sm:$0xff]  ;;  %v10166_v18 = vpack.c.bf16 %v6274_v10, %v6273_v12  ;;  %v6277_v38 = vld [vmem:[%s16610_s19 + $0x70] sm:$0xff]  ;;  %v6278_v36 = vld [vmem:[%s16610_s19 + $0x78] sm:$0xff] }
 0xde8   :  { %v5962_v21 = vmul.f32 %v14777_v51, %v5939_v14  ;;  %v10168_v8 = vpack.c.bf16 %v6292_v3, %v6291_v28  ;;  %v6275_v23 = vld [vmem:[%s16610_s19 + $0x60] sm:$0xff]  ;;  %v6293_v14 = vld [vmem:[%s16610_s19 + $0xf0] sm:$0xff]  ;;  %v10174_v37 = vpack.c.bf16 %v6278_v36, %v6277_v38 }
 0xde9   :  { %8412 = vmatmul.mubr.msk.f32.gmra.mrb[196].mxu1 %vm583_vm1, %v14807_v56  ;;  %v5961_v45 = vmul.f32 %v14777_v51, %v5938_v32  ;;  %10145 = vmatprep.subr.bf16.mxu0 %v10144_v7  ;;  %v10170_v32 = vpack.c.bf16 %v6276_v29, %v6275_v23  ;;  %v15029_v12 = vld [vmem:[%s16617_s26 + $0x30] sm:$0xff] }
 0xdea   :  { %6152 = vmatprep.mubr.f32.mxu1 %v17145_v58  ;;  %v14845_v50 = vadd.f32 %v14786_v49, %v5962_v21  ;;  %10176 = vmatprep.subr.bf16.mxu1 %v10144_v7  ;;  %v14949_v7 = vld [vmem:[%s16617_s26] sm:$0xff]  ;;  %v15036_v28 = vld [vmem:[%s16617_s26 + $0x70] sm:$0xff]  ;;  %v6513_v23 = vsel %vm338_vm2, %v15029_v12, 0.0 }
 0xdeb   :  { %v14839_v27 = vadd.f32 %v14786_v49, %v5961_v45  ;;  %10147 = vmatpush3.bf16.msra.mxu0 %v10146_v20  ;;  %10184 = vmatpush3.bf16.msra.mxu1 %v10146_v20  ;;  %v6294_v45 = vld [vmem:[%s16610_s19 + $0xf8] sm:$0xff]  ;;  %v14959_v20 = vld [vmem:[%s16617_s26 + $0x40] sm:$0xff]  ;;  %v6502_v34 = vsel %vm338_vm2, %v14949_v7, 0.0 }
 0xdec   :  { %10149 = vmatprep.subr.bf16.mxu0 %v10148_v15  ;;  %10177 = vmatprep.subr.bf16.mxu1 %v10148_v15  ;;  %v10172_v21 = vpack.c.bf16 %v6294_v45, %v6293_v14  ;;  %v14973_v15 = vld [vmem:[%s16617_s26 + $0x48] sm:$0xff]  ;;  %v6504_v57 = vadd.f32 %v6503_v11, %v6502_v34  ;;  %v7292_v60 = vsel %vm338_vm2, %v14959_v20, 0.0  ;;  %v7303_v45 = vsel %vm338_vm2, %v15036_v28, 0.0 }
 0xded   :  { %8413 = vmatmul.mubr.msk.f32.gmra.mrb[198].mxu1 %vm583_vm1, %v14814_v1  ;;  %6913 = vadd.xlane.f32.xlu0 %v6502_v34  ;;  %v7293_v35 = vsel %vm338_vm2, %v14973_v15, 0.0 }
 0xdee   :  { %6158 = vmatprep.mubr.f32.mxu1 %v17145_v58  ;;  %v7294_v59 = vadd.f32 %v7293_v35, %v7292_v60  ;;  %v6506_v4 = vadd.f32 %v6505_v31, %v6504_v57 }
 0xdef   :  { %10151 = vmatpush3.bf16.msra.mxu0 %v10150_v2  ;;  %10185 = vmatpush3.bf16.msra.mxu1 %v10150_v2  ;;  %v14982_v2 = vld [vmem:[%s16617_s26 + $0x18] sm:$0xff] }
 0xdf0   :  { %10153 = vmatprep.subr.bf16.mxu0 %v10152_v5  ;;  %10178 = vmatprep.subr.bf16.mxu1 %v10152_v5  ;;  %v14987_v5 = vld [vmem:[%s16617_s26 + $0x50] sm:$0xff] }
 0xdf1   :  { %8414 = vmatmul.mubr.msk.f32.gmra.mrb[200].mxu1 %vm583_vm1, %v14823_v33  ;;  %v7295_v17 = vsel %vm338_vm2, %v14987_v5, 0.0  ;;  %7701 = vadd.xlane.f32.xlu0 %v7292_v60 }
 0xdf2   :  { %6164 = vmatprep.mubr.f32.mxu1 %v17145_v58  ;;  %v7296_v39 = vadd.f32 %v7295_v17, %v7294_v59 }
 0xdf3   :  { %10155 = vmatpush3.bf16.msra.mxu0 %v10154_v48  ;;  %10186 = vmatpush3.bf16.msra.mxu1 %v10154_v48  ;;  %v14994_v48 = vld [vmem:[%s16617_s26 + $0x58] sm:$0xff] }
 0xdf4   :  { %10157 = vmatprep.subr.bf16.mxu0 %v10156_v0  ;;  %10179 = vmatprep.subr.bf16.mxu1 %v10156_v0  ;;  %v6507_v0 = vsel %vm338_vm2, %v14982_v2, 0.0 }
 0xdf5   :  { %8415 = vmatmul.mubr.msk.f32.gmra.mrb[202].mxu1 %vm583_vm1, %v14830_v54  ;;  %v6508_v43 = vadd.f32 %v6507_v0, %v6506_v4  ;;  %7703 = vadd.xlane.f32.xlu0 %v7293_v35 }
 0xdf6   :  { %6170 = vmatprep.mubr.f32.mxu1 %v17145_v58  ;;  %6919 = vadd.xlane.f32.xlu1 %v6507_v0 }
 0xdf7   :  { %10159 = vmatpush3.bf16.msra.mxu0 %v10158_v52  ;;  %10187 = vmatpush3.bf16.msra.mxu1 %v10158_v52  ;;  %v7297_v52 = vsel %vm338_vm2, %v14994_v48, 0.0  ;;  %v6510_v24 = vadd.f32 %v6509_v26, %v6508_v43 }
 0xdf8   :  { %10161 = vmatprep.subr.bf16.mxu0 %v10160_v30  ;;  %10180 = vmatprep.subr.bf16.mxu1 %v10160_v30  ;;  %v15015_v30 = vld [vmem:[%s16617_s26 + $0x28] sm:$0xff]  ;;  %v7298_v63 = vadd.f32 %v7297_v52, %v7296_v39 }
 0xdf9   :  { %8416 = vmatmul.mubr.msk.f32.gmra.mrb[204].mxu1 %vm583_vm1, %v14839_v27  ;;  %7705 = vadd.xlane.f32.xlu0 %v7295_v17 }
 0xdfa   :  { %6176 = vmatprep.mubr.f32.mxu1 %v17145_v58  ;;  %v7300_v10 = vadd.f32 %v7299_v41, %v7298_v63  ;;  %6921 = vadd.xlane.f32.xlu1 %v6509_v26  ;;  %v6012_v63 = vlaneseq }
 0xdfb   :  { %10163 = vmatpush3.bf16.msra.mxu0 %v10162_v42  ;;  %10188 = vmatpush3.bf16.msra.mxu1 %v10162_v42  ;;  %v15022_v42 = vld [vmem:[%s16617_s26 + $0x68] sm:$0xff] }
 0xdfc   :  { %10165 = vmatprep.subr.bf16.mxu0 %v10164_v44  ;;  %10181 = vmatprep.subr.bf16.mxu1 %v10164_v44  ;;  %v6511_v44 = vsel %vm338_vm2, %v15015_v30, 0.0 }
 0xdfd   :  { %8417 = vmatmul.mubr.msk.f32.gmra.mrb[206].mxu1 %vm583_vm1, %v14845_v50  ;;  %v6512_v3 = vadd.f32 %v6511_v44, %v6510_v24  ;;  %7707 = vadd.xlane.f32.xlu0 %v7297_v52 }
 0xdfe   :  { %6182 = vmatprep.mubr.f32.mxu1 %v17145_v58  ;;  %6923 = vadd.xlane.f32.xlu1 %v6511_v44 }
 0xdff   :  { %10167 = vmatpush3.bf16.msra.mxu0 %v10166_v18  ;;  %10189 = vmatpush3.bf16.msra.mxu1 %v10166_v18  ;;  %v7301_v18 = vsel %vm338_vm2, %v15022_v42, 0.0  ;;  %v6514_v14 = vadd.f32 %v6513_v23, %v6512_v3 }
 0xe00   :  { %10169 = vmatprep.subr.bf16.mxu0 %v10168_v8  ;;  %10182 = vmatprep.subr.bf16.mxu1 %v10168_v8  ;;  %v15043_v8 = vld [vmem:[%s16617_s26 + $0x38] sm:$0xff]  ;;  %v7302_v29 = vadd.f32 %v7301_v18, %v7300_v10  ;;  %v6013_v10 = vshrl.u32 %v6012_v63, 7 }
 0xe01   :  { %7709 = vadd.xlane.f32.xlu0 %v7299_v41 }
 0xe02   :  { %v7304_v38 = vadd.f32 %v7303_v45, %v7302_v29  ;;  %6925 = vadd.xlane.f32.xlu1 %v6513_v23  ;;  %v6014_v29 = vsub.s32 0, %v6013_v10 }
 0xe03   :  { %10171 = vmatpush3.bf16.msra.mxu0 %v10170_v32  ;;  %10190 = vmatpush3.bf16.msra.mxu1 %v10170_v32  ;;  %v15050_v32 = vld [vmem:[%s16617_s26 + $0x78] sm:$0xff] }
 0xe04   :  { %10173 = vmatprep.subr.bf16.mxu0 %v10172_v21  ;;  %10183 = vmatprep.subr.bf16.mxu1 %v10172_v21  ;;  %v6515_v21 = vsel %vm338_vm2, %v15043_v8, 0.0 }
 0xe05   :  { %v15056_v36 = vadd.f32 %v6515_v21, %v6514_v14  ;;  %7711 = vadd.xlane.f32.xlu0 %v7301_v18 }
 0xe06   :  { %6927 = vadd.xlane.f32.xlu1 %v6515_v21 }
 0xe07   :  { %10175 = vmatpush3.bf16.msra.mxu0 %v10174_v37  ;;  %10191 = vmatpush3.bf16.msra.mxu1 %v10174_v37  ;;  %v7305_v37 = vsel %vm338_vm2, %v15050_v32, 0.0 }
 0xe08   :  { %v15060_v34 = vadd.f32 %v7305_v37, %v7304_v38 }
 0xe09   :  { %7713 = vadd.xlane.f32.xlu0 %v7303_v45 }
 0xe0a   :  { %7715 = vadd.xlane.f32.xlu1 %v7305_v37 }
 0xe95   :  { %v9555_v11 = vpop.f32.mrb[200].mxu0 }
 0xe96   :  { %v5893_v57 = vpop.f32.mrb[201].mxu0  ;;  %v5941_v60 = vmul.f32 %v9555_v11, %v14664_v16 }
 0xe97   :  { %v5940_v35 = vmul.f32 %v5893_v57, %v14667_v40 }
 0xe98   :  { %v5964_v59 = vmul.f32 %v14777_v51, %v5941_v60 }
 0xe99   :  { %v5963_v31 = vmul.f32 %v14777_v51, %v5940_v35 }
 0xe9a   :  { %v15073_v39 = vadd.f32 %v14786_v49, %v5964_v59 }
 0xe9b   :  { %v15067_v4 = vadd.f32 %v14786_v49, %v5963_v31 }
 0xe9d   :  { %v9558_v17 = vpop.f32.mrb[202].mxu0  ;;  %8418 = vmatmul.mubr.msk.f32.gmra.mrb[208].mxu1 %vm583_vm1, %v15067_v4 }
 0xe9e   :  { %v5903_v0 = vpop.f32.mrb[203].mxu0  ;;  %6188 = vmatprep.mubr.f32.mxu1 %v17145_v58  ;;  %v5943_v16 = vmul.f32 %v9558_v17, %v14676_v13 }
 0xe9f   :  { %v5942_v40 = vmul.f32 %v5903_v0, %v14679_v61 }
 0xea0   :  { %v5966_v52 = vmul.f32 %v14777_v51, %v5943_v16 }
 0xea1   :  { %v5965_v43 = vmul.f32 %v14777_v51, %v5942_v40  ;;  %8419 = vmatmul.mubr.msk.f32.gmra.mrb[210].mxu1 %vm583_vm1, %v15073_v39 }
 0xea2   :  { %6194 = vmatprep.mubr.f32.mxu1 %v17145_v58  ;;  %v15089_v61 = vadd.f32 %v14786_v49, %v5966_v52 }
 0xea3   :  { %v15083_v26 = vadd.f32 %v14786_v49, %v5965_v43 }
 0xea5   :  { %v9561_v24 = vpop.f32.mrb[204].mxu0  ;;  %8420 = vmatmul.mubr.msk.f32.gmra.mrb[212].mxu1 %vm583_vm1, %v15083_v26 }
 0xea6   :  { %v5913_v13 = vpop.f32.mrb[205].mxu0  ;;  %6200 = vmatprep.mubr.f32.mxu1 %v17145_v58  ;;  %v5945_v41 = vmul.f32 %v9561_v24, %v14688_v9  ;;  %v6010_v9 = vld [vmem:[%s16609_s18] sm:$0x3] }
 0xea7   :  { %v5944_v44 = vmul.f32 %v5913_v13, %v14691_v62  ;;  %v6018_v62 = vsub.s32 1, %v6013_v10  ;;  %v15112_v11 = vrot.slane %v6010_v9, %v6014_v29 }
 0xea8   :  { %v5968_v18 = vmul.f32 %v14777_v51, %v5945_v41 }
 0xea9   :  { %v5967_v3 = vmul.f32 %v14777_v51, %v5944_v44  ;;  %8421 = vmatmul.mubr.msk.f32.gmra.mrb[214].mxu1 %vm583_vm1, %v15089_v61  ;;  %v15117_v60 = vrot.slane %v6010_v9, %v6018_v62 }
 0xeaa   :  { %6206 = vmatprep.mubr.f32.mxu1 %v17145_v58  ;;  %v15108_v21 = vadd.f32 %v14786_v49, %v5968_v18 }
 0xeab   :  { %v15099_v23 = vadd.f32 %v14786_v49, %v5967_v3 }
 0xead   :  { %8422 = vmatmul.mubr.msk.f32.gmra.mrb[216].mxu1 %vm583_vm1, %v15099_v23 }
 0xeae   :  { %v9564_v14 = vpop.f32.mrb[206].mxu0  ;;  %6212 = vmatprep.mubr.f32.mxu1 %v17145_v58 }
 0xeaf   :  { %v5923_v45 = vpop.f32.mrb[207].mxu0  ;;  %v5947_v38 = vmul.f32 %v9564_v14, %v14700_v19 }
 0xeb0   :  { %v5946_v37 = vmul.f32 %v5923_v45, %v14703_v22 }
 0xeb1   :  { %8423 = vmatmul.mubr.msk.f32.gmra.mrb[218].mxu1 %vm583_vm1, %v15108_v21  ;;  %v5970_v35 = vmul.f32 %v14777_v51, %v5947_v38 }
 0xeb2   :  { %v5969_v57 = vmul.f32 %v14777_v51, %v5946_v37  ;;  %6218 = vmatprep.mubr.f32.mxu1 %v17145_v58 }
 0xeb3   :  { %v15130_v0 = vadd.f32 %v14786_v49, %v5970_v35 }
 0xeb4   :  { %v15122_v31 = vadd.f32 %v14786_v49, %v5969_v57  ;;  %v6136_v59 = vpop.f32.mrb[192].mxu1 }
 0xeb5   :  { %v6137_v19 = vadd.f32 %v6136_v59, %v15112_v11  ;;  %v6138_v22 = vpop.f32.mrb[193].mxu1 }
 0xeb6   :  { %v6139_v17 = vadd.f32 %v6138_v22, %v15117_v60  ;;  %8424 = vmatmul.mubr.msk.f32.gmra.mrb[220].mxu1 %vm583_vm1, %v15122_v31 }
 0xeb7   :  { %6224 = vmatprep.mubr.f32.mxu1 %v17145_v58  ;;  %v6231_v51 = vmax.f32 %v6137_v19, 0.0 }
 0xeb8   :  { %v6232_v16 = vmax.f32 %v6139_v17, 0.0  ;;  %v6142_v40 = vpop.f32.mrb[194].mxu1 }
 0xeb9   :  { %v6143_v43 = vadd.f32 %v6142_v40, %v15112_v11  ;;  %v6144_v52 = vpop.f32.mrb[195].mxu1 }
 0xeba   :  { %v6145_v63 = vadd.f32 %v6144_v52, %v15117_v60  ;;  %8425 = vmatmul.mubr.msk.f32.gmra.mrb[222].mxu1 %vm583_vm1, %v15130_v0  ;;  %6366 = vmatprep.mubr.f32.mxu0 %v6232_v16 }
 0xebb   :  { %6367 = vmatmul.mubr.f32.vlgmr.msra.gmra.mrb[208].mxu0 %v6231_v51  ;;  %v6233_v41 = vmax.f32 %v6143_v43, 0.0 }
 0xebc   :  { %v6234_v24 = vmax.f32 %v6145_v63, 0.0  ;;  %v6148_v13 = vpop.f32.mrb[196].mxu1 }
 0xebd   :  { %v6149_v58 = vadd.f32 %v6148_v13, %v15112_v11  ;;  %v6150_v49 = vpop.f32.mrb[197].mxu1 }
 0xebe   :  { %v6151_v44 = vadd.f32 %v6150_v49, %v15117_v60  ;;  %6371 = vmatprep.mubr.f32.mxu0 %v6234_v24 }
 0xebf   :  { %6372 = vmatmul.mubr.f32.gmra.mrb[210].mxu0 %v6233_v41  ;;  %v6235_v18 = vmax.f32 %v6149_v58, 0.0 }
 0xec0   :  { %v6236_v10 = vmax.f32 %v6151_v44, 0.0  ;;  %v6154_v3 = vpop.f32.mrb[198].mxu1 }
 0xec1   :  { %v6155_v29 = vadd.f32 %v6154_v3, %v15112_v11  ;;  %v6156_v14 = vpop.f32.mrb[199].mxu1 }
 0xec2   :  { %v6157_v9 = vadd.f32 %v6156_v14, %v15117_v60  ;;  %6376 = vmatprep.mubr.f32.mxu0 %v6236_v10 }
 0xec3   :  { %6377 = vmatmul.mubr.f32.gmra.mrb[212].mxu0 %v6235_v18  ;;  %v6237_v38 = vmax.f32 %v6155_v29, 0.0 }
 0xec4   :  { %v6238_v62 = vmax.f32 %v6157_v9, 0.0  ;;  %v6160_v45 = vpop.f32.mrb[200].mxu1 }
 0xec5   :  { %v6161_v37 = vadd.f32 %v6160_v45, %v15112_v11  ;;  %v6162_v57 = vpop.f32.mrb[201].mxu1 }
 0xec6   :  { %v6163_v35 = vadd.f32 %v6162_v57, %v15117_v60  ;;  %6381 = vmatprep.mubr.f32.mxu0 %v6238_v62 }
 0xec7   :  { %6382 = vmatmul.mubr.f32.gmra.mrb[214].mxu0 %v6237_v38  ;;  %v6239_v22 = vmax.f32 %v6161_v37, 0.0 }
 0xec8   :  { %v6240_v59 = vmax.f32 %v6163_v35, 0.0  ;;  %v6166_v19 = vpop.f32.mrb[202].mxu1 }
 0xec9   :  { %v6167_v17 = vadd.f32 %v6166_v19, %v15112_v11  ;;  %v6168_v16 = vpop.f32.mrb[203].mxu1 }
 0xeca   :  { %v6169_v40 = vadd.f32 %v6168_v16, %v15117_v60  ;;  %6386 = vmatprep.mubr.f32.mxu0 %v6240_v59 }
 0xecb   :  { %6387 = vmatmul.mubr.f32.gmra.mrb[216].mxu0 %v6239_v22  ;;  %v6241_v52 = vmax.f32 %v6167_v17, 0.0 }
 0xecc   :  { %v6242_v51 = vmax.f32 %v6169_v40, 0.0  ;;  %v6172_v43 = vpop.f32.mrb[204].mxu1 }
 0xecd   :  { %v6173_v63 = vadd.f32 %v6172_v43, %v15112_v11  ;;  %v6174_v24 = vpop.f32.mrb[205].mxu1 }
 0xece   :  { %v6175_v13 = vadd.f32 %v6174_v24, %v15117_v60  ;;  %6391 = vmatprep.mubr.f32.mxu0 %v6242_v51 }
 0xecf   :  { %6392 = vmatmul.mubr.f32.gmra.mrb[218].mxu0 %v6241_v52  ;;  %v6243_v49 = vmax.f32 %v6173_v63, 0.0 }
 0xed0   :  { %v6244_v41 = vmax.f32 %v6175_v13, 0.0  ;;  %v6178_v58 = vpop.f32.mrb[206].mxu1 }
 0xed1   :  { %v6179_v44 = vadd.f32 %v6178_v58, %v15112_v11  ;;  %v6180_v10 = vpop.f32.mrb[207].mxu1 }
 0xed2   :  { %v6181_v3 = vadd.f32 %v6180_v10, %v15117_v60  ;;  %6396 = vmatprep.mubr.f32.mxu0 %v6244_v41 }
 0xed3   :  { %6397 = vmatmul.mubr.f32.gmra.mrb[220].mxu0 %v6243_v49  ;;  %v6245_v29 = vmax.f32 %v6179_v44, 0.0 }
 0xed4   :  { %v6246_v18 = vmax.f32 %v6181_v3, 0.0 }
 0xed6   :  { %6401 = vmatprep.mubr.f32.mxu0 %v6246_v18 }
 0xed7   :  { %6402 = vmatmul.mubr.f32.gmra.mrb[222].mxu0 %v6245_v29 }
 0xf70   :  { %v6184_v14 = vpop.f32.mrb[208].mxu1 }
 0xf71   :  { %v6185_v9 = vadd.f32 %v6184_v14, %v15112_v11  ;;  %v6186_v62 = vpop.f32.mrb[209].mxu1 }
 0xf72   :  { %v6187_v45 = vadd.f32 %v6186_v62, %v15117_v60 }
 0xf73   :  { %v6247_v57 = vmax.f32 %v6185_v9, 0.0 }
 0xf74   :  { %v6248_v38 = vmax.f32 %v6187_v45, 0.0  ;;  %v6190_v37 = vpop.f32.mrb[210].mxu1 }
 0xf75   :  { %v6191_v35 = vadd.f32 %v6190_v37, %v15112_v11  ;;  %v6192_v59 = vpop.f32.mrb[211].mxu1 }
 0xf76   :  { %v6193_v19 = vadd.f32 %v6192_v59, %v15117_v60  ;;  %6406 = vmatprep.mubr.f32.mxu0 %v6248_v38 }
 0xf77   :  { %6407 = vmatmul.mubr.f32.gmra.mrb[224].mxu0 %v6247_v57  ;;  %v6249_v16 = vmax.f32 %v6191_v35, 0.0 }
 0xf78   :  { %v6250_v22 = vmax.f32 %v6193_v19, 0.0  ;;  %v6196_v17 = vpop.f32.mrb[212].mxu1 }
 0xf79   :  { %v6197_v40 = vadd.f32 %v6196_v17, %v15112_v11  ;;  %v6198_v51 = vpop.f32.mrb[213].mxu1 }
 0xf7a   :  { %v6199_v43 = vadd.f32 %v6198_v51, %v15117_v60  ;;  %6411 = vmatprep.mubr.f32.mxu0 %v6250_v22 }
 0xf7b   :  { %6412 = vmatmul.mubr.f32.gmra.mrb[226].mxu0 %v6249_v16  ;;  %v6251_v24 = vmax.f32 %v6197_v40, 0.0 }
 0xf7c   :  { %v6252_v52 = vmax.f32 %v6199_v43, 0.0  ;;  %v6202_v63 = vpop.f32.mrb[214].mxu1 }
 0xf7d   :  { %v6203_v13 = vadd.f32 %v6202_v63, %v15112_v11  ;;  %v6204_v41 = vpop.f32.mrb[215].mxu1 }
 0xf7e   :  { %v6205_v58 = vadd.f32 %v6204_v41, %v15117_v60  ;;  %6416 = vmatprep.mubr.f32.mxu0 %v6252_v52 }
 0xf7f   :  { %6417 = vmatmul.mubr.f32.gmra.mrb[228].mxu0 %v6251_v24  ;;  %v6253_v10 = vmax.f32 %v6203_v13, 0.0  ;;  %v15167_v13 = vld [vmem:[%s16611_s20] ss:$0 sm:$0xff]  ;;  %s11005_s20 = smov 96  }
 0xf80   :  { %v6254_v49 = vmax.f32 %v6205_v58, 0.0  ;;  %v6208_v44 = vpop.f32.mrb[216].mxu1 }
 0xf81   :  { %v6209_v3 = vadd.f32 %v6208_v44, %v15112_v11  ;;  %v6210_v18 = vpop.f32.mrb[217].mxu1 }
 0xf82   :  { %v6211_v29 = vadd.f32 %v6210_v18, %v15117_v60  ;;  %6421 = vmatprep.mubr.f32.mxu0 %v6254_v49 }
 0xf83   :  { %6422 = vmatmul.mubr.f32.gmra.mrb[230].mxu0 %v6253_v10  ;;  %v6255_v62 = vmax.f32 %v6209_v3, 0.0 }
 0xf84   :  { %v6256_v14 = vmax.f32 %v6211_v29, 0.0  ;;  %v6214_v9 = vpop.f32.mrb[218].mxu1 }
 0xf85   :  { %v6215_v45 = vadd.f32 %v6214_v9, %v15112_v11  ;;  %v6216_v38 = vpop.f32.mrb[219].mxu1 }
 0xf86   :  { %v6217_v37 = vadd.f32 %v6216_v38, %v15117_v60  ;;  %6426 = vmatprep.mubr.f32.mxu0 %v6256_v14 }
 0xf87   :  { %6427 = vmatmul.mubr.f32.gmra.mrb[232].mxu0 %v6255_v62  ;;  %v6257_v59 = vmax.f32 %v6215_v45, 0.0 }
 0xf88   :  { %v6258_v57 = vmax.f32 %v6217_v37, 0.0 }
 0xf89   :  { %v6220_v35 = vpop.f32.mrb[220].mxu1 }
 0xf8a   :  { %v6221_v19 = vadd.f32 %v6220_v35, %v15112_v11  ;;  %v6222_v22 = vpop.f32.mrb[221].mxu1  ;;  %6431 = vmatprep.mubr.f32.mxu0 %v6258_v57 }
 0xf8b   :  { %v6223_v17 = vadd.f32 %v6222_v22, %v15117_v60  ;;  %6432 = vmatmul.mubr.f32.gmra.mrb[234].mxu0 %v6257_v59 }
 0xf8c   :  { %v6259_v51 = vmax.f32 %v6221_v19, 0.0 }
 0xf8d   :  { %v6260_v16 = vmax.f32 %v6223_v17, 0.0  ;;  %v6226_v40 = vpop.f32.mrb[222].mxu1 }
 0xf8e   :  { %v6227_v43 = vadd.f32 %v6226_v40, %v15112_v11  ;;  %v6228_v52 = vpop.f32.mrb[223].mxu1  ;;  %v9257_v63 = vpop.f32.mrb[208].mxu0 }
 0xf8f   :  { %v6229_v24 = vadd.f32 %v6228_v52, %v15117_v60  ;;  %v9258_v41 = vpop.f32.mrb[209].mxu0  ;;  %6436 = vmatprep.mubr.f32.mxu1 %v6260_v16 }
 0xf90   :  { %v9259_v58 = vadd.f32 %v9258_v41, %v9257_v63  ;;  %6437 = vmatmul.mubr.f32.vlgmr.msra.gmra.mrb[224].mxu1 %v6259_v51  ;;  %v6261_v44 = vmax.f32 %v6227_v43, 0.0 }
 0xf91   :  { %v6262_v49 = vmax.f32 %v6229_v24, 0.0 }
 0xf92   :  { %v6369_v10 = vadd.f32 %v9259_v58, %v15167_v13  ;;  %v9260_v3 = vpop.f32.mrb[210].mxu0 }
 0xf93   :  { %v9261_v18 = vpop.f32.mrb[211].mxu0  ;;  %6441 = vmatprep.mubr.f32.mxu1 %v6262_v49 }
 0xf94   :  { %v15171_v11 = vadd.f32 %v6369_v10, %v14791_v55  ;;  %v9262_v60 = vadd.f32 %v9261_v18, %v9260_v3  ;;  %6442 = vmatmul.mubr.f32.gmra.mrb[226].mxu1 %v6261_v44  ;;  %v6914_v18 = vpop.xlane.xlu0 %6913 }
 0xf96   :  { %v6374_v29 = vadd.f32 %v9262_v60, %v15167_v13  ;;  %v9263_v14 = vpop.f32.mrb[212].mxu0  ;;  %6856 = vrot.lane.b32.xlu0 %v15171_v11, %s11005_s20  ;;  %v6916_v60 = vpop.xlane.xlu1 %6915 }
 0xf97   :  { %v9264_v9 = vpop.f32.mrb[213].mxu0 }
 0xf98   :  { %v15177_v62 = vadd.f32 %v6374_v29, %v14798_v6  ;;  %v9265_v45 = vadd.f32 %v9264_v9, %v9263_v14  ;;  %v7702_v29 = vpop.xlane.xlu0 %7701 }
 0xf9a   :  { %v6379_v38 = vadd.f32 %v9265_v45, %v15167_v13  ;;  %v9266_v37 = vpop.f32.mrb[214].mxu0  ;;  %6858 = vrot.lane.b32.xlu1 %v15177_v62, %s11005_s20  ;;  %v6918_v14 = vpop.xlane.xlu1 %6917 }
 0xf9b   :  { %v9267_v55 = vpop.f32.mrb[215].mxu0 }
 0xf9c   :  { %v15183_v57 = vadd.f32 %v6379_v38, %v14807_v56  ;;  %v9268_v35 = vadd.f32 %v9267_v55, %v9266_v37  ;;  %v7704_v9 = vpop.xlane.xlu0 %7703  ;;  %v15219_v37 = vmul.f32 0.03125, %v6916_v60 }
 0xf9e   :  { %v6384_v59 = vadd.f32 %v9268_v35, %v15167_v13  ;;  %v9269_v19 = vpop.f32.mrb[216].mxu0  ;;  %6860 = vrot.lane.b32.xlu0 %v15183_v57, %s11005_s20  ;;  %v6920_v45 = vpop.xlane.xlu1 %6919  ;;  %v15227_v35 = vsub.f32 %v14954_v46, %v15219_v37 }
 0xf9f   :  { %v9270_v6 = vpop.f32.mrb[217].mxu0 }
 0xfa0   :  { %v15189_v22 = vadd.f32 %v6384_v59, %v14814_v1  ;;  %v9271_v17 = vadd.f32 %v9270_v6, %v9269_v19  ;;  %v7706_v38 = vpop.xlane.xlu0 %7705  ;;  %v15229_v59 = vmul.f32 0.03125, %v6918_v14  ;;  %v15231_v19 = vmul.f32 0.03125, %v7702_v29 }
 0xfa2   :  { %v6389_v16 = vadd.f32 %v9271_v17, %v15167_v13  ;;  %v9272_v40 = vpop.f32.mrb[218].mxu0  ;;  %6862 = vrot.lane.b32.xlu0 %v15189_v22, %s11005_s20  ;;  %17318 = vst [vmem:[#allocation61_spill] sm:$0xff] %v15231_v19  ;;  %v15233_v17 = vmul.f32 0.03125, %v7704_v9  ;;  %v15247_v46 = vsub.f32 %v14959_v20, %v15231_v19 }
 0xfa3   :  { %v9273_v56 = vpop.f32.mrb[219].mxu0 }
 0xfa4   :  { %v15195_v51 = vadd.f32 %v6389_v16, %v14823_v33  ;;  %v9274_v43 = vadd.f32 %v9273_v56, %v9272_v40  ;;  %v7708_v6 = vpop.xlane.xlu0 %7707  ;;  %17319 = vst [vmem:[#allocation62_spill] sm:$0xff] %v15233_v17  ;;  %v7120_v40 = vmul.f32 %v15227_v35, %v15227_v35  ;;  %v15243_v56 = vmul.f32 0.03125, %v6920_v45 }
 0xfa6   :  { %v6394_v52 = vadd.f32 %v9274_v43, %v15167_v13  ;;  %v9275_v63 = vpop.f32.mrb[220].mxu0  ;;  %6864 = vrot.lane.b32.xlu0 %v15195_v51, %s11005_s20 }
 0xfa7   :  { %v9276_v1 = vpop.f32.mrb[221].mxu0 }
 0xfa8   :  { %v15201_v24 = vadd.f32 %v6394_v52, %v14830_v54  ;;  %v9277_v41 = vadd.f32 %v9276_v1, %v9275_v63  ;;  %v15251_v52 = vsub.f32 %v14973_v15, %v15233_v17  ;;  %v15253_v63 = vmul.f32 0.03125, %v7706_v38 }
 0xfa9   :  { %v7905_v15 = vmul.f32 %v15247_v46, %v15247_v46 }
 0xfaa   :  { %v6399_v58 = vadd.f32 %v9277_v41, %v15167_v13  ;;  %v9278_v49 = vpop.f32.mrb[222].mxu0  ;;  %6866 = vrot.lane.b32.xlu0 %v15201_v24, %s11005_s20  ;;  %17320 = vst [vmem:[#allocation63_spill] sm:$0xff] %v15253_v63  ;;  %v7710_v41 = vpop.xlane.xlu0 %7709 }
 0xfab   :  { %v9279_v33 = vpop.f32.mrb[223].mxu0  ;;  %v7913_v45 = vsel %vm338_vm2, %v7905_v15, 0.0 }
 0xfac   :  { %v15207_v44 = vadd.f32 %v6399_v58, %v14839_v27  ;;  %v9280_v10 = vadd.f32 %v9279_v33, %v9278_v49  ;;  %v15217_v27 = vmul.f32 0.03125, %v6914_v18  ;;  %v7128_v58 = vsel %vm338_vm2, %v7120_v40, 0.0 }
 0xfad   :  { %v15261_v49 = vsub.f32 %v14982_v2, %v15243_v56  ;;  %v7906_v33 = vmul.f32 %v15251_v52, %v15251_v52 }
 0xfae   :  { %v6404_v3 = vadd.f32 %v9280_v10, %v15167_v13  ;;  %6868 = vrot.lane.b32.xlu0 %v15207_v44, %s11005_s20  ;;  %v15223_v55 = vsub.f32 %v14949_v7, %v15217_v27  ;;  %v15241_v7 = vsub.f32 %v14968_v47, %v15229_v59  ;;  %v15271_v10 = vsub.f32 %v14987_v5, %v15253_v63  ;;  %v7712_v38 = vpop.xlane.xlu0 %7711 }
 0xfaf   :  { %v7122_v2 = vmul.f32 %v15261_v49, %v15261_v49  ;;  %v7914_v5 = vsel %vm338_vm2, %v7906_v33, 0.0 }
 0xfb0   :  { %v15213_v54 = vadd.f32 %v6404_v3, %v14845_v50  ;;  %v6922_v50 = vpop.xlane.xlu1 %6921  ;;  %v7119_v16 = vmul.f32 %v15223_v55, %v15223_v55  ;;  %v7121_v47 = vmul.f32 %v15241_v7, %v15241_v7  ;;  %v15273_v3 = vmul.f32 0.03125, %v7708_v6 }
 0xfb1   :  { %v15263_v20 = vmul.f32 0.03125, %v6922_v50  ;;  %v7907_v50 = vmul.f32 %v15271_v10, %v15271_v10 }
 0xfb2   :  { %6870 = vrot.lane.b32.xlu0 %v15213_v54, %s11005_s20  ;;  %v7127_v1 = vsel %vm338_vm2, %v7119_v16, 0.0  ;;  %17321 = vst [vmem:[#allocation64_spill] sm:$0xff] %v15273_v3  ;;  %v7130_v29 = vsel %vm338_vm2, %v7121_v47, 0.0  ;;  %v15290_v6 = vsub.f32 %v14994_v48, %v15273_v3  ;;  %v15292_v16 = vmul.f32 0.03125, %v7710_v41 }
 0xfb3   :  { %v7129_v18 = vadd.f32 %v7128_v58, %v7127_v1  ;;  %v15280_v14 = vsub.f32 %v15001_v53, %v15263_v20  ;;  %v7132_v53 = vsel %vm338_vm2, %v7122_v2, 0.0  ;;  %v7915_v47 = vadd.f32 %v7914_v5, %v7913_v45  ;;  %v7714_v2 = vpop.xlane.xlu0 %7713 }
 0xfb4   :  { %v6924_v43 = vpop.xlane.xlu1 %6923  ;;  %17322 = vst [vmem:[#allocation8_spill] sm:$0xff] %v15292_v16  ;;  %v7916_v33 = vsel %vm338_vm2, %v7907_v50, 0.0  ;;  %v7908_v48 = vmul.f32 %v15290_v6, %v15290_v6  ;;  %v15308_v41 = vsub.f32 %v15008_v25, %v15292_v16 }
 0xfb5   :  { %v15282_v9 = vmul.f32 0.03125, %v6924_v43  ;;  %v7131_v40 = vadd.f32 %v7130_v29, %v7129_v18  ;;  %v7123_v43 = vmul.f32 %v15280_v14, %v15280_v14  ;;  %v15310_v18 = vmul.f32 0.03125, %v7712_v38 }
 0xfb6   :  { %v7917_v50 = vadd.f32 %v7916_v33, %v7915_v47  ;;  %v7918_v3 = vsel %vm338_vm2, %v7908_v48, 0.0  ;;  %v7909_v25 = vmul.f32 %v15308_v41, %v15308_v41 }
 0xfb7   :  { %v15299_v1 = vsub.f32 %v15015_v30, %v15282_v9  ;;  %17323 = vst [vmem:[#allocation65_spill] sm:$0xff] %v15310_v18  ;;  %v7133_v29 = vadd.f32 %v7132_v53, %v7131_v40  ;;  %v7134_v30 = vsel %vm338_vm2, %v7123_v43, 0.0  ;;  %v15326_v38 = vsub.f32 %v15022_v42, %v15310_v18 }
 0xfb8   :  { %v6926_v60 = vpop.xlane.xlu1 %6925  ;;  %v15328_v40 = vmul.f32 0.03125, %v7714_v2  ;;  %v7919_v33 = vadd.f32 %v7918_v3, %v7917_v50  ;;  %v7920_v42 = vsel %vm338_vm2, %v7909_v25, 0.0 }
 0xfb9   :  { %v15301_v58 = vmul.f32 0.03125, %v6926_v60  ;;  %v7124_v60 = vmul.f32 %v15299_v1, %v15299_v1  ;;  %v7135_v53 = vadd.f32 %v7134_v30, %v7133_v29  ;;  %v7910_v2 = vmul.f32 %v15326_v38, %v15326_v38 }
 0xfba   :  { %17324 = vst [vmem:[#allocation66_spill] sm:$0xff] %v15328_v40  ;;  %v15343_v29 = vsub.f32 %v15036_v28, %v15328_v40 }
 0xfbb   :  { %v15317_v45 = vsub.f32 %v15029_v12, %v15301_v58  ;;  %v7136_v16 = vsel %vm338_vm2, %v7124_v60, 0.0  ;;  %v7922_v18 = vsel %vm338_vm2, %v7910_v2, 0.0 }
 0xfbc   :  { %v6928_v15 = vpop.xlane.xlu1 %6927  ;;  %v7137_v60 = vadd.f32 %v7136_v16, %v7135_v53  ;;  %v7911_v63 = vmul.f32 %v15343_v29, %v15343_v29 }
 0xfbd   :  { %v15319_v5 = vmul.f32 0.03125, %v6928_v15  ;;  %v7125_v12 = vmul.f32 %v15317_v45, %v15317_v45 }
 0xfbf   :  { %v15335_v47 = vsub.f32 %v15043_v8, %v15319_v5  ;;  %v7138_v8 = vsel %vm338_vm2, %v7125_v12, 0.0 }
 0xfc0   :  { %v7716_v43 = vpop.xlane.xlu1 %7715  ;;  %v7139_v16 = vadd.f32 %v7138_v8, %v7137_v60 }
 0xfc1   :  { %v15345_v30 = vmul.f32 0.03125, %v7716_v43  ;;  %v7126_v3 = vmul.f32 %v15335_v47, %v15335_v47 }
 0xfc3   :  { %17325 = vst [vmem:[#allocation67_spill] sm:$0xff] %v15345_v30  ;;  %v15356_v28 = vsub.f32 %v15050_v32, %v15345_v30  ;;  %v7140_v53 = vsel %vm338_vm2, %v7126_v3, 0.0 }
 0xfc4   :  { %v7141_v2 = vadd.f32 %v7140_v53, %v7139_v16 }
 0xfc6   :  { %v7142_v60 = vrot.slane %v7141_v2, 4 }
0x1008   :  { %v6857_v15 = vpop.permute.xlu0 %6856 }
0x1009   :  { %v6880_v48 = vsel %vm338_vm2, %v6857_v15, 0.0  ;;  %v7921_v15 = vadd.f32 %v7920_v42, %v7919_v33  ;;  %v7924_v33 = vsel %vm338_vm2, %v7911_v63, 0.0  ;;  %v7912_v42 = vmul.f32 %v15356_v28, %v15356_v28 }
0x100a   :  { %6881 = vadd.xlane.f32.xlu1 %v6880_v48 }
0x100b   :  { %v7923_v12 = vadd.f32 %v7922_v18, %v7921_v15  ;;  %v7143_v15 = vadd.f32 %v7142_v60, %v7141_v2 }
0x100c   :  { %v6859_v50 = vpop.permute.xlu1 %6858 }
0x100d   :  { %v6883_v25 = vsel %vm338_vm2, %v6859_v50, 0.0  ;;  %v7925_v40 = vadd.f32 %v7924_v33, %v7923_v12  ;;  %v7144_v16 = vrot.slane %v7143_v15, 2 }
0x100e   :  { %6884 = vadd.xlane.f32.xlu1 %v6883_v25  ;;  %v7926_v25 = vsel %vm338_vm2, %v7912_v42, 0.0 }
0x100f   :  { %v7927_v3 = vadd.f32 %v7926_v25, %v7925_v40  ;;  %v7145_v33 = vadd.f32 %v7144_v16, %v7143_v15 }
0x1010   :  { %v6861_v43 = vpop.permute.xlu0 %6860 }
0x1011   :  { %v6886_v48 = vsel %vm338_vm2, %v6861_v43, 0.0  ;;  %v7928_v43 = vrot.slane %v7927_v3, 4 }
0x1012   :  { %6887 = vadd.xlane.f32.xlu1 %v6886_v48 }
0x1013   :  { %v7929_v12 = vadd.f32 %v7928_v43, %v7927_v3 }
0x1014   :  { %v6863_v50 = vpop.permute.xlu0 %6862 }
0x1015   :  { %v6889_v32 = vsel %vm338_vm2, %v6863_v50, 0.0  ;;  %v7930_v50 = vrot.slane %v7929_v12, 2 }
0x1016   :  { %6890 = vadd.xlane.f32.xlu0 %v6889_v32  ;;  %v7146_v32 = vrot.slane %v7145_v33, 1 }
0x1017   :  { %v7931_v25 = vadd.f32 %v7930_v50, %v7929_v12 }
0x1018   :  { %v6865_v8 = vpop.permute.xlu0 %6864  ;;  %v7147_v2 = vadd.f32 %v7146_v32, %v7145_v33 }
0x1019   :  { %v6892_v18 = vsel %vm338_vm2, %v6865_v8, 0.0  ;;  %v7932_v60 = vrot.slane %v7931_v25, 1 }
0x101a   :  { %6893 = vadd.xlane.f32.xlu1 %v6892_v18  ;;  %10728 = vrsqrt.f32 %v7147_v2  ;;  %vm7150_vm7 = vcmp.eq.f32.partialorder %v7147_v2, inf  ;;  %vm7152_vm8 = vcmp.eq.f32.partialorder %v7147_v2, 0.0 }
0x101b   :  { %v7933_v8 = vadd.f32 %v7932_v60, %v7931_v25 }
0x101c   :  { %v6867_v63 = vpop.permute.xlu0 %6866 }
0x101d   :  { %v6895_v30 = vsel %vm338_vm2, %v6867_v63, 0.0  ;;  %10730 = vrsqrt.f32 %v7933_v8  ;;  %v7153_v63 = vand.u32 2147483648, %v7147_v2  ;;  %vm7936_vm9 = vcmp.eq.f32.partialorder %v7933_v8, inf }
0x101e   :  { %6896 = vadd.xlane.f32.xlu1 %v6895_v30  ;;  %vm7938_vm10 = vcmp.eq.f32.partialorder %v7933_v8, 0.0 }
0x1020   :  { %v6869_v53 = vpop.permute.xlu0 %6868 }
0x1021   :  { %v6898_v48 = vsel %vm338_vm2, %v6869_v53, 0.0  ;;  %v7939_v53 = vand.u32 2147483648, %v7933_v8 }
0x1022   :  { %6899 = vadd.xlane.f32.xlu1 %v6898_v48 }
0x1024   :  { %v6871_v42 = vpop.permute.xlu0 %6870  ;;  %v10729_v30 = vpop.eup %10728 }
0x1025   :  { %v6901_v40 = vsel %vm338_vm2, %v6871_v42, 0.0  ;;  %v7149_v18 = vmul.f32 %v10729_v30, %v7147_v2 }
0x1026   :  { %6902 = vadd.xlane.f32.xlu1 %v6901_v40 }
0x1027   :  { %v10731_v3 = vpop.eup %10730  ;;  %v7151_v43 = vsel %vm7150_vm7, %v7147_v2, %v7149_v18 }
0x1028   :  { %v7935_v15 = vmul.f32 %v10731_v3, %v7933_v8  ;;  %v7154_v16 = vsel %vm7152_vm8, %v7153_v63, %v7151_v43 }
0x1029   :  { %v7155_v48 = vmax.f32 %v7154_v16, 1e-12 }
0x102a   :  { %v7937_v42 = vsel %vm7936_vm9, %v7933_v8, %v7935_v15 }
0x102b   :  { %v7940_v12 = vsel %vm7938_vm10, %v7939_v53, %v7937_v42  ;;  %10732 = vrcp.f32 %v7155_v48 }
0x102c   :  { %v7941_v50 = vmax.f32 %v7940_v12, 1e-12 }
0x102e   :  { %10734 = vrcp.f32 %v7941_v50 }
0x1035   :  { %v15376_v8 = vpop.eup %10732 }
0x1036   :  { %v7158_v53 = vmul.f32 %v15376_v8, %v15227_v35  ;;  %v7157_v12 = vmul.f32 %v15376_v8, %v15223_v55 }
0x104a   :  { %v9281_v33 = vpop.f32.mrb[224].mxu0 }
0x104b   :  { %v9282_v40 = vpop.f32.mrb[225].mxu0 }
0x104c   :  { %v9283_v32 = vadd.f32 %v9282_v40, %v9281_v33  ;;  %v15390_v33 = vpop.eup %10734 }
0x104d   :  { %v7944_v55 = vmul.f32 %v15390_v33, %v15251_v52 }
0x104e   :  { %v6409_v25 = vadd.f32 %v9283_v32, %v15167_v13  ;;  %v9284_v60 = vpop.f32.mrb[226].mxu0 }
0x104f   :  { %v9285_v30 = vpop.f32.mrb[227].mxu0 }
0x1050   :  { %v15371_v2 = vadd.f32 %v6409_v25, %v15067_v4  ;;  %v9286_v18 = vadd.f32 %v9285_v30, %v9284_v60  ;;  %v7943_v25 = vmul.f32 %v15390_v33, %v15247_v46 }
0x1052   :  { %17326 = vst [vmem:[#allocation68_spill] sm:$0xff] %v15371_v2  ;;  %v6414_v3 = vadd.f32 %v9286_v18, %v15167_v13  ;;  %v9287_v63 = vpop.f32.mrb[228].mxu0  ;;  %7645 = vrot.lane.b32.xlu1 %v15371_v2, %s11005_s20 }
0x1053   :  { %v9288_v43 = vpop.f32.mrb[229].mxu0 }
0x1054   :  { %v15379_v15 = vadd.f32 %v6414_v3, %v15073_v39  ;;  %v9289_v16 = vadd.f32 %v9288_v43, %v9287_v63  ;;  %v7159_v39 = vmul.f32 %v15376_v8, %v15241_v7 }
0x1056   :  { %17327 = vst [vmem:[#allocation7_spill] sm:$0xff] %v15379_v15  ;;  %v9290_v48 = vpop.f32.mrb[230].mxu0  ;;  %7647 = vrot.lane.b32.xlu0 %v15379_v15, %s11005_s20  ;;  %7175 = vrot.lane.b32.xlu1 %v7158_v53, %s11006_s4  ;;  %v6419_v40 = vadd.f32 %v9289_v16, %v15167_v13 }
0x1057   :  { %v9291_v4 = vpop.f32.mrb[231].mxu0 }
0x1058   :  { %v9292_v42 = vadd.f32 %v9291_v4, %v9290_v48  ;;  %v15402_v30 = vadd.f32 %v6419_v40, %v15083_v26 }
0x105a   :  { %v9293_v50 = vpop.f32.mrb[232].mxu0  ;;  %7173 = vrot.lane.b32.xlu0 %v7157_v12, %s11006_s4  ;;  %7177 = vrot.lane.b32.xlu1 %v7159_v39, %s11006_s4  ;;  %v6424_v18 = vadd.f32 %v9292_v42, %v15167_v13  ;;  %v6480_v12 = vsel %vm338_vm2, %v15177_v62, 0.0  ;;  %v6479_v39 = vsel %vm338_vm2, %v15171_v11, 0.0 }
0x105b   :  { %v9294_v35 = vpop.f32.mrb[233].mxu0 }
0x105c   :  { %v9295_v32 = vadd.f32 %v9294_v35, %v9293_v50  ;;  %v15408_v43 = vadd.f32 %v6424_v18, %v15089_v61  ;;  %v6482_v50 = vsel %vm338_vm2, %v15183_v57, 0.0  ;;  %v6481_v35 = vadd.f32 %v6480_v12, %v6479_v39 }
0x105d   :  { %v6975_v39 = vmul.f32 %v15217_v27, %v15217_v27 }
0x105e   :  { %v9296_v60 = vpop.f32.mrb[234].mxu0  ;;  %7959 = vrot.lane.b32.xlu0 %v7943_v25, %s11006_s4  ;;  %7961 = vrot.lane.b32.xlu1 %v7944_v55, %s11006_s4  ;;  %v6429_v52 = vadd.f32 %v9295_v32, %v15167_v13  ;;  %v6484_v25 = vsel %vm338_vm2, %v15189_v22, 0.0  ;;  %v6483_v55 = vadd.f32 %v6482_v50, %v6481_v35  ;;  %v7275_v12 = vsel %vm338_vm2, %v15408_v43, 0.0 }
0x105f   :  { %v9297_v7 = vpop.f32.mrb[235].mxu0  ;;  %v6976_v50 = vmul.f32 %v15219_v37, %v15219_v37 }
0x1060   :  { %v9298_v3 = vadd.f32 %v9297_v7, %v9296_v60  ;;  %v15414_v48 = vadd.f32 %v6429_v52, %v15099_v23  ;;  %v6486_v60 = vsel %vm338_vm2, %v15195_v51, 0.0  ;;  %v7271_v52 = vsel %vm338_vm2, %v15379_v15, 0.0 }
0x1062   :  { %7649 = vrot.lane.b32.xlu1 %v15402_v30, %s11005_s20  ;;  %v6434_v4 = vadd.f32 %v9298_v3, %v15167_v13  ;;  %v6490_v3 = vsel %vm338_vm2, %v15207_v44, 0.0 }
0x1063   :  { %v9299_v63 = vpop.f32.mrb[224].mxu1 }
0x1064   :  { %v9300_v46 = vpop.f32.mrb[225].mxu1  ;;  %v15427_v23 = vadd.f32 %v6434_v4, %v15108_v21  ;;  %v6485_v21 = vadd.f32 %v6484_v25, %v6483_v55  ;;  %v7947_v25 = vmul.f32 %v15390_v33, %v15308_v41  ;;  %v6517_v55 = vrot.slane %v15056_v36, 4 }
0x1065   :  { %v9301_v16 = vadd.f32 %v9300_v46, %v9299_v63  ;;  %v7945_v46 = vmul.f32 %v15390_v33, %v15271_v10  ;;  %v7162_v10 = vmul.f32 %v15376_v8, %v15299_v1  ;;  %v7277_v1 = vsel %vm338_vm2, %v15414_v48, 0.0 }
0x1066   :  { %7651 = vrot.lane.b32.xlu1 %v15408_v43, %s11005_s20  ;;  %v6487_v18 = vadd.f32 %v6486_v60, %v6485_v21  ;;  %v7279_v60 = vsel %vm338_vm2, %v15427_v23, 0.0  ;;  %v7164_v41 = vmul.f32 %v15376_v8, %v15335_v47  ;;  %v7949_v47 = vmul.f32 %v15390_v33, %v15343_v29 }
0x1067   :  { %v9302_v53 = vpop.f32.mrb[226].mxu1  ;;  %v6439_v40 = vadd.f32 %v9301_v16, %v15167_v13 }
0x1068   :  { %v9303_v26 = vpop.f32.mrb[227].mxu1 }
0x1069   :  { %v9304_v42 = vadd.f32 %v9303_v26, %v9302_v53  ;;  %v15442_v7 = vadd.f32 %v6439_v40, %v15122_v31  ;;  %v7161_v31 = vmul.f32 %v15376_v8, %v15280_v14  ;;  %v7270_v53 = vsel %vm338_vm2, %v15371_v2, 0.0 }
0x106a   :  { %7653 = vrot.lane.b32.xlu1 %v15414_v48, %s11005_s20  ;;  %v7273_v14 = vsel %vm338_vm2, %v15402_v30, 0.0  ;;  %v7272_v4 = vadd.f32 %v7271_v52, %v7270_v53  ;;  %v6978_v53 = vmul.f32 %v15243_v56, %v15243_v56 }
0x106b   :  { %v6444_v61 = vadd.f32 %v9304_v42, %v15167_v13  ;;  %v6488_v13 = vsel %vm338_vm2, %v15201_v24, 0.0  ;;  %v7946_v42 = vmul.f32 %v15390_v33, %v15290_v6  ;;  %v7163_v6 = vmul.f32 %v15376_v8, %v15317_v45 }
0x106c   :  { %v6489_v63 = vadd.f32 %v6488_v13, %v6487_v18  ;;  %v6977_v13 = vmul.f32 %v15229_v59, %v15229_v59  ;;  %v7281_v45 = vsel %vm338_vm2, %v15442_v7, 0.0 }
0x106d   :  { %v15431_v32 = vadd.f32 %v6444_v61, %v15130_v0  ;;  %v7160_v0 = vmul.f32 %v15376_v8, %v15261_v49  ;;  %v6492_v49 = vsel %vm338_vm2, %v15213_v54, 0.0  ;;  %v7274_v61 = vadd.f32 %v7273_v14, %v7272_v4 }
0x106e   :  { %7655 = vrot.lane.b32.xlu1 %v15427_v23, %s11005_s20  ;;  %v6491_v16 = vadd.f32 %v6490_v3, %v6489_v63  ;;  %v7948_v63 = vmul.f32 %v15390_v33, %v15326_v38  ;;  %v6979_v4 = vmul.f32 %v15263_v20, %v15263_v20 }
0x106f   :  { %7659 = vrot.lane.b32.xlu0 %v15431_v32, %s11005_s20  ;;  %v7276_v40 = vadd.f32 %v7275_v12, %v7274_v61 }
0x1070   :  { %v6493_v26 = vadd.f32 %v6492_v49, %v6491_v16 }
0x1071   :  { %v7278_v21 = vadd.f32 %v7277_v1, %v7276_v40 }
0x1072   :  { %7657 = vrot.lane.b32.xlu1 %v15442_v7, %s11005_s20  ;;  %v6494_v35 = vrot.slane %v6493_v26, 4 }
0x1073   :  { %7179 = vrot.lane.b32.xlu0 %v7160_v0, %s11006_s4  ;;  %v6983_v0 = vadd.f32 %v6976_v50, %v6975_v39  ;;  %v7280_v3 = vadd.f32 %v7279_v60, %v7278_v21  ;;  %v6980_v50 = vmul.f32 %v15282_v9, %v15282_v9 }
0x1074   :  { %v6495_v18 = vadd.f32 %v6494_v35, %v6493_v26 }
0x1075   :  { %v7282_v49 = vadd.f32 %v7281_v45, %v7280_v3  ;;  %v6984_v52 = vadd.f32 %v6983_v0, %v6977_v13 }
0x1076   :  { %7963 = vrot.lane.b32.xlu1 %v7945_v46, %s11006_s4  ;;  %v7283_v46 = vsel %vm338_vm2, %v15431_v32, 0.0  ;;  %v6496_v16 = vrot.slane %v6495_v18, 2 }
0x1077   :  { %7181 = vrot.lane.b32.xlu0 %v7161_v31, %s11006_s4  ;;  %v6518_v31 = vadd.f32 %v6517_v55, %v15056_v36  ;;  %v7284_v14 = vadd.f32 %v7283_v46, %v7282_v49  ;;  %v7307_v36 = vrot.slane %v15060_v34, 4  ;;  %v6985_v26 = vadd.f32 %v6984_v52, %v6978_v53  ;;  %v10972_v49 = vld [vmem:[%s16617_s26] sm:$0xff] }
0x1078   :  { %v6497_v8 = vadd.f32 %v6496_v16, %v6495_v18 }
0x1079   :  { %v6519_v38 = vrot.slane %v6518_v31, 2  ;;  %v7308_v12 = vadd.f32 %v7307_v36, %v15060_v34  ;;  %v6986_v39 = vadd.f32 %v6985_v26, %v6979_v4  ;;  %v6982_v34 = vmul.f32 %v15319_v5, %v15319_v5 }
0x107a   :  { %7965 = vrot.lane.b32.xlu1 %v7946_v42, %s11006_s4  ;;  %v6498_v61 = vrot.slane %v6497_v8, 1 }
0x107b   :  { %7183 = vrot.lane.b32.xlu0 %v7162_v10, %s11006_s4  ;;  %v7285_v10 = vrot.slane %v7284_v14, 4  ;;  %v6520_v42 = vadd.f32 %v6519_v38, %v6518_v31  ;;  %v7309_v35 = vrot.slane %v7308_v12, 2 }
0x107c   :  { %v6499_v40 = vadd.f32 %v6498_v61, %v6497_v8 }
0x107d   :  { %v7286_v29 = vadd.f32 %v7285_v10, %v7284_v14  ;;  %v6521_v1 = vrot.slane %v6520_v42, 1  ;;  %v7310_v21 = vadd.f32 %v7309_v35, %v7308_v12  ;;  %v10973_v12 = vld [vmem:[%s16617_s26 + $0x8] sm:$0xff] }
0x107e   :  { %7967 = vrot.lane.b32.xlu1 %v7947_v25, %s11006_s4  ;;  %v6981_v25 = vmul.f32 %v15301_v58, %v15301_v58  ;;  %v15516_v0 = vmul.f32 0.015625, %v6499_v40 }
0x107f   :  { %7185 = vrot.lane.b32.xlu0 %v7163_v6, %s11006_s4  ;;  %v6987_v6 = vadd.f32 %v6986_v39, %v6980_v50  ;;  %v7287_v55 = vrot.slane %v7286_v29, 2  ;;  %v6522_v60 = vadd.f32 %v6521_v1, %v6520_v42  ;;  %v7311_v3 = vrot.slane %v7310_v21, 1 }
0x1080   :  { %17328 = vst [vmem:[#allocation69_spill] sm:$0xff] %v15516_v0  ;;  %v15524_v46 = vsub.f32 %v15171_v11, %v15516_v0  ;;  %v15563_v40 = vsub.f32 %v15177_v62, %v15516_v0 }
0x1081   :  { %v6988_v13 = vadd.f32 %v6987_v6, %v6981_v25  ;;  %v7288_v45 = vadd.f32 %v7287_v55, %v7286_v29  ;;  %v15520_v18 = vmul.f32 0.015625, %v6522_v60  ;;  %v7312_v16 = vadd.f32 %v7311_v3, %v7310_v21 }
0x1082   :  { %7969 = vrot.lane.b32.xlu1 %v7948_v63, %s11006_s4  ;;  %17330 = vst [vmem:[#allocation72_spill] sm:$0xff] %v15524_v46  ;;  %v6575_v8 = vmul.f32 %v15524_v46, %v15524_v46  ;;  %17335 = vst [vmem:[#allocation92_spill] sm:$0xff] %v15563_v40 }
0x1083   :  { %7187 = vrot.lane.b32.xlu0 %v7164_v41, %s11006_s4  ;;  %17329 = vst [vmem:[#allocation71_spill] sm:$0xff] %v15520_v18  ;;  %v6989_v63 = vadd.f32 %v6988_v13, %v6982_v34  ;;  %v7289_v31 = vrot.slane %v7288_v45, 1  ;;  %v15530_v52 = vsub.f32 %v10972_v49, %v15520_v18  ;;  %v15544_v10 = vmul.f32 0.015625, %v7312_v16 }
0x1084   :  { %v15550_v61 = vsub.f32 %v10973_v12, %v15520_v18  ;;  %v6583_v35 = vsel %vm338_vm2, %v6575_v8, 0.0 }
0x1085   :  { %17331 = vst [vmem:[#allocation73_spill] sm:$0xff] %v15530_v52  ;;  %v6990_v38 = vrot.slane %v6989_v63, 4  ;;  %v7290_v36 = vadd.f32 %v7289_v31, %v7288_v45  ;;  %v6695_v26 = vmul.f32 %v15530_v52, %v15530_v52  ;;  %17332 = vst [vmem:[#allocation10_spill] sm:$0xff] %v15544_v10  ;;  %v6576_v31 = vmul.f32 %v15563_v40, %v15563_v40 }
0x1086   :  { %7971 = vrot.lane.b32.xlu1 %v7949_v47, %s11006_s4  ;;  %17333 = vst [vmem:[#allocation75_spill] sm:$0xff] %v15550_v61  ;;  %v6696_v21 = vmul.f32 %v15550_v61, %v15550_v61 }
0x1087   :  { %v6991_v29 = vadd.f32 %v6990_v38, %v6989_v63  ;;  %v15558_v1 = vmul.f32 0.015625, %v7290_v36  ;;  %v6703_v25 = vsel %vm338_vm2, %v6695_v26, 0.0 }
0x1089   :  { %17334 = vst [vmem:[#allocation78_spill] sm:$0xff] %v15558_v1  ;;  %v15596_v49 = vsub.f32 %v15379_v15, %v15558_v1  ;;  %v6992_v8 = vrot.slane %v6991_v29, 2 }
0x108b   :  { %17337 = vst [vmem:[#allocation9_spill] sm:$0xff] %v15596_v49 }
0x1097   :  { %v6882_v41 = vpop.xlane.xlu1 %6881 }
0x1098   :  { %v15532_v53 = vmul.f32 0.03125, %v6882_v41 }
0x109a   :  { %v15554_v39 = vsub.f32 %v15171_v11, %v15532_v53  ;;  %v6937_v45 = vmul.f32 %v15532_v53, %v15532_v53 }
0x109b   :  { %v6885_v14 = vpop.xlane.xlu1 %6884 }
0x109c   :  { %v15534_v47 = vmul.f32 0.03125, %v6885_v14  ;;  %v7064_v34 = vmul.f32 %v15554_v39, %v15554_v39 }
0x109e   :  { %v15542_v4 = vsub.f32 %v15177_v62, %v15534_v47  ;;  %v6938_v6 = vmul.f32 %v15534_v47, %v15534_v47  ;;  %v10974_v62 = vld [vmem:[%s16617_s26 + $0x40] sm:$0xff] }
0x109f   :  { %v6888_v42 = vpop.xlane.xlu1 %6887  ;;  %v15580_v13 = vsub.f32 %v10974_v62, %v15544_v10  ;;  %v6586_v62 = vsel %vm338_vm2, %v6576_v31, 0.0  ;;  %v6993_v31 = vadd.f32 %v6992_v8, %v6991_v29 }
0x10a0   :  { %v15556_v50 = vmul.f32 0.03125, %v6888_v42  ;;  %v7065_v55 = vmul.f32 %v15542_v4, %v15542_v4  ;;  %v6945_v16 = vadd.f32 %v6938_v6, %v6937_v45  ;;  %v6706_v42 = vsel %vm338_vm2, %v6696_v21, 0.0 }
0x10a1   :  { %17336 = vst [vmem:[#allocation93_spill] sm:$0xff] %v15580_v13  ;;  %v7484_v12 = vmul.f32 %v15580_v13, %v15580_v13  ;;  %v7365_v45 = vmul.f32 %v15596_v49, %v15596_v49  ;;  %v15619_v21 = vsub.f32 %v15371_v2, %v15558_v1  ;;  %v6994_v8 = vrot.slane %v6993_v31, 1 }
0x10a2   :  { %6584 = vadd.xlane.f32.xlu0 %v6583_v35  ;;  %v15570_v11 = vsub.f32 %v15183_v57, %v15556_v50  ;;  %v6939_v3 = vmul.f32 %v15556_v50, %v15556_v50  ;;  %v7074_v38 = vsel %vm7072_vm11, %v7065_v55, 0.0  ;;  %v7073_v35 = vsel %vm7072_vm11, %v7064_v34, 0.0 }
0x10a3   :  { %v6891_v60 = vpop.xlane.xlu0 %6890  ;;  %v7075_v15 = vadd.f32 %v7074_v38, %v7073_v35  ;;  %17338 = vst [vmem:[#allocation94_spill] sm:$0xff] %v15619_v21  ;;  %v7492_v49 = vsel %vm338_vm2, %v7484_v12, 0.0 }
0x10a4   :  { %v15588_v41 = vmul.f32 0.03125, %v6891_v60  ;;  %v7066_v63 = vmul.f32 %v15570_v11, %v15570_v11  ;;  %v6946_v6 = vadd.f32 %v6945_v16, %v6939_v3 }
0x10a6   :  { %v6940_v14 = vmul.f32 %v15588_v41, %v15588_v41  ;;  %6704 = vadd.xlane.f32.xlu0 %v6703_v25  ;;  %v15603_v36 = vsub.f32 %v15189_v22, %v15588_v41  ;;  %v7076_v25 = vsel %vm7072_vm11, %v7066_v63, 0.0 }
0x10a7   :  { %v6894_v26 = vpop.xlane.xlu1 %6893 }
0x10a8   :  { %v15609_v60 = vmul.f32 0.03125, %v6894_v26  ;;  %v7067_v55 = vmul.f32 %v15603_v36, %v15603_v36  ;;  %v6947_v13 = vadd.f32 %v6946_v6, %v6940_v14  ;;  %v7077_v26 = vadd.f32 %v7076_v25, %v7075_v15 }
0x10aa   :  { %v6941_v34 = vmul.f32 %v15609_v60, %v15609_v60  ;;  %6707 = vadd.xlane.f32.xlu0 %v6706_v42  ;;  %v15625_v3 = vsub.f32 %v15195_v51, %v15609_v60  ;;  %v7078_v63 = vsel %vm7072_vm11, %v7067_v55, 0.0  ;;  %6587 = vadd.xlane.f32.xlu1 %v6586_v62  ;;  %v7375_v42 = vsel %vm338_vm2, %v7365_v45, 0.0 }
0x10ab   :  { %v6897_v16 = vpop.xlane.xlu1 %6896  ;;  %v7079_v6 = vadd.f32 %v7078_v63, %v7077_v26 }
0x10ac   :  { %v6948_v38 = vadd.f32 %v6947_v13, %v6941_v34  ;;  %v15628_v35 = vmul.f32 0.03125, %v6897_v16  ;;  %v7068_v14 = vmul.f32 %v15625_v3, %v15625_v3  ;;  %v7364_v13 = vmul.f32 %v15619_v21, %v15619_v21 }
0x10ae   :  { %v6942_v2 = vmul.f32 %v15628_v35, %v15628_v35  ;;  %v15638_v29 = vsub.f32 %v15201_v24, %v15628_v35  ;;  %7376 = vadd.xlane.f32.xlu0 %v7375_v42  ;;  %v7080_v15 = vsel %vm7072_vm11, %v7068_v14, 0.0  ;;  %7493 = vadd.xlane.f32.xlu1 %v7492_v49  ;;  %v7372_v26 = vsel %vm338_vm2, %v7364_v13, 0.0 }
0x10af   :  { %v6900_v12 = vpop.xlane.xlu1 %6899  ;;  %v7081_v25 = vadd.f32 %v7080_v15, %v7079_v6  ;;  %v6995_v14 = vadd.f32 %v6994_v8, %v6993_v31 }
0x10b0   :  { %v6949_v55 = vadd.f32 %v6948_v38, %v6942_v2  ;;  %v7069_v62 = vmul.f32 %v15638_v29, %v15638_v29  ;;  %v15645_v45 = vmul.f32 0.03125, %v6900_v12 }
0x10b1   :  { %10736 = vrsqrt.f32 %v6995_v14  ;;  %vm6998_vm12 = vcmp.eq.f32.partialorder %v6995_v14, inf  ;;  %vm7000_vm13 = vcmp.eq.f32.partialorder %v6995_v14, 0.0 }
0x10b2   :  { %v7082_v34 = vsel %vm7072_vm11, %v7069_v62, 0.0  ;;  %v6943_v63 = vmul.f32 %v15645_v45, %v15645_v45  ;;  %v15652_v16 = vsub.f32 %v15207_v44, %v15645_v45  ;;  %7373 = vadd.xlane.f32.xlu1 %v7372_v26 }
0x10b3   :  { %v6903_v49 = vpop.xlane.xlu1 %6902  ;;  %v7083_v42 = vadd.f32 %v7082_v34, %v7081_v25 }
0x10b4   :  { %v6950_v2 = vadd.f32 %v6949_v55, %v6943_v63  ;;  %v7070_v38 = vmul.f32 %v15652_v16, %v15652_v16  ;;  %v15657_v6 = vmul.f32 0.03125, %v6903_v49 }
0x10b6   :  { %v7084_v15 = vsel %vm7072_vm11, %v7070_v38, 0.0  ;;  %v6944_v12 = vmul.f32 %v15657_v6, %v15657_v6  ;;  %v15664_v62 = vsub.f32 %v15213_v54, %v15657_v6 }
0x10b7   :  { %v7085_v31 = vadd.f32 %v7084_v15, %v7083_v42  ;;  %v7001_v15 = vand.u32 2147483648, %v6995_v14 }
0x10b8   :  { %v6951_v13 = vadd.f32 %v6950_v2, %v6944_v12  ;;  %v7071_v8 = vmul.f32 %v15664_v62, %v15664_v62 }
0x10ba   :  { %v6952_v25 = vrot.slane %v6951_v13, 4  ;;  %v7086_v55 = vsel %vm7072_vm11, %v7071_v8, 0.0 }
0x10bb   :  { %v7087_v34 = vadd.f32 %v7086_v55, %v7085_v31  ;;  %v10737_v40 = vpop.eup %10736 }
0x10bc   :  { %v6953_v63 = vadd.f32 %v6952_v25, %v6951_v13  ;;  %v6997_v17 = vmul.f32 %v10737_v40, %v6995_v14 }
0x10bd   :  { %v7088_v26 = vrot.slane %v7087_v34, 4 }
0x10be   :  { %v6954_v49 = vrot.slane %v6953_v63, 2  ;;  %v6999_v31 = vsel %vm6998_vm12, %v6995_v14, %v6997_v17 }
0x10bf   :  { %v7089_v38 = vadd.f32 %v7088_v26, %v7087_v34 }
0x10c0   :  { %v6955_v21 = vadd.f32 %v6954_v49, %v6953_v63 }
0x10c1   :  { %v7090_v61 = vrot.slane %v7089_v38, 2 }
0x10c2   :  { %v6956_v52 = vrot.slane %v6955_v21, 1 }
0x10c3   :  { %v7091_v46 = vadd.f32 %v7090_v61, %v7089_v38  ;;  %v7002_v61 = vsel %vm7000_vm13, %v7001_v15, %v6999_v31 }
0x10c4   :  { %v6957_v19 = vadd.f32 %v6956_v52, %v6955_v21  ;;  %v7646_v2 = vpop.permute.xlu1 %7645  ;;  %v7003_v40 = vmax.f32 %v7002_v61, 1e-12 }
0x10c5   :  { %v7092_v42 = vrot.slane %v7091_v46, 1  ;;  %v7669_v8 = vsel %vm338_vm2, %v7646_v2, 0.0 }
0x10c6   :  { %10738 = vrsqrt.f32 %v6957_v19  ;;  %7670 = vadd.xlane.f32.xlu1 %v7669_v8  ;;  %vm6960_vm14 = vcmp.eq.f32.partialorder %v6957_v19, inf  ;;  %v6963_v17 = vand.u32 2147483648, %v6957_v19  ;;  %vm6962_vm15 = vcmp.eq.f32.partialorder %v6957_v19, 0.0 }
0x10c7   :  { %v7093_v12 = vadd.f32 %v7092_v42, %v7091_v46 }
0x10c8   :  { %v15670_v13 = vpop.permute.xlu1 %7175  ;;  %v7648_v25 = vpop.permute.xlu0 %7647 }
0x10c9   :  { %10740 = vrsqrt.f32 %v7093_v12  ;;  %v7672_v55 = vsel %vm338_vm2, %v7648_v25, 0.0  ;;  %vm7096_vm0 = vcmp.eq.f32.partialorder %v7093_v12, inf  ;;  %v7099_v42 = vand.u32 2147483648, %v7093_v12 }
0x10ca   :  { %7673 = vadd.xlane.f32.xlu1 %v7672_v55  ;;  %10742 = vrcp.f32 %v7003_v40  ;;  %vm7098_vm1 = vcmp.eq.f32.partialorder %v7093_v12, 0.0 }
0x10cc   :  { %v15673_v52 = vpop.permute.xlu1 %7177  ;;  %v7174_v25 = vpop.permute.xlu0 %7173 }
0x10d0   :  { %v10739_v21 = vpop.eup %10738  ;;  %v15675_v63 = vpop.permute.xlu1 %7961 }
0x10d1   :  { %v6959_v34 = vmul.f32 %v10739_v21, %v6957_v19 }
0x10d3   :  { %v10741_v46 = vpop.eup %10740  ;;  %v6961_v14 = vsel %vm6960_vm14, %v6957_v19, %v6959_v34  ;;  %v10975_v19 = vld [vmem:[%s16617_s26 + $0x48] sm:$0xff]  ;;  %v15685_v34 = vpop.permute.xlu0 %7959 }
0x10d4   :  { %v6964_v26 = vsel %vm6962_vm15, %v6963_v17, %v6961_v14  ;;  %v7095_v49 = vmul.f32 %v10741_v46, %v7093_v12  ;;  %v7650_v2 = vpop.permute.xlu1 %7649  ;;  %v15682_v40 = vsub.f32 %v10975_v19, %v15544_v10 }
0x10d5   :  { %v6965_v38 = vmax.f32 %v6964_v26, 1e-12  ;;  %v7675_v8 = vsel %vm338_vm2, %v7650_v2, 0.0 }
0x10d6   :  { %v7097_v15 = vsel %vm7096_vm0, %v7093_v12, %v7095_v49  ;;  %7676 = vadd.xlane.f32.xlu1 %v7675_v8  ;;  %v10743_v12 = vpop.eup %10742  ;;  %v7485_v46 = vmul.f32 %v15682_v40, %v15682_v40 }
0x10d7   :  { %10744 = vrcp.f32 %v6965_v38  ;;  %v7100_v31 = vsel %vm7098_vm1, %v7099_v42, %v7097_v15  ;;  %v7012_v26 = vmul.f32 %v10743_v12, %v15319_v5  ;;  %v7005_v49 = vmul.f32 %v10743_v12, %v15217_v27 }
0x10d8   :  { %v7101_v55 = vmax.f32 %v7100_v31, 1e-12  ;;  %v7652_v61 = vpop.permute.xlu1 %7651  ;;  %v15694_v38 = vsub.f32 %v15183_v57, %v15516_v0  ;;  %v7006_v42 = vmul.f32 %v10743_v12, %v15219_v37  ;;  %v7007_v2 = vmul.f32 %v10743_v12, %v15229_v59  ;;  %v10976_v37 = vld [vmem:[%s16617_s26 + $0x10] sm:$0xff] }
0x10d9   :  { %v7678_v21 = vsel %vm338_vm2, %v7652_v61, 0.0  ;;  %v7008_v15 = vmul.f32 %v10743_v12, %v15243_v56  ;;  %v7495_v61 = vsel %vm338_vm2, %v7485_v46, 0.0  ;;  %v7009_v5 = vmul.f32 %v10743_v12, %v15263_v20 }
0x10da   :  { %10746 = vrcp.f32 %v7101_v55  ;;  %7679 = vadd.xlane.f32.xlu1 %v7678_v21  ;;  %v7010_v19 = vmul.f32 %v10743_v12, %v15282_v9  ;;  %v7011_v27 = vmul.f32 %v10743_v12, %v15301_v58  ;;  %v15709_v59 = vsub.f32 %v10976_v37, %v15520_v18 }
0x10dc   :  { %v7654_v17 = vpop.permute.xlu1 %7653 }
0x10dd   :  { %v7681_v14 = vsel %vm338_vm2, %v7654_v17, 0.0 }
0x10de   :  { %7682 = vadd.xlane.f32.xlu1 %v7681_v14 }
0x10e0   :  { %v7656_v31 = vpop.permute.xlu1 %7655 }
0x10e1   :  { %v10745_v8 = vpop.eup %10744  ;;  %v7660_v55 = vpop.permute.xlu0 %7659  ;;  %v7684_v21 = vsel %vm338_vm2, %v7656_v31, 0.0 }
0x10e2   :  { %v6974_v57 = vmul.f32 %v10745_v8, %v15657_v6  ;;  %v6967_v56 = vmul.f32 %v10745_v8, %v15532_v53  ;;  %7685 = vadd.xlane.f32.xlu1 %v7684_v21  ;;  %v6968_v20 = vmul.f32 %v10745_v8, %v15534_v47  ;;  %v6969_v9 = vmul.f32 %v10745_v8, %v15556_v50 }
0x10e3   :  { %v6970_v58 = vmul.f32 %v10745_v8, %v15588_v41  ;;  %v6971_v6 = vmul.f32 %v10745_v8, %v15609_v60  ;;  %v6972_v46 = vmul.f32 %v10745_v8, %v15628_v35  ;;  %v6973_v14 = vmul.f32 %v10745_v8, %v15645_v45 }
0x10e4   :  { %v10747_v12 = vpop.eup %10746  ;;  %v7020_v17 = vsub.f32 %v6974_v57, %v7012_v26  ;;  %v7013_v31 = vsub.f32 %v6967_v56, %v7005_v49  ;;  %v7658_v41 = vpop.permute.xlu1 %7657  ;;  %v7690_v45 = vsel %vm338_vm2, %v7660_v55, 0.0  ;;  %v7014_v49 = vsub.f32 %v6968_v20, %v7006_v42 }
0x10e5   :  { %v7104_v37 = vmul.f32 %v10747_v12, %v15542_v4  ;;  %v7105_v53 = vmul.f32 %v10747_v12, %v15570_v11  ;;  %v7103_v21 = vmul.f32 %v10747_v12, %v15554_v39  ;;  %v15722_v47 = vmul.f32 %v10747_v12, %v15603_v36  ;;  %v15724_v50 = vpop.permute.xlu0 %7179 }
0x10e6   :  { %v7687_v60 = vsel %vm338_vm2, %v7658_v41, 0.0  ;;  %v15728_v26 = vmul.f32 %v10747_v12, %v15625_v3  ;;  %v15731_v35 = vmul.f32 %v10747_v12, %v15638_v29  ;;  %v7109_v4 = vmul.f32 %v10747_v12, %v15652_v16  ;;  %7691 = vadd.xlane.f32.xlu1 %v7690_v45 }
0x10e7   :  { %v15735_v11 = vsub.f32 %v7104_v37, %v15670_v13  ;;  %v15738_v39 = vsub.f32 %v7105_v53, %v15673_v52  ;;  %v15740_v36 = vsub.f32 %v7103_v21, %v7174_v25  ;;  %7688 = vadd.xlane.f32.xlu0 %v7687_v60  ;;  %v7110_v3 = vmul.f32 %v10747_v12, %v15664_v62 }
0x10e8   :  { %v7015_v8 = vsub.f32 %v6969_v9, %v7007_v2  ;;  %v7016_v29 = vsub.f32 %v6970_v58, %v7008_v15  ;;  %v6577_v16 = vmul.f32 %v15694_v38, %v15694_v38  ;;  %v7017_v13 = vsub.f32 %v6971_v6, %v7009_v5  ;;  %v10977_v58 = vld [vmem:[%s16617_s26 + $0x50] sm:$0xff] }
0x10e9   :  { %v15744_v57 = vpop.permute.xlu0 %7181  ;;  %v7018_v56 = vsub.f32 %v6972_v46, %v7010_v19  ;;  %v7019_v52 = vsub.f32 %v6973_v14, %v7011_v27  ;;  %v7021_v25 = vmul.f32 %v7013_v31, %v7013_v31  ;;  %v7022_v37 = vmul.f32 %v7014_v49, %v7014_v49 }
0x10ea   :  { %v7023_v55 = vmul.f32 %v7015_v8, %v7015_v8  ;;  %v6697_v53 = vmul.f32 %v15709_v59, %v15709_v59  ;;  %v7024_v42 = vmul.f32 %v7016_v29, %v7016_v29  ;;  %v6589_v20 = vsel %vm338_vm2, %v6577_v16, 0.0 }
0x10eb   :  { %7496 = vadd.xlane.f32.xlu0 %v7495_v61  ;;  %v7030_v2 = vsel %vm7029_vm3, %v7021_v25, 0.0  ;;  %v7031_v15 = vsel %vm7029_vm3, %v7022_v37, 0.0  ;;  %v15757_v5 = vsub.f32 %v15402_v30, %v15558_v1  ;;  %v7025_v19 = vmul.f32 %v7017_v13, %v7017_v13 }
0x10ec   :  { %v7032_v61 = vadd.f32 %v7031_v15, %v7030_v2  ;;  %v7033_v27 = vsel %vm7029_vm3, %v7023_v55, 0.0  ;;  %v6709_v9 = vsel %vm338_vm2, %v6697_v53, 0.0  ;;  %v15765_v6 = vsub.f32 %v10977_v58, %v15544_v10 }
0x10ed   :  { %v15750_v62 = vpop.permute.xlu0 %7183  ;;  %17339 = vst [vmem:[#allocation95_spill] sm:$0xff] %v15757_v5  ;;  %v7026_v14 = vmul.f32 %v7018_v56, %v7018_v56  ;;  %v7035_v31 = vsel %vm7029_vm3, %v7024_v42, 0.0  ;;  %v7366_v41 = vmul.f32 %v15757_v5, %v15757_v5  ;;  %v7027_v45 = vmul.f32 %v7019_v52, %v7019_v52 }
0x10ee   :  { %17340 = vst [vmem:[#allocation96_spill] sm:$0xff] %v15765_v6  ;;  %v7034_v12 = vadd.f32 %v7033_v27, %v7032_v61  ;;  %v7037_v49 = vsel %vm7029_vm3, %v7025_v19, 0.0  ;;  %v7486_v8 = vmul.f32 %v15765_v6, %v15765_v6  ;;  %v7028_v13 = vmul.f32 %v7020_v17, %v7020_v17 }
0x10ef   :  { %6590 = vadd.xlane.f32.xlu0 %v6589_v20  ;;  %v7039_v56 = vsel %vm7029_vm3, %v7026_v14, 0.0  ;;  %v15781_v37 = vsub.f32 %v15189_v22, %v15516_v0  ;;  %v7950_v52 = vmul.f32 %v15390_v33, %v15356_v28  ;;  %v7041_v53 = vsel %vm7029_vm3, %v7027_v45, 0.0  ;;  %v10978_v28 = vld [vmem:[%s16617_s26 + $0x58] sm:$0xff]  ;;  %v10980_v45 = vld [vmem:[%s16617_s26 + $0x60] sm:$0xff] }
0x10f0   :  { %v7036_v60 = vadd.f32 %v7035_v31, %v7034_v12  ;;  %v7498_v42 = vsel %vm338_vm2, %v7486_v8, 0.0  ;;  %v15793_v22 = vsub.f32 %v15408_v43, %v15558_v1  ;;  %v15801_v33 = vsub.f32 %v10978_v28, %v15544_v10  ;;  %v10979_v12 = vld [vmem:[%s16617_s26 + $0x20] sm:$0xff] }
0x10f1   :  { %v7186_v46 = vpop.permute.xlu0 %7185  ;;  %v6578_v2 = vmul.f32 %v15781_v37, %v15781_v37 }
0x10f2   :  { %v15768_v21 = vsub.f32 %v7109_v4, %v7186_v46  ;;  %v7038_v29 = vadd.f32 %v7037_v49, %v7036_v60  ;;  %v7378_v4 = vsel %vm338_vm2, %v7366_v41, 0.0  ;;  %17341 = vst [vmem:[#allocation97_spill] sm:$0xff] %v15793_v22  ;;  %17343 = vst [vmem:[#allocation98_spill] sm:$0xff] %v15801_v33  ;;  %v7367_v61 = vmul.f32 %v15793_v22, %v15793_v22 }
0x10f3   :  { %6710 = vadd.xlane.f32.xlu0 %v6709_v9  ;;  %v6592_v20 = vsel %vm338_vm2, %v6578_v2, 0.0  ;;  %v7487_v19 = vmul.f32 %v15801_v33, %v15801_v33  ;;  %v15811_v9 = vsub.f32 %v15195_v51, %v15516_v0  ;;  %v15818_v46 = vsub.f32 %v10979_v12, %v15520_v18  ;;  %v15884_v12 = vpop.permute.xlu1 %7963 }
0x10f4   :  { %v7040_v55 = vadd.f32 %v7039_v56, %v7038_v29  ;;  %v7381_v27 = vsel %vm338_vm2, %v7367_v61, 0.0  ;;  %v15827_v41 = vsub.f32 %v15414_v48, %v15558_v1  ;;  %v15834_v49 = vsub.f32 %v10980_v45, %v15544_v10  ;;  %v10981_v56 = vld [vmem:[%s16617_s26 + $0x18] sm:$0xff] }
0x10f5   :  { %v7188_v16 = vpop.permute.xlu0 %7187  ;;  %v7501_v58 = vsel %vm338_vm2, %v7487_v19, 0.0  ;;  %v6579_v14 = vmul.f32 %v15811_v9, %v15811_v9  ;;  %v6699_v31 = vmul.f32 %v15818_v46, %v15818_v46  ;;  %v15876_v19 = vsub.f32 %v15427_v23, %v15558_v1 }
0x10f6   :  { %v15776_v25 = vsub.f32 %v7110_v3, %v7188_v16  ;;  %v7042_v17 = vadd.f32 %v7041_v53, %v7040_v55  ;;  %v7043_v3 = vsel %vm7029_vm3, %v7028_v13, 0.0  ;;  %17344 = vst [vmem:[#allocation99_spill] sm:$0xff] %v15827_v41  ;;  %17345 = vst [vmem:[#allocation100_spill] sm:$0xff] %v15834_v49  ;;  %v7368_v8 = vmul.f32 %v15827_v41, %v15827_v41 }
0x10f7   :  { %7379 = vadd.xlane.f32.xlu0 %v7378_v4  ;;  %7973 = vrot.lane.b32.xlu1 %v7950_v52, %s11006_s4  ;;  %v6595_v51 = vsel %vm338_vm2, %v6579_v14, 0.0  ;;  %v6715_v60 = vsel %vm338_vm2, %v6699_v31, 0.0  ;;  %v7488_v29 = vmul.f32 %v15834_v49, %v15834_v49  ;;  %v15842_v16 = vsub.f32 %v15201_v24, %v15516_v0  ;;  %v10982_v52 = vld [vmem:[%s16617_s26 + $0x28] sm:$0xff]  ;;  %17347 = vst [vmem:[#allocation11_spill] sm:$0xff] %v15876_v19 }
0x10f8   :  { %v15795_v15 = vadd.f32 %v7043_v3, %v7042_v17  ;;  %v7384_v13 = vsel %vm338_vm2, %v7368_v8, 0.0  ;;  %v15849_v4 = vsub.f32 %v10981_v56, %v15520_v18  ;;  %v15856_v53 = vsub.f32 %v10982_v52, %v15520_v18  ;;  %v10983_v17 = vld [vmem:[%s16617_s26 + $0x68] sm:$0xff]  ;;  %v10985_v8 = vld [vmem:[%s16617_s26 + $0x70] sm:$0xff]  ;;  %v15908_v56 = vpop.permute.xlu1 %7965 }
0x10f9   :  { %v7504_v55 = vsel %vm338_vm2, %v7488_v29, 0.0  ;;  %v6580_v24 = vmul.f32 %v15842_v16, %v15842_v16  ;;  %v15866_v3 = vsub.f32 %v10983_v17, %v15544_v10  ;;  %v15889_v31 = vsub.f32 %v15207_v44, %v15516_v0 }
0x10fa   :  { %17342 = vst [vmem:[#allocation12_spill] sm:$0xff] %v15795_v15  ;;  %v6700_v2 = vmul.f32 %v15856_v53, %v15856_v53  ;;  %v15900_v29 = vsub.f32 %v10985_v8, %v15544_v10  ;;  %v17352_v15 = vld [vmem:[#allocation61_spill] sm:$0xff] }
0x10fb   :  { %7499 = vadd.xlane.f32.xlu0 %v7498_v42  ;;  %v6698_v42 = vmul.f32 %v15849_v4, %v15849_v4  ;;  %17346 = vst [vmem:[#allocation101_spill] sm:$0xff] %v15866_v3  ;;  %v6598_v28 = vsel %vm338_vm2, %v6580_v24, 0.0  ;;  %v7489_v61 = vmul.f32 %v15866_v3, %v15866_v3  ;;  %v6581_v44 = vmul.f32 %v15889_v31, %v15889_v31 }
0x10fc   :  { %v6718_v14 = vsel %vm338_vm2, %v6700_v2, 0.0  ;;  %17348 = vst [vmem:[#allocation102_spill] sm:$0xff] %v15900_v29  ;;  %v7490_v24 = vmul.f32 %v15900_v29, %v15900_v29  ;;  %v17354_v29 = vld [vmem:[#allocation63_spill] sm:$0xff] }
0x10fd   :  { %v6601_v2 = vsel %vm338_vm2, %v6581_v44, 0.0 }
0x10ff   :  { %6593 = vadd.xlane.f32.xlu0 %v6592_v20  ;;  %v6712_v20 = vsel %vm338_vm2, %v6698_v42, 0.0  ;;  %v10986_v42 = vld [vmem:[%s16617_s26 + $0x38] sm:$0xff] }
0x1100   :  { %v15918_v17 = vsub.f32 %v10986_v42, %v15520_v18 }
0x1103   :  { %7382 = vadd.xlane.f32.xlu0 %v7381_v27  ;;  %v10984_v27 = vld [vmem:[%s16617_s26 + $0x30] sm:$0xff] }
0x1107   :  { %7502 = vadd.xlane.f32.xlu0 %v7501_v58  ;;  %v15882_v58 = vsub.f32 %v10984_v27, %v15520_v18  ;;  %v6702_v27 = vmul.f32 %v15918_v17, %v15918_v17 }
0x1109   :  { %v6701_v45 = vmul.f32 %v15882_v58, %v15882_v58  ;;  %v6724_v8 = vsel %vm338_vm2, %v6702_v27, 0.0 }
0x110b   :  { %6596 = vadd.xlane.f32.xlu0 %v6595_v51  ;;  %v7507_v51 = vsel %vm338_vm2, %v7489_v61, 0.0  ;;  %v6721_v52 = vsel %vm338_vm2, %v6701_v45, 0.0 }
0x110f   :  { %6716 = vadd.xlane.f32.xlu0 %v6715_v60  ;;  %v7369_v60 = vmul.f32 %v15876_v19, %v15876_v19 }
0x1113   :  { %7385 = vadd.xlane.f32.xlu0 %v7384_v13  ;;  %v15906_v13 = vsub.f32 %v15442_v7, %v15558_v1 }
0x1115   :  { %17349 = vst [vmem:[#allocation103_spill] sm:$0xff] %v15906_v13  ;;  %v7370_v61 = vmul.f32 %v15906_v13, %v15906_v13 }
0x1117   :  { %7505 = vadd.xlane.f32.xlu0 %v7504_v55  ;;  %v7387_v55 = vsel %vm338_vm2, %v7369_v60, 0.0  ;;  %v15936_v60 = vpop.permute.xlu1 %7967  ;;  %v7390_v45 = vsel %vm338_vm2, %v7370_v61, 0.0 }
0x111b   :  { %6599 = vadd.xlane.f32.xlu0 %v6598_v28  ;;  %6713 = vadd.xlane.f32.xlu1 %v6712_v20  ;;  %v15923_v28 = vsub.f32 %v15213_v54, %v15516_v0  ;;  %v7510_v20 = vsel %vm338_vm2, %v7490_v24, 0.0 }
0x111d   :  { %v6582_v54 = vmul.f32 %v15923_v28, %v15923_v28 }
0x111f   :  { %6719 = vadd.xlane.f32.xlu0 %v6718_v14  ;;  %7508 = vadd.xlane.f32.xlu1 %v7507_v51  ;;  %v10987_v14 = vld [vmem:[%s16617_s26 + $0x78] sm:$0xff]  ;;  %v6604_v24 = vsel %vm338_vm2, %v6582_v54, 0.0  ;;  %v7328_v54 = vmul.f32 %v15544_v10, %v15544_v10 }
0x1120   :  { %v15934_v51 = vsub.f32 %v10987_v14, %v15544_v10 }
0x1122   :  { %17350 = vst [vmem:[#allocation104_spill] sm:$0xff] %v15934_v51  ;;  %v7491_v44 = vmul.f32 %v15934_v51, %v15934_v51 }
0x1123   :  { %7388 = vadd.xlane.f32.xlu0 %v7387_v55  ;;  %6722 = vadd.xlane.f32.xlu1 %v6721_v52  ;;  %v15946_v55 = vsub.f32 %v15431_v32, %v15558_v1  ;;  %v15948_v52 = vpop.permute.xlu1 %7969 }
0x1124   :  { %v7513_v42 = vsel %vm338_vm2, %v7491_v44, 0.0 }
0x1125   :  { %17351 = vst [vmem:[#allocation105_spill] sm:$0xff] %v15946_v55 }
0x1127   :  { %6602 = vadd.xlane.f32.xlu0 %v6601_v2  ;;  %7511 = vadd.xlane.f32.xlu1 %v7510_v20  ;;  %v7371_v2 = vmul.f32 %v15946_v55, %v15946_v55  ;;  %v6538_v20 = vmul.f32 %v15520_v18, %v15520_v18  ;;  %v15962_v44 = vpop.permute.xlu1 %7971  ;;  %v17353_v18 = vld [vmem:[#allocation62_spill] sm:$0xff] }
0x1128   :  { %v7764_v10 = vmul.f32 %v17353_v18, %v17353_v18 }
0x1129   :  { %v7393_v27 = vsel %vm338_vm2, %v7371_v2, 0.0  ;;  %v6539_v14 = vsel %vm338_vm2, %v6538_v20, 0.0  ;;  %v7314_v2 = vmul.f32 %v15558_v1, %v15558_v1  ;;  %v7765_v1 = vmul.f32 %v17354_v29, %v17354_v29 }
0x112b   :  { %7391 = vadd.xlane.f32.xlu0 %v7390_v45  ;;  %6725 = vadd.xlane.f32.xlu1 %v6724_v8  ;;  %v6524_v45 = vmul.f32 %v15516_v0, %v15516_v0  ;;  %v7763_v0 = vmul.f32 %v17352_v15, %v17352_v15 }
0x112f   :  { %v6585_v61 = vpop.xlane.xlu0 %6584  ;;  %6605 = vadd.xlane.f32.xlu0 %v6604_v24  ;;  %7514 = vadd.xlane.f32.xlu1 %v7513_v42  ;;  %v6525_v24 = vsel %vm338_vm2, %v6524_v45, 0.0  ;;  %v7329_v42 = vsel %vm338_vm2, %v7328_v54, 0.0  ;;  %v7315_v45 = vsel %vm338_vm2, %v7314_v2, 0.0  ;;  %v7771_v54 = vadd.f32 %v7764_v10, %v7763_v0 }
0x1130   :  { %10748 = vrsqrt.f32 %v6585_v61  ;;  %vm6609_vm4 = vcmp.eq.f32.partialorder %v6585_v61, inf  ;;  %vm6611_vm5 = vcmp.eq.f32.partialorder %v6585_v61, 0.0 }
0x1131   :  { %v7772_v2 = vadd.f32 %v7771_v54, %v7765_v1 }
0x1133   :  { %v6705_v8 = vpop.xlane.xlu0 %6704  ;;  %7394 = vadd.xlane.f32.xlu0 %v7393_v27  ;;  %6540 = vadd.xlane.f32.xlu1 %v6539_v14 }
0x1134   :  { %10750 = vrsqrt.f32 %v6705_v8  ;;  %vm6729_vm6 = vcmp.eq.f32.partialorder %v6705_v8, inf  ;;  %v6732_v13 = vand.u32 2147483648, %v6705_v8  ;;  %vm6731_vm7 = vcmp.eq.f32.partialorder %v6705_v8, 0.0 }
0x1137   :  { %v6708_v20 = vpop.xlane.xlu0 %6707  ;;  %6526 = vadd.xlane.f32.xlu0 %v6525_v24  ;;  %v6588_v27 = vpop.xlane.xlu1 %6587  ;;  %7330 = vadd.xlane.f32.xlu1 %v7329_v42  ;;  %v6612_v24 = vand.u32 2147483648, %v6585_v61 }
0x1138   :  { %10752 = vrsqrt.f32 %v6708_v20  ;;  %vm6736_vm8 = vcmp.eq.f32.partialorder %v6708_v20, inf  ;;  %v6739_v6 = vand.u32 2147483648, %v6708_v20  ;;  %vm6738_vm9 = vcmp.eq.f32.partialorder %v6708_v20, 0.0 }
0x1139   :  { %10754 = vrsqrt.f32 %v6588_v27  ;;  %vm6616_vm10 = vcmp.eq.f32.partialorder %v6588_v27, inf  ;;  %v6619_v5 = vand.u32 2147483648, %v6588_v27  ;;  %vm6618_vm12 = vcmp.eq.f32.partialorder %v6588_v27, 0.0 }
0x113a   :  { %v10749_v14 = vpop.eup %10748 }
0x113b   :  { %v6608_v51 = vmul.f32 %v10749_v14, %v6585_v61  ;;  %7316 = vadd.xlane.f32.xlu0 %v7315_v45  ;;  %v7494_v3 = vpop.xlane.xlu1 %7493  ;;  %v17355_v14 = vld [vmem:[#allocation64_spill] sm:$0xff] }
0x113c   :  { %10756 = vrsqrt.f32 %v7494_v3  ;;  %v7766_v0 = vmul.f32 %v17355_v14, %v17355_v14  ;;  %vm7518_vm13 = vcmp.eq.f32.partialorder %v7494_v3, inf  ;;  %vm7520_vm14 = vcmp.eq.f32.partialorder %v7494_v3, 0.0 }
0x113d   :  { %v6610_v55 = vsel %vm6609_vm4, %v6585_v61, %v6608_v51 }
0x113e   :  { %v10751_v49 = vpop.eup %10750  ;;  %v6613_v33 = vsel %vm6611_vm5, %v6612_v24, %v6610_v55  ;;  %v7773_v24 = vadd.f32 %v7772_v2, %v7766_v0 }
0x113f   :  { %v6663_v42 = vmax.f32 %v6613_v33, 1e-12  ;;  %v6728_v19 = vmul.f32 %v10751_v49, %v6705_v8  ;;  %v7374_v10 = vpop.xlane.xlu1 %7373  ;;  %v17356_v33 = vld [vmem:[#allocation8_spill] sm:$0xff] }
0x1140   :  { %10758 = vrsqrt.f32 %v7374_v10  ;;  %v7767_v49 = vmul.f32 %v17356_v33, %v17356_v33  ;;  %vm7398_vm15 = vcmp.eq.f32.partialorder %v7374_v10, inf  ;;  %vm7400_vm0 = vcmp.eq.f32.partialorder %v7374_v10, 0.0 }
0x1141   :  { %v6730_v45 = vsel %vm6729_vm6, %v6705_v8, %v6728_v19  ;;  %10760 = vrcp.f32 %v6663_v42  ;;  %v7521_v42 = vand.u32 2147483648, %v7494_v3 }
0x1142   :  { %v10753_v41 = vpop.eup %10752  ;;  %v6733_v22 = vsel %vm6731_vm7, %v6732_v13, %v6730_v45  ;;  %v7774_v0 = vadd.f32 %v7773_v24, %v7767_v49  ;;  %v17358_v49 = vld [vmem:[#allocation66_spill] sm:$0xff] }
0x1143   :  { %v10755_v51 = vpop.eup %10754  ;;  %v6783_v61 = vmax.f32 %v6733_v22, 1e-12  ;;  %v6735_v55 = vmul.f32 %v10753_v41, %v6708_v20  ;;  %v7206_v22 = vmul.f32 %v15735_v11, %v15735_v11  ;;  %v7207_v11 = vmul.f32 %v15738_v39, %v15738_v39 }
0x1144   :  { %v6615_v1 = vmul.f32 %v10755_v51, %v6588_v27  ;;  %v17357_v51 = vld [vmem:[#allocation65_spill] sm:$0xff]  ;;  %v7201_v39 = vsub.f32 %v15728_v26, %v15744_v57  ;;  %v7202_v26 = vsub.f32 %v15731_v35, %v15750_v62  ;;  %v17362_v57 = vld [vmem:[#allocation75_spill] sm:$0xff] }
0x1145   :  { %10762 = vrcp.f32 %v6783_v61  ;;  %v6737_v54 = vsel %vm6736_vm8, %v6708_v20, %v6735_v55  ;;  %v7768_v20 = vmul.f32 %v17357_v51, %v17357_v51 }
0x1146   :  { %v6740_v19 = vsel %vm6738_vm9, %v6739_v6, %v6737_v54  ;;  %v6617_v8 = vsel %vm6616_vm10, %v6588_v27, %v6615_v1  ;;  %v10757_v13 = vpop.eup %10756  ;;  %v7769_v54 = vmul.f32 %v17358_v49, %v17358_v49 }
0x1147   :  { %v6784_v45 = vmax.f32 %v6740_v19, 1e-12  ;;  %v6620_v14 = vsel %vm6618_vm12, %v6619_v5, %v6617_v8  ;;  %v7517_v2 = vmul.f32 %v10757_v13, %v7494_v3  ;;  %v7200_v5 = vsub.f32 %v15722_v47, %v15724_v50 }
0x1148   :  { %v6664_v41 = vmax.f32 %v6620_v14, 1e-12  ;;  %7223 = vrot.lane.b32.xlu1 %v7206_v22, %s11005_s20  ;;  %v7775_v1 = vadd.f32 %v7774_v0, %v7768_v20  ;;  %v7401_v19 = vand.u32 2147483648, %v7374_v10  ;;  %v17360_v22 = vld [vmem:[#allocation73_spill] sm:$0xff]  ;;  %v17361_v0 = vld [vmem:[#allocation67_spill] sm:$0xff] }
0x1149   :  { %10764 = vrcp.f32 %v6784_v45  ;;  %v7519_v6 = vsel %vm7518_vm13, %v7494_v3, %v7517_v2  ;;  %v7205_v3 = vmul.f32 %v15740_v36, %v15740_v36  ;;  %v7208_v50 = vmul.f32 %v7200_v5, %v7200_v5  ;;  %v17359_v45 = vld [vmem:[#allocation72_spill] sm:$0xff] }
0x114a   :  { %10766 = vrcp.f32 %v6664_v41  ;;  %v7522_v27 = vsel %vm7520_vm14, %v7521_v42, %v7519_v6  ;;  %v10759_v61 = vpop.eup %10758  ;;  %v7776_v36 = vadd.f32 %v7775_v1, %v7769_v54  ;;  %v7770_v20 = vmul.f32 %v17361_v0, %v17361_v0 }
0x114b   :  { %v7572_v14 = vmax.f32 %v7522_v27, 1e-12  ;;  %v10761_v55 = vpop.eup %10760  ;;  %v7397_v24 = vmul.f32 %v10759_v61, %v7374_v10  ;;  %v7209_v27 = vmul.f32 %v7201_v39, %v7201_v39  ;;  %v7210_v54 = vmul.f32 %v7202_v26, %v7202_v26  ;;  %v17364_v39 = vld [vmem:[#allocation93_spill] sm:$0xff] }
0x114c   :  { %7225 = vrot.lane.b32.xlu1 %v7207_v11, %s11005_s20  ;;  %v6672_v42 = vmul.f32 %v10761_v55, %v17359_v45  ;;  %v17363_v11 = vld [vmem:[#allocation92_spill] sm:$0xff]  ;;  %v7777_v55 = vadd.f32 %v7776_v36, %v7770_v20 }
0x114d   :  { %10768 = vrcp.f32 %v7572_v14  ;;  %v7399_v8 = vsel %vm7398_vm15, %v7374_v10, %v7397_v24 }
0x114e   :  { %v7402_v13 = vsel %vm7400_vm0, %v7401_v19, %v7399_v8 }
0x114f   :  { %v10763_v47 = vpop.eup %10762  ;;  %v7452_v2 = vmax.f32 %v7402_v13, 1e-12 }
0x1150   :  { %v6792_v41 = vmul.f32 %v10763_v47, %v17360_v22  ;;  %7227 = vrot.lane.b32.xlu1 %v7208_v50, %s11005_s20  ;;  %v7778_v47 = vrot.slane %v7777_v55, 4  ;;  %v17365_v22 = vld [vmem:[#allocation94_spill] sm:$0xff] }
0x1151   :  { %7221 = vrot.lane.b32.xlu0 %v7205_v3, %s11005_s20  ;;  %10770 = vrcp.f32 %v7452_v2 }
0x1152   :  { %v6807_v6 = vsub.f32 %v6672_v42, %v6792_v41  ;;  %v7779_v42 = vadd.f32 %v7778_v47, %v7777_v55 }
0x1153   :  { %v10765_v5 = vpop.eup %10764  ;;  %v7671_v50 = vpop.xlane.xlu1 %7670 }
0x1154   :  { %v10767_v10 = vpop.eup %10766  ;;  %v6794_v61 = vmul.f32 %v10765_v5, %v17362_v57  ;;  %7229 = vrot.lane.b32.xlu1 %v7209_v27, %s11005_s20  ;;  %v6815_v24 = vmul.f32 %v6807_v6, %v6807_v6  ;;  %v7780_v20 = vrot.slane %v7779_v42, 2  ;;  %v16017_v5 = vmul.f32 0.03125, %v7671_v50  ;;  %v17369_v57 = vld [vmem:[#allocation7_spill] sm:$0xff] }
0x1155   :  { %v6674_v14 = vmul.f32 %v10767_v10, %v17363_v11  ;;  %v16025_v11 = vpop.xlane.xlu0 %7376 }
0x1156   :  { %v6823_v8 = vsel %vm338_vm2, %v6815_v24, 0.0  ;;  %17367 = vst [vmem:[#allocation107_spill] sm:$0xff] %v16017_v5  ;;  %v7781_v26 = vadd.f32 %v7780_v20, %v7779_v42  ;;  %10772 = vrsqrt.f32 %v16025_v11  ;;  %vm7405_vm1 = vcmp.eq.f32.partialorder %v16025_v11, inf }
0x1157   :  { %v6808_v1 = vsub.f32 %v6674_v14, %v6794_v61  ;;  %v10769_v3 = vpop.eup %10768  ;;  %v7674_v2 = vpop.xlane.xlu1 %7673  ;;  %v17370_v14 = vld [vmem:[#allocation68_spill] sm:$0xff]  ;;  %vm7407_vm4 = vcmp.eq.f32.partialorder %v16025_v11, 0.0 }
0x1158   :  { %7231 = vrot.lane.b32.xlu1 %v7210_v54, %s11005_s20  ;;  %v7581_v13 = vmul.f32 %v10769_v3, %v17364_v39  ;;  %v16015_v6 = vmul.f32 0.03125, %v7674_v2  ;;  %v16029_v55 = vsub.f32 %v17370_v14, %v16017_v5  ;;  %v7782_v3 = vrot.slane %v7781_v26, 1 }
0x1159   :  { %v6816_v19 = vmul.f32 %v6808_v1, %v6808_v1 }
0x115a   :  { %17366 = vst [vmem:[#allocation106_spill] sm:$0xff] %v16015_v6  ;;  %v16023_v61 = vsub.f32 %v17369_v57, %v16015_v6  ;;  %v16056_v42 = vadd.f32 %v7782_v3, %v7781_v26 }
0x115b   :  { %v6824_v35 = vsel %vm338_vm2, %v6816_v19, 0.0  ;;  %v10771_v45 = vpop.eup %10770  ;;  %v7726_v19 = vmul.f32 %v16015_v6, %v16015_v6 }
0x115c   :  { %v16009_v62 = vadd.f32 %v6824_v35, %v6823_v8  ;;  %v7461_v41 = vmul.f32 %v10771_v45, %v17365_v22  ;;  %v7852_v47 = vmul.f32 %v16023_v61, %v16023_v61  ;;  %v7725_v8 = vmul.f32 %v16017_v5, %v16017_v5 }
0x115d   :  { %10774 = vrsqrt.f32 %v16056_v42  ;;  %vm7786_vm5 = vcmp.eq.f32.partialorder %v16056_v42, inf  ;;  %vm7788_vm6 = vcmp.eq.f32.partialorder %v16056_v42, 0.0 }
0x115e   :  { %v16013_v36 = vsub.f32 %v7461_v41, %v7581_v13  ;;  %v7733_v22 = vadd.f32 %v7726_v19, %v7725_v8 }
0x1163   :  { %v7677_v10 = vpop.xlane.xlu1 %7676 }
0x1164   :  { %v16019_v27 = vmul.f32 0.03125, %v7677_v10 }
0x1166   :  { %17368 = vst [vmem:[#allocation48_spill] sm:$0xff] %v16019_v27  ;;  %v16033_v24 = vsub.f32 %v15402_v30, %v16019_v27  ;;  %v7851_v30 = vmul.f32 %v16029_v55, %v16029_v55  ;;  %v7727_v35 = vmul.f32 %v16019_v27, %v16019_v27 }
0x1167   :  { %v7680_v1 = vpop.xlane.xlu1 %7679 }
0x1168   :  { %v16035_v54 = vmul.f32 0.03125, %v7680_v1  ;;  %v7853_v13 = vmul.f32 %v16033_v24, %v16033_v24  ;;  %v7859_v10 = vsel %vm7072_vm11, %v7851_v30, 0.0  ;;  %v7734_v57 = vadd.f32 %v7733_v22, %v7727_v35  ;;  %v10773_v22 = vpop.eup %10772 }
0x116a   :  { %17371 = vst [vmem:[#allocation23_spill] sm:$0xff] %v16035_v54  ;;  %v16044_v50 = vsub.f32 %v15408_v43, %v16035_v54  ;;  %v7860_v43 = vsel %vm7072_vm11, %v7852_v47, 0.0  ;;  %v7728_v41 = vmul.f32 %v16035_v54, %v16035_v54  ;;  %v7862_v26 = vsel %vm7072_vm11, %v7853_v13, 0.0 }
0x116b   :  { %v7683_v39 = vpop.xlane.xlu1 %7682  ;;  %v7861_v47 = vadd.f32 %v7860_v43, %v7859_v10 }
0x116c   :  { %v16054_v45 = vmul.f32 0.03125, %v7683_v39  ;;  %v7854_v2 = vmul.f32 %v16044_v50, %v16044_v50  ;;  %v7735_v8 = vadd.f32 %v7734_v57, %v7728_v41 }
0x116d   :  { %v7863_v39 = vadd.f32 %v7862_v26, %v7861_v47 }
0x116e   :  { %17372 = vst [vmem:[#allocation28_spill] sm:$0xff] %v16054_v45  ;;  %v16065_v20 = vsub.f32 %v15414_v48, %v16054_v45  ;;  %v7729_v1 = vmul.f32 %v16054_v45, %v16054_v45  ;;  %v7864_v48 = vsel %vm7072_vm11, %v7854_v2, 0.0 }
0x116f   :  { %v7686_v14 = vpop.xlane.xlu1 %7685  ;;  %v7865_v2 = vadd.f32 %v7864_v48, %v7863_v39 }
0x1170   :  { %v7855_v3 = vmul.f32 %v16065_v20, %v16065_v20  ;;  %v16073_v19 = vmul.f32 0.03125, %v7686_v14  ;;  %v7736_v45 = vadd.f32 %v7735_v8, %v7729_v1  ;;  %v7404_v1 = vmul.f32 %v10773_v22, %v16025_v11  ;;  %v10775_v22 = vpop.eup %10774 }
0x1172   :  { %17373 = vst [vmem:[#allocation27_spill] sm:$0xff] %v16073_v19  ;;  %v7730_v30 = vmul.f32 %v16073_v19, %v16073_v19  ;;  %v16081_v35 = vsub.f32 %v15427_v23, %v16073_v19  ;;  %v7866_v14 = vsel %vm7072_vm11, %v7855_v3, 0.0 }
0x1173   :  { %v7692_v41 = vpop.xlane.xlu1 %7691  ;;  %v7867_v3 = vadd.f32 %v7866_v14, %v7865_v2 }
0x1174   :  { %v7689_v13 = vpop.xlane.xlu0 %7688  ;;  %v7856_v54 = vmul.f32 %v16081_v35, %v16081_v35  ;;  %v16088_v10 = vmul.f32 0.03125, %v7692_v41  ;;  %v7737_v57 = vadd.f32 %v7736_v45, %v7730_v30  ;;  %v7406_v41 = vsel %vm7405_vm1, %v16025_v11, %v7404_v1 }
0x1175   :  { %v16086_v43 = vmul.f32 0.03125, %v7689_v13  ;;  %v7789_v1 = vand.u32 2147483648, %v16056_v42 }
0x1176   :  { %v7868_v27 = vsel %vm7072_vm11, %v7856_v54, 0.0  ;;  %v16100_v8 = vsub.f32 %v15431_v32, %v16088_v10  ;;  %v7732_v54 = vmul.f32 %v16088_v10, %v16088_v10 }
0x1177   :  { %17374 = vst [vmem:[#allocation42_spill] sm:$0xff] %v16086_v43  ;;  %v7731_v23 = vmul.f32 %v16086_v43, %v16086_v43  ;;  %v16095_v26 = vsub.f32 %v15442_v7, %v16086_v43  ;;  %v7869_v30 = vadd.f32 %v7868_v27, %v7867_v3 }
0x1178   :  { %v7497_v47 = vpop.xlane.xlu0 %7496  ;;  %v7858_v7 = vmul.f32 %v16100_v8, %v16100_v8 }
0x1179   :  { %v7738_v48 = vadd.f32 %v7737_v57, %v7731_v23  ;;  %v7857_v45 = vmul.f32 %v16095_v26, %v16095_v26  ;;  %10776 = vrsqrt.f32 %v7497_v47  ;;  %v7408_v23 = vand.u32 2147483648, %v16025_v11 }
0x117a   :  { %v7872_v57 = vsel %vm7072_vm11, %v7858_v7, 0.0  ;;  %v7528_v11 = vand.u32 2147483648, %v7497_v47  ;;  %vm7527_vm7 = vcmp.eq.f32.partialorder %v7497_v47, 0.0 }
0x117b   :  { %v7870_v39 = vsel %vm7072_vm11, %v7857_v45, 0.0  ;;  %v7739_v13 = vadd.f32 %v7738_v48, %v7732_v54  ;;  %v7785_v45 = vmul.f32 %v10775_v22, %v16056_v42  ;;  %v7409_v48 = vsel %vm7407_vm4, %v7408_v23, %v7406_v41 }
0x117c   :  { %v7871_v32 = vadd.f32 %v7870_v39, %v7869_v30  ;;  %v6591_v14 = vpop.xlane.xlu0 %6590  ;;  %v7453_v19 = vmax.f32 %v7409_v48, 1e-12  ;;  %vm7525_vm11 = vcmp.eq.f32.partialorder %v7497_v47, inf }
0x117d   :  { %v7740_v2 = vrot.slane %v7739_v13, 4  ;;  %10778 = vrsqrt.f32 %v6591_v14  ;;  %vm6623_vm8 = vcmp.eq.f32.partialorder %v6591_v14, inf  ;;  %vm6625_vm9 = vcmp.eq.f32.partialorder %v6591_v14, 0.0 }
0x117e   :  { %v7873_v27 = vadd.f32 %v7872_v57, %v7871_v32 }
0x117f   :  { %v7741_v3 = vadd.f32 %v7740_v2, %v7739_v13  ;;  %v7787_v13 = vsel %vm7786_vm5, %v16056_v42, %v7785_v45 }
0x1180   :  { %v7874_v54 = vrot.slane %v7873_v27, 4  ;;  %v6711_v43 = vpop.xlane.xlu0 %6710  ;;  %v7790_v49 = vsel %vm7788_vm6, %v7789_v1, %v7787_v13 }
0x1181   :  { %v7742_v30 = vrot.slane %v7741_v3, 2  ;;  %10780 = vrsqrt.f32 %v6711_v43  ;;  %v7791_v42 = vmax.f32 %v7790_v49, 1e-12  ;;  %vm6743_vm10 = vcmp.eq.f32.partialorder %v6711_v43, inf }
0x1182   :  { %v7875_v7 = vadd.f32 %v7874_v54, %v7873_v27  ;;  %10782 = vrcp.f32 %v7453_v19  ;;  %v6746_v19 = vand.u32 2147483648, %v6711_v43  ;;  %vm6745_vm12 = vcmp.eq.f32.partialorder %v6711_v43, 0.0 }
0x1183   :  { %v10777_v39 = vpop.eup %10776  ;;  %v7743_v32 = vadd.f32 %v7742_v30, %v7741_v3 }
0x1184   :  { %v7524_v22 = vmul.f32 %v10777_v39, %v7497_v47  ;;  %v7876_v41 = vrot.slane %v7875_v7, 2  ;;  %v16119_v2 = vpop.xlane.xlu0 %7379  ;;  %v6626_v39 = vand.u32 2147483648, %v6591_v14 }
0x1185   :  { %v7744_v57 = vrot.slane %v7743_v32, 1  ;;  %10784 = vrsqrt.f32 %v16119_v2  ;;  %vm7412_vm4 = vcmp.eq.f32.partialorder %v16119_v2, inf  ;;  %vm7414_vm5 = vcmp.eq.f32.partialorder %v16119_v2, 0.0 }
0x1186   :  { %v7526_v23 = vsel %vm7525_vm11, %v7497_v47, %v7524_v22  ;;  %v7877_v6 = vadd.f32 %v7876_v41, %v7875_v7 }
0x1187   :  { %v10779_v5 = vpop.eup %10778  ;;  %v7745_v27 = vadd.f32 %v7744_v57, %v7743_v32  ;;  %v7529_v48 = vsel %vm7527_vm7, %v7528_v11, %v7526_v23 }
0x1188   :  { %v7573_v3 = vmax.f32 %v7529_v48, 1e-12  ;;  %v7878_v54 = vrot.slane %v7877_v6, 1  ;;  %v6622_v30 = vmul.f32 %v10779_v5, %v6591_v14  ;;  %v16124_v45 = vpop.xlane.xlu0 %7499 }
0x1189   :  { %10786 = vrsqrt.f32 %v7745_v27  ;;  %vm7748_vm13 = vcmp.eq.f32.partialorder %v7745_v27, inf  ;;  %vm7750_vm14 = vcmp.eq.f32.partialorder %v7745_v27, 0.0  ;;  %vm7532_vm1 = vcmp.eq.f32.partialorder %v16124_v45, inf }
0x118a   :  { %10788 = vrcp.f32 %v7573_v3  ;;  %v7879_v47 = vadd.f32 %v7878_v54, %v7877_v6  ;;  %v6624_v7 = vsel %vm6623_vm8, %v6591_v14, %v6622_v30  ;;  %vm7534_vm6 = vcmp.eq.f32.partialorder %v16124_v45, 0.0 }
0x118b   :  { %v10781_v22 = vpop.eup %10780  ;;  %v6627_v1 = vsel %vm6625_vm9, %v6626_v39, %v6624_v7  ;;  %10790 = vrsqrt.f32 %v16124_v45 }
0x118c   :  { %10792 = vrsqrt.f32 %v7879_v47  ;;  %v16127_v5 = vpop.xlane.xlu0 %6593  ;;  %v6665_v32 = vmax.f32 %v6627_v1, 1e-12  ;;  %v6742_v11 = vmul.f32 %v10781_v22, %v6711_v43  ;;  %v10783_v14 = vpop.eup %10782  ;;  %v17375_v22 = vld [vmem:[#allocation9_spill] sm:$0xff]  ;;  %vm7882_vm15 = vcmp.eq.f32.partialorder %v7879_v47, inf }
0x118d   :  { %10794 = vrcp.f32 %v7791_v42  ;;  %v7463_v42 = vmul.f32 %v10783_v14, %v17375_v22  ;;  %vm7884_vm0 = vcmp.eq.f32.partialorder %v7879_v47, 0.0  ;;  %vm6630_vm11 = vcmp.eq.f32.partialorder %v16127_v5, inf }
0x118e   :  { %v6744_v13 = vsel %vm6743_vm10, %v6711_v43, %v6742_v11  ;;  %10796 = vrsqrt.f32 %v16127_v5  ;;  %v7751_v43 = vand.u32 2147483648, %v7745_v27  ;;  %v7604_v11 = vmul.f32 %v16013_v36, %v16013_v36 }
0x118f   :  { %v6747_v41 = vsel %vm6745_vm12, %v6746_v19, %v6744_v13  ;;  %10798 = vrcp.f32 %v6665_v32  ;;  %v10785_v57 = vpop.eup %10784  ;;  %vm6632_vm7 = vcmp.eq.f32.partialorder %v16127_v5, 0.0 }
0x1190   :  { %v16130_v6 = vpop.xlane.xlu0 %7382  ;;  %v6785_v49 = vmax.f32 %v6747_v41, 1e-12  ;;  %v7885_v41 = vand.u32 2147483648, %v7879_v47 }
0x1191   :  { %10800 = vrsqrt.f32 %v16130_v6  ;;  %vm7419_vm8 = vcmp.eq.f32.partialorder %v16130_v6, inf  ;;  %vm7421_vm9 = vcmp.eq.f32.partialorder %v16130_v6, 0.0 }
0x1192   :  { %10802 = vrcp.f32 %v6785_v49 }
0x1193   :  { %v10787_v23 = vpop.eup %10786 }
0x1194   :  { %v10789_v48 = vpop.eup %10788  ;;  %v7747_v3 = vmul.f32 %v10787_v23, %v7745_v27  ;;  %v16133_v54 = vpop.xlane.xlu0 %7502 }
0x1195   :  { %v10791_v30 = vpop.eup %10790  ;;  %10804 = vrsqrt.f32 %v16133_v54  ;;  %v7583_v1 = vmul.f32 %v10789_v48, %v15682_v40  ;;  %vm7539_vm10 = vcmp.eq.f32.partialorder %v16133_v54, inf  ;;  %vm7541_vm12 = vcmp.eq.f32.partialorder %v16133_v54, 0.0 }
0x1196   :  { %v10793_v39 = vpop.eup %10792  ;;  %v7749_v7 = vsel %vm7748_vm13, %v7745_v27, %v7747_v3  ;;  %v7411_v27 = vmul.f32 %v10785_v57, %v16119_v2  ;;  %v7531_v14 = vmul.f32 %v10791_v30, %v16124_v45  ;;  %v7612_v57 = vsel %vm338_vm2, %v7604_v11, 0.0 }
0x1197   :  { %v7752_v19 = vsel %vm7750_vm14, %v7751_v43, %v7749_v7  ;;  %v7881_v32 = vmul.f32 %v10793_v39, %v7879_v47  ;;  %v7597_v23 = vsub.f32 %v7463_v42, %v7583_v1  ;;  %v16142_v51 = vpop.eup %10794  ;;  %v16152_v39 = vmul.f32 %v15768_v21, %v15768_v21 }
0x1198   :  { %v7753_v13 = vmax.f32 %v7752_v19, 1e-12  ;;  %v16140_v49 = vpop.xlane.xlu0 %6596  ;;  %v10797_v40 = vpop.eup %10796  ;;  %v7800_v43 = vmul.f32 %v16142_v51, %v17361_v0  ;;  %v7415_v30 = vand.u32 2147483648, %v16119_v2  ;;  %v7413_v0 = vsel %vm7412_vm4, %v16119_v2, %v7411_v27 }
0x1199   :  { %v7883_v3 = vsel %vm7882_vm15, %v7879_v47, %v7881_v32  ;;  %10806 = vrsqrt.f32 %v16140_v49  ;;  %v10799_v36 = vpop.eup %10798  ;;  %v7533_v21 = vsel %vm7532_vm1, %v16124_v45, %v7531_v14  ;;  %v7535_v1 = vand.u32 2147483648, %v16124_v45 }
0x119a   :  { %10808 = vrcp.f32 %v7753_v13  ;;  %v7886_v48 = vsel %vm7884_vm0, %v7885_v41, %v7883_v3  ;;  %v6629_v19 = vmul.f32 %v10797_v40, %v16127_v5  ;;  %v6676_v32 = vmul.f32 %v10799_v36, %v15694_v38 }
0x119b   :  { %v7887_v47 = vmax.f32 %v7886_v48, 1e-12  ;;  %v10801_v7 = vpop.eup %10800  ;;  %v7605_v13 = vmul.f32 %v7597_v23, %v7597_v23  ;;  %v7416_v27 = vsel %vm7414_vm5, %v7415_v30, %v7413_v0  ;;  %v6633_v14 = vand.u32 2147483648, %v16127_v5 }
0x119c   :  { %v16159_v22 = vpop.xlane.xlu0 %6716  ;;  %v10803_v42 = vpop.eup %10802  ;;  %v7418_v3 = vmul.f32 %v10801_v7, %v16130_v6  ;;  %v7536_v23 = vsel %vm7534_vm6, %v7535_v1, %v7533_v21  ;;  %v6631_v48 = vsel %vm6630_vm11, %v16127_v5, %v6629_v19  ;;  %v7422_v2 = vand.u32 2147483648, %v16130_v6 }
0x119d   :  { %10810 = vrcp.f32 %v7887_v47  ;;  %v6796_v11 = vmul.f32 %v10803_v42, %v15709_v59  ;;  %v7613_v59 = vsel %vm338_vm2, %v7605_v13, 0.0  ;;  %v7454_v30 = vmax.f32 %v7416_v27, 1e-12 }
0x119e   :  { %10812 = vrsqrt.f32 %v16159_v22  ;;  %v7420_v42 = vsel %vm7419_vm8, %v16130_v6, %v7418_v3  ;;  %v16187_v45 = vadd.f32 %v7613_v59, %v7612_v57  ;;  %v7574_v21 = vmax.f32 %v7536_v23, 1e-12 }
0x119f   :  { %v10805_v41 = vpop.eup %10804  ;;  %v6809_v38 = vsub.f32 %v6676_v32, %v6796_v11  ;;  %v6634_v13 = vsel %vm6632_vm7, %v6633_v14, %v6631_v48  ;;  %v7542_v57 = vand.u32 2147483648, %v16133_v54  ;;  %v7423_v3 = vsel %vm7421_vm9, %v7422_v2, %v7420_v42 }
0x11a0   :  { %v16174_v40 = vpop.xlane.xlu0 %7385  ;;  %v7538_v36 = vmul.f32 %v10805_v41, %v16133_v54  ;;  %v7974_v41 = vpop.permute.xlu1 %7973  ;;  %vm6637_vm13 = vcmp.eq.f32.partialorder %v16140_v49, inf  ;;  %v6666_v6 = vmax.f32 %v6634_v13, 1e-12  ;;  %v6640_v23 = vand.u32 2147483648, %v16140_v49 }
0x11a1   :  { %10814 = vrsqrt.f32 %v16174_v40  ;;  %v6817_v47 = vmul.f32 %v6809_v38, %v6809_v38  ;;  %vm6639_vm14 = vcmp.eq.f32.partialorder %v16140_v49, 0.0  ;;  %vm6757_vm15 = vcmp.eq.f32.partialorder %v16159_v22, inf }
0x11a2   :  { %v7540_v27 = vsel %vm7539_vm10, %v16133_v54, %v7538_v36  ;;  %v7455_v36 = vmax.f32 %v7423_v3, 1e-12  ;;  %vm6759_vm0 = vcmp.eq.f32.partialorder %v16159_v22, 0.0  ;;  %v6760_v54 = vand.u32 2147483648, %v16159_v22 }
0x11a3   :  { %v10807_v7 = vpop.eup %10806  ;;  %v6826_v32 = vsel %vm338_vm2, %v6817_v47, 0.0  ;;  %vm7426_vm1 = vcmp.eq.f32.partialorder %v16174_v40, inf  ;;  %vm7428_vm4 = vcmp.eq.f32.partialorder %v16174_v40, 0.0 }
0x11a4   :  { %v16189_v0 = vpop.eup %10808  ;;  %v6636_v1 = vmul.f32 %v10807_v7, %v16140_v49  ;;  %v16193_v19 = vpop.xlane.xlu0 %7505  ;;  %v16207_v38 = vadd.f32 %v6826_v32, %v16009_v62 }
0x11a5   :  { %v7762_v11 = vmul.f32 %v16189_v0, %v16088_v10  ;;  %10816 = vrsqrt.f32 %v16193_v19  ;;  %v16213_v10 = vmul.f32 %v15776_v25, %v15776_v25  ;;  %v7543_v25 = vsel %vm7541_vm12, %v7542_v57, %v7540_v27 }
0x11a6   :  { %10818 = vrcp.f32 %v7454_v30  ;;  %v6638_v14 = vsel %vm6637_vm13, %v16140_v49, %v6636_v1  ;;  %v7575_v49 = vmax.f32 %v7543_v25, 1e-12  ;;  %v7429_v27 = vand.u32 2147483648, %v16174_v40 }
0x11a7   :  { %v16209_v59 = vpop.eup %10810  ;;  %v16215_v5 = vsub.f32 %v7762_v11, %v7800_v43  ;;  %10820 = vrcp.f32 %v7574_v21  ;;  %v6641_v43 = vsel %vm6639_vm14, %v6640_v23, %v6638_v14  ;;  %vm7546_vm5 = vcmp.eq.f32.partialorder %v16193_v19, inf }
0x11a8   :  { %v16219_v48 = vpop.xlane.xlu0 %6599  ;;  %v7889_v62 = vmul.f32 %v16209_v59, %v16029_v55  ;;  %v10813_v2 = vpop.eup %10812  ;;  %v7890_v42 = vmul.f32 %v16209_v59, %v16023_v61  ;;  %v6667_v61 = vmax.f32 %v6641_v43, 1e-12  ;;  %vm7548_vm6 = vcmp.eq.f32.partialorder %v16193_v19, 0.0 }
0x11a9   :  { %10822 = vrsqrt.f32 %v16219_v48  ;;  %v6756_v47 = vmul.f32 %v10813_v2, %v16159_v22  ;;  %v16228_v7 = vpop.xlane.xlu1 %6713  ;;  %v7549_v14 = vand.u32 2147483648, %v16193_v19  ;;  %vm6644_vm11 = vcmp.eq.f32.partialorder %v16219_v48, inf }
0x11aa   :  { %v7983_v30 = vsub.f32 %v7889_v62, %v15685_v34  ;;  %10824 = vrsqrt.f32 %v16228_v7  ;;  %v7896_v34 = vmul.f32 %v16209_v59, %v16100_v8  ;;  %v7984_v57 = vsub.f32 %v7890_v42, %v15675_v63 }
0x11ab   :  { %v10815_v55 = vpop.eup %10814  ;;  %10826 = vrcp.f32 %v6666_v6  ;;  %v6758_v11 = vsel %vm6757_vm15, %v16159_v22, %v6756_v47  ;;  %vm6646_vm7 = vcmp.eq.f32.partialorder %v16219_v48, 0.0  ;;  %vm6750_vm8 = vcmp.eq.f32.partialorder %v16228_v7, inf }
0x11ac   :  { %v7425_v21 = vmul.f32 %v10815_v55, %v16174_v40  ;;  %v16238_v1 = vpop.xlane.xlu0 %6719  ;;  %v7991_v32 = vmul.f32 %v7983_v30, %v7983_v30  ;;  %v7990_v63 = vsub.f32 %v7896_v34, %v7974_v41  ;;  %v6761_v62 = vsel %vm6759_vm0, %v6760_v54, %v6758_v11 }
0x11ad   :  { %10828 = vrsqrt.f32 %v16238_v1  ;;  %v16246_v13 = vpop.xlane.xlu1 %7508  ;;  %v7992_v2 = vmul.f32 %v7984_v57, %v7984_v57  ;;  %v7891_v41 = vmul.f32 %v16209_v59, %v16033_v24  ;;  %v6647_v30 = vand.u32 2147483648, %v16219_v48 }
0x11ae   :  { %10830 = vrcp.f32 %v7455_v36  ;;  %8007 = vrot.lane.b32.xlu1 %v7991_v32, %s11005_s20  ;;  %v7427_v8 = vsel %vm7426_vm1, %v16174_v40, %v7425_v21  ;;  %v6787_v42 = vmax.f32 %v6761_v62, 1e-12  ;;  %vm6752_vm9 = vcmp.eq.f32.partialorder %v16228_v7, 0.0 }
0x11af   :  { %v10817_v3 = vpop.eup %10816  ;;  %10832 = vrsqrt.f32 %v16246_v13  ;;  %v7430_v22 = vsel %vm7428_vm4, %v7429_v27, %v7427_v8  ;;  %8009 = vrot.lane.b32.xlu0 %v7992_v2, %s11005_s20  ;;  %v7998_v40 = vmul.f32 %v7990_v63, %v7990_v63  ;;  %vm6764_vm10 = vcmp.eq.f32.partialorder %v16238_v1, inf }
0x11b0   :  { %10834 = vrcp.f32 %v7575_v49  ;;  %v16257_v6 = vpop.xlane.xlu0 %7388  ;;  %v16259_v23 = vpop.eup %10818  ;;  %v7545_v25 = vmul.f32 %v10817_v3, %v16193_v19  ;;  %v6753_v49 = vand.u32 2147483648, %v16228_v7  ;;  %v7456_v32 = vmax.f32 %v7430_v22, 1e-12 }
0x11b1   :  { %10836 = vrcp.f32 %v6667_v61  ;;  %v16263_v36 = vpop.eup %10820  ;;  %v16268_v43 = vpop.xlane.xlu1 %6722  ;;  %vm6766_vm12 = vcmp.eq.f32.partialorder %v16238_v1, 0.0  ;;  %v6767_v3 = vand.u32 2147483648, %v16238_v1  ;;  %vm7553_vm13 = vcmp.eq.f32.partialorder %v16246_v13, inf }
0x11b2   :  { %10838 = vrsqrt.f32 %v16257_v6  ;;  %7233 = vrot.lane.b32.xlu1 %v16152_v39, %s11005_s20  ;;  %v7985_v39 = vsub.f32 %v7891_v41, %v15884_v12  ;;  %v7547_v34 = vsel %vm7546_vm5, %v16193_v19, %v7545_v25  ;;  %vm7555_vm14 = vcmp.eq.f32.partialorder %v16246_v13, 0.0 }
0x11b3   :  { %v10823_v47 = vpop.eup %10822  ;;  %10840 = vrsqrt.f32 %v16268_v43  ;;  %v7550_v2 = vsel %vm7548_vm6, %v7549_v14, %v7547_v34  ;;  %v7556_v25 = vand.u32 2147483648, %v16246_v13  ;;  %v7892_v41 = vmul.f32 %v16209_v59, %v16044_v50 }
0x11b4   :  { %v6643_v55 = vmul.f32 %v10823_v47, %v16219_v48  ;;  %v16283_v24 = vpop.xlane.xlu0 %6602  ;;  %v10825_v54 = vpop.eup %10824  ;;  %v7993_v12 = vmul.f32 %v7985_v39, %v7985_v39  ;;  %vm7433_vm15 = vcmp.eq.f32.partialorder %v16257_v6, inf  ;;  %v7436_v14 = vand.u32 2147483648, %v16257_v6 }
0x11b5   :  { %10842 = vrsqrt.f32 %v16283_v24  ;;  %v16288_v21 = vpop.eup %10826  ;;  %v6749_v61 = vmul.f32 %v10825_v54, %v16228_v7  ;;  %v16294_v11 = vpop.xlane.xlu1 %7511  ;;  %vm6771_vm0 = vcmp.eq.f32.partialorder %v16268_v43, inf  ;;  %v7576_v54 = vmax.f32 %v7550_v2, 1e-12 }
0x11b6   :  { %7235 = vrot.lane.b32.xlu1 %v16213_v10, %s11005_s20  ;;  %10844 = vrsqrt.f32 %v16294_v11  ;;  %v6645_v8 = vsel %vm6644_vm11, %v16219_v48, %v6643_v55  ;;  %8011 = vrot.lane.b32.xlu0 %v7993_v12, %s11005_s20  ;;  %v7986_v55 = vsub.f32 %v7892_v41, %v15908_v56  ;;  %vm6773_vm1 = vcmp.eq.f32.partialorder %v16268_v43, 0.0 }
0x11b7   :  { %v10829_v57 = vpop.eup %10828  ;;  %10846 = vrcp.f32 %v6787_v42  ;;  %v6751_v22 = vsel %vm6750_vm8, %v16228_v7, %v6749_v61  ;;  %v6648_v50 = vsel %vm6646_vm7, %v6647_v30, %v6645_v8  ;;  %vm7435_vm4 = vcmp.eq.f32.partialorder %v16257_v6, 0.0 }
0x11b8   :  { %v16302_v27 = vpop.eup %10830  ;;  %v6763_v63 = vmul.f32 %v10829_v57, %v16238_v1  ;;  %v16310_v10 = vpop.xlane.xlu0 %7391  ;;  %v6754_v61 = vsel %vm6752_vm9, %v6753_v49, %v6751_v22  ;;  %vm6651_vm5 = vcmp.eq.f32.partialorder %v16283_v24, inf  ;;  %v7994_v56 = vmul.f32 %v7986_v55, %v7986_v55 }
0x11b9   :  { %v10833_v62 = vpop.eup %10832  ;;  %10848 = vrsqrt.f32 %v16310_v10  ;;  %v16338_v34 = vpop.xlane.xlu1 %6725  ;;  %v6668_v12 = vmax.f32 %v6648_v50, 1e-12  ;;  %vm6653_vm6 = vcmp.eq.f32.partialorder %v16283_v24, 0.0  ;;  %v7893_v2 = vmul.f32 %v16209_v59, %v16065_v20 }
0x11ba   :  { %v16318_v47 = vpop.eup %10834  ;;  %10850 = vrcp.f32 %v7456_v32  ;;  %v7552_v42 = vmul.f32 %v10833_v62, %v16246_v13  ;;  %8021 = vrot.lane.b32.xlu1 %v7998_v40, %s11005_s20  ;;  %v6765_v32 = vsel %vm6764_vm10, %v16238_v1, %v6763_v63  ;;  %v6774_v40 = vand.u32 2147483648, %v16268_v43  ;;  %8013 = vrot.lane.b32.xlu0 %v7994_v56, %s11005_s20 }
0x11bb   :  { %v16326_v19 = vpop.eup %10836  ;;  %10852 = vrsqrt.f32 %v16338_v34  ;;  %v6768_v7 = vsel %vm6766_vm12, %v6767_v3, %v6765_v32  ;;  %v6654_v62 = vand.u32 2147483648, %v16283_v24  ;;  %v6786_v41 = vmax.f32 %v6754_v61, 1e-12 }
0x11bc   :  { %v10839_v39 = vpop.eup %10838  ;;  %v16340_v48 = vpop.xlane.xlu0 %6605  ;;  %v7554_v57 = vsel %vm7553_vm13, %v16246_v13, %v7552_v42  ;;  %10854 = vrcp.f32 %v7576_v54  ;;  %vm7560_vm11 = vcmp.eq.f32.partialorder %v16294_v11, inf  ;;  %v7987_v3 = vsub.f32 %v7893_v2, %v15936_v60 }
0x11bd   :  { %v10841_v30 = vpop.eup %10840  ;;  %v7432_v49 = vmul.f32 %v10839_v39, %v16257_v6  ;;  %v7557_v1 = vsel %vm7555_vm14, %v7556_v25, %v7554_v57  ;;  %10856 = vrsqrt.f32 %v16340_v48  ;;  %v6788_v20 = vmax.f32 %v6768_v7, 1e-12  ;;  %v16374_v54 = vpop.xlane.xlu1 %7514 }
0x11be   :  { %v6770_v8 = vmul.f32 %v10841_v30, %v16268_v43  ;;  %10858 = vrcp.f32 %v6668_v12  ;;  %vm7562_vm7 = vcmp.eq.f32.partialorder %v16294_v11, 0.0  ;;  %v7995_v61 = vmul.f32 %v7987_v3, %v7987_v3 }
0x11bf   :  { %v10843_v63 = vpop.eup %10842  ;;  %v7434_v60 = vsel %vm7433_vm15, %v16257_v6, %v7432_v49  ;;  %10860 = vrcp.f32 %v6786_v41  ;;  %v7577_v12 = vmax.f32 %v7557_v1, 1e-12  ;;  %v7563_v57 = vand.u32 2147483648, %v16294_v11 }
0x11c0   :  { %v6772_v22 = vsel %vm6771_vm0, %v16268_v43, %v6770_v8  ;;  %v6650_v42 = vmul.f32 %v10843_v63, %v16283_v24  ;;  %v10845_v50 = vpop.eup %10844  ;;  %v16376_v13 = vpop.xlane.xlu0 %7394  ;;  %vm7440_vm8 = vcmp.eq.f32.partialorder %v16310_v10, inf  ;;  %vm7442_vm9 = vcmp.eq.f32.partialorder %v16310_v10, 0.0  ;;  %8015 = vrot.lane.b32.xlu0 %v7995_v61, %s11005_s20 }
0x11c1   :  { %v16368_v55 = vpop.eup %10846  ;;  %v6775_v32 = vsel %vm6773_vm1, %v6774_v40, %v6772_v22  ;;  %v7559_v30 = vmul.f32 %v10845_v50, %v16294_v11  ;;  %10862 = vrsqrt.f32 %v16374_v54  ;;  %v7437_v43 = vsel %vm7435_vm4, %v7436_v14, %v7434_v60  ;;  %v16406_v14 = vpop.xlane.xlu1 %6540 }
0x11c2   :  { %v6652_v39 = vsel %vm6651_vm5, %v16283_v24, %v6650_v42  ;;  %10864 = vrcp.f32 %v6788_v20  ;;  %v6789_v40 = vmax.f32 %v6775_v32, 1e-12  ;;  %vm6778_vm10 = vcmp.eq.f32.partialorder %v16338_v34, inf }
0x11c3   :  { %v10849_v25 = vpop.eup %10848  ;;  %v6655_v8 = vsel %vm6653_vm6, %v6654_v62, %v6652_v39  ;;  %v7561_v24 = vsel %vm7560_vm11, %v16294_v11, %v7559_v30  ;;  %v6781_v49 = vand.u32 2147483648, %v16338_v34  ;;  %v7894_v62 = vmul.f32 %v16209_v59, %v16081_v35 }
0x11c4   :  { %v16384_v56 = vpop.eup %10850  ;;  %v7439_v63 = vmul.f32 %v10849_v25, %v16310_v10  ;;  %10866 = vrsqrt.f32 %v16376_v13  ;;  %v6669_v2 = vmax.f32 %v6655_v8, 1e-12  ;;  %vm6780_vm12 = vcmp.eq.f32.partialorder %v16338_v34, 0.0  ;;  %v16408_v41 = vpop.xlane.xlu0 %6526 }
0x11c5   :  { %v10853_v7 = vpop.eup %10852  ;;  %10868 = vrcp.f32 %v7577_v12  ;;  %v7443_v42 = vand.u32 2147483648, %v16310_v10  ;;  %v7988_v35 = vsub.f32 %v7894_v62, %v15948_v52  ;;  %v7457_v1 = vmax.f32 %v7437_v43, 1e-12 }
0x11c6   :  { %v6777_v6 = vmul.f32 %v10853_v7, %v16338_v34  ;;  %v7441_v22 = vsel %vm7440_vm8, %v16310_v10, %v7439_v63  ;;  %10870 = vrsqrt.f32 %v16406_v14  ;;  %v16416_v50 = vpop.eup %10854  ;;  %v7564_v3 = vsel %vm7562_vm7, %v7563_v57, %v7561_v24 }
0x11c7   :  { %10872 = vrcp.f32 %v6789_v40  ;;  %v10857_v39 = vpop.eup %10856  ;;  %v7996_v60 = vmul.f32 %v7988_v35, %v7988_v35  ;;  %v7895_v32 = vmul.f32 %v16209_v59, %v16095_v26  ;;  %v7444_v30 = vsel %vm7442_vm9, %v7443_v42, %v7441_v22 }
0x11c8   :  { %v6779_v20 = vsel %vm6778_vm10, %v16338_v34, %v6777_v6  ;;  %10874 = vrsqrt.f32 %v16408_v41  ;;  %v16426_v52 = vpop.eup %10858  ;;  %v6657_v61 = vmul.f32 %v10857_v39, %v16340_v48  ;;  %v7578_v12 = vmax.f32 %v7564_v3, 1e-12 }
0x11c9   :  { %v6782_v25 = vsel %vm6780_vm12, %v6781_v49, %v6779_v20  ;;  %10876 = vrcp.f32 %v6669_v2  ;;  %vm6658_vm13 = vcmp.eq.f32.partialorder %v16340_v48, inf  ;;  %v6661_v34 = vand.u32 2147483648, %v16340_v48  ;;  %8017 = vrot.lane.b32.xlu0 %v7996_v60, %s11005_s20  ;;  %v10861_v59 = vpop.eup %10860 }
0x11ca   :  { %v6790_v11 = vmax.f32 %v6782_v25, 1e-12  ;;  %v7989_v26 = vsub.f32 %v7895_v32, %v15962_v44  ;;  %v6659_v57 = vsel %vm6658_vm13, %v16340_v48, %v6657_v61  ;;  %vm6660_vm14 = vcmp.eq.f32.partialorder %v16340_v48, 0.0 }
0x11cb   :  { %vm7567_vm15 = vcmp.eq.f32.partialorder %v16374_v54, inf  ;;  %v10863_v10 = vpop.eup %10862  ;;  %v7458_v8 = vmax.f32 %v7444_v30, 1e-12  ;;  %v6662_v63 = vsel %vm6660_vm14, %v6661_v34, %v6659_v57  ;;  %v7570_v43 = vand.u32 2147483648, %v16374_v54 }
0x11cc   :  { %10878 = vrcp.f32 %v6790_v11  ;;  %v7997_v40 = vmul.f32 %v7989_v26, %v7989_v26  ;;  %v10865_v7 = vpop.eup %10864  ;;  %v6670_v24 = vmax.f32 %v6662_v63, 1e-12  ;;  %v7566_v49 = vmul.f32 %v10863_v10, %v16374_v54 }
0x11cd   :  { %10880 = vrcp.f32 %v7457_v1  ;;  %vm7569_vm0 = vcmp.eq.f32.partialorder %v16374_v54, 0.0  ;;  %vm7447_vm1 = vcmp.eq.f32.partialorder %v16376_v13, inf  ;;  %vm7449_vm4 = vcmp.eq.f32.partialorder %v16376_v13, 0.0 }
0x11ce   :  { %v10867_v44 = vpop.eup %10866  ;;  %10882 = vrcp.f32 %v7578_v12  ;;  %8019 = vrot.lane.b32.xlu0 %v7997_v40, %s11005_s20  ;;  %v7568_v62 = vsel %vm7567_vm15, %v16374_v54, %v7566_v49  ;;  %v7450_v6 = vand.u32 2147483648, %v16376_v13  ;;  %vm6544_vm5 = vcmp.eq.f32.partialorder %v16406_v14, inf }
0x11cf   :  { %v16444_v48 = vpop.eup %10868  ;;  %10884 = vrcp.f32 %v6670_v24  ;;  %v7446_v2 = vmul.f32 %v10867_v44, %v16376_v13  ;;  %v7571_v42 = vsel %vm7569_vm0, %v7570_v43, %v7568_v62  ;;  %v6547_v35 = vand.u32 2147483648, %v16406_v14  ;;  %v17377_v62 = vld [vmem:[#allocation95_spill] sm:$0xff] }
0x11d0   :  { %v10871_v22 = vpop.eup %10870  ;;  %10886 = vrcp.f32 %v7458_v8  ;;  %v7579_v3 = vmax.f32 %v7571_v42, 1e-12  ;;  %vm6546_vm6 = vcmp.eq.f32.partialorder %v16406_v14, 0.0  ;;  %vm6530_vm11 = vcmp.eq.f32.partialorder %v16408_v41, inf  ;;  %v17378_v42 = vld [vmem:[#allocation96_spill] sm:$0xff] }
0x11d1   :  { %v10873_v1 = vpop.eup %10872  ;;  %v7448_v20 = vsel %vm7447_vm1, %v16376_v13, %v7446_v2  ;;  %v6543_v39 = vmul.f32 %v10871_v22, %v16406_v14  ;;  %vm6532_vm7 = vcmp.eq.f32.partialorder %v16408_v41, 0.0  ;;  %v6533_v60 = vand.u32 2147483648, %v16408_v41 }
0x11d2   :  { %v10875_v54 = vpop.eup %10874  ;;  %v7451_v25 = vsel %vm7449_vm4, %v7450_v6, %v7448_v20  ;;  %v6678_v12 = vmul.f32 %v16288_v21, %v15781_v37  ;;  %10888 = vrcp.f32 %v7579_v3  ;;  %v6798_v13 = vmul.f32 %v10861_v59, %v15849_v4  ;;  %v17379_v3 = vld [vmem:[#allocation97_spill] sm:$0xff] }
0x11d3   :  { %v10877_v32 = vpop.eup %10876  ;;  %v7459_v30 = vmax.f32 %v7451_v25, 1e-12  ;;  %v6545_v11 = vsel %vm6544_vm5, %v16406_v14, %v6543_v39  ;;  %v6529_v61 = vmul.f32 %v10875_v54, %v16408_v41  ;;  %v6800_v26 = vmul.f32 %v16368_v55, %v15818_v46  ;;  %v17380_v39 = vld [vmem:[#allocation99_spill] sm:$0xff] }
0x11d4   :  { %v6548_v34 = vsel %vm6546_vm6, %v6547_v35, %v6545_v11  ;;  %v6680_v14 = vmul.f32 %v16326_v19, %v15811_v9  ;;  %v6684_v37 = vmul.f32 %v10877_v32, %v15889_v31  ;;  %v6802_v21 = vmul.f32 %v10865_v7, %v15856_v53  ;;  %v17376_v7 = vld [vmem:[#allocation64_spill] sm:$0xff] }
0x11d5   :  { %10890 = vrcp.f32 %v7459_v30  ;;  %v6549_v10 = vmax.f32 %v6548_v34, 1e-12  ;;  %v6531_v8 = vsel %vm6530_vm11, %v16408_v41, %v6529_v61  ;;  %v6804_v4 = vmul.f32 %v10873_v1, %v15882_v58  ;;  %v17382_v61 = vld [vmem:[#allocation103_spill] sm:$0xff]  ;;  %v17383_v34 = vld [vmem:[#allocation98_spill] sm:$0xff] }
0x11d6   :  { %v10879_v57 = vpop.eup %10878  ;;  %v6534_v63 = vsel %vm6532_vm7, %v6533_v60, %v6531_v8  ;;  %v6682_v43 = vmul.f32 %v16426_v52, %v15842_v16  ;;  %v6810_v24 = vsub.f32 %v6678_v12, %v6798_v13  ;;  %v6811_v9 = vsub.f32 %v6680_v14, %v6800_v26  ;;  %v17386_v8 = vld [vmem:[#allocation101_spill] sm:$0xff] }
0x11d7   :  { %v10881_v59 = vpop.eup %10880  ;;  %10892 = vrcp.f32 %v6549_v10  ;;  %v6535_v46 = vmax.f32 %v6534_v63, 1e-12  ;;  %v6806_v40 = vmul.f32 %v10879_v57, %v15918_v17  ;;  %v16481_v31 = vmul.f32 %v16142_v51, %v17352_v15  ;;  %v17385_v10 = vld [vmem:[#allocation105_spill] sm:$0xff] }
0x11d8   :  { %v10883_v55 = vpop.eup %10882  ;;  %v16485_v53 = vmul.f32 %v16142_v51, %v17353_v18  ;;  %v16489_v58 = vmul.f32 %v16142_v51, %v17354_v29  ;;  %v6812_v17 = vsub.f32 %v6682_v43, %v6802_v21  ;;  %v6813_v52 = vsub.f32 %v6684_v37, %v6804_v4  ;;  %v17387_v37 = vld [vmem:[#allocation102_spill] sm:$0xff]  ;;  %v17388_v4 = vld [vmem:[#allocation104_spill] sm:$0xff] }
0x11d9   :  { %v10885_v19 = vpop.eup %10884  ;;  %10894 = vrcp.f32 %v6535_v46  ;;  %v16494_v49 = vmul.f32 %v16142_v51, %v17376_v7  ;;  %v6818_v44 = vmul.f32 %v6810_v24, %v6810_v24  ;;  %v6819_v15 = vmul.f32 %v6811_v9, %v6811_v9  ;;  %v17389_v9 = vld [vmem:[#allocation71_spill] sm:$0xff] }
0x11da   :  { %v10887_v41 = vpop.eup %10886  ;;  %v6686_v16 = vmul.f32 %v10885_v19, %v15923_v28  ;;  %v7465_v2 = vmul.f32 %v16259_v23, %v17377_v62  ;;  %v16500_v18 = vmul.f32 %v16142_v51, %v17356_v33  ;;  %v6820_v6 = vmul.f32 %v6812_v17, %v6812_v17 }
0x11db   :  { %v6821_v22 = vmul.f32 %v6813_v52, %v6813_v52  ;;  %v7585_v28 = vmul.f32 %v16263_v36, %v17378_v42  ;;  %v6828_v35 = vsel %vm338_vm2, %v6818_v44, 0.0  ;;  %v6830_v1 = vsel %vm338_vm2, %v6819_v15, 0.0  ;;  %v17381_v36 = vld [vmem:[#allocation11_spill] sm:$0xff]  ;;  %v17390_v15 = vld [vmem:[#allocation69_spill] sm:$0xff] }
0x11dc   :  { %v6814_v29 = vsub.f32 %v6686_v16, %v6806_v40  ;;  %v7467_v20 = vmul.f32 %v16302_v27, %v17379_v3  ;;  %v7469_v23 = vmul.f32 %v16384_v56, %v17380_v39  ;;  %v10889_v54 = vpop.eup %10888  ;;  %v6829_v33 = vadd.f32 %v6828_v35, %v16207_v38  ;;  %v17384_v27 = vld [vmem:[#allocation100_spill] sm:$0xff]  ;;  %v17393_v3 = vld [vmem:[#allocation107_spill] sm:$0xff] }
0x11dd   :  { %v6832_v60 = vsel %vm338_vm2, %v6820_v6, 0.0  ;;  %v6834_v32 = vsel %vm338_vm2, %v6821_v22, 0.0  ;;  %v7471_v11 = vmul.f32 %v10881_v59, %v17381_v36  ;;  %v7473_v12 = vmul.f32 %v10887_v41, %v17382_v61  ;;  %v17392_v22 = vld [vmem:[#allocation66_spill] sm:$0xff]  ;;  %v17397_v61 = vld [vmem:[#allocation28_spill] sm:$0xff] }
0x11de   :  { %v6822_v25 = vmul.f32 %v6814_v29, %v6814_v29  ;;  %v7587_v13 = vmul.f32 %v16318_v47, %v17383_v34  ;;  %v7589_v26 = vmul.f32 %v16416_v50, %v17384_v27  ;;  %v6831_v56 = vadd.f32 %v6830_v1, %v6829_v33  ;;  %v17391_v29 = vld [vmem:[#allocation65_spill] sm:$0xff]  ;;  %v17398_v34 = vld [vmem:[#allocation27_spill] sm:$0xff] }
0x11df   :  { %v10891_v30 = vpop.eup %10890  ;;  %v7591_v14 = vmul.f32 %v16444_v48, %v17386_v8  ;;  %v7593_v21 = vmul.f32 %v10883_v55, %v17387_v37  ;;  %v7595_v59 = vmul.f32 %v10889_v54, %v17388_v4  ;;  %v7598_v46 = vsub.f32 %v7465_v2, %v7585_v28 }
0x11e0   :  { %v6836_v57 = vsel %vm338_vm2, %v6822_v25, 0.0  ;;  %v7475_v38 = vmul.f32 %v10891_v30, %v17385_v10  ;;  %v7599_v43 = vsub.f32 %v7467_v20, %v7587_v13  ;;  %v6833_v40 = vadd.f32 %v6832_v60, %v6831_v56  ;;  %v17394_v60 = vld [vmem:[#allocation106_spill] sm:$0xff] }
0x11e1   :  { %v10893_v63 = vpop.eup %10892  ;;  %v7600_v47 = vsub.f32 %v7469_v23, %v7589_v26  ;;  %v7601_v24 = vsub.f32 %v7471_v11, %v7591_v14  ;;  %v7602_v41 = vsub.f32 %v7473_v12, %v7593_v21  ;;  %v7606_v17 = vmul.f32 %v7598_v46, %v7598_v46  ;;  %v17399_v56 = vld [vmem:[#allocation42_spill] sm:$0xff] }
0x11e2   :  { %v6551_v50 = vmul.f32 %v10893_v63, %v17389_v9  ;;  %v7603_v16 = vsub.f32 %v7475_v38, %v7595_v59  ;;  %v7607_v52 = vmul.f32 %v7599_v43, %v7599_v43  ;;  %v6835_v7 = vadd.f32 %v6834_v32, %v6833_v40  ;;  %v17400_v9 = vld [vmem:[#allocation12_spill] sm:$0xff] }
0x11e3   :  { %v10895_v19 = vpop.eup %10894  ;;  %v7608_v44 = vmul.f32 %v7600_v47, %v7600_v47  ;;  %v7609_v48 = vmul.f32 %v7601_v24, %v7601_v24  ;;  %v7615_v55 = vsel %vm338_vm2, %v7606_v17, 0.0  ;;  %v7798_v6 = vmul.f32 %v16142_v51, %v17391_v29  ;;  %v7317_v17 = vpop.xlane.xlu0 %7316 }
0x11e4   :  { %v6537_v62 = vmul.f32 %v10895_v19, %v17390_v15  ;;  %v7617_v2 = vsel %vm338_vm2, %v7607_v52, 0.0  ;;  %v7799_v42 = vmul.f32 %v16142_v51, %v17392_v22  ;;  %v6837_v28 = vadd.f32 %v6836_v57, %v6835_v7  ;;  %v17395_v51 = vld [vmem:[#allocation48_spill] sm:$0xff]  ;;  %v7331_v7 = vpop.xlane.xlu1 %7330 }
0x11e5   :  { %v7610_v35 = vmul.f32 %v7602_v41, %v7602_v41  ;;  %v7616_v1 = vadd.f32 %v7615_v55, %v16187_v45  ;;  %v7755_v20 = vmul.f32 %v16189_v0, %v17393_v3  ;;  %v7611_v39 = vmul.f32 %v7603_v16, %v7603_v16  ;;  %v17396_v45 = vld [vmem:[#allocation23_spill] sm:$0xff] }
0x11e6   :  { %v7619_v23 = vsel %vm338_vm2, %v7608_v44, 0.0  ;;  %v6552_v54 = vsub.f32 %v6537_v62, %v6551_v50  ;;  %vm6554_vm8 = vcmask 253952   ;;  %6838 = vadd.xlane.f32.xlu1 %v6837_v28  ;;  %v7621_v33 = vsel %vm338_vm2, %v7609_v48, 0.0 }
0x11e7   :  { %v7618_v25 = vadd.f32 %v7617_v2, %v7616_v1  ;;  %v7756_v32 = vmul.f32 %v16189_v0, %v17394_v60  ;;  %v7757_v30 = vmul.f32 %v16189_v0, %v17395_v51  ;;  %v7758_v11 = vmul.f32 %v16189_v0, %v17396_v45 }
0x11e8   :  { %v6553_v36 = vmul.f32 %v6552_v54, %v6552_v54  ;;  %v7759_v12 = vmul.f32 %v16189_v0, %v17397_v61  ;;  %v7760_v13 = vmul.f32 %v16189_v0, %v17398_v34  ;;  %v7623_v26 = vsel %vm338_vm2, %v7610_v35, 0.0  ;;  %v7224_v35 = vpop.permute.xlu1 %7223 }
0x11e9   :  { %v7620_v27 = vadd.f32 %v7619_v23, %v7618_v25  ;;  %v7761_v57 = vmul.f32 %v16189_v0, %v17399_v56  ;;  %v7801_v10 = vsub.f32 %v7755_v20, %v16481_v31  ;;  %v7802_v8 = vsub.f32 %v7756_v32, %v16485_v53 }
0x11ea   :  { %v6555_v38 = vsel %vm6554_vm8, %v6553_v36, 0.0  ;;  %v7803_v14 = vsub.f32 %v7757_v30, %v16489_v58  ;;  %v7804_v63 = vsub.f32 %v7758_v11, %v16494_v49  ;;  %v7805_v21 = vsub.f32 %v7759_v12, %v16500_v18  ;;  %v7222_v36 = vpop.permute.xlu0 %7221 }
0x11eb   :  { %v7622_v37 = vadd.f32 %v7621_v33, %v7620_v27  ;;  %v7806_v4 = vsub.f32 %v7760_v13, %v7798_v6  ;;  %v7625_v59 = vsel %vm338_vm2, %v7611_v39, 0.0  ;;  %v7807_v46 = vsub.f32 %v7761_v57, %v7799_v42 }
0x11ec   :  { %v7809_v43 = vmul.f32 %v7801_v10, %v7801_v10  ;;  %v7810_v0 = vmul.f32 %v7802_v8, %v7802_v8  ;;  %v7811_v31 = vmul.f32 %v7803_v14, %v7803_v14  ;;  %v7812_v53 = vmul.f32 %v7804_v63, %v7804_v63  ;;  %v7226_v23 = vpop.permute.xlu1 %7225  ;;  %v17401_v63 = vld [vmem:[#allocation78_spill] sm:$0xff] }
0x11ed   :  { %6556 = vadd.xlane.f32.xlu0 %v6555_v38  ;;  %v7624_v40 = vadd.f32 %v7623_v26, %v7622_v37  ;;  %v7813_v18 = vmul.f32 %v7805_v21, %v7805_v21  ;;  %v7814_v41 = vmul.f32 %v7806_v4, %v7806_v4  ;;  %v7815_v44 = vmul.f32 %v7807_v46, %v7807_v46  ;;  %v17402_v21 = vld [vmem:[#allocation10_spill] sm:$0xff] }
0x11ee   :  { %v7817_v47 = vsel %vm7029_vm3, %v7809_v43, 0.0  ;;  %v7818_v58 = vsel %vm7029_vm3, %v7810_v0, 0.0  ;;  %v7820_v50 = vsel %vm7029_vm3, %v7811_v31, 0.0  ;;  %v7822_v16 = vsel %vm7029_vm3, %v7812_v53, 0.0 }
0x11ef   :  { %v7626_v24 = vadd.f32 %v7625_v59, %v7624_v40  ;;  %v7819_v49 = vadd.f32 %v7818_v58, %v7817_v47  ;;  %v7824_v48 = vsel %vm7029_vm3, %v7813_v18, 0.0  ;;  %10896 = vrsqrt.f32 %v7331_v7 }
0x11f0   :  { %10898 = vrsqrt.f32 %v7317_v17  ;;  %v7816_v62 = vmul.f32 %v16215_v5, %v16215_v5  ;;  %v7826_v55 = vsel %vm7029_vm3, %v7814_v41, 0.0  ;;  %v7828_v29 = vsel %vm7029_vm3, %v7815_v44, 0.0  ;;  %v7228_v32 = vpop.permute.xlu1 %7227 }
0x11f1   :  { %7045 = vadd.xlane.f32.xlu0 %v17400_v9  ;;  %7627 = vadd.xlane.f32.xlu1 %v7626_v24  ;;  %v7821_v19 = vadd.f32 %v7820_v50, %v7819_v49  ;;  %vm7334_vm9 = vcmp.eq.f32.partialorder %v7331_v7, inf  ;;  %v7337_v39 = vand.u32 2147483648, %v7331_v7  ;;  %vm7336_vm10 = vcmp.eq.f32.partialorder %v7331_v7, 0.0 }
0x11f2   :  { %v7830_v22 = vsel %vm7029_vm3, %v7816_v62, 0.0  ;;  %vm7320_vm12 = vcmp.eq.f32.partialorder %v7317_v17, inf  ;;  %v7323_v25 = vand.u32 2147483648, %v7317_v17  ;;  %vm7322_vm13 = vcmp.eq.f32.partialorder %v7317_v17, 0.0 }
0x11f3   :  { %v7823_v52 = vadd.f32 %v7822_v16, %v7821_v19  ;;  %v7245_v11 = vsel %vm338_vm2, %v7222_v36, 0.0  ;;  %v7246_v61 = vsel %vm338_vm2, %v7224_v35, 0.0  ;;  %v7248_v34 = vsel %vm338_vm2, %v7226_v23, 0.0 }
0x11f4   :  { %v7230_v45 = vpop.permute.xlu1 %7229  ;;  %v7247_v12 = vadd.f32 %v7246_v61, %v7245_v11  ;;  %v7250_v56 = vsel %vm338_vm2, %v7228_v32, 0.0 }
0x11f5   :  { %v7825_v15 = vadd.f32 %v7824_v48, %v7823_v52  ;;  %v7252_v38 = vsel %vm338_vm2, %v7230_v45, 0.0 }
0x11f6   :  { %v7249_v27 = vadd.f32 %v7248_v34, %v7247_v12 }
0x11f7   :  { %v7827_v2 = vadd.f32 %v7826_v55, %v7825_v15 }
0x11f8   :  { %v7232_v13 = vpop.permute.xlu1 %7231  ;;  %v7251_v8 = vadd.f32 %v7250_v56, %v7249_v27 }
0x11f9   :  { %v7829_v6 = vadd.f32 %v7828_v29, %v7827_v2  ;;  %v10897_v28 = vpop.eup %10896  ;;  %v7254_v14 = vsel %vm338_vm2, %v7232_v13, 0.0 }
0x11fa   :  { %v10899_v1 = vpop.eup %10898  ;;  %v7333_v3 = vmul.f32 %v10897_v28, %v7331_v7  ;;  %v7253_v59 = vadd.f32 %v7252_v38, %v7251_v8 }
0x11fb   :  { %v7831_v42 = vadd.f32 %v7830_v22, %v7829_v6  ;;  %v7319_v20 = vmul.f32 %v10899_v1, %v7317_v17 }
0x11fc   :  { %v7335_v54 = vsel %vm7334_vm9, %v7331_v7, %v7333_v3  ;;  %v7255_v0 = vadd.f32 %v7254_v14, %v7253_v59 }
0x11fd   :  { %v7321_v5 = vsel %vm7320_vm12, %v7317_v17, %v7319_v20  ;;  %v7338_v33 = vsel %vm7336_vm10, %v7337_v39, %v7335_v54 }
0x11fe   :  { %v7324_v60 = vsel %vm7322_vm13, %v7323_v25, %v7321_v5  ;;  %v7339_v51 = vmax.f32 %v7338_v33, 1e-12 }
0x11ff   :  { %v7325_v30 = vmax.f32 %v7324_v60, 1e-12 }
0x1200   :  { %10900 = vrcp.f32 %v7339_v51 }
0x1201   :  { %10902 = vrcp.f32 %v7325_v30 }
0x120a   :  { %v10901_v26 = vpop.eup %10900 }
0x120b   :  { %v10903_v57 = vpop.eup %10902  ;;  %v7341_v4 = vmul.f32 %v10901_v26, %v17402_v21 }
0x120c   :  { %v7327_v37 = vmul.f32 %v10903_v57, %v17401_v63 }
0x120e   :  { %v7342_v31 = vsub.f32 %v7327_v37, %v7341_v4 }
0x1210   :  { %v7343_v9 = vmul.f32 %v7342_v31, %v7342_v31 }
0x1212   :  { %v7344_v18 = vsel %vm6554_vm8, %v7343_v9, 0.0 }
0x1220   :  { %v8008_v10 = vpop.permute.xlu1 %8007 }
0x1221   :  { %v8010_v40 = vpop.permute.xlu0 %8009  ;;  %v8031_v19 = vsel %vm338_vm2, %v8008_v10, 0.0 }
0x1222   :  { %v8032_v41 = vsel %vm338_vm2, %v8010_v40, 0.0 }
0x1223   :  { %v8033_v52 = vadd.f32 %v8032_v41, %v8031_v19 }
0x1224   :  { %v7234_v46 = vpop.permute.xlu1 %7233 }
0x1225   :  { %v7256_v43 = vsel %vm338_vm2, %v7234_v46, 0.0 }
0x1226   :  { %v7257_v47 = vadd.f32 %v7256_v43, %v7255_v0 }
0x1228   :  { %v7236_v24 = vpop.permute.xlu1 %7235  ;;  %v8012_v49 = vpop.permute.xlu0 %8011 }
0x1229   :  { %v7258_v53 = vsel %vm338_vm2, %v7236_v24, 0.0  ;;  %v8034_v17 = vsel %vm338_vm2, %v8012_v49, 0.0 }
0x122a   :  { %v7259_v58 = vadd.f32 %v7258_v53, %v7257_v47  ;;  %v8035_v44 = vadd.f32 %v8034_v17, %v8033_v52 }
0x122c   :  { %7260 = vadd.xlane.f32.xlu0 %v7259_v58  ;;  %v8014_v50 = vpop.permute.xlu0 %8013  ;;  %v8022_v29 = vpop.permute.xlu1 %8021 }
0x122d   :  { %v8036_v7 = vsel %vm338_vm2, %v8014_v50, 0.0  ;;  %v8044_v35 = vsel %vm338_vm2, %v8022_v29, 0.0 }
0x122e   :  { %v8037_v15 = vadd.f32 %v8036_v7, %v8035_v44 }
0x1230   :  { %7345 = vadd.xlane.f32.xlu0 %v7344_v18 }
0x1232   :  { %v8016_v16 = vpop.permute.xlu0 %8015 }
0x1233   :  { %v8038_v48 = vsel %vm338_vm2, %v8016_v16, 0.0 }
0x1234   :  { %7832 = vadd.xlane.f32.xlu0 %v7831_v42  ;;  %v8039_v2 = vadd.f32 %v8038_v48, %v8037_v15 }
0x123b   :  { %v8018_v62 = vpop.permute.xlu0 %8017 }
0x123c   :  { %v8040_v55 = vsel %vm338_vm2, %v8018_v62, 0.0 }
0x123d   :  { %v8041_v6 = vadd.f32 %v8040_v55, %v8039_v2 }
0x1240   :  { %v8020_v22 = vpop.permute.xlu0 %8019 }
0x1241   :  { %v8042_v42 = vsel %vm338_vm2, %v8020_v22, 0.0 }
0x1242   :  { %v8043_v28 = vadd.f32 %v8042_v42, %v8041_v6 }
0x1244   :  { %v8045_v1 = vadd.f32 %v8044_v35, %v8043_v28 }
0x1246   :  { %8046 = vadd.xlane.f32.xlu1 %v8045_v1 }
0x1273   :  { %v6839_v3 = vpop.xlane.xlu1 %6838 }
0x1274   :  { %v6840_v20 = vrot.slane %v6839_v3, 4 }
0x1276   :  { %v6841_v39 = vadd.f32 %v6840_v20, %v6839_v3 }
0x1278   :  { %v6842_v23 = vrot.slane %v6841_v39, 2 }
0x127a   :  { %v6557_v54 = vpop.xlane.xlu0 %6556  ;;  %v6843_v60 = vadd.f32 %v6842_v23, %v6841_v39 }
0x127b   :  { %v6558_v5 = vrot.slane %v6557_v54, 4 }
0x127c   :  { %v6844_v45 = vrot.slane %v6843_v60, 1 }
0x127d   :  { %v6559_v25 = vadd.f32 %v6558_v5, %v6557_v54 }
0x127e   :  { %v7046_v33 = vpop.xlane.xlu0 %7045  ;;  %v6845_v13 = vadd.f32 %v6844_v45, %v6843_v60  ;;  %v7628_v56 = vpop.xlane.xlu1 %7627 }
0x127f   :  { %v6560_v32 = vrot.slane %v6559_v25, 2  ;;  %v7047_v51 = vrot.slane %v7046_v33, 4  ;;  %v7629_v57 = vrot.slane %v7628_v56, 4 }
0x1281   :  { %v7048_v30 = vadd.f32 %v7047_v51, %v7046_v33  ;;  %v6561_v36 = vadd.f32 %v6560_v32, %v6559_v25  ;;  %v7630_v10 = vadd.f32 %v7629_v57, %v7628_v56 }
0x1283   :  { %v7049_v11 = vrot.slane %v7048_v30, 2  ;;  %v6562_v61 = vrot.slane %v6561_v36, 1  ;;  %v7631_v63 = vrot.slane %v7630_v10, 2 }
0x1285   :  { %v6563_v12 = vadd.f32 %v6562_v61, %v6561_v36  ;;  %v7050_v34 = vadd.f32 %v7049_v11, %v7048_v30  ;;  %v7632_v0 = vadd.f32 %v7631_v63, %v7630_v10 }
0x1287   :  { %10192 = vpush %v6563_v12  ;;  %v7051_v27 = vrot.slane %v7050_v34, 1  ;;  %v7633_v9 = vrot.slane %v7632_v0, 1 }
0x1288   :  { %10194 = vpush %v6845_v13 }
0x1289   :  { %v7052_v26 = vadd.f32 %v7051_v27, %v7050_v34  ;;  %v7634_v41 = vadd.f32 %v7633_v9, %v7632_v0 }
0x128b   :  { %10196 = vpush %v7052_v26 }
0x12b8   :  { %s10193_s26 = spop %10192 }
0x12b9   :  { %v7261_v38 = vpop.xlane.xlu0 %7260  ;;  %s10195_s20 = spop %10194  ;;  %s6565_s15 = smul.f32 64.0, %s10193_s26 }
0x12ba   :  { %v7262_v8 = vrot.slane %v7261_v38, 4 }
0x12bc   :  { %v7263_v14 = vadd.f32 %v7262_v8, %v7261_v38  ;;  %s10197_s24 = spop %10196 }
0x12bd   :  { %v7346_v37 = vpop.xlane.xlu0 %7345  ;;  %s7054_s6 = smul.f32 32.0, %s10197_s24 }
0x12be   :  { %v7264_v21 = vrot.slane %v7263_v14, 2  ;;  %v7347_v4 = vrot.slane %v7346_v37, 4 }
0x12c0   :  { %v7348_v59 = vadd.f32 %v7347_v4, %v7346_v37  ;;  %v7265_v46 = vadd.f32 %v7264_v21, %v7263_v14 }
0x12c1   :  { %v7833_v43 = vpop.xlane.xlu0 %7832 }
0x12c2   :  { %v7349_v40 = vrot.slane %v7348_v59, 2  ;;  %v7834_v31 = vrot.slane %v7833_v43, 4  ;;  %v7266_v47 = vrot.slane %v7265_v46, 1 }
0x12c4   :  { %v7835_v24 = vadd.f32 %v7834_v31, %v7833_v43  ;;  %v7267_v53 = vadd.f32 %v7266_v47, %v7265_v46  ;;  %v7350_v58 = vadd.f32 %v7349_v40, %v7348_v59 }
0x12c6   :  { %v7836_v49 = vrot.slane %v7835_v24, 2  ;;  %10198 = vpush %v7267_v53  ;;  %v7351_v18 = vrot.slane %v7350_v58, 1 }
0x12c8   :  { %v7837_v50 = vadd.f32 %v7836_v49, %v7835_v24  ;;  %v7352_v19 = vadd.f32 %v7351_v18, %v7350_v58 }
0x12ca   :  { %10200 = vpush %v7352_v19  ;;  %v7838_v16 = vrot.slane %v7837_v50, 1 }
0x12cb   :  { %10202 = vpush %v7634_v41 }
0x12cc   :  { %v7839_v17 = vadd.f32 %v7838_v16, %v7837_v50 }
0x12ce   :  { %10204 = vpush %v7839_v17 }
0x12d3   :  { %v8047_v52 = vpop.xlane.xlu1 %8046 }
0x12d4   :  { %v8048_v7 = vrot.slane %v8047_v52, 4 }
0x12d6   :  { %v8049_v44 = vadd.f32 %v8048_v7, %v8047_v52 }
0x12d8   :  { %v8050_v48 = vrot.slane %v8049_v44, 2 }
0x12da   :  { %v8051_v15 = vadd.f32 %v8050_v48, %v8049_v44 }
0x12dc   :  { %v8052_v62 = vrot.slane %v8051_v15, 1 }
0x12de   :  { %v8053_v55 = vadd.f32 %v8052_v62, %v8051_v15 }
0x12e0   :  { %10206 = vpush %v8053_v55 }
0x12f7   :  { %s10199_s30 = spop %10198 }
0x12fb   :  { %s10201_s16 = spop %10200 }
0x12fc   :  { %s7354_s10 = smul.f32 64.0, %s10201_s16  ;;  %s10203_s29 = spop %10202 }
0x12fd   :  { %s7636_s1 = sadd.f32 %s10203_s29, %s10195_s20 }
0x12fe   :  { %s7355_s28 = sadd.f32 %s7354_s10, %s6565_s15 }
0x12ff   :  { %8059 = sst [smem:[#allocation2 + $0x1]] %s7636_s1  ;;  %s10205_s7 = spop %10204 }
0x1300   :  { %8057 = sst [smem:[#allocation2]] %s7355_s28  ;;  %s7841_s23 = smul.f32 32.0, %s10205_s7 }
0x1302   :  { %s7842_s21 = sadd.f32 %s7841_s23, %s7054_s6 }
0x1304   :  { %8061 = sst [smem:[#allocation2 + $0x2]] %s7842_s21 }
0x1311   :  { %s10207_s22 = spop %10206 }
0x1312   :  { %s8055_s3 = sadd.f32 %s10207_s22, %s10199_s30 }
0x1314   :  { %8063 = sst [smem:[#allocation2 + $0x3]] %s8055_s3 }
0x1315   :  { %10999 = shalt.err (!%p10996_p4)
}
0x1316   :  { %s11007_s13 = smov [#allocation2]  }
0x1317   :  { %8073 = dma.smem_to_vmem %s11007_s13, 16, %s8071_s2, [#allocation3]  }
0x1318   :  { %11000 = dma.done.wait [#allocation3], 16  }
0x1319   :  { %11001 = vsyncadd [#allocation3], 4294967280 }
0x131a   :  { %8077 = sfence }
0x131b   :  { %8078 = vsyncpa [#allocation3], 1 }

</bundles_post_ra>
